<compile_context>
chip_gen: v7x
topology: tpu7x:2x2x1
jax: 0.10.0
libtpu: 0.0.40
codegen_flags: <defaults>
</compile_context>

<pallas_src>
import jax
import jax.numpy as jnp
from jax.experimental import pallas as pl
from jax.experimental.pallas import tpu as pltpu


def conv_head_attention_kernel(
    x_ref,       # (C, S, TB)   activations, batch on the 128-lane axis
    chan_ref,    # (3, C, 1, 1) packed per-channel params: [ln_gamma, ln_beta, attn_w]
    attn_b_ref,  # (S, 1)       attention per-position bias
    w1_ref,      # (I, C)       head Linear-1 weight (out, in)
    b1_ref,      # (I, 1)       head Linear-1 bias
    w2_ref,      # (O, I)       head Linear-2 weight (out, in)
    b2_ref,      # (O, 1)       head Linear-2 bias
    out_ref,     # (O, TB)
):
    x = x_ref[...].astype(jnp.float32)                      # (C, S, TB)
    gamma = chan_ref[0]                                      # (C, 1, 1)
    beta = chan_ref[1]
    attn_w = chan_ref[2]

    # ---- LayerNorm over channels (leading axis => per-lane VALU accumulation) ----
    mean = jnp.mean(x, axis=0, keepdims=True)                # (1, S, TB)
    var = jnp.mean(jnp.square(x - mean), axis=0, keepdims=True)
    xn = (x - mean) * jax.lax.rsqrt(var + 1e-5)
    xn = xn * gamma + beta                                   # (C,1,1) broadcast

    # ---- Attention pooling (Attention.forward) ----
    # eij = (xn @ w) + b ; a = softmax(tanh(eij)) + 1e-10 ; pooled = sum_s a*xn
    eij = jnp.sum(xn * attn_w, axis=0)                       # (S, TB), leading-dim reduce
    eij = eij + attn_b_ref[...]                              # (S,1) lane-broadcast
    eij = jnp.tanh(eij)                                      # EUP
    a = jnp.exp(eij)                                         # tanh-bounded -> safe exp
    denom = jnp.sum(a, axis=0, keepdims=True)                # (1, TB) sublane reduce
    inv = pl.reciprocal(denom, approx=True)                  # EUP slot
    inv = inv * (2.0 - denom * inv)                          # one Newton step -> ~f32 exact
    a = a * inv + 1e-10                                      # matches torch order
    pooled = jnp.sum(xn * a[None, :, :], axis=1)             # (C, TB) sublane reduce

    # ---- Head: Linear -> ReLU -> (Identity BN) -> (Dropout p=0 == Identity) -> Linear ----
    h = jnp.dot(w1_ref[...], pooled, preferred_element_type=jnp.float32)   # (I, TB)
    h = jnp.maximum(h + b1_ref[...], 0.0)                                  # ReLU
    out = jnp.dot(w2_ref[...], h, preferred_element_type=jnp.float32)      # (O, TB)
    out_ref[...] = (out + b2_ref[...]).astype(out_ref.dtype)


def _const_spec(shape):
    zeros = (0,) * len(shape)
    return pl.BlockSpec(shape, lambda b, _z=zeros: _z)


def conv_head_attention(x_nchw, params, *, block_b=None):
    """x_nchw: (B, C, H, W) with H*W == 49. Returns (B, output_dimensions) f32."""
    B, C, H, W = x_nchw.shape
    S = H * W
    assert S == 49, "Attention module is built with sequence_length=49"

    ln_g, ln_b, attn_w, attn_b, w1, b1, w2, b2 = params
    I = w1.shape[1]
    O = w2.shape[1]

    # Batch-on-lanes layout: one wrapper-side transpose pass; every in-kernel
    # reduction is then lane-dense (all 128 lanes carry live batch rows).
    x_csb = jnp.transpose(x_nchw.reshape(B, C, S), (1, 2, 0))   # (C, S, B)

    # ---- batch-tile selection: lane axis must be a multiple of 128 or the full batch ----
    if block_b is None:
        if B <= 128:
            TB = B
        elif B <= 1024:
            TB = 128          # >=2 grid steps, fits 16 MiB default scoped VMEM (v5e)
        else:
            TB = 256          # >=4 grid steps for v7x's two TensorCores
    else:
        TB = B if block_b >= B else max(128, (block_b // 128) * 128)

    if TB >= B:
        TB = B
        B_pad = B
    else:
        B_pad = pl.cdiv(B, TB) * TB
        if B_pad != B:
            # zero padding: LayerNorm of a zero column stays finite (var=0, eps>0)
            x_csb = jnp.pad(x_csb, ((0, 0), (0, 0), (0, B_pad - B)))
    grid = (B_pad // TB,)

    # ---- explicit VMEM budget from the *padded* tile shapes ----
    s_pad = ((S + 7) // 8) * 8              # sublane padding of S
    tb_pad = ((TB + 127) // 128) * 128      # lane padding of TB
    in_tile = C * s_pad * tb_pad * x_csb.dtype.itemsize
    f32_tile = C * s_pad * tb_pad * 4
    # 2x double-buffered input + ~6 live f32 full-tile temporaries + constants/output
    vmem_limit = int(min(max(2 * in_tile + 6 * f32_tile + (1 << 20), 16 << 20), 64 << 20))

    # Pack per-channel params into one constant input (fewer DMA descriptors / step).
    chan = jnp.stack(
        [ln_g.reshape(C), ln_b.reshape(C), attn_w.reshape(C)], axis=0
    ).reshape(3, C, 1, 1).astype(jnp.float32)

    in_specs = [
        pl.BlockSpec((C, S, TB), lambda b: (0, 0, b)),   # x: block only on batch (lanes)
        _const_spec((3, C, 1, 1)),                       # packed per-channel params
        _const_spec((S, 1)),                             # attention bias
        _const_spec((I, C)),                             # w1 (out, in)
        _const_spec((I, 1)),                             # b1
        _const_spec((O, I)),                             # w2 (out, in)
        _const_spec((O, 1)),                             # b2
    ]
    out_specs = pl.BlockSpec((O, TB), lambda b: (0, b))

    out = pl.pallas_call(
        conv_head_attention_kernel,
        out_shape=jax.ShapeDtypeStruct((O, B_pad), jnp.float32),
        grid=grid,
        in_specs=in_specs,
        out_specs=out_specs,
        compiler_params=pltpu.CompilerParams(
            dimension_semantics=("parallel",),   # megacore split on v7x
            vmem_limit_bytes=vmem_limit,
        ),
    )(
        x_csb,
        chan,
        attn_b.reshape(S, 1).astype(jnp.float32),
        jnp.transpose(w1).astype(jnp.float32),
        b1.reshape(I, 1).astype(jnp.float32),
        jnp.transpose(w2).astype(jnp.float32),
        b2.reshape(O, 1).astype(jnp.float32),
    )
    return jnp.transpose(out[:, :B])                     # (B, O)


def reference(x_nchw, params):
    """Pure-JAX reference mirroring the PyTorch forward (attention path)."""
    ln_g, ln_b, attn_w, attn_b, w1, b1, w2, b2 = params
    B, C, H, W = x_nchw.shape
    x = jnp.transpose(x_nchw.reshape(B, C, H * W), (0, 2, 1)).astype(jnp.float32)  # (B,S,C)
    mean = jnp.mean(x, axis=-1, keepdims=True)
    var = jnp.mean(jnp.square(x - mean), axis=-1, keepdims=True)
    xn = (x - mean) / jnp.sqrt(var + 1e-5) * ln_g + ln_b
    eij = jnp.einsum("bsc,c->bs", xn, attn_w) + attn_b
    eij = jnp.tanh(eij)
    a = jnp.exp(eij)
    a = a / jnp.sum(a, axis=-1, keepdims=True) + 1e-10
    pooled = jnp.sum(xn * a[:, :, None], axis=1)
    h = jnp.maximum(pooled @ w1 + b1, 0.0)
    return h @ w2 + b2


def make_params(key, input_dimensions, intermediate_dimensions, output_dimensions, seq_len=49):
    C, I, O, S = input_dimensions, intermediate_dimensions, output_dimensions, seq_len
    k0, k1, k2, k3, k4, k5 = jax.random.split(key, 6)
    # LayerNorm params (perturbed from torch's ones/zeros init so the test is non-trivial)
    ln_g = 1.0 + 0.1 * jax.random.normal(k3, (C,), jnp.float32)
    ln_b = 0.1 * jax.random.normal(k4, (C,), jnp.float32)
    # Attention: xavier_uniform_ on (C, 1); bias zeros(S)
    limit = (6.0 / (C + 1)) ** 0.5
    attn_w = jax.random.uniform(k0, (C,), jnp.float32, -limit, limit)
    attn_b = jnp.zeros((S,), jnp.float32)
    # Head linears stored as (in, out)
    w1 = jax.random.normal(k1, (C, I), jnp.float32) * 0.05
    b1 = 0.02 * jax.random.normal(k5, (I,), jnp.float32)
    w2 = jax.random.normal(k2, (I, O), jnp.float32) * 0.05
    b2 = 0.02 * jax.random.normal(jax.random.fold_in(k5, 1), (O,), jnp.float32)
    return (ln_g, ln_b, attn_w, attn_b, w1, b1, w2, b2)


if __name__ == "__main__":
    # Shapes implied by the module: spatial 7x7 (Attention sequence_length=49).
    C, H, W = 32, 7, 7
    INTER, OUT = 64, 8

    key = jax.random.PRNGKey(0)
    kx1, kx2, kp = jax.random.split(key, 3)
    params = make_params(kp, C, INTER, OUT, seq_len=H * W)

    # 1) Small batch: single grid step, TB == B (full-extent lane block).
    x1 = jax.random.normal(kx1, (4, C, H, W), jnp.float32)
    out1 = jax.block_until_ready(conv_head_attention(x1, params))
    ref1 = reference(x1, params)
    assert out1.shape == (4, OUT)
    assert jnp.allclose(out1, ref1, rtol=1e-4, atol=1e-4), (out1, ref1)

    # 2) B not a multiple of the tile: 200 -> padded to 256, TB=128, 2 pipelined grid steps.
    x2 = jax.random.normal(kx2, (200, C, H, W), jnp.float32)
    out2 = jax.block_until_ready(conv_head_attention(x2, params, block_b=128))
    ref2 = reference(x2, params)
    assert out2.shape == (200, OUT)
    assert jnp.allclose(out2, ref2, rtol=1e-4, atol=1e-4), (out2, ref2)

    # TODO(synk): Dropout(p>0, training mode) and BatchNorm1d(train) are stateful/random
    # and are Identity in this configuration (p=0.0, batch_normalization=False).
    print("KERNEL_OK")
</pallas_src>

<mosaic_0001>
module attributes {stable_mosaic.version = 11 : i64} {
  func.func @conv_head_attention_kernel(%arg0: i32, %arg1: memref<32x49x4xf32, #tpu.memory_space<vmem>>, %arg2: memref<3x32x1x1xf32, #tpu.memory_space<vmem>>, %arg3: memref<49x1xf32, #tpu.memory_space<vmem>>, %arg4: memref<64x32xf32, #tpu.memory_space<vmem>>, %arg5: memref<64x1xf32, #tpu.memory_space<vmem>>, %arg6: memref<8x64xf32, #tpu.memory_space<vmem>>, %arg7: memref<8x1xf32, #tpu.memory_space<vmem>>, %arg8: memref<8x4xf32, #tpu.memory_space<vmem>>) attributes {dimension_semantics = [#tpu.dimension_semantics<parallel>], iteration_bounds = array<i64: 1>, scalar_prefetch = 0 : i64, scratch_operands = 0 : i64, tpu.core_type = #tpu.core_type<tc>, window_params = [{transform_indices = @transform_0, window_bounds = array<i64: 32, 49, 4>}, {pipeline_mode = #tpu.pipeline_mode<synchronous>, transform_indices = @transform_1, window_bounds = array<i64: 3, 32, 1, 1>}, {pipeline_mode = #tpu.pipeline_mode<synchronous>, transform_indices = @transform_2, window_bounds = array<i64: 49, 1>}, {pipeline_mode = #tpu.pipeline_mode<synchronous>, transform_indices = @transform_3, window_bounds = array<i64: 64, 32>}, {pipeline_mode = #tpu.pipeline_mode<synchronous>, transform_indices = @transform_4, window_bounds = array<i64: 64, 1>}, {pipeline_mode = #tpu.pipeline_mode<synchronous>, transform_indices = @transform_5, window_bounds = array<i64: 8, 64>}, {pipeline_mode = #tpu.pipeline_mode<synchronous>, transform_indices = @transform_6, window_bounds = array<i64: 8, 1>}, {transform_indices = @transform_7, window_bounds = array<i64: 8, 4>}]} {
    %c0 = arith.constant 0 : index
    %c0_0 = arith.constant 0 : index
    %c0_1 = arith.constant 0 : index
    %0 = vector.load %arg1[%c0, %c0_0, %c0_1] : memref<32x49x4xf32, #tpu.memory_space<vmem>>, vector<32x49x4xf32>
    %c0_2 = arith.constant 0 : index
    %c0_3 = arith.constant 0 : index
    %c0_4 = arith.constant 0 : index
    %c0_5 = arith.constant 0 : index
    %1 = vector.load %arg2[%c0_2, %c0_3, %c0_4, %c0_5] : memref<3x32x1x1xf32, #tpu.memory_space<vmem>>, vector<1x32x1x1xf32>
    %2 = vector.shape_cast %1 : vector<1x32x1x1xf32> to vector<32x1x1xf32>
    %c1 = arith.constant 1 : index
    %c0_6 = arith.constant 0 : index
    %c0_7 = arith.constant 0 : index
    %c0_8 = arith.constant 0 : index
    %3 = vector.load %arg2[%c1, %c0_6, %c0_7, %c0_8] : memref<3x32x1x1xf32, #tpu.memory_space<vmem>>, vector<1x32x1x1xf32>
    %4 = vector.shape_cast %3 : vector<1x32x1x1xf32> to vector<32x1x1xf32>
    %c2 = arith.constant 2 : index
    %c0_9 = arith.constant 0 : index
    %c0_10 = arith.constant 0 : index
    %c0_11 = arith.constant 0 : index
    %5 = vector.load %arg2[%c2, %c0_9, %c0_10, %c0_11] : memref<3x32x1x1xf32, #tpu.memory_space<vmem>>, vector<1x32x1x1xf32>
    %6 = vector.shape_cast %5 : vector<1x32x1x1xf32> to vector<32x1x1xf32>
    %cst = arith.constant dense<0.000000e+00> : vector<49x4xf32>
    %7 = vector.multi_reduction <add>, %0, %cst [0] : vector<32x49x4xf32> to vector<49x4xf32>
    %8 = vector.shape_cast %7 : vector<49x4xf32> to vector<1x49x4xf32>
    %cst_12 = arith.constant 3.200000e+01 : f32
    %9 = vector.broadcast %cst_12 : f32 to vector<1x49x4xf32>
    %10 = arith.divf %8, %9 : vector<1x49x4xf32>
    %11 = vector.broadcast %10 : vector<1x49x4xf32> to vector<32x49x4xf32>
    %12 = arith.subf %0, %11 : vector<32x49x4xf32>
    %13 = arith.mulf %12, %12 : vector<32x49x4xf32>
    %cst_13 = arith.constant dense<0.000000e+00> : vector<49x4xf32>
    %14 = vector.multi_reduction <add>, %13, %cst_13 [0] : vector<32x49x4xf32> to vector<49x4xf32>
    %15 = vector.shape_cast %14 : vector<49x4xf32> to vector<1x49x4xf32>
    %cst_14 = arith.constant 3.200000e+01 : f32
    %16 = vector.broadcast %cst_14 : f32 to vector<1x49x4xf32>
    %17 = arith.divf %15, %16 : vector<1x49x4xf32>
    %18 = vector.broadcast %10 : vector<1x49x4xf32> to vector<32x49x4xf32>
    %19 = arith.subf %0, %18 : vector<32x49x4xf32>
    %cst_15 = arith.constant 9.99999974E-6 : f32
    %20 = vector.broadcast %cst_15 : f32 to vector<1x49x4xf32>
    %21 = arith.addf %17, %20 : vector<1x49x4xf32>
    %22 = math.rsqrt %21 : vector<1x49x4xf32>
    %23 = vector.broadcast %22 : vector<1x49x4xf32> to vector<32x49x4xf32>
    %24 = arith.mulf %19, %23 : vector<32x49x4xf32>
    %25 = vector.broadcast %2 : vector<32x1x1xf32> to vector<32x49x4xf32>
    %26 = arith.mulf %24, %25 : vector<32x49x4xf32>
    %27 = vector.broadcast %4 : vector<32x1x1xf32> to vector<32x49x4xf32>
    %28 = arith.addf %26, %27 : vector<32x49x4xf32>
    %29 = vector.broadcast %6 : vector<32x1x1xf32> to vector<32x49x4xf32>
    %30 = arith.mulf %28, %29 : vector<32x49x4xf32>
    %cst_16 = arith.constant dense<0.000000e+00> : vector<49x4xf32>
    %31 = vector.multi_reduction <add>, %30, %cst_16 [0] : vector<32x49x4xf32> to vector<49x4xf32>
    %c0_17 = arith.constant 0 : index
    %c0_18 = arith.constant 0 : index
    %32 = vector.load %arg3[%c0_17, %c0_18] : memref<49x1xf32, #tpu.memory_space<vmem>>, vector<49x1xf32>
    %33 = vector.broadcast %32 : vector<49x1xf32> to vector<49x4xf32>
    %34 = arith.addf %31, %33 : vector<49x4xf32>
    %35 = math.tanh %34 : vector<49x4xf32>
    %36 = math.exp %35 : vector<49x4xf32>
    %cst_19 = arith.constant dense<0.000000e+00> : vector<4xf32>
    %37 = vector.multi_reduction <add>, %36, %cst_19 [0] : vector<49x4xf32> to vector<4xf32>
    %38 = vector.shape_cast %37 : vector<4xf32> to vector<1x4xf32>
    %39 = tpu.reciprocal %38 {approx = true} : vector<1x4xf32> -> vector<1x4xf32>
    %40 = arith.mulf %38, %39 : vector<1x4xf32>
    %cst_20 = arith.constant 2.000000e+00 : f32
    %41 = vector.broadcast %cst_20 : f32 to vector<1x4xf32>
    %42 = arith.subf %41, %40 : vector<1x4xf32>
    %43 = arith.mulf %39, %42 : vector<1x4xf32>
    %44 = vector.broadcast %43 : vector<1x4xf32> to vector<49x4xf32>
    %45 = arith.mulf %36, %44 : vector<49x4xf32>
    %cst_21 = arith.constant 1.000000e-10 : f32
    %46 = vector.broadcast %cst_21 : f32 to vector<49x4xf32>
    %47 = arith.addf %45, %46 : vector<49x4xf32>
    %48 = vector.shape_cast %47 : vector<49x4xf32> to vector<1x49x4xf32>
    %49 = vector.broadcast %48 : vector<1x49x4xf32> to vector<32x49x4xf32>
    %50 = arith.mulf %28, %49 : vector<32x49x4xf32>
    %cst_22 = arith.constant dense<0.000000e+00> : vector<32x4xf32>
    %51 = vector.multi_reduction <add>, %50, %cst_22 [1] : vector<32x49x4xf32> to vector<32x4xf32>
    %c0_23 = arith.constant 0 : index
    %c0_24 = arith.constant 0 : index
    %52 = vector.load %arg4[%c0_23, %c0_24] : memref<64x32xf32, #tpu.memory_space<vmem>>, vector<64x32xf32>
    %cst_25 = arith.constant dense<0.000000e+00> : vector<64x4xf32>
    %53 = tpu.matmul %52, %51, %cst_25 {dimension_numbers = #tpu.dot_dimension_numbers<[1], [0], [0], [1], [0, 0, 1, 1], [], []>} : vector<64x32xf32>, vector<32x4xf32>, vector<64x4xf32> -> vector<64x4xf32>
    %c0_26 = arith.constant 0 : index
    %c0_27 = arith.constant 0 : index
    %54 = vector.load %arg5[%c0_26, %c0_27] : memref<64x1xf32, #tpu.memory_space<vmem>>, vector<64x1xf32>
    %55 = vector.broadcast %54 : vector<64x1xf32> to vector<64x4xf32>
    %56 = arith.addf %53, %55 : vector<64x4xf32>
    %cst_28 = arith.constant 0.000000e+00 : f32
    %57 = vector.broadcast %cst_28 : f32 to vector<64x4xf32>
    %58 = arith.maximumf %56, %57 : vector<64x4xf32>
    %c0_29 = arith.constant 0 : index
    %c0_30 = arith.constant 0 : index
    %59 = vector.load %arg6[%c0_29, %c0_30] : memref<8x64xf32, #tpu.memory_space<vmem>>, vector<8x64xf32>
    %cst_31 = arith.constant dense<0.000000e+00> : vector<8x4xf32>
    %60 = tpu.matmul %59, %58, %cst_31 {dimension_numbers = #tpu.dot_dimension_numbers<[1], [0], [0], [1], [0, 0, 1, 1], [], []>} : vector<8x64xf32>, vector<64x4xf32>, vector<8x4xf32> -> vector<8x4xf32>
    %c0_32 = arith.constant 0 : index
    %c0_33 = arith.constant 0 : index
    %61 = vector.load %arg7[%c0_32, %c0_33] : memref<8x1xf32, #tpu.memory_space<vmem>>, vector<8x1xf32>
    %62 = vector.broadcast %61 : vector<8x1xf32> to vector<8x4xf32>
    %63 = arith.addf %60, %62 : vector<8x4xf32>
    %c0_34 = arith.constant 0 : index
    %c0_35 = arith.constant 0 : index
    %64 = vector.load %arg8[%c0_34, %c0_35] : memref<8x4xf32, #tpu.memory_space<vmem>>, vector<8x4xf32>
    tpu.vector_store %arg8[%c0_34, %c0_35], %63 {strides = array<i32>} : memref<8x4xf32, #tpu.memory_space<vmem>>, vector<8x4xf32>,
    return
  }
  func.func @transform_0(%arg0: i32) -> (i32, i32, i32) {
    %c0_i32 = arith.constant 0 : i32
    %c0_i32_0 = arith.constant 0 : i32
    %c0_i32_1 = arith.constant 0 : i32
    return %c0_i32, %c0_i32_0, %arg0 : i32, i32, i32
  }
  func.func @transform_1(%arg0: i32) -> (i32, i32, i32, i32) {
    %c0_i32 = arith.constant 0 : i32
    %c0_i32_0 = arith.constant 0 : i32
    %c0_i32_1 = arith.constant 0 : i32
    %c0_i32_2 = arith.constant 0 : i32
    %c0_i32_3 = arith.constant 0 : i32
    return %c0_i32, %c0_i32_0, %c0_i32_1, %c0_i32_2 : i32, i32, i32, i32
  }
  func.func @transform_2(%arg0: i32) -> (i32, i32) {
    %c0_i32 = arith.constant 0 : i32
    %c0_i32_0 = arith.constant 0 : i32
    %c0_i32_1 = arith.constant 0 : i32
    return %c0_i32, %c0_i32_0 : i32, i32
  }
  func.func @transform_3(%arg0: i32) -> (i32, i32) {
    %c0_i32 = arith.constant 0 : i32
    %c0_i32_0 = arith.constant 0 : i32
    %c0_i32_1 = arith.constant 0 : i32
    return %c0_i32, %c0_i32_0 : i32, i32
  }
  func.func @transform_4(%arg0: i32) -> (i32, i32) {
    %c0_i32 = arith.constant 0 : i32
    %c0_i32_0 = arith.constant 0 : i32
    %c0_i32_1 = arith.constant 0 : i32
    return %c0_i32, %c0_i32_0 : i32, i32
  }
  func.func @transform_5(%arg0: i32) -> (i32, i32) {
    %c0_i32 = arith.constant 0 : i32
    %c0_i32_0 = arith.constant 0 : i32
    %c0_i32_1 = arith.constant 0 : i32
    return %c0_i32, %c0_i32_0 : i32, i32
  }
  func.func @transform_6(%arg0: i32) -> (i32, i32) {
    %c0_i32 = arith.constant 0 : i32
    %c0_i32_0 = arith.constant 0 : i32
    %c0_i32_1 = arith.constant 0 : i32
    return %c0_i32, %c0_i32_0 : i32, i32
  }
  func.func @transform_7(%arg0: i32) -> (i32, i32) {
    %c0_i32 = arith.constant 0 : i32
    %c0_i32_0 = arith.constant 0 : i32
    return %c0_i32, %arg0 : i32, i32
  }
}

</mosaic_0001>

<bundles_post_ra>
// kernel: tpu_custom_call.1
= control target key start
LH: loop header
LB: loop body
LE: loop exit
PB: predicated region body
PF: predicated region fallthrough
CT: control target
= control target key end

     0   :  { %v5617_v0 = vmov 0   ;;  %vm348_vm0 = vcmask 31744   ;;  %vm727_vm1 = vcmask 24576   ;;  %vm4937_vm2 = vcmask 1041409   ;;  %s14620_s1 = inlined_call_operand.vmem [shape: f32[3,32,1,1], index: 1, kind: input, shape index: {}]   ;;  %s14621_s0 = inlined_call_operand.vmem [shape: f32[32,49,4], index: 0, kind: input, shape index: {}]   ;;  %s14622_s2 = inlined_call_operand.vmem [shape: f32[49,1], index: 2, kind: input, shape index: {}]   ;;  %s14623_s4 = inlined_call_operand.vmem [shape: f32[64,1], index: 4, kind: input, shape index: {}]   ;;  %s14624_s6 = inlined_call_operand.vmem [shape: f32[8,1], index: 6, kind: input, shape index: {}]   ;;  %s14625_s3 = inlined_call_operand.vmem [shape: f32[64,32], index: 3, kind: input, shape index: {}]   ;;  %s14626_s5 = inlined_call_operand.vmem [shape: f32[8,64], index: 5, kind: input, shape index: {}]   ;;  %s14627_s7 = inlined_call_operand.vmem [shape: f32[8,4], index: 7, kind: output, shape index: {}]  }
   0x1   :  { %5454 = vset.pattern.permute.xlu1 %v5617_v0  ;;  %5453 = vset.pattern.permute.xlu0 %v5617_v0  ;;  %v5266_v1 = vld [vmem:[%s14620_s1 + $0x2] ss:$0 sm:$0xff]  ;;  %v5264_v2 = vld [vmem:[%s14620_s1] ss:$0 sm:$0xff]  ;;  %v5265_v4 = vld [vmem:[%s14620_s1 + $0x1] ss:$0 sm:$0xff] }
   0x2   :  { %2102 = vperm.xlu1 %5454, %v5266_v1   ;;  %2094 = vperm.xlu0 %5453, %v5264_v2   ;;  %v5296_v3 = vld [vmem:[%s14620_s1 + $0x20] ss:$0 sm:$0xff]  ;;  %v5267_v5 = vld [vmem:[%s14620_s1 + $0x3] ss:$0 sm:$0xff]  ;;  %v5297_v6 = vld [vmem:[%s14620_s1 + $0x21] ss:$0 sm:$0xff] }
   0x3   :  { %v5328_v7 = vld [vmem:[%s14620_s1 + $0x40] ss:$0 sm:$0xff]  ;;  %v5298_v8 = vld [vmem:[%s14620_s1 + $0x22] ss:$0 sm:$0xff]  ;;  %v5268_v9 = vld [vmem:[%s14620_s1 + $0x4] ss:$0 sm:$0xff] }
   0x4   :  { %v5329_v10 = vld [vmem:[%s14620_s1 + $0x41] ss:$0 sm:$0xff]  ;;  %v5330_v11 = vld [vmem:[%s14620_s1 + $0x42] ss:$0 sm:$0xff]  ;;  %v5299_v12 = vld [vmem:[%s14620_s1 + $0x23] ss:$0 sm:$0xff] }
   0x5   :  { %v5300_v13 = vld [vmem:[%s14620_s1 + $0x24] ss:$0 sm:$0xff]  ;;  %v5269_v14 = vld [vmem:[%s14620_s1 + $0x5] ss:$0 sm:$0xff]  ;;  %v27_v16 = vld [vmem:[%s14621_s0 + $0x8] sm:$0xff]  ;;  %vm4939_vm3 = vcmask 1042434  }
   0x6   :  { %2606 = vperm.xlu1 %5454, %v5296_v3   ;;  %2098 = vperm.xlu0 %5453, %v5265_v4   ;;  %v26_v15 = vld [vmem:[%s14621_s0] sm:$0xff]  ;;  %v28_v17 = vld [vmem:[%s14621_s0 + $0x10] sm:$0xff]  ;;  %v29_v18 = vld [vmem:[%s14621_s0 + $0x18] sm:$0xff]  ;;  %v412_v22 = vsel %vm348_vm0, %v27_v16, 0.0  ;;  %vm4941_vm4 = vcmask 1043459   ;;  %vm4943_vm5 = vcmask 1044484  }
   0x7   :  { %v30_v19 = vld [vmem:[%s14621_s0 + $0x20] sm:$0xff]  ;;  %v349_v20 = vsel %vm348_vm0, %v26_v15, 0.0  ;;  %v33_v21 = vld [vmem:[%s14621_s0 + $0x38] sm:$0xff]  ;;  %v475_v23 = vsel %vm348_vm0, %v28_v17, 0.0  ;;  %v35_v26 = vld [vmem:[%s14621_s0 + $0x48] sm:$0xff]  ;;  %v538_v29 = vsel %vm348_vm0, %v29_v18, 0.0 }
   0x8   :  { %v5270_v24 = vld [vmem:[%s14620_s1 + $0x6] ss:$0 sm:$0xff]  ;;  %v36_v27 = vld [vmem:[%s14621_s0 + $0x50] sm:$0xff]  ;;  %v350_v28 = vsel %vm348_vm0, %v33_v21, 0.0  ;;  %v5331_v30 = vld [vmem:[%s14620_s1 + $0x43] ss:$0 sm:$0xff] }
   0x9   :  { %v34_v25 = vld [vmem:[%s14621_s0 + $0x40] sm:$0xff]  ;;  %v37_v31 = vld [vmem:[%s14621_s0 + $0x58] sm:$0xff]  ;;  %v351_v32 = vadd.f32 %v350_v28, %v349_v20  ;;  %v476_v34 = vsel %vm348_vm0, %v35_v26, 0.0  ;;  %v601_v35 = vsel %vm348_vm0, %v30_v19, 0.0  ;;  %v40_v36 = vld [vmem:[%s14621_s0 + $0x70] sm:$0xff]  ;;  %v539_v41 = vsel %vm348_vm0, %v36_v27, 0.0 }
   0xa   :  { %2106 = vperm.xlu1 %5454, %v5267_v5   ;;  %2610 = vperm.xlu0 %5453, %v5297_v6   ;;  %v413_v33 = vsel %vm348_vm0, %v34_v25, 0.0  ;;  %v41_v37 = vld [vmem:[%s14621_s0 + $0x78] sm:$0xff]  ;;  %v42_v38 = vld [vmem:[%s14621_s0 + $0x80] sm:$0xff]  ;;  %v477_v40 = vadd.f32 %v476_v34, %v475_v23  ;;  %v602_v42 = vsel %vm348_vm0, %v37_v31, 0.0  ;;  %v43_v43 = vld [vmem:[%s14621_s0 + $0x88] sm:$0xff]  ;;  %v352_v44 = vsel %vm348_vm0, %v40_v36, 0.0 }
   0xb   :  { %v414_v39 = vadd.f32 %v413_v33, %v412_v22  ;;  %v415_v45 = vsel %vm348_vm0, %v41_v37, 0.0  ;;  %v478_v46 = vsel %vm348_vm0, %v42_v38, 0.0  ;;  %v540_v47 = vadd.f32 %v539_v41, %v538_v29  ;;  %v44_v48 = vld [vmem:[%s14621_s0 + $0x90] sm:$0xff]  ;;  %v47_v49 = vld [vmem:[%s14621_s0 + $0xa8] sm:$0xff]  ;;  %v5332_v55 = vld [vmem:[%s14620_s1 + $0x44] ss:$0 sm:$0xff] }
   0xc   :  { %v48_v50 = vld [vmem:[%s14621_s0 + $0xb0] sm:$0xff]  ;;  %v353_v51 = vadd.f32 %v352_v44, %v351_v32  ;;  %v479_v53 = vadd.f32 %v478_v46, %v477_v40  ;;  %v541_v54 = vsel %vm348_vm0, %v43_v43, 0.0  ;;  %v49_v56 = vld [vmem:[%s14621_s0 + $0xb8] sm:$0xff]  ;;  %v50_v57 = vld [vmem:[%s14621_s0 + $0xc0] sm:$0xff]  ;;  %v354_v58 = vsel %vm348_vm0, %v47_v49, 0.0 }
   0xd   :  { %v416_v52 = vadd.f32 %v415_v45, %v414_v39  ;;  %v417_v59 = vsel %vm348_vm0, %v48_v50, 0.0  ;;  %v542_v60 = vadd.f32 %v541_v54, %v540_v47  ;;  %v603_v61 = vadd.f32 %v602_v42, %v601_v35  ;;  %v5301_v62 = vld [vmem:[%s14620_s1 + $0x25] ss:$0 sm:$0xff]  ;;  %v51_v63 = vld [vmem:[%s14621_s0 + $0xc8] sm:$0xff]  ;;  %v56_v6 = vld [vmem:[%s14621_s0 + $0xf0] sm:$0xff] }
   0xe   :  { %3118 = vperm.xlu1 %5454, %v5328_v7   ;;  %2614 = vperm.xlu0 %5453, %v5298_v8   ;;  %v54_v0 = vld [vmem:[%s14621_s0 + $0xe0] sm:$0xff]  ;;  %v355_v1 = vadd.f32 %v354_v58, %v353_v51  ;;  %v480_v3 = vsel %vm348_vm0, %v49_v56, 0.0  ;;  %v543_v4 = vsel %vm348_vm0, %v50_v57, 0.0  ;;  %v55_v5 = vld [vmem:[%s14621_s0 + $0xe8] sm:$0xff]  ;;  %v57_v7 = vld [vmem:[%s14621_s0 + $0xf8] sm:$0xff]  ;;  %v482_v15 = vsel %vm348_vm0, %v56_v6, 0.0 }
   0xf   :  { %v418_v2 = vadd.f32 %v417_v59, %v416_v52  ;;  %v356_v8 = vsel %vm348_vm0, %v54_v0, 0.0  ;;  %v61_v17 = vld [vmem:[%s14621_s0 + $0x118] sm:$0xff]  ;;  %v62_v18 = vld [vmem:[%s14621_s0 + $0x120] sm:$0xff]  ;;  %v63_v19 = vld [vmem:[%s14621_s0 + $0x128] sm:$0xff]  ;;  %v545_v22 = vsel %vm348_vm0, %v57_v7, 0.0  ;;  %v606_v23 = vsel %vm348_vm0, %v51_v63, 0.0 }
  0x10   :  { %v64_v25 = vld [vmem:[%s14621_s0 + $0x130] sm:$0xff]  ;;  %v358_v26 = vsel %vm348_vm0, %v61_v17, 0.0  ;;  %v421_v27 = vsel %vm348_vm0, %v62_v18, 0.0  ;;  %v484_v28 = vsel %vm348_vm0, %v63_v19, 0.0  ;;  %v69_v32 = vld [vmem:[%s14621_s0 + $0x158] sm:$0xff]  ;;  %v70_v38 = vld [vmem:[%s14621_s0 + $0x160] sm:$0xff] }
  0x11   :  { %v68_v31 = vld [vmem:[%s14621_s0 + $0x150] sm:$0xff]  ;;  %v547_v36 = vsel %vm348_vm0, %v64_v25, 0.0  ;;  %v5272_v37 = vld [vmem:[%s14620_s1 + $0x8] ss:$0 sm:$0xff]  ;;  %v423_v41 = vsel %vm348_vm0, %v69_v32, 0.0  ;;  %v65_v45 = vld [vmem:[%s14621_s0 + $0x138] sm:$0xff] }
  0x12   :  { %2110 = vperm.xlu1 %5454, %v5268_v9   ;;  %3122 = vperm.xlu0 %5453, %v5329_v10   ;;  %v481_v9 = vadd.f32 %v480_v3, %v479_v53  ;;  %v544_v10 = vadd.f32 %v543_v4, %v542_v60  ;;  %v71_v39 = vld [vmem:[%s14621_s0 + $0x168] sm:$0xff]  ;;  %v360_v40 = vsel %vm348_vm0, %v68_v31, 0.0  ;;  %v5333_v44 = vld [vmem:[%s14620_s1 + $0x45] ss:$0 sm:$0xff]  ;;  %v486_v49 = vsel %vm348_vm0, %v70_v38, 0.0  ;;  %v76_v51 = vld [vmem:[%s14621_s0 + $0x190] sm:$0xff] }
  0x13   :  { %v75_v46 = vld [vmem:[%s14621_s0 + $0x188] sm:$0xff]  ;;  %v549_v50 = vsel %vm348_vm0, %v71_v39, 0.0  ;;  %v77_v52 = vld [vmem:[%s14621_s0 + $0x198] sm:$0xff]  ;;  %v78_v53 = vld [vmem:[%s14621_s0 + $0x1a0] sm:$0xff]  ;;  %v425_v59 = vsel %vm348_vm0, %v76_v51, 0.0  ;;  %vm4945_vm6 = vcmask 1045509  }
  0x14   :  { %v483_v21 = vadd.f32 %v482_v15, %v481_v9  ;;  %v546_v29 = vadd.f32 %v545_v22, %v544_v10  ;;  %v362_v54 = vsel %vm348_vm0, %v75_v46, 0.0  ;;  %v488_v60 = vsel %vm348_vm0, %v77_v52, 0.0  ;;  %v82_v63 = vld [vmem:[%s14621_s0 + $0x1c0] sm:$0xff]  ;;  %v83_v0 = vld [vmem:[%s14621_s0 + $0x1c8] sm:$0xff]  ;;  %v85_v7 = vld [vmem:[%s14621_s0 + $0x1d8] sm:$0xff] }
  0x15   :  { %v551_v4 = vsel %vm348_vm0, %v78_v53, 0.0  ;;  %v5303_v6 = vld [vmem:[%s14620_s1 + $0x27] ss:$0 sm:$0xff]  ;;  %v427_v9 = vsel %vm348_vm0, %v83_v0, 0.0  ;;  %v553_v18 = vsel %vm348_vm0, %v85_v7, 0.0  ;;  %v91_v19 = vld [vmem:[%s14621_s0 + $0x208] sm:$0xff] }
  0x16   :  { %3126 = vperm.xlu1 %5454, %v5330_v11   ;;  %2618 = vperm.xlu0 %5453, %v5299_v12   ;;  %v604_v11 = vsel %vm348_vm0, %v44_v48, 0.0  ;;  %v5302_v12 = vld [vmem:[%s14620_s1 + $0x26] ss:$0 sm:$0xff]  ;;  %v485_v35 = vadd.f32 %v484_v28, %v483_v21  ;;  %v548_v42 = vadd.f32 %v547_v36, %v546_v29  ;;  %v79_v25 = vld [vmem:[%s14621_s0 + $0x1a8] sm:$0xff]  ;;  %v492_v29 = vsel %vm348_vm0, %v91_v19, 0.0  ;;  %v97_v31 = vld [vmem:[%s14621_s0 + $0x238] sm:$0xff] }
  0x17   :  { %v605_v16 = vadd.f32 %v604_v11, %v603_v61  ;;  %v98_v32 = vld [vmem:[%s14621_s0 + $0x240] sm:$0xff]  ;;  %v5304_v38 = vld [vmem:[%s14620_s1 + $0x28] ss:$0 sm:$0xff]  ;;  %v5273_v39 = vld [vmem:[%s14620_s1 + $0x9] ss:$0 sm:$0xff]  ;;  %vm4947_vm7 = vcmask 1046534  }
  0x18   :  { %v550_v56 = vadd.f32 %v549_v50, %v548_v42  ;;  %v494_v42 = vsel %vm348_vm0, %v98_v32, 0.0  ;;  %v105_v46 = vld [vmem:[%s14621_s0 + $0x278] sm:$0xff]  ;;  %v614_v50 = vsel %vm348_vm0, %v79_v25, 0.0  ;;  %v5274_v51 = vld [vmem:[%s14620_s1 + $0xa] ss:$0 sm:$0xff]  ;;  %v106_v52 = vld [vmem:[%s14621_s0 + $0x280] sm:$0xff] }
  0x19   :  { %v607_v43 = vadd.f32 %v606_v23, %v605_v16  ;;  %v5335_v0 = vld [vmem:[%s14620_s1 + $0x47] ss:$0 sm:$0xff]  ;;  %v93_v7 = vld [vmem:[%s14621_s0 + $0x218] sm:$0xff]  ;;  %vm4949_vm8 = vcmask 1047559   ;;  %vm4976_vm9 = vcmask 261120   ;;  %vm5619_vm10 = vmmov 0  }
  0x1a   :  { %2622 = vperm.xlu1 %5454, %v5300_v13   ;;  %2114 = vperm.xlu0 %5453, %v5269_v14   ;;  %v357_v13 = vadd.f32 %v356_v8, %v355_v1  ;;  %v419_v14 = vsel %vm348_vm0, %v55_v5, 0.0  ;;  %v84_v1 = vld [vmem:[%s14621_s0 + $0x1d0] sm:$0xff]  ;;  %v610_v5 = vsel %vm348_vm0, %v65_v45, 0.0  ;;  %v364_v8 = vsel %vm348_vm0, %v82_v63, 0.0 }
  0x1b   :  { %v420_v20 = vadd.f32 %v419_v14, %v418_v2  ;;  %v490_v10 = vsel %vm348_vm0, %v84_v1, 0.0  ;;  %v552_v11 = vadd.f32 %v551_v4, %v550_v56  ;;  %v90_v14 = vld [vmem:[%s14621_s0 + $0x200] sm:$0xff]  ;;  %v104_v45 = vld [vmem:[%s14621_s0 + $0x270] sm:$0xff]  ;;  %v559_v63 = vsel %vm348_vm0, %v106_v52, 0.0  ;;  %v5275_v52 = vld [vmem:[%s14620_s1 + $0xb] ss:$0 sm:$0xff] }
  0x1c   :  { %v359_v33 = vadd.f32 %v358_v26, %v357_v13  ;;  %v89_v13 = vld [vmem:[%s14621_s0 + $0x1f8] sm:$0xff]  ;;  %v429_v22 = vsel %vm348_vm0, %v90_v14, 0.0  ;;  %v96_v26 = vld [vmem:[%s14621_s0 + $0x230] sm:$0xff]  ;;  %v119_v14 = vld [vmem:[%s14621_s0 + $0x2e8] sm:$0xff]  ;;  %v618_v32 = vsel %vm348_vm0, %v93_v7, 0.0  ;;  %vm5121_vm11 = vcmask 523264  }
  0x1d   :  { %v422_v34 = vadd.f32 %v421_v27, %v420_v20  ;;  %v92_v20 = vld [vmem:[%s14621_s0 + $0x210] sm:$0xff]  ;;  %v366_v21 = vsel %vm348_vm0, %v89_v13, 0.0  ;;  %v554_v23 = vadd.f32 %v553_v18, %v552_v11  ;;  %v118_v13 = vld [vmem:[%s14621_s0 + $0x2e0] sm:$0xff]  ;;  %v145_v7 = vld [vmem:[%s14621_s0 + $0x3b8] sm:$0xff] }
  0x1e   :  { %2118 = vperm.xlu1 %5454, %v5270_v24   ;;  %3130 = vperm.xlu0 %5453, %v5331_v30   ;;  %v5271_v24 = vld [vmem:[%s14620_s1 + $0x7] ss:$0 sm:$0xff]  ;;  %v361_v47 = vadd.f32 %v360_v40, %v359_v33  ;;  %v99_v33 = vld [vmem:[%s14621_s0 + $0x248] sm:$0xff]  ;;  %v112_v1 = vld [vmem:[%s14621_s0 + $0x2b0] sm:$0xff] }
  0x1f   :  { %v58_v30 = vld [vmem:[%s14621_s0 + $0x100] sm:$0xff]  ;;  %v424_v48 = vadd.f32 %v423_v41, %v422_v34  ;;  %v368_v34 = vsel %vm348_vm0, %v96_v26, 0.0  ;;  %v431_v41 = vsel %vm348_vm0, %v97_v31, 0.0  ;;  %v498_v11 = vsel %vm348_vm0, %v112_v1, 0.0  ;;  %v124_v26 = vld [vmem:[%s14621_s0 + $0x310] sm:$0xff] }
  0x20   :  { %v608_v57 = vsel %vm348_vm0, %v58_v30, 0.0  ;;  %v363_v58 = vadd.f32 %v362_v54, %v361_v47  ;;  %v555_v30 = vsel %vm348_vm0, %v92_v20, 0.0  ;;  %v433_v54 = vsel %vm348_vm0, %v104_v45, 0.0  ;;  %v5336_v20 = vld [vmem:[%s14620_s1 + $0x48] ss:$0 sm:$0xff] }
  0x21   :  { %v609_v61 = vadd.f32 %v608_v57, %v607_v43  ;;  %v426_v2 = vadd.f32 %v425_v59, %v424_v48  ;;  %v556_v36 = vadd.f32 %v555_v30, %v554_v23  ;;  %v86_v57 = vld [vmem:[%s14621_s0 + $0x1e0] sm:$0xff]  ;;  %v111_v59 = vld [vmem:[%s14621_s0 + $0x2a8] sm:$0xff]  ;;  %v437_v23 = vsel %vm348_vm0, %v118_v13, 0.0 }
  0x22   :  { %3134 = vperm.xlu1 %5454, %v5332_v55   ;;  %2626 = vperm.xlu0 %5453, %v5301_v62   ;;  %v487_v55 = vadd.f32 %v486_v49, %v485_v35  ;;  %v5334_v62 = vld [vmem:[%s14620_s1 + $0x46] ss:$0 sm:$0xff]  ;;  %v365_v15 = vadd.f32 %v364_v8, %v363_v58  ;;  %v557_v49 = vsel %vm348_vm0, %v99_v33, 0.0  ;;  %v435_v4 = vsel %vm348_vm0, %v111_v59, 0.0  ;;  %v117_v8 = vld [vmem:[%s14621_s0 + $0x2d8] sm:$0xff]  ;;  %v127_v33 = vld [vmem:[%s14621_s0 + $0x328] sm:$0xff] }
  0x23   :  { %v428_v16 = vadd.f32 %v427_v9, %v426_v2  ;;  %v558_v56 = vadd.f32 %v557_v49, %v556_v36  ;;  %v110_v58 = vld [vmem:[%s14621_s0 + $0x2a0] sm:$0xff]  ;;  %v113_v2 = vld [vmem:[%s14621_s0 + $0x2b8] sm:$0xff]  ;;  %v616_v19 = vsel %vm348_vm0, %v86_v57, 0.0  ;;  %v5306_v45 = vld [vmem:[%s14620_s1 + $0x2a] ss:$0 sm:$0xff] }
  0x24   :  { %v489_v3 = vadd.f32 %v488_v60, %v487_v55  ;;  %v367_v27 = vadd.f32 %v366_v21, %v365_v15  ;;  %v496_v55 = vsel %vm348_vm0, %v105_v46, 0.0  ;;  %v120_v15 = vld [vmem:[%s14621_s0 + $0x2f0] sm:$0xff]  ;;  %v5305_v21 = vld [vmem:[%s14620_s1 + $0x29] ss:$0 sm:$0xff]  ;;  %v133_v46 = vld [vmem:[%s14621_s0 + $0x358] sm:$0xff] }
  0x25   :  { %v430_v28 = vadd.f32 %v429_v22, %v428_v16  ;;  %v374_v16 = vsel %vm348_vm0, %v117_v8, 0.0  ;;  %v563_v31 = vsel %vm348_vm0, %v120_v15, 0.0  ;;  %v504_v57 = vsel %vm348_vm0, %v133_v46, 0.0  ;;  %v139_v59 = vld [vmem:[%s14621_s0 + $0x388] sm:$0xff]  ;;  %v146_v8 = vld [vmem:[%s14621_s0 + $0x3c0] sm:$0xff]  ;;  %v148_v15 = vld [vmem:[%s14621_s0 + $0x3d0] sm:$0xff] }
  0x26   :  { %2630 = vperm.xlu1 %5454, %v5302_v12   ;;  %2122 = vperm.xlu0 %5453, %v5271_v24   ;;  %v72_v12 = vld [vmem:[%s14621_s0 + $0x170] sm:$0xff]  ;;  %v491_v17 = vadd.f32 %v490_v10, %v489_v3  ;;  %v611_v24 = vadd.f32 %v610_v5, %v609_v61  ;;  %v369_v40 = vadd.f32 %v368_v34, %v367_v27  ;;  %v372_v3 = vsel %vm348_vm0, %v110_v58, 0.0  ;;  %v125_v27 = vld [vmem:[%s14621_s0 + $0x318] sm:$0xff] }
  0x27   :  { %v432_v47 = vadd.f32 %v431_v41, %v430_v28  ;;  %v560_v5 = vadd.f32 %v559_v63, %v558_v56  ;;  %v126_v28 = vld [vmem:[%s14621_s0 + $0x320] sm:$0xff]  ;;  %v376_v34 = vsel %vm348_vm0, %v124_v26, 0.0  ;;  %v5338_v26 = vld [vmem:[%s14620_s1 + $0x4a] ss:$0 sm:$0xff] }
  0x28   :  { %v493_v35 = vadd.f32 %v492_v29, %v491_v17  ;;  %v502_v36 = vsel %vm348_vm0, %v126_v28, 0.0  ;;  %v155_v28 = vld [vmem:[%s14621_s0 + $0x408] sm:$0xff] }
  0x29   :  { %v434_v61 = vadd.f32 %v433_v54, %v432_v47  ;;  %v134_v47 = vld [vmem:[%s14621_s0 + $0x360] sm:$0xff] }
  0x2a   :  { %2126 = vperm.xlu1 %5454, %v5272_v37   ;;  %3138 = vperm.xlu0 %5453, %v5333_v44   ;;  %v612_v37 = vsel %vm348_vm0, %v72_v12, 0.0  ;;  %v103_v44 = vld [vmem:[%s14621_s0 + $0x268] sm:$0xff]  ;;  %v495_v48 = vadd.f32 %v494_v42, %v493_v35  ;;  %v561_v12 = vsel %vm348_vm0, %v113_v2, 0.0  ;;  %v439_v35 = vsel %vm348_vm0, %v125_v27, 0.0  ;;  %v138_v54 = vld [vmem:[%s14621_s0 + $0x380] sm:$0xff] }
  0x2b   :  { %v613_v43 = vadd.f32 %v612_v37, %v611_v24  ;;  %v370_v53 = vsel %vm348_vm0, %v103_v44, 0.0  ;;  %v436_v10 = vadd.f32 %v435_v4, %v434_v61  ;;  %v562_v18 = vadd.f32 %v561_v12, %v560_v5  ;;  %v141_v61 = vld [vmem:[%s14621_s0 + $0x398] sm:$0xff]  ;;  %v5276_v2 = vld [vmem:[%s14620_s1 + $0xc] ss:$0 sm:$0xff]  ;;  %v154_v27 = vld [vmem:[%s14621_s0 + $0x400] sm:$0xff] }
  0x2c   :  { %v371_v60 = vadd.f32 %v370_v53, %v369_v40  ;;  %v500_v24 = vsel %vm348_vm0, %v119_v14, 0.0  ;;  %v132_v40 = vld [vmem:[%s14621_s0 + $0x350] sm:$0xff]  ;;  %v565_v44 = vsel %vm348_vm0, %v127_v33, 0.0  ;;  %v107_v53 = vld [vmem:[%s14621_s0 + $0x288] sm:$0xff]  ;;  %v567_v58 = vsel %vm348_vm0, %v134_v47, 0.0  ;;  %v166_v47 = vld [vmem:[%s14621_s0 + $0x460] sm:$0xff] }
  0x2d   :  { %v438_v29 = vadd.f32 %v437_v23, %v436_v10  ;;  %v564_v37 = vadd.f32 %v563_v31, %v562_v18  ;;  %v441_v49 = vsel %vm348_vm0, %v132_v40, 0.0  ;;  %v443_v4 = vsel %vm348_vm0, %v139_v59, 0.0  ;;  %v5337_v14 = vld [vmem:[%s14620_s1 + $0x49] ss:$0 sm:$0xff]  ;;  %v5307_v33 = vld [vmem:[%s14620_s1 + $0x2b] ss:$0 sm:$0xff] }
  0x2e   :  { %3142 = vperm.xlu1 %5454, %v5334_v62   ;;  %2634 = vperm.xlu0 %5453, %v5303_v6   ;;  %v497_v62 = vadd.f32 %v496_v55, %v495_v48  ;;  %v615_v6 = vadd.f32 %v614_v50, %v613_v43  ;;  %v373_v9 = vadd.f32 %v372_v3, %v371_v60  ;;  %v140_v60 = vld [vmem:[%s14621_s0 + $0x390] sm:$0xff]  ;;  %v569_v12 = vsel %vm348_vm0, %v141_v61, 0.0  ;;  %v161_v40 = vld [vmem:[%s14621_s0 + $0x438] sm:$0xff] }
  0x2f   :  { %v440_v42 = vadd.f32 %v439_v35, %v438_v29  ;;  %v566_v50 = vadd.f32 %v565_v44, %v564_v37  ;;  %v506_v5 = vsel %vm348_vm0, %v140_v60, 0.0  ;;  %v622_v13 = vsel %vm348_vm0, %v107_v53, 0.0  ;;  %v159_v35 = vld [vmem:[%s14621_s0 + $0x428] sm:$0xff]  ;;  %v162_v44 = vld [vmem:[%s14621_s0 + $0x440] sm:$0xff]  ;;  %v169_v61 = vld [vmem:[%s14621_s0 + $0x478] sm:$0xff] }
  0x30   :  { %v499_v17 = vadd.f32 %v498_v11, %v497_v62  ;;  %v375_v22 = vadd.f32 %v374_v16, %v373_v9  ;;  %v617_v25 = vadd.f32 %v616_v19, %v615_v6  ;;  %v380_v62 = vsel %vm348_vm0, %v138_v54, 0.0  ;;  %v147_v9 = vld [vmem:[%s14621_s0 + $0x3c8] sm:$0xff] }
  0x31   :  { %v442_v56 = vadd.f32 %v441_v49, %v440_v42  ;;  %v382_v16 = vsel %vm348_vm0, %v145_v7, 0.0  ;;  %v508_v18 = vsel %vm348_vm0, %v147_v9, 0.0  ;;  %v510_v37 = vsel %vm348_vm0, %v154_v27, 0.0  ;;  %v5309_v27 = vld [vmem:[%s14620_s1 + $0x2d] ss:$0 sm:$0xff] }
  0x32   :  { %2638 = vperm.xlu1 %5454, %v5304_v38   ;;  %2130 = vperm.xlu0 %5453, %v5273_v39   ;;  %v501_v30 = vadd.f32 %v500_v24, %v499_v17  ;;  %v100_v38 = vld [vmem:[%s14621_s0 + $0x250] sm:$0xff]  ;;  %v131_v39 = vld [vmem:[%s14621_s0 + $0x348] sm:$0xff]  ;;  %v377_v41 = vadd.f32 %v376_v34, %v375_v22  ;;  %v445_v17 = vsel %vm348_vm0, %v146_v8, 0.0  ;;  %v153_v22 = vld [vmem:[%s14621_s0 + $0x3f8] sm:$0xff]  ;;  %v573_v42 = vsel %vm348_vm0, %v155_v28, 0.0 }
  0x33   :  { %v378_v48 = vsel %vm348_vm0, %v131_v39, 0.0  ;;  %v620_v1 = vsel %vm348_vm0, %v100_v38, 0.0  ;;  %v444_v10 = vadd.f32 %v443_v4, %v442_v56  ;;  %v121_v34 = vld [vmem:[%s14621_s0 + $0x2f8] sm:$0xff]  ;;  %v160_v39 = vld [vmem:[%s14621_s0 + $0x430] sm:$0xff]  ;;  %v512_v54 = vsel %vm348_vm0, %v161_v40, 0.0  ;;  %v182_v28 = vld [vmem:[%s14621_s0 + $0x4e0] sm:$0xff] }
  0x34   :  { %v503_v43 = vadd.f32 %v502_v36, %v501_v30  ;;  %v379_v55 = vadd.f32 %v378_v48, %v377_v41  ;;  %v447_v30 = vsel %vm348_vm0, %v153_v22, 0.0  ;;  %v386_v41 = vsel %vm348_vm0, %v159_v35, 0.0  ;;  %v5277_v56 = vld [vmem:[%s14620_s1 + $0xd] ss:$0 sm:$0xff]  ;;  %v5278_v4 = vld [vmem:[%s14620_s1 + $0xe] ss:$0 sm:$0xff] }
  0x35   :  { %v446_v24 = vadd.f32 %v445_v17, %v444_v10  ;;  %v449_v48 = vsel %vm348_vm0, %v160_v39, 0.0  ;;  %v388_v59 = vsel %vm348_vm0, %v166_v47, 0.0  ;;  %v575_v60 = vsel %vm348_vm0, %v162_v44, 0.0  ;;  %v5339_v10 = vld [vmem:[%s14620_s1 + $0x4b] ss:$0 sm:$0xff]  ;;  %v6204_v22 = vld [vmem:[%s14621_s0 + $0x3a0] sm:$0xff] }
  0x36   :  { %2134 = vperm.xlu1 %5454, %v5274_v51   ;;  %3146 = vperm.xlu0 %5453, %v5335_v0   ;;  %v619_v51 = vadd.f32 %v618_v32, %v617_v25  ;;  %v505_v63 = vadd.f32 %v504_v57, %v503_v43  ;;  %v568_v0 = vadd.f32 %v567_v58, %v566_v50  ;;  %v571_v25 = vsel %vm348_vm0, %v148_v15, 0.0  ;;  %v128_v57 = vld [vmem:[%s14621_s0 + $0x330] sm:$0xff]  ;;  %v5310_v39 = vld [vmem:[%s14620_s1 + $0x2e] ss:$0 sm:$0xff] }
  0x37   :  { %v381_v3 = vadd.f32 %v380_v62, %v379_v55  ;;  %v626_v50 = vsel %vm348_vm0, %v121_v34, 0.0  ;;  %v168_v58 = vld [vmem:[%s14621_s0 + $0x470] sm:$0xff]  ;;  %v173_v62 = vld [vmem:[%s14621_s0 + $0x498] sm:$0xff]  ;;  %v628_v9 = vsel %vm348_vm0, %v128_v57, 0.0  ;;  %v187_v34 = vld [vmem:[%s14621_s0 + $0x508] sm:$0xff] }
  0x38   :  { %v621_v6 = vadd.f32 %v620_v1, %v619_v51  ;;  %v507_v11 = vadd.f32 %v506_v5, %v505_v63  ;;  %v570_v19 = vadd.f32 %v569_v12, %v568_v0  ;;  %v5308_v51 = vld [vmem:[%s14620_s1 + $0x2c] ss:$0 sm:$0xff]  ;;  %v174_v5 = vld [vmem:[%s14621_s0 + $0x4a0] sm:$0xff]  ;;  %v514_v7 = vsel %vm348_vm0, %v168_v58, 0.0  ;;  %v176_v15 = vld [vmem:[%s14621_s0 + $0x4b0] sm:$0xff] }
  0x39   :  { %v383_v23 = vadd.f32 %v382_v16, %v381_v3  ;;  %v135_v1 = vld [vmem:[%s14621_s0 + $0x368] sm:$0xff]  ;;  %v390_v12 = vsel %vm348_vm0, %v173_v62, 0.0  ;;  %v180_v16 = vld [vmem:[%s14621_s0 + $0x4d0] sm:$0xff]  ;;  %v394_v47 = vsel %vm348_vm0, %v187_v34, 0.0 }
  0x3a   :  { %3150 = vperm.xlu1 %5454, %v5336_v20   ;;  %2642 = vperm.xlu0 %5453, %v5305_v21   ;;  %v114_v20 = vld [vmem:[%s14621_s0 + $0x2c0] sm:$0xff]  ;;  %v152_v21 = vld [vmem:[%s14621_s0 + $0x3f0] sm:$0xff]  ;;  %v509_v31 = vadd.f32 %v508_v18, %v507_v11  ;;  %v623_v32 = vadd.f32 %v622_v13, %v621_v6  ;;  %v572_v38 = vadd.f32 %v571_v25, %v570_v19  ;;  %v175_v11 = vld [vmem:[%s14621_s0 + $0x4a8] sm:$0xff]  ;;  %v577_v13 = vsel %vm348_vm0, %v169_v61, 0.0 }
  0x3b   :  { %v384_v29 = vsel %vm348_vm0, %v152_v21, 0.0  ;;  %v624_v43 = vsel %vm348_vm0, %v114_v20, 0.0  ;;  %v630_v18 = vsel %vm348_vm0, %v135_v1, 0.0  ;;  %v453_v19 = vsel %vm348_vm0, %v174_v5, 0.0  ;;  %v5340_v21 = vld [vmem:[%s14620_s1 + $0x4c] ss:$0 sm:$0xff] }
  0x3c   :  { %v385_v36 = vadd.f32 %v384_v29, %v383_v23  ;;  %v625_v46 = vadd.f32 %v624_v43, %v623_v32  ;;  %v511_v49 = vadd.f32 %v510_v37, %v509_v31  ;;  %v574_v55 = vadd.f32 %v573_v42, %v572_v38  ;;  %v181_v23 = vld [vmem:[%s14621_s0 + $0x4d8] sm:$0xff]  ;;  %v188_v40 = vld [vmem:[%s14621_s0 + $0x510] sm:$0xff]  ;;  %v6273_v57 = vld [vmem:[%s14621_s0 + $0x548] sm:$0xff] }
  0x3d   :  { %v516_v25 = vsel %vm348_vm0, %v175_v11, 0.0  ;;  %v392_v29 = vsel %vm348_vm0, %v180_v16, 0.0  ;;  %v6221_v32 = vld [vmem:[%s14621_s0 + $0x3d8] sm:$0xff]  ;;  %v632_v38 = vsel %vm348_vm0, %v6204_v22, 0.0  ;;  %v518_v42 = vsel %vm348_vm0, %v182_v28, 0.0  ;;  %v202_v11 = vld [vmem:[%s14621_s0 + $0x580] sm:$0xff] }
  0x3e   :  { %2646 = vperm.xlu1 %5454, %v5306_v45   ;;  %2138 = vperm.xlu0 %5453, %v5275_v52   ;;  %v448_v45 = vadd.f32 %v447_v30, %v446_v24  ;;  %v167_v52 = vld [vmem:[%s14621_s0 + $0x468] sm:$0xff]  ;;  %v387_v53 = vadd.f32 %v386_v41, %v385_v36  ;;  %v627_v0 = vadd.f32 %v626_v50, %v625_v46  ;;  %v579_v30 = vsel %vm348_vm0, %v176_v15, 0.0  ;;  %v6245_v46 = vld [vmem:[%s14621_s0 + $0x518] sm:$0xff]  ;;  %v6254_v50 = vld [vmem:[%s14621_s0 + $0x520] sm:$0xff] }
  0x3f   :  { %v513_v3 = vadd.f32 %v512_v54, %v511_v49  ;;  %v576_v8 = vadd.f32 %v575_v60, %v574_v55  ;;  %v455_v36 = vsel %vm348_vm0, %v181_v23, 0.0  ;;  %v634_v49 = vsel %vm348_vm0, %v6221_v32, 0.0  ;;  %v5341_v62 = vld [vmem:[%s14620_s1 + $0x4d] ss:$0 sm:$0xff]  ;;  %v5311_v16 = vld [vmem:[%s14620_s1 + $0x2f] ss:$0 sm:$0xff] }
  0x40   :  { %v450_v63 = vadd.f32 %v449_v48, %v448_v45  ;;  %v389_v6 = vadd.f32 %v388_v59, %v387_v53  ;;  %v5279_v45 = vld [vmem:[%s14620_s1 + $0xf] ss:$0 sm:$0xff]  ;;  %v6264_v53 = vld [vmem:[%s14621_s0 + $0x410] sm:$0xff]  ;;  %v457_v54 = vsel %vm348_vm0, %v188_v40, 0.0  ;;  %v520_v59 = vsel %vm348_vm0, %v6245_v46, 0.0 }
  0x41   :  { %v515_v20 = vadd.f32 %v514_v7, %v513_v3  ;;  %v197_v3 = vld [vmem:[%s14621_s0 + $0x558] sm:$0xff]  ;;  %v459_v7 = vsel %vm348_vm0, %v6273_v57, 0.0  ;;  %v6334_v23 = vld [vmem:[%s14621_s0 + $0x5b0] sm:$0xff] }
  0x42   :  { %2142 = vperm.xlu1 %5454, %v5276_v2   ;;  %3154 = vperm.xlu0 %5453, %v5337_v14   ;;  %v451_v2 = vsel %vm348_vm0, %v167_v52, 0.0  ;;  %v629_v14 = vadd.f32 %v628_v9, %v627_v0  ;;  %v391_v24 = vadd.f32 %v390_v12, %v389_v6  ;;  %v196_v0 = vld [vmem:[%s14621_s0 + $0x550] sm:$0xff]  ;;  %v636_v6 = vsel %vm348_vm0, %v6264_v53, 0.0  ;;  %15155 = vst [vmem:[#allocation4_spill] sm:$0xff] %v6334_v23 }
  0x43   :  { %v452_v17 = vadd.f32 %v451_v2, %v450_v63  ;;  %v517_v37 = vadd.f32 %v516_v25, %v515_v20  ;;  %v6283_v63 = vld [vmem:[%s14621_s0 + $0x448] sm:$0xff]  ;;  %v583_v2 = vsel %vm348_vm0, %v6254_v50, 0.0  ;;  %v6324_v20 = vld [vmem:[%s14621_s0 + $0x480] sm:$0xff]  ;;  %v5312_v25 = vld [vmem:[%s14620_s1 + $0x30] ss:$0 sm:$0xff] }
  0x44   :  { %v631_v31 = vadd.f32 %v630_v18, %v629_v14  ;;  %v393_v41 = vadd.f32 %v392_v29, %v391_v24  ;;  %v638_v15 = vsel %vm348_vm0, %v6283_v63, 0.0  ;;  %v6343_v29 = vld [vmem:[%s14621_s0 + $0x4b8] sm:$0xff]  ;;  %v640_v40 = vsel %vm348_vm0, %v6324_v20, 0.0 }
  0x45   :  { %v454_v35 = vadd.f32 %v453_v19, %v452_v17  ;;  %v519_v55 = vadd.f32 %v518_v42, %v517_v37  ;;  %v6317_v17 = vld [vmem:[%s14621_s0 + $0x588] sm:$0xff]  ;;  %v585_v19 = vsel %vm348_vm0, %v197_v3, 0.0  ;;  %v6359_v37 = vld [vmem:[%s14621_s0 + $0x4f0] sm:$0xff] }
  0x46   :  { %3158 = vperm.xlu1 %5454, %v5338_v26   ;;  %2650 = vperm.xlu0 %5453, %v5307_v33   ;;  %v578_v26 = vadd.f32 %v577_v13, %v576_v8  ;;  %v183_v33 = vld [vmem:[%s14621_s0 + $0x4e8] sm:$0xff]  ;;  %v633_v44 = vadd.f32 %v632_v38, %v631_v31  ;;  %v395_v58 = vadd.f32 %v394_v47, %v393_v41  ;;  %v522_v13 = vsel %vm348_vm0, %v196_v0, 0.0  ;;  %v210_v31 = vld [vmem:[%s14621_s0 + $0x5c0] sm:$0xff]  ;;  %v5282_v47 = vld [vmem:[%s14620_s1 + $0x12] ss:$0 sm:$0xff] }
  0x47   :  { %v581_v48 = vsel %vm348_vm0, %v183_v33, 0.0  ;;  %v456_v52 = vadd.f32 %v455_v36, %v454_v35  ;;  %v521_v8 = vadd.f32 %v520_v59, %v519_v55  ;;  %15153 = vst [vmem:[#allocation2_spill] sm:$0xff] %v6317_v17  ;;  %v524_v34 = vsel %vm348_vm0, %v6317_v17, 0.0  ;;  %v5281_v36 = vld [vmem:[%s14620_s1 + $0x11] ss:$0 sm:$0xff]  ;;  %v6370_v41 = vld [vmem:[%s14621_s0 + $0x28] sm:$0xff] }
  0x48   :  { %v580_v43 = vadd.f32 %v579_v30, %v578_v26  ;;  %v635_v61 = vadd.f32 %v634_v49, %v633_v44  ;;  %v461_v26 = vsel %vm348_vm0, %v202_v11, 0.0  ;;  %v209_v30 = vld [vmem:[%s14621_s0 + $0x5b8] sm:$0xff]  ;;  %v400_v38 = vsel %vm348_vm0, %v6334_v23, 0.0  ;;  %v211_v42 = vld [vmem:[%s14621_s0 + $0x5c8] sm:$0xff]  ;;  %v6403_v59 = vld [vmem:[%s14621_s0 + $0x5f0] sm:$0xff] }
  0x49   :  { %v458_v5 = vadd.f32 %v457_v54, %v456_v52  ;;  %v463_v49 = vsel %vm348_vm0, %v209_v30, 0.0  ;;  %v526_v54 = vsel %vm348_vm0, %v210_v31, 0.0  ;;  %v642_v55 = vsel %vm348_vm0, %v6343_v29, 0.0  ;;  %15156 = vst [vmem:[#allocation5_spill] sm:$0xff] %v6403_v59  ;;  %v5313_v30 = vld [vmem:[%s14620_s1 + $0x31] ss:$0 sm:$0xff] }
  0x4a   :  { %2654 = vperm.xlu1 %5454, %v5308_v51   ;;  %2146 = vperm.xlu0 %5453, %v5277_v56   ;;  %v6259_v51 = vld [vmem:[%s14621_s0 + $0x540] sm:$0xff]  ;;  %v5280_v56 = vld [vmem:[%s14620_s1 + $0x10] ss:$0 sm:$0xff]  ;;  %v582_v60 = vadd.f32 %v581_v48, %v580_v43  ;;  %v637_v9 = vadd.f32 %v636_v6, %v635_v61  ;;  %v215_v43 = vld [vmem:[%s14621_s0 + $0x5e8] sm:$0xff]  ;;  %v644_v0 = vsel %vm348_vm0, %v6359_v37, 0.0 }
  0x4b   :  { %v396_v1 = vsel %vm348_vm0, %v6259_v51, 0.0  ;;  %v460_v24 = vadd.f32 %v459_v7, %v458_v5  ;;  %v6384_v48 = vld [vmem:[%s14621_s0 + $0x528] sm:$0xff]  ;;  %v402_v3 = vsel %vm348_vm0, %v215_v43, 0.0  ;;  %v664_v5 = vsel %vm348_vm0, %v6370_v41, 0.0  ;;  %v6422_v6 = vld [vmem:[%s14621_s0 + $0xd0] sm:$0xff]  ;;  %v6427_v7 = vld [vmem:[%s14621_s0 + $0x600] sm:$0xff] }
  0x4c   :  { %v397_v12 = vadd.f32 %v396_v1, %v395_v58  ;;  %v584_v14 = vadd.f32 %v583_v2, %v582_v60  ;;  %v639_v28 = vadd.f32 %v638_v15, %v637_v9  ;;  %v6398_v58 = vld [vmem:[%s14621_s0 + $0x98] sm:$0xff]  ;;  %v5343_v1 = vld [vmem:[%s14620_s1 + $0x4f] ss:$0 sm:$0xff]  ;;  %15158 = vst [vmem:[#allocation7_spill] sm:$0xff] %v6427_v7  ;;  %v646_v11 = vsel %vm348_vm0, %v6384_v48, 0.0  ;;  %v6468_v31 = vld [vmem:[%s14621_s0 + $0x630] sm:$0xff] }
  0x4d   :  { %v462_v44 = vadd.f32 %v461_v26, %v460_v24  ;;  %v6413_v2 = vld [vmem:[%s14621_s0 + $0x5f8] sm:$0xff]  ;;  %v6458_v24 = vld [vmem:[%s14621_s0 + $0x628] sm:$0xff]  ;;  %15162 = vst [vmem:[#allocation11_spill] sm:$0xff] %v6468_v31 }
  0x4e   :  { %2150 = vperm.xlu1 %5454, %v5278_v4   ;;  %3162 = vperm.xlu0 %5453, %v5339_v10   ;;  %v201_v4 = vld [vmem:[%s14621_s0 + $0x578] sm:$0xff]  ;;  %v5342_v10 = vld [vmem:[%s14620_s1 + $0x4e] ss:$0 sm:$0xff]  ;;  %v586_v35 = vadd.f32 %v585_v19, %v584_v14  ;;  %15157 = vst [vmem:[#allocation6_spill] sm:$0xff] %v6413_v2  ;;  %15161 = vst [vmem:[#allocation10_spill] sm:$0xff] %v6458_v24  ;;  %v528_v26 = vsel %vm348_vm0, %v6413_v2, 0.0 }
  0x4f   :  { %v398_v18 = vsel %vm348_vm0, %v201_v4, 0.0  ;;  %v589_v4 = vsel %vm348_vm0, %v211_v42, 0.0  ;;  %v464_v9 = vadd.f32 %v463_v49, %v462_v44  ;;  %v6453_v19 = vld [vmem:[%s14621_s0 + $0x108] sm:$0xff]  ;;  %v467_v49 = vsel %vm348_vm0, %v6458_v24, 0.0  ;;  %v6690_v2 = vld [vmem:[%s14621_s0 + $0x6d0] sm:$0xff] }
  0x50   :  { %v399_v33 = vadd.f32 %v398_v18, %v397_v12  ;;  %v6439_v12 = vld [vmem:[%s14621_s0 + $0x560] sm:$0xff]  ;;  %v5344_v18 = vld [vmem:[%s14620_s1 + $0x50] ss:$0 sm:$0xff]  ;;  %v6659_v24 = vld [vmem:[%s14621_s0 + $0x6c8] sm:$0xff]  ;;  %15190 = vst [vmem:[#allocation39_spill] sm:$0xff] %v6690_v2 }
  0x51   :  { %15160 = vst [vmem:[#allocation9_spill] sm:$0xff] %v6439_v12  ;;  %v648_v43 = vsel %vm348_vm0, %v6439_v12, 0.0  ;;  %15186 = vst [vmem:[#allocation35_spill] sm:$0xff] %v6659_v24  ;;  %v6902_v17 = vld [vmem:[%s14621_s0 + $0x378] sm:$0x1] }
  0x52   :  { %3166 = vperm.xlu1 %5454, %v5340_v21   ;;  %2658 = vperm.xlu0 %5453, %v5309_v27   ;;  %v6329_v21 = vld [vmem:[%s14621_s0 + $0x590] sm:$0xff]  ;;  %v523_v27 = vadd.f32 %v522_v13, %v521_v8  ;;  %v401_v60 = vadd.f32 %v400_v38, %v399_v33  ;;  %v6432_v8 = vld [vmem:[%s14621_s0 + $0x620] sm:$0xff]  ;;  %v465_v13 = vsel %vm348_vm0, %v6403_v59, 0.0  ;;  %15219 = vst [vmem:[#allocation68_spill] sm:$0xff] %v6902_v17 }
  0x53   :  { %15154 = vst [vmem:[#allocation3_spill] sm:$0xff] %v6329_v21  ;;  %15159 = vst [vmem:[#allocation8_spill] sm:$0xff] %v6432_v8  ;;  %v404_v33 = vsel %vm348_vm0, %v6432_v8, 0.0  ;;  %v6479_v38 = vld [vmem:[%s14621_s0 + $0x140] sm:$0xff]  ;;  %v466_v42 = vadd.f32 %v465_v13, %v464_v9 }
  0x54   :  { %v525_v52 = vadd.f32 %v524_v34, %v523_v27  ;;  %v591_v34 = vsel %vm348_vm0, %v6427_v7, 0.0  ;;  %v673_v13 = vsel %vm348_vm0, %v6479_v38, 0.0  ;;  %v6685_v7 = vld [vmem:[%s14621_s0 + $0x640] sm:$0xff] }
  0x55   :  { %15189 = vst [vmem:[#allocation38_spill] sm:$0xff] %v6685_v7 }
  0x56   :  { %2662 = vperm.xlu1 %5454, %v5310_v39   ;;  %2154 = vperm.xlu0 %5453, %v5279_v45   ;;  %v587_v39 = vsel %vm348_vm0, %v6329_v21, 0.0  ;;  %v641_v45 = vadd.f32 %v640_v40, %v639_v28  ;;  %v527_v14 = vadd.f32 %v526_v54, %v525_v52  ;;  %v6489_v40 = vld [vmem:[%s14621_s0 + $0x658] sm:$0xff]  ;;  %v671_v54 = vsel %vm348_vm0, %v6453_v19, 0.0  ;;  %v6897_v21 = vld [vmem:[%s14621_s0 + $0x340] sm:$0x1] }
  0x57   :  { %v588_v61 = vadd.f32 %v587_v39, %v586_v35  ;;  %v6484_v39 = vld [vmem:[%s14621_s0 + $0x638] sm:$0xff]  ;;  %15164 = vst [vmem:[#allocation13_spill] sm:$0xff] %v6489_v40  ;;  %v406_v9 = vsel %vm348_vm0, %v6489_v40, 0.0  ;;  %v6628_v40 = vld [vmem:[%s14621_s0 + $0x6a0] sm:$0xff]  ;;  %15218 = vst [vmem:[#allocation67_spill] sm:$0xff] %v6897_v21 }
  0x58   :  { %15163 = vst [vmem:[#allocation12_spill] sm:$0xff] %v6484_v39  ;;  %v529_v52 = vadd.f32 %v528_v26, %v527_v14  ;;  %v6539_v14 = vld [vmem:[%s14621_s0 + $0x30] sm:$0x1]  ;;  %15182 = vst [vmem:[#allocation31_spill] sm:$0xff] %v6628_v40 }
  0x59   :  { %v590_v27 = vadd.f32 %v589_v4, %v588_v61  ;;  %v6518_v61 = vld [vmem:[%s14621_s0 + $0x668] sm:$0xff]  ;;  %v5283_v4 = vld [vmem:[%s14620_s1 + $0x13] ss:$0 sm:$0xff]  ;;  %15170 = vst [vmem:[#allocation19_spill] sm:$0xff] %v6539_v14 }
  0x5a   :  { %2158 = vperm.xlu1 %5454, %v5280_v56   ;;  %3170 = vperm.xlu0 %5453, %v5341_v62   ;;  %v6393_v56 = vld [vmem:[%s14621_s0 + $0x60] sm:$0xff]  ;;  %v643_v62 = vadd.f32 %v642_v55, %v641_v45  ;;  %v5314_v45 = vld [vmem:[%s14620_s1 + $0x32] ss:$0 sm:$0xff]  ;;  %v6508_v55 = vld [vmem:[%s14621_s0 + $0x178] sm:$0xff]  ;;  %15168 = vst [vmem:[#allocation17_spill] sm:$0xff] %v6518_v61 }
  0x5b   :  { %v665_v15 = vsel %vm348_vm0, %v6393_v56, 0.0  ;;  %15166 = vst [vmem:[#allocation15_spill] sm:$0xff] %v6508_v55 }
  0x5c   :  { %v666_v28 = vadd.f32 %v665_v15, %v664_v5  ;;  %v6528_v5 = vld [vmem:[%s14621_s0 + $0x670] sm:$0xff]  ;;  %v6544_v15 = vld [vmem:[%s14621_s0 + $0x68] sm:$0x1] }
  0x5d   :  { %15169 = vst [vmem:[#allocation18_spill] sm:$0xff] %v6528_v5  ;;  %15171 = vst [vmem:[#allocation20_spill] sm:$0xff] %v6544_v15 }
  0x5e   :  { %3174 = vperm.xlu1 %5454, %v5342_v10   ;;  %2666 = vperm.xlu0 %5453, %v5311_v16   ;;  %v645_v10 = vadd.f32 %v644_v0, %v643_v62  ;;  %v667_v16 = vsel %vm348_vm0, %v6398_v58, 0.0  ;;  %v530_v0 = vsel %vm348_vm0, %v6468_v31, 0.0  ;;  %v6642_v31 = vld [vmem:[%s14621_s0 + $0x258] sm:$0xff] }
  0x5f   :  { %v668_v44 = vadd.f32 %v667_v16, %v666_v28  ;;  %v6549_v16 = vld [vmem:[%s14621_s0 + $0x1b0] sm:$0xff]  ;;  %v6559_v28 = vld [vmem:[%s14621_s0 + $0xa0] sm:$0x1]  ;;  %15184 = vst [vmem:[#allocation33_spill] sm:$0xff] %v6642_v31 }
  0x60   :  { %v647_v35 = vadd.f32 %v646_v11, %v645_v10  ;;  %v593_v10 = vsel %vm348_vm0, %v6484_v39, 0.0  ;;  %15172 = vst [vmem:[#allocation21_spill] sm:$0xff] %v6549_v16  ;;  %15173 = vst [vmem:[#allocation22_spill] sm:$0xff] %v6559_v28 }
  0x62   :  { %2670 = vperm.xlu1 %5454, %v5312_v25   ;;  %2162 = vperm.xlu0 %5453, %v5281_v36   ;;  %v403_v25 = vadd.f32 %v402_v3, %v401_v60  ;;  %v669_v36 = vsel %vm348_vm0, %v6422_v6, 0.0  ;;  %v6513_v60 = vld [vmem:[%s14621_s0 + $0x660] sm:$0xff]  ;;  %v649_v11 = vadd.f32 %v648_v43, %v647_v35  ;;  %v532_v35 = vsel %vm348_vm0, %v6518_v61, 0.0  ;;  %v6578_v43 = vld [vmem:[%s14621_s0 + $0xd8] sm:$0x1] }
  0x63   :  { %15167 = vst [vmem:[#allocation16_spill] sm:$0xff] %v6513_v60  ;;  %v670_v3 = vadd.f32 %v669_v36, %v668_v44  ;;  %v675_v36 = vsel %vm348_vm0, %v6508_v55, 0.0  ;;  %15175 = vst [vmem:[#allocation24_spill] sm:$0xff] %v6578_v43  ;;  %v6583_v44 = vld [vmem:[%s14621_s0 + $0x1e8] sm:$0xff]  ;;  %v677_v61 = vsel %vm348_vm0, %v6549_v16, 0.0 }
  0x64   :  { %v405_v62 = vadd.f32 %v404_v33, %v403_v25  ;;  %v469_v33 = vsel %vm348_vm0, %v6513_v60, 0.0  ;;  %15176 = vst [vmem:[#allocation25_spill] sm:$0xff] %v6583_v44  ;;  %v6623_v60 = vld [vmem:[%s14621_s0 + $0x608] sm:$0xff] }
  0x65   :  { %v672_v26 = vadd.f32 %v671_v54, %v670_v3  ;;  %v6595_v3 = vld [vmem:[%s14621_s0 + $0x698] sm:$0xff]  ;;  %15181 = vst [vmem:[#allocation30_spill] sm:$0xff] %v6623_v60 }
  0x66   :  { %2166 = vperm.xlu1 %5454, %v5282_v47   ;;  %3178 = vperm.xlu0 %5453, %v5343_v1   ;;  %v6499_v47 = vld [vmem:[%s14621_s0 + $0x598] sm:$0xff]  ;;  %v592_v1 = vadd.f32 %v591_v34, %v590_v27  ;;  %v5284_v27 = vld [vmem:[%s14620_s1 + $0x14] ss:$0 sm:$0xff]  ;;  %v531_v34 = vadd.f32 %v530_v0, %v529_v52  ;;  %15178 = vst [vmem:[#allocation27_spill] sm:$0xff] %v6595_v3 }
  0x67   :  { %15165 = vst [vmem:[#allocation14_spill] sm:$0xff] %v6499_v47  ;;  %v650_v25 = vsel %vm348_vm0, %v6499_v47, 0.0  ;;  %v674_v54 = vadd.f32 %v673_v13, %v672_v26  ;;  %v6590_v0 = vld [vmem:[%s14621_s0 + $0x690] sm:$0xff]  ;;  %v731_v26 = vsel %vm727_vm1, %v6559_v28, 0.0 }
  0x68   :  { %v594_v52 = vadd.f32 %v593_v10, %v592_v1  ;;  %15177 = vst [vmem:[#allocation26_spill] sm:$0xff] %v6590_v0  ;;  %v729_v1 = vsel %vm727_vm1, %v6544_v15, 0.0  ;;  %v6611_v10 = vld [vmem:[%s14621_s0 + $0x220] sm:$0xff]  ;;  %v6825_v28 = vld [vmem:[%s14621_s0 + $0x450] sm:$0xff] }
  0x69   :  { %15180 = vst [vmem:[#allocation29_spill] sm:$0xff] %v6611_v10  ;;  %v676_v13 = vadd.f32 %v675_v36, %v674_v54  ;;  %v533_v36 = vadd.f32 %v532_v35, %v531_v34  ;;  %v679_v54 = vsel %vm348_vm0, %v6583_v44, 0.0  ;;  %15208 = vst [vmem:[#allocation57_spill] sm:$0xff] %v6825_v28 }
  0x6a   :  { %3182 = vperm.xlu1 %5454, %v5344_v18   ;;  %2674 = vperm.xlu0 %5453, %v5313_v30   ;;  %v468_v18 = vadd.f32 %v467_v49, %v466_v42  ;;  %v6564_v30 = vld [vmem:[%s14621_s0 + $0x5d0] sm:$0xff]  ;;  %v407_v49 = vadd.f32 %v406_v9, %v405_v62  ;;  %v728_v62 = vsel %vm727_vm1, %v6539_v14, 0.0 }
  0x6b   :  { %15174 = vst [vmem:[#allocation23_spill] sm:$0xff] %v6564_v30  ;;  %v5345_v42 = vld [vmem:[%s14620_s1 + $0x51] ss:$0 sm:$0xff]  ;;  %v6606_v9 = vld [vmem:[%s14621_s0 + $0x110] sm:$0x1]  ;;  %v678_v34 = vadd.f32 %v677_v61, %v676_v13  ;;  %v681_v61 = vsel %vm348_vm0, %v6611_v10, 0.0 }
  0x6c   :  { %15179 = vst [vmem:[#allocation28_spill] sm:$0xff] %v6606_v9  ;;  %v470_v39 = vadd.f32 %v469_v33, %v468_v18  ;;  %v408_v18 = vsel %vm348_vm0, %v6590_v0, 0.0  ;;  %v471_v33 = vsel %vm348_vm0, %v6595_v3, 0.0  ;;  %v735_v13 = vsel %vm727_vm1, %v6606_v9, 0.0  ;;  %v5316_v3 = vld [vmem:[%s14620_s1 + $0x34] ss:$0 sm:$0xff] }
  0x6e   :  { %2678 = vperm.xlu1 %5454, %v5314_v45   ;;  %2170 = vperm.xlu0 %5453, %v5283_v4   ;;  %v595_v45 = vsel %vm348_vm0, %v6528_v5, 0.0  ;;  %v651_v4 = vadd.f32 %v650_v25, %v649_v11  ;;  %v652_v11 = vsel %vm348_vm0, %v6564_v30, 0.0  ;;  %v730_v25 = vadd.f32 %v729_v1, %v728_v62  ;;  %v5346_v5 = vld [vmem:[%s14620_s1 + $0x52] ss:$0 sm:$0xff]  ;;  %v6637_v1 = vld [vmem:[%s14621_s0 + $0x148] sm:$0x1] }
  0x6f   :  { %v733_v62 = vsel %vm727_vm1, %v6578_v43, 0.0  ;;  %15183 = vst [vmem:[#allocation32_spill] sm:$0xff] %v6637_v1  ;;  %v596_v0 = vadd.f32 %v595_v45, %v594_v52  ;;  %v534_v52 = vsel %vm348_vm0, %v6628_v40, 0.0  ;;  %v654_v45 = vsel %vm348_vm0, %v6623_v60, 0.0  ;;  %v6721_v60 = vld [vmem:[%s14621_s0 + $0x6e0] sm:$0xff]  ;;  %v6820_v43 = vld [vmem:[%s14621_s0 + $0x418] sm:$0xff] }
  0x70   :  { %v732_v35 = vadd.f32 %v731_v26, %v730_v25  ;;  %v653_v8 = vadd.f32 %v652_v11, %v651_v4  ;;  %v6668_v25 = vld [vmem:[%s14621_s0 + $0x180] sm:$0x1]  ;;  %v6673_v26 = vld [vmem:[%s14621_s0 + $0x290] sm:$0xff]  ;;  %v680_v4 = vadd.f32 %v679_v54, %v678_v34  ;;  %v409_v40 = vadd.f32 %v408_v18, %v407_v49  ;;  %v6699_v34 = vld [vmem:[%s14621_s0 + $0x1b8] sm:$0x1]  ;;  %15194 = vst [vmem:[#allocation43_spill] sm:$0xff] %v6721_v60 }
  0x71   :  { %15187 = vst [vmem:[#allocation36_spill] sm:$0xff] %v6668_v25  ;;  %15188 = vst [vmem:[#allocation37_spill] sm:$0xff] %v6673_v26  ;;  %v472_v59 = vadd.f32 %v471_v33, %v470_v39  ;;  %v683_v54 = vsel %vm348_vm0, %v6642_v31, 0.0  ;;  %v6709_v39 = vld [vmem:[%s14621_s0 + $0x6d8] sm:$0xff]  ;;  %v410_v49 = vsel %vm348_vm0, %v6659_v24, 0.0  ;;  %v535_v30 = vadd.f32 %v534_v52, %v533_v36 }
  0x72   :  { %2174 = vperm.xlu1 %5454, %v5284_v27   ;;  %3186 = vperm.xlu0 %5453, %v5345_v42   ;;  %v5315_v27 = vld [vmem:[%s14620_s1 + $0x33] ss:$0 sm:$0xff]  ;;  %v6654_v42 = vld [vmem:[%s14621_s0 + $0x6a8] sm:$0xff]  ;;  %v734_v11 = vadd.f32 %v733_v62, %v732_v35  ;;  %v737_v62 = vsel %vm727_vm1, %v6637_v1, 0.0  ;;  %15191 = vst [vmem:[#allocation40_spill] sm:$0xff] %v6699_v34  ;;  %15193 = vst [vmem:[#allocation42_spill] sm:$0xff] %v6709_v39  ;;  %v682_v18 = vadd.f32 %v681_v61, %v680_v4 }
  0x73   :  { %15185 = vst [vmem:[#allocation34_spill] sm:$0xff] %v6654_v42  ;;  %v6704_v35 = vld [vmem:[%s14621_s0 + $0x2c8] sm:$0xff]  ;;  %v655_v1 = vadd.f32 %v654_v45, %v653_v8  ;;  %v685_v9 = vsel %vm348_vm0, %v6673_v26, 0.0  ;;  %v739_v24 = vsel %vm727_vm1, %v6668_v25, 0.0  ;;  %v6730_v61 = vld [vmem:[%s14621_s0 + $0x1f0] sm:$0x1] }
  0x74   :  { %15192 = vst [vmem:[#allocation41_spill] sm:$0xff] %v6704_v35  ;;  %v736_v33 = vadd.f32 %v735_v13, %v734_v11  ;;  %15195 = vst [vmem:[#allocation44_spill] sm:$0xff] %v6730_v61  ;;  %v6735_v13 = vld [vmem:[%s14621_s0 + $0x300] sm:$0xff]  ;;  %v473_v36 = vsel %vm348_vm0, %v6690_v2, 0.0  ;;  %v656_v8 = vsel %vm348_vm0, %v6685_v7, 0.0  ;;  %v684_v52 = vadd.f32 %v683_v54, %v682_v18 }
  0x75   :  { %15196 = vst [vmem:[#allocation45_spill] sm:$0xff] %v6735_v13  ;;  %v5286_v4 = vld [vmem:[%s14620_s1 + $0x16] ss:$0 sm:$0xff]  ;;  %v5347_v11 = vld [vmem:[%s14620_s1 + $0x53] ss:$0 sm:$0xff]  ;;  %v536_v2 = vsel %vm348_vm0, %v6709_v39, 0.0 }
  0x76   :  { %3190 = vperm.xlu1 %5454, %v5346_v5   ;;  %2682 = vperm.xlu0 %5453, %v5315_v27   ;;  %v597_v5 = vsel %vm348_vm0, %v6654_v42, 0.0  ;;  %v5285_v27 = vld [vmem:[%s14620_s1 + $0x15] ss:$0 sm:$0xff]  ;;  %v738_v45 = vadd.f32 %v737_v62, %v736_v33  ;;  %v6750_v42 = vld [vmem:[%s14621_s0 + $0x678] sm:$0xff]  ;;  %v687_v54 = vsel %vm348_vm0, %v6704_v35, 0.0  ;;  %v741_v62 = vsel %vm727_vm1, %v6699_v34, 0.0 }
  0x77   :  { %15197 = vst [vmem:[#allocation46_spill] sm:$0xff] %v6750_v42  ;;  %v598_v25 = vadd.f32 %v597_v5, %v596_v0  ;;  %v6761_v18 = vld [vmem:[%s14621_s0 + $0x228] sm:$0x1]  ;;  %v6766_v33 = vld [vmem:[%s14621_s0 + $0x338] sm:$0xff]  ;;  %v6771_v0 = vld [vmem:[%s14621_s0 + $0x6b0] sm:$0xff]  ;;  %v6773_v5 = vadd.f32 %v410_v49, %v409_v40  ;;  %v6792_v49 = vadd.f32 %v473_v36, %v472_v59  ;;  %v658_v36 = vsel %vm348_vm0, %v6750_v42, 0.0 }
  0x78   :  { %15198 = vst [vmem:[#allocation47_spill] sm:$0xff] %v6761_v18  ;;  %15199 = vst [vmem:[#allocation48_spill] sm:$0xff] %v6766_v33  ;;  %v740_v39 = vadd.f32 %v739_v24, %v738_v45  ;;  %v6780_v7 = vld [vmem:[%s14621_s0 + $0x260] sm:$0x1]  ;;  %v6785_v34 = vld [vmem:[%s14621_s0 + $0x370] sm:$0xff]  ;;  %v689_v24 = vsel %vm348_vm0, %v6735_v13, 0.0 }
  0x79   :  { %15200 = vst [vmem:[#allocation49_spill] sm:$0xff] %v6771_v0  ;;  %15201 = vst [vmem:[#allocation50_spill] sm:$0xff] %v6780_v7  ;;  %v6790_v40 = vld [vmem:[%s14621_s0 + $0x6e8] sm:$0xff]  ;;  %v6811_v59 = vld [vmem:[%s14621_s0 + $0x3e0] sm:$0xff] }
  0x7a   :  { %2686 = vperm.xlu1 %5454, %v5316_v3   ;;  %2178 = vperm.xlu0 %5453, %v5285_v27   ;;  %v599_v3 = vsel %vm348_vm0, %v6721_v60, 0.0  ;;  %v686_v27 = vadd.f32 %v685_v9, %v684_v52  ;;  %15202 = vst [vmem:[#allocation51_spill] sm:$0xff] %v6785_v34  ;;  %15203 = vst [vmem:[#allocation52_spill] sm:$0xff] %v6790_v40  ;;  %v657_v60 = vadd.f32 %v656_v8, %v655_v1  ;;  %v6801_v52 = vld [vmem:[%s14621_s0 + $0x298] sm:$0x1]  ;;  %v6806_v45 = vld [vmem:[%s14621_s0 + $0x3a8] sm:$0xff] }
  0x7b   :  { %v743_v9 = vsel %vm727_vm1, %v6730_v61, 0.0  ;;  %15204 = vst [vmem:[#allocation53_spill] sm:$0xff] %v6801_v52  ;;  %15205 = vst [vmem:[#allocation54_spill] sm:$0xff] %v6806_v45  ;;  %v6813_v1 = vadd.f32 %v536_v2, %v535_v30  ;;  %v742_v61 = vadd.f32 %v741_v62, %v740_v39  ;;  %v6827_v23 = vadd.f32 %v599_v3, %v598_v25  ;;  %v6843_v25 = vld [vmem:[%s14621_s0 + $0x488] sm:$0xff]  ;;  %v6848_v62 = vld [vmem:[%s14621_s0 + $0x4c0] sm:$0xff] }
  0x7c   :  { %15206 = vst [vmem:[#allocation55_spill] sm:$0xff] %v6811_v59  ;;  %v688_v8 = vadd.f32 %v687_v54, %v686_v27  ;;  %15207 = vst [vmem:[#allocation56_spill] sm:$0xff] %v6820_v43  ;;  %v660_v2 = vsel %vm348_vm0, %v6771_v0, 0.0  ;;  %v691_v30 = vsel %vm348_vm0, %v6766_v33, 0.0  ;;  %v745_v39 = vsel %vm727_vm1, %v6761_v18, 0.0  ;;  %v6862_v42 = vld [vmem:[%s14621_s0 + $0x530] sm:$0xff] }
  0x7d   :  { %v6838_v54 = vld [vmem:[%s14621_s0 + $0x2d0] sm:$0x1]  ;;  %15210 = vst [vmem:[#allocation59_spill] sm:$0xff] %v6843_v25  ;;  %15211 = vst [vmem:[#allocation60_spill] sm:$0xff] %v6848_v62  ;;  %v693_v27 = vsel %vm348_vm0, %v6785_v34, 0.0  ;;  %v744_v0 = vadd.f32 %v743_v9, %v742_v61  ;;  %v6867_v18 = vld [vmem:[%s14621_s0 + $0x568] sm:$0xff]  ;;  %v659_v15 = vadd.f32 %v658_v36, %v657_v60 }
  0x7e   :  { %2182 = vperm.xlu1 %5454, %v5286_v4   ;;  %3194 = vperm.xlu0 %5453, %v5347_v11   ;;  %15209 = vst [vmem:[#allocation58_spill] sm:$0xff] %v6838_v54  ;;  %v6853_v4 = vld [vmem:[%s14621_s0 + $0x4f8] sm:$0xff]  ;;  %v662_v11 = vsel %vm348_vm0, %v6790_v40, 0.0  ;;  %v690_v3 = vadd.f32 %v689_v24, %v688_v8  ;;  %15213 = vst [vmem:[#allocation62_spill] sm:$0xff] %v6862_v42  ;;  %v695_v14 = vsel %vm348_vm0, %v6806_v45, 0.0  ;;  %v697_v24 = vsel %vm348_vm0, %v6811_v59, 0.0 }
  0x7f   :  { %15212 = vst [vmem:[#allocation61_spill] sm:$0xff] %v6853_v4  ;;  %15214 = vst [vmem:[#allocation63_spill] sm:$0xff] %v6867_v18  ;;  %v747_v61 = vsel %vm727_vm1, %v6780_v7, 0.0  ;;  %v6878_v9 = vld [vmem:[%s14621_s0 + $0x308] sm:$0x1]  ;;  %v6883_v8 = vld [vmem:[%s14621_s0 + $0x5a0] sm:$0xff]  ;;  %v746_v47 = vadd.f32 %v745_v39, %v744_v0 }
  0x80   :  { %15215 = vst [vmem:[#allocation64_spill] sm:$0xff] %v6878_v9  ;;  %15216 = vst [vmem:[#allocation65_spill] sm:$0xff] %v6883_v8  ;;  %v6888_v60 = vld [vmem:[%s14621_s0 + $0x5d8] sm:$0xff]  ;;  %v692_v36 = vadd.f32 %v691_v30, %v690_v3  ;;  %v699_v40 = vsel %vm348_vm0, %v6820_v43, 0.0  ;;  %v701_v7 = vsel %vm348_vm0, %v6825_v28, 0.0  ;;  %v6907_v30 = vld [vmem:[%s14621_s0 + $0x610] sm:$0xff] }
  0x81   :  { %15217 = vst [vmem:[#allocation66_spill] sm:$0xff] %v6888_v60  ;;  %15220 = vst [vmem:[#allocation69_spill] sm:$0xff] %v6907_v30  ;;  %v6912_v3 = vld [vmem:[%s14621_s0 + $0x648] sm:$0xff]  ;;  %v6916_v0 = vsel %vm348_vm0, %v6843_v25, 0.0  ;;  %v6920_v39 = vsel %vm348_vm0, %v6848_v62, 0.0  ;;  %v6924_v12 = vsel %vm348_vm0, %v6853_v4, 0.0  ;;  %v748_v13 = vadd.f32 %v747_v61, %v746_v47 }
  0x82   :  { %15221 = vst [vmem:[#allocation70_spill] sm:$0xff] %v6912_v3  ;;  %v749_v28 = vsel %vm727_vm1, %v6801_v52, 0.0  ;;  %v6931_v43 = vld [vmem:[%s14621_s0 + $0x3b0] sm:$0x1]  ;;  %v6936_v25 = vld [vmem:[%s14621_s0 + $0x3e8] sm:$0x1]  ;;  %v694_v45 = vadd.f32 %v693_v27, %v692_v36  ;;  %v661_v27 = vadd.f32 %v660_v2, %v659_v15 }
  0x83   :  { %15222 = vst [vmem:[#allocation71_spill] sm:$0xff] %v6931_v43  ;;  %15223 = vst [vmem:[#allocation72_spill] sm:$0xff] %v6936_v25  ;;  %v6941_v62 = vld [vmem:[%s14621_s0 + $0x420] sm:$0x1]  ;;  %v6951_v52 = vld [vmem:[%s14621_s0 + $0x6b8] sm:$0xff]  ;;  %v6960_v34 = vsel %vm348_vm0, %v6862_v42, 0.0 }
  0x84   :  { %15224 = vst [vmem:[#allocation73_spill] sm:$0xff] %v6941_v62  ;;  %v6946_v4 = vld [vmem:[%s14621_s0 + $0x680] sm:$0xff]  ;;  %15226 = vst [vmem:[#allocation75_spill] sm:$0xff] %v6951_v52  ;;  %v6956_v59 = vld [vmem:[%s14621_s0 + $0x6f0] sm:$0xff]  ;;  %v6964_v33 = vsel %vm348_vm0, %v6867_v18, 0.0  ;;  %v6978_v36 = vsel %vm348_vm0, %v6883_v8, 0.0  ;;  %v696_v2 = vadd.f32 %v695_v14, %v694_v45  ;;  %v663_v10 = vadd.f32 %v662_v11, %v661_v27 }
  0x85   :  { %15225 = vst [vmem:[#allocation74_spill] sm:$0xff] %v6946_v4  ;;  %15227 = vst [vmem:[#allocation76_spill] sm:$0xff] %v6956_v59  ;;  %v6969_v35 = vld [vmem:[%s14621_s0 + $0x458] sm:$0x1]  ;;  %v6974_v26 = vld [vmem:[%s14621_s0 + $0x490] sm:$0x1] }
  0x86   :  { %15228 = vst [vmem:[#allocation77_spill] sm:$0xff] %v6969_v35  ;;  %15229 = vst [vmem:[#allocation78_spill] sm:$0xff] %v6974_v26  ;;  %v6982_v18 = vsel %vm348_vm0, %v6888_v60, 0.0  ;;  %v751_v47 = vsel %vm727_vm1, %v6838_v54, 0.0  ;;  %v6989_v61 = vld [vmem:[%s14621_s0 + $0x4c8] sm:$0x1]  ;;  %v750_v54 = vadd.f32 %v749_v28, %v748_v13 }
  0x87   :  { %15230 = vst [vmem:[#allocation79_spill] sm:$0xff] %v6989_v61  ;;  %v6994_v15 = vld [vmem:[%s14621_s0 + $0x500] sm:$0x1]  ;;  %v6998_v8 = vsel %vm348_vm0, %v6907_v30, 0.0  ;;  %v7002_v60 = vsel %vm348_vm0, %v6912_v3, 0.0  ;;  %v7011_v31 = vsel %vm348_vm0, %v6946_v4, 0.0  ;;  %v698_v3 = vadd.f32 %v697_v24, %v696_v2 }
  0x88   :  { %15231 = vst [vmem:[#allocation80_spill] sm:$0xff] %v6994_v15  ;;  %v7007_v42 = vld [vmem:[%s14621_s0 + $0x538] sm:$0x1]  ;;  %v7015_v14 = vsel %vm348_vm0, %v6951_v52, 0.0  ;;  %v7019_v45 = vsel %vm348_vm0, %v6956_v59, 0.0  ;;  %v753_v28 = vsel %vm727_vm1, %v6878_v9, 0.0  ;;  %v752_v52 = vadd.f32 %v751_v47, %v750_v54 }
  0x89   :  { %15232 = vst [vmem:[#allocation81_spill] sm:$0xff] %v7007_v42  ;;  %v7026_v13 = vld [vmem:[%s14621_s0 + $0x570] sm:$0x1]  ;;  %v7031_v4 = vld [vmem:[%s14621_s0 + $0x5a8] sm:$0x1]  ;;  %v755_v30 = vsel %vm727_vm1, %v6897_v21, 0.0  ;;  %v700_v11 = vadd.f32 %v699_v40, %v698_v3 }
  0x8a   :  { %15233 = vst [vmem:[#allocation82_spill] sm:$0xff] %v7026_v13  ;;  %v757_v59 = vsel %vm727_vm1, %v6902_v17, 0.0  ;;  %v7040_v9 = vld [vmem:[%s14621_s0 + $0x5e0] sm:$0x1]  ;;  %v759_v44 = vsel %vm727_vm1, %v6931_v43, 0.0  ;;  %v761_v16 = vsel %vm727_vm1, %v6936_v25, 0.0  ;;  %v754_v27 = vadd.f32 %v753_v28, %v752_v52 }
  0x8b   :  { %v763_v54 = vsel %vm727_vm1, %v6941_v62, 0.0  ;;  %v7051_v24 = vld [vmem:[%s14621_s0 + $0x618] sm:$0x1]  ;;  %v7056_v47 = vld [vmem:[%s14621_s0 + $0x650] sm:$0x1]  ;;  %v7060_v2 = vsel %vm727_vm1, %v6969_v35, 0.0 }
  0x8c   :  { %v7064_v25 = vsel %vm727_vm1, %v6974_v26, 0.0  ;;  %v7069_v62 = vld [vmem:[%s14621_s0 + $0x688] sm:$0x1]  ;;  %v7073_v43 = vsel %vm727_vm1, %v6989_v61, 0.0  ;;  %v7077_v40 = vsel %vm727_vm1, %v6994_v15, 0.0  ;;  %v7081_v52 = vsel %vm727_vm1, %v7007_v42, 0.0 }
  0x8d   :  { %v7085_v3 = vsel %vm727_vm1, %v7026_v13, 0.0  ;;  %v7090_v28 = vld [vmem:[%s14621_s0 + $0x6c0] sm:$0x1]  ;;  %v7095_v61 = vld [vmem:[%s14621_s0 + $0x6f8] sm:$0x1]  ;;  %v702_v15 = vadd.f32 %v701_v7, %v700_v11  ;;  %v756_v26 = vadd.f32 %v755_v30, %v754_v27  ;;  %v7098_v35 = vmul.f32 0.03125, %v6773_v5 }
  0x8e   :  { %15234 = vst [vmem:[#allocation83_spill] sm:$0xff] %v7090_v28  ;;  %15235 = vst [vmem:[#allocation84_spill] sm:$0xff] %v7095_v61  ;;  %v7101_v42 = vmul.f32 0.03125, %v6792_v49  ;;  %v7105_v13 = vsel %vm727_vm1, %v7031_v4, 0.0  ;;  %v7108_v17 = vmul.f32 0.03125, %v6813_v1  ;;  %v7111_v21 = vmul.f32 0.03125, %v6827_v23 }
  0x8f   :  { %v7113_v55 = vmul.f32 0.03125, %v663_v10  ;;  %v704_v7 = vadd.f32 %v6916_v0, %v702_v15  ;;  %v758_v30 = vadd.f32 %v757_v59, %v756_v26  ;;  %v7118_v5 = vsel %vm727_vm1, %v7040_v9, 0.0  ;;  %v5499_v15 = vld [vmem:[%s14621_s0] sm:$0xff]  ;;  %v5500_v27 = vld [vmem:[%s14621_s0 + $0x8] sm:$0xff] }
  0x90   :  { %v7122_v49 = vsel %vm727_vm1, %v7051_v24, 0.0  ;;  %v7126_v1 = vsel %vm727_vm1, %v7056_v47, 0.0  ;;  %v7130_v23 = vsel %vm727_vm1, %v7069_v62, 0.0  ;;  %v7134_v10 = vsel %vm727_vm1, %v7090_v28, 0.0 }
  0x91   :  { %v7138_v26 = vsel %vm727_vm1, %v7095_v61, 0.0  ;;  %v706_v59 = vadd.f32 %v6920_v39, %v704_v7  ;;  %v760_v0 = vadd.f32 %v759_v44, %v758_v30  ;;  %v7145_v11 = vsub.f32 %v5499_v15, %v7098_v35  ;;  %v5501_v61 = vld [vmem:[%s14621_s0 + $0x10] sm:$0xff]  ;;  %v5502_v39 = vld [vmem:[%s14621_s0 + $0x18] sm:$0xff]  ;;  %v5503_v30 = vld [vmem:[%s14621_s0 + $0x20] sm:$0xff] }
  0x92   :  { %v7151_v28 = vsub.f32 %v5500_v27, %v7101_v42  ;;  %v7157_v44 = vsub.f32 %v5501_v61, %v7108_v17  ;;  %v7163_v7 = vsub.f32 %v5502_v39, %v7111_v21  ;;  %v7169_v15 = vsub.f32 %v5503_v30, %v7113_v55  ;;  %v5504_v27 = vld [vmem:[%s14621_s0 + $0x38] sm:$0xff]  ;;  %v5505_v39 = vld [vmem:[%s14621_s0 + $0x40] sm:$0xff]  ;;  %v5506_v30 = vld [vmem:[%s14621_s0 + $0x48] sm:$0xff] }
  0x93   :  { %15236 = vst [vmem:[#allocation85_spill] sm:$0xff] %v7145_v11  ;;  %v7175_v61 = vsub.f32 %v5504_v27, %v7098_v35  ;;  %v5507_v27 = vld [vmem:[%s14621_s0 + $0x50] sm:$0xff] }
  0x94   :  { %15237 = vst [vmem:[#allocation86_spill] sm:$0xff] %v7151_v28  ;;  %15238 = vst [vmem:[#allocation87_spill] sm:$0xff] %v7157_v44  ;;  %v708_v44 = vadd.f32 %v6924_v12, %v706_v59  ;;  %v762_v28 = vadd.f32 %v761_v16, %v760_v0  ;;  %v7194_v12 = vsub.f32 %v5507_v27, %v7111_v21  ;;  %v5508_v16 = vld [vmem:[%s14621_s0 + $0x58] sm:$0xff]  ;;  %v5509_v0 = vld [vmem:[%s14621_s0 + $0x70] sm:$0xff] }
  0x95   :  { %15239 = vst [vmem:[#allocation88_spill] sm:$0xff] %v7163_v7  ;;  %15240 = vst [vmem:[#allocation89_spill] sm:$0xff] %v7169_v15  ;;  %v7182_v7 = vsub.f32 %v5505_v39, %v7101_v42  ;;  %v7188_v15 = vsub.f32 %v5506_v30, %v7108_v17  ;;  %v7200_v59 = vsub.f32 %v5508_v16, %v7113_v55  ;;  %v5510_v30 = vld [vmem:[%s14621_s0 + $0x78] sm:$0xff]  ;;  %v5511_v16 = vld [vmem:[%s14621_s0 + $0x80] sm:$0xff] }
  0x96   :  { %15241 = vst [vmem:[#allocation90_spill] sm:$0xff] %v7175_v61  ;;  %15244 = vst [vmem:[#allocation93_spill] sm:$0xff] %v7194_v12  ;;  %v7206_v39 = vsub.f32 %v5509_v0, %v7098_v35  ;;  %v7212_v27 = vsub.f32 %v5510_v30, %v7101_v42  ;;  %v710_v12 = vadd.f32 %v6960_v34, %v708_v44  ;;  %v5512_v0 = vld [vmem:[%s14621_s0 + $0x88] sm:$0xff]  ;;  %v5513_v30 = vld [vmem:[%s14621_s0 + $0x90] sm:$0xff] }
  0x97   :  { %15242 = vst [vmem:[#allocation91_spill] sm:$0xff] %v7182_v7  ;;  %15243 = vst [vmem:[#allocation92_spill] sm:$0xff] %v7188_v15  ;;  %v764_v15 = vadd.f32 %v763_v54, %v762_v28  ;;  %v7231_v34 = vsub.f32 %v5513_v30, %v7113_v55  ;;  %v5514_v54 = vld [vmem:[%s14621_s0 + $0xa8] sm:$0xff]  ;;  %v5515_v44 = vld [vmem:[%s14621_s0 + $0xb0] sm:$0xff] }
  0x98   :  { %15245 = vst [vmem:[#allocation94_spill] sm:$0xff] %v7200_v59  ;;  %15246 = vst [vmem:[#allocation95_spill] sm:$0xff] %v7206_v39  ;;  %v7219_v59 = vsub.f32 %v5511_v16, %v7108_v17  ;;  %v7225_v39 = vsub.f32 %v5512_v0, %v7111_v21  ;;  %v7237_v28 = vsub.f32 %v5514_v54, %v7098_v35  ;;  %v5516_v0 = vld [vmem:[%s14621_s0 + $0xb8] sm:$0xff]  ;;  %v5517_v54 = vld [vmem:[%s14621_s0 + $0xc0] sm:$0xff] }
  0x99   :  { %15247 = vst [vmem:[#allocation96_spill] sm:$0xff] %v7212_v27  ;;  %15250 = vst [vmem:[#allocation99_spill] sm:$0xff] %v7231_v34  ;;  %v7243_v16 = vsub.f32 %v5515_v44, %v7101_v42  ;;  %v7249_v30 = vsub.f32 %v5516_v0, %v7108_v17  ;;  %v712_v34 = vadd.f32 %v6964_v33, %v710_v12  ;;  %v5518_v44 = vld [vmem:[%s14621_s0 + $0xc8] sm:$0xff]  ;;  %v5519_v33 = vld [vmem:[%s14621_s0 + $0xe0] sm:$0xff] }
  0x9a   :  { %15248 = vst [vmem:[#allocation97_spill] sm:$0xff] %v7219_v59  ;;  %15249 = vst [vmem:[#allocation98_spill] sm:$0xff] %v7225_v39  ;;  %v766_v39 = vadd.f32 %v7060_v2, %v764_v15  ;;  %v7269_v2 = vsub.f32 %v5519_v33, %v7098_v35  ;;  %v5520_v15 = vld [vmem:[%s14621_s0 + $0xe8] sm:$0xff]  ;;  %v5521_v0 = vld [vmem:[%s14621_s0 + $0xf0] sm:$0xff] }
  0x9b   :  { %15251 = vst [vmem:[#allocation100_spill] sm:$0xff] %v7237_v28  ;;  %15252 = vst [vmem:[#allocation101_spill] sm:$0xff] %v7243_v16  ;;  %v7257_v28 = vsub.f32 %v5517_v54, %v7111_v21  ;;  %v7263_v16 = vsub.f32 %v5518_v44, %v7113_v55  ;;  %v7275_v12 = vsub.f32 %v5520_v15, %v7101_v42  ;;  %v5522_v44 = vld [vmem:[%s14621_s0 + $0xf8] sm:$0xff]  ;;  %v5523_v15 = vld [vmem:[%s14621_s0 + $0x100] sm:$0xff] }
  0x9c   :  { %15253 = vst [vmem:[#allocation102_spill] sm:$0xff] %v7249_v30  ;;  %15256 = vst [vmem:[#allocation105_spill] sm:$0xff] %v7269_v2  ;;  %v7281_v54 = vsub.f32 %v5521_v0, %v7108_v17  ;;  %v7287_v33 = vsub.f32 %v5522_v44, %v7111_v21  ;;  %v714_v2 = vadd.f32 %v6978_v36, %v712_v34  ;;  %v5524_v0 = vld [vmem:[%s14621_s0 + $0x118] sm:$0xff]  ;;  %v5525_v36 = vld [vmem:[%s14621_s0 + $0x120] sm:$0xff] }
  0x9d   :  { %15254 = vst [vmem:[#allocation103_spill] sm:$0xff] %v7257_v28  ;;  %15255 = vst [vmem:[#allocation104_spill] sm:$0xff] %v7263_v16  ;;  %v768_v16 = vadd.f32 %v7064_v25, %v766_v39  ;;  %v7307_v25 = vsub.f32 %v5525_v36, %v7101_v42  ;;  %v5526_v39 = vld [vmem:[%s14621_s0 + $0x128] sm:$0xff]  ;;  %v5527_v44 = vld [vmem:[%s14621_s0 + $0x130] sm:$0xff] }
  0x9e   :  { %15257 = vst [vmem:[#allocation106_spill] sm:$0xff] %v7275_v12  ;;  %15258 = vst [vmem:[#allocation107_spill] sm:$0xff] %v7281_v54  ;;  %v7295_v12 = vsub.f32 %v5523_v15, %v7113_v55  ;;  %v7301_v54 = vsub.f32 %v5524_v0, %v7098_v35  ;;  %v7313_v34 = vsub.f32 %v5526_v39, %v7108_v17  ;;  %v5528_v0 = vld [vmem:[%s14621_s0 + $0x138] sm:$0xff]  ;;  %v5529_v39 = vld [vmem:[%s14621_s0 + $0x150] sm:$0xff] }
  0x9f   :  { %15259 = vst [vmem:[#allocation108_spill] sm:$0xff] %v7287_v33  ;;  %15262 = vst [vmem:[#allocation111_spill] sm:$0xff] %v7307_v25  ;;  %v7319_v15 = vsub.f32 %v5527_v44, %v7111_v21  ;;  %v7325_v36 = vsub.f32 %v5528_v0, %v7113_v55  ;;  %v716_v25 = vadd.f32 %v6982_v18, %v714_v2  ;;  %v5530_v44 = vld [vmem:[%s14621_s0 + $0x158] sm:$0xff]  ;;  %v5531_v18 = vld [vmem:[%s14621_s0 + $0x160] sm:$0xff] }
  0xa0   :  { %15260 = vst [vmem:[#allocation109_spill] sm:$0xff] %v7295_v12  ;;  %15261 = vst [vmem:[#allocation110_spill] sm:$0xff] %v7301_v54  ;;  %v770_v54 = vadd.f32 %v7073_v43, %v768_v16  ;;  %v7345_v43 = vsub.f32 %v5531_v18, %v7108_v17  ;;  %v5532_v16 = vld [vmem:[%s14621_s0 + $0x168] sm:$0xff]  ;;  %v5533_v0 = vld [vmem:[%s14621_s0 + $0x170] sm:$0xff] }
  0xa1   :  { %15263 = vst [vmem:[#allocation112_spill] sm:$0xff] %v7313_v34  ;;  %15264 = vst [vmem:[#allocation113_spill] sm:$0xff] %v7319_v15  ;;  %v7333_v34 = vsub.f32 %v5529_v39, %v7098_v35  ;;  %v7339_v15 = vsub.f32 %v5530_v44, %v7101_v42  ;;  %v7351_v2 = vsub.f32 %v5532_v16, %v7111_v21  ;;  %v5534_v44 = vld [vmem:[%s14621_s0 + $0x188] sm:$0xff]  ;;  %v5535_v16 = vld [vmem:[%s14621_s0 + $0x190] sm:$0xff] }
  0xa2   :  { %15265 = vst [vmem:[#allocation114_spill] sm:$0xff] %v7325_v36  ;;  %15268 = vst [vmem:[#allocation117_spill] sm:$0xff] %v7345_v43  ;;  %v7357_v39 = vsub.f32 %v5533_v0, %v7113_v55  ;;  %v7363_v18 = vsub.f32 %v5534_v44, %v7098_v35  ;;  %v772_v43 = vadd.f32 %v7077_v40, %v770_v54  ;;  %v5536_v0 = vld [vmem:[%s14621_s0 + $0x198] sm:$0xff]  ;;  %v5537_v44 = vld [vmem:[%s14621_s0 + $0x1a0] sm:$0xff] }
  0xa3   :  { %15266 = vst [vmem:[#allocation115_spill] sm:$0xff] %v7333_v34  ;;  %15267 = vst [vmem:[#allocation116_spill] sm:$0xff] %v7339_v15  ;;  %v7382_v40 = vsub.f32 %v5537_v44, %v7111_v21  ;;  %v718_v54 = vadd.f32 %v6998_v8, %v716_v25  ;;  %v5540_v44 = vld [vmem:[%s14621_s0 + $0x1c8] sm:$0xff] }
  0xa4   :  { %15269 = vst [vmem:[#allocation118_spill] sm:$0xff] %v7351_v2  ;;  %15270 = vst [vmem:[#allocation119_spill] sm:$0xff] %v7357_v39  ;;  %v7370_v2 = vsub.f32 %v5535_v16, %v7101_v42  ;;  %v7376_v39 = vsub.f32 %v5536_v0, %v7108_v17  ;;  %v5538_v16 = vld [vmem:[%s14621_s0 + $0x1a8] sm:$0xff]  ;;  %v5539_v0 = vld [vmem:[%s14621_s0 + $0x1c0] sm:$0xff]  ;;  %v7401_v8 = vsub.f32 %v5540_v44, %v7101_v42 }
  0xa5   :  { %15271 = vst [vmem:[#allocation120_spill] sm:$0xff] %v7363_v18  ;;  %15274 = vst [vmem:[#allocation123_spill] sm:$0xff] %v7382_v40  ;;  %v774_v25 = vadd.f32 %v7081_v52, %v772_v43  ;;  %v5543_v44 = vld [vmem:[%s14621_s0 + $0x1e0] sm:$0xff]  ;;  %v5544_v43 = vld [vmem:[%s14621_s0 + $0x1f8] sm:$0xff] }
  0xa6   :  { %15272 = vst [vmem:[#allocation121_spill] sm:$0xff] %v7370_v2  ;;  %15273 = vst [vmem:[#allocation122_spill] sm:$0xff] %v7376_v39  ;;  %v7389_v2 = vsub.f32 %v5538_v16, %v7113_v55  ;;  %v7395_v39 = vsub.f32 %v5539_v0, %v7098_v35  ;;  %v5541_v16 = vld [vmem:[%s14621_s0 + $0x1d0] sm:$0xff]  ;;  %v5542_v0 = vld [vmem:[%s14621_s0 + $0x1d8] sm:$0xff]  ;;  %v7420_v52 = vsub.f32 %v5543_v44, %v7113_v55 }
  0xa7   :  { %15277 = vst [vmem:[#allocation126_spill] sm:$0xff] %v7401_v8 }
  0xa8   :  { %15275 = vst [vmem:[#allocation124_spill] sm:$0xff] %v7389_v2  ;;  %15276 = vst [vmem:[#allocation125_spill] sm:$0xff] %v7395_v39  ;;  %v7408_v2 = vsub.f32 %v5541_v16, %v7108_v17  ;;  %v7414_v39 = vsub.f32 %v5542_v0, %v7111_v21  ;;  %v7426_v16 = vsub.f32 %v5544_v43, %v7098_v35 }
  0xa9   :  { %15280 = vst [vmem:[#allocation129_spill] sm:$0xff] %v7420_v52  ;;  %v5547_v52 = vld [vmem:[%s14621_s0 + $0x210] sm:$0xff] }
  0xaa   :  { %15278 = vst [vmem:[#allocation127_spill] sm:$0xff] %v7408_v2  ;;  %15279 = vst [vmem:[#allocation128_spill] sm:$0xff] %v7414_v39  ;;  %v5545_v2 = vld [vmem:[%s14621_s0 + $0x200] sm:$0xff]  ;;  %v5546_v39 = vld [vmem:[%s14621_s0 + $0x208] sm:$0xff]  ;;  %v7444_v43 = vsub.f32 %v5547_v52, %v7111_v21 }
  0xab   :  { %15281 = vst [vmem:[#allocation130_spill] sm:$0xff] %v7426_v16  ;;  %v7432_v0 = vsub.f32 %v5545_v2, %v7101_v42  ;;  %v7438_v44 = vsub.f32 %v5546_v39, %v7108_v17  ;;  %v776_v16 = vadd.f32 %v7085_v3, %v774_v25  ;;  %v5548_v2 = vld [vmem:[%s14621_s0 + $0x218] sm:$0xff]  ;;  %v5549_v39 = vld [vmem:[%s14621_s0 + $0x230] sm:$0xff]  ;;  %v720_v25 = vadd.f32 %v7002_v60, %v718_v54 }
  0xac   :  { %15284 = vst [vmem:[#allocation133_spill] sm:$0xff] %v7444_v43  ;;  %v5550_v52 = vld [vmem:[%s14621_s0 + $0x238] sm:$0xff] }
  0xad   :  { %15282 = vst [vmem:[#allocation131_spill] sm:$0xff] %v7432_v0  ;;  %15283 = vst [vmem:[#allocation132_spill] sm:$0xff] %v7438_v44  ;;  %v7451_v0 = vsub.f32 %v5548_v2, %v7113_v55  ;;  %v7457_v44 = vsub.f32 %v5549_v39, %v7098_v35  ;;  %v7463_v3 = vsub.f32 %v5550_v52, %v7101_v42  ;;  %v5551_v2 = vld [vmem:[%s14621_s0 + $0x240] sm:$0xff]  ;;  %v5552_v39 = vld [vmem:[%s14621_s0 + $0x248] sm:$0xff] }
  0xae   :  { %v5553_v52 = vld [vmem:[%s14621_s0 + $0x250] sm:$0xff]  ;;  %v778_v54 = vadd.f32 %v7105_v13, %v776_v16  ;;  %v5557_v16 = vld [vmem:[%s14621_s0 + $0x280] sm:$0xff] }
  0xaf   :  { %15285 = vst [vmem:[#allocation134_spill] sm:$0xff] %v7451_v0  ;;  %15286 = vst [vmem:[#allocation135_spill] sm:$0xff] %v7457_v44  ;;  %v7470_v0 = vsub.f32 %v5551_v2, %v7108_v17  ;;  %v7476_v44 = vsub.f32 %v5552_v39, %v7111_v21  ;;  %v7482_v60 = vsub.f32 %v5553_v52, %v7113_v55  ;;  %v5554_v2 = vld [vmem:[%s14621_s0 + $0x268] sm:$0xff]  ;;  %v5555_v39 = vld [vmem:[%s14621_s0 + $0x270] sm:$0xff] }
  0xb0   :  { %15287 = vst [vmem:[#allocation136_spill] sm:$0xff] %v7463_v3  ;;  %v5556_v52 = vld [vmem:[%s14621_s0 + $0x278] sm:$0xff] }
  0xb1   :  { %15288 = vst [vmem:[#allocation137_spill] sm:$0xff] %v7470_v0  ;;  %15289 = vst [vmem:[#allocation138_spill] sm:$0xff] %v7476_v44  ;;  %v7489_v0 = vsub.f32 %v5554_v2, %v7098_v35  ;;  %v7495_v44 = vsub.f32 %v5555_v39, %v7101_v42  ;;  %v7501_v13 = vsub.f32 %v5556_v52, %v7108_v17 }
  0xb2   :  { %15290 = vst [vmem:[#allocation139_spill] sm:$0xff] %v7482_v60  ;;  %v7507_v2 = vsub.f32 %v5557_v16, %v7111_v21 }
  0xb3   :  { %15291 = vst [vmem:[#allocation140_spill] sm:$0xff] %v7489_v0  ;;  %15292 = vst [vmem:[#allocation141_spill] sm:$0xff] %v7495_v44  ;;  %v5558_v0 = vld [vmem:[%s14621_s0 + $0x288] sm:$0xff]  ;;  %v5559_v44 = vld [vmem:[%s14621_s0 + $0x2a0] sm:$0xff] }
  0xb4   :  { %15293 = vst [vmem:[#allocation142_spill] sm:$0xff] %v7501_v13  ;;  %15294 = vst [vmem:[#allocation143_spill] sm:$0xff] %v7507_v2  ;;  %v7513_v39 = vsub.f32 %v5558_v0, %v7113_v55  ;;  %v7519_v52 = vsub.f32 %v5559_v44, %v7098_v35  ;;  %v5560_v13 = vld [vmem:[%s14621_s0 + $0x2a8] sm:$0xff]  ;;  %v780_v2 = vadd.f32 %v7118_v5, %v778_v54  ;;  %v5561_v0 = vld [vmem:[%s14621_s0 + $0x2b0] sm:$0xff] }
  0xb5   :  { %v7525_v16 = vsub.f32 %v5560_v13, %v7101_v42  ;;  %v5562_v44 = vld [vmem:[%s14621_s0 + $0x2b8] sm:$0xff]  ;;  %v5563_v13 = vld [vmem:[%s14621_s0 + $0x2c0] sm:$0xff]  ;;  %v722_v54 = vadd.f32 %v7011_v31, %v720_v25 }
  0xb6   :  { %15295 = vst [vmem:[#allocation144_spill] sm:$0xff] %v7513_v39  ;;  %15296 = vst [vmem:[#allocation145_spill] sm:$0xff] %v7519_v52  ;;  %v7532_v39 = vsub.f32 %v5561_v0, %v7108_v17  ;;  %v7538_v52 = vsub.f32 %v5562_v44, %v7111_v21  ;;  %v7544_v5 = vsub.f32 %v5563_v13, %v7113_v55  ;;  %v5564_v0 = vld [vmem:[%s14621_s0 + $0x2d8] sm:$0xff]  ;;  %v5565_v44 = vld [vmem:[%s14621_s0 + $0x2e0] sm:$0xff] }
  0xb7   :  { %15297 = vst [vmem:[#allocation146_spill] sm:$0xff] %v7525_v16  ;;  %v5566_v13 = vld [vmem:[%s14621_s0 + $0x2e8] sm:$0xff]  ;;  %v782_v25 = vadd.f32 %v7122_v49, %v780_v2  ;;  %v5570_v2 = vld [vmem:[%s14621_s0 + $0x318] sm:$0xff] }
  0xb8   :  { %15298 = vst [vmem:[#allocation147_spill] sm:$0xff] %v7532_v39  ;;  %15299 = vst [vmem:[#allocation148_spill] sm:$0xff] %v7538_v52  ;;  %v7551_v39 = vsub.f32 %v5564_v0, %v7098_v35  ;;  %v7557_v52 = vsub.f32 %v5565_v44, %v7101_v42  ;;  %v7563_v31 = vsub.f32 %v5566_v13, %v7108_v17  ;;  %v5567_v0 = vld [vmem:[%s14621_s0 + $0x2f0] sm:$0xff]  ;;  %v5568_v44 = vld [vmem:[%s14621_s0 + $0x2f8] sm:$0xff] }
  0xb9   :  { %15300 = vst [vmem:[#allocation149_spill] sm:$0xff] %v7544_v5  ;;  %v5569_v13 = vld [vmem:[%s14621_s0 + $0x310] sm:$0xff]  ;;  %v15450_v16 = vld [vmem:[#allocation71_spill] sm:$0xff] }
  0xba   :  { %15301 = vst [vmem:[#allocation150_spill] sm:$0xff] %v7551_v39  ;;  %15302 = vst [vmem:[#allocation151_spill] sm:$0xff] %v7557_v52  ;;  %v7570_v39 = vsub.f32 %v5567_v0, %v7111_v21  ;;  %v7576_v52 = vsub.f32 %v5568_v44, %v7113_v55  ;;  %v7582_v49 = vsub.f32 %v5569_v13, %v7098_v35  ;;  %v15448_v5 = vld [vmem:[#allocation68_spill] sm:$0xff] }
  0xbb   :  { %15303 = vst [vmem:[#allocation152_spill] sm:$0xff] %v7563_v31  ;;  %v7588_v0 = vsub.f32 %v5570_v2, %v7101_v42  ;;  %v15444_v31 = vld [vmem:[#allocation64_spill] sm:$0xff] }
  0xbc   :  { %15304 = vst [vmem:[#allocation153_spill] sm:$0xff] %v7570_v39  ;;  %15305 = vst [vmem:[#allocation154_spill] sm:$0xff] %v7576_v52  ;;  %v5571_v39 = vld [vmem:[%s14621_s0 + $0x320] sm:$0xff]  ;;  %v5572_v52 = vld [vmem:[%s14621_s0 + $0x328] sm:$0xff] }
  0xbd   :  { %15306 = vst [vmem:[#allocation155_spill] sm:$0xff] %v7582_v49  ;;  %15307 = vst [vmem:[#allocation156_spill] sm:$0xff] %v7588_v0  ;;  %v7594_v44 = vsub.f32 %v5571_v39, %v7108_v17  ;;  %v7600_v13 = vsub.f32 %v5572_v52, %v7111_v21  ;;  %v5573_v49 = vld [vmem:[%s14621_s0 + $0x330] sm:$0xff]  ;;  %v5574_v0 = vld [vmem:[%s14621_s0 + $0x348] sm:$0xff] }
  0xbe   :  { %v7606_v2 = vsub.f32 %v5573_v49, %v7113_v55  ;;  %v7612_v39 = vsub.f32 %v5574_v0, %v7098_v35 }
  0xbf   :  { %15308 = vst [vmem:[#allocation157_spill] sm:$0xff] %v7594_v44  ;;  %15309 = vst [vmem:[#allocation158_spill] sm:$0xff] %v7600_v13  ;;  %v5575_v44 = vld [vmem:[%s14621_s0 + $0x350] sm:$0xff]  ;;  %v5576_v13 = vld [vmem:[%s14621_s0 + $0x358] sm:$0xff] }
  0xc0   :  { %15310 = vst [vmem:[#allocation159_spill] sm:$0xff] %v7606_v2  ;;  %15311 = vst [vmem:[#allocation160_spill] sm:$0xff] %v7612_v39  ;;  %v7618_v52 = vsub.f32 %v5575_v44, %v7101_v42  ;;  %v7624_v49 = vsub.f32 %v5576_v13, %v7108_v17  ;;  %v5577_v2 = vld [vmem:[%s14621_s0 + $0x360] sm:$0xff]  ;;  %v724_v39 = vadd.f32 %v7015_v14, %v722_v54  ;;  %v5578_v44 = vld [vmem:[%s14621_s0 + $0x368] sm:$0xff] }
  0xc1   :  { %v7630_v0 = vsub.f32 %v5577_v2, %v7111_v21  ;;  %v5579_v13 = vld [vmem:[%s14621_s0 + $0x380] sm:$0xff]  ;;  %v5580_v2 = vld [vmem:[%s14621_s0 + $0x388] sm:$0xff]  ;;  %v784_v54 = vadd.f32 %v7126_v1, %v782_v25  ;;  %v5583_v1 = vld [vmem:[%s14621_s0 + $0x3b8] sm:$0xff] }
  0xc2   :  { %15312 = vst [vmem:[#allocation161_spill] sm:$0xff] %v7618_v52  ;;  %15313 = vst [vmem:[#allocation162_spill] sm:$0xff] %v7624_v49  ;;  %v7637_v52 = vsub.f32 %v5578_v44, %v7113_v55  ;;  %v7643_v49 = vsub.f32 %v5579_v13, %v7098_v35  ;;  %v7649_v14 = vsub.f32 %v5580_v2, %v7101_v42  ;;  %v5581_v44 = vld [vmem:[%s14621_s0 + $0x390] sm:$0xff]  ;;  %v5582_v13 = vld [vmem:[%s14621_s0 + $0x398] sm:$0xff] }
  0xc3   :  { %15314 = vst [vmem:[#allocation163_spill] sm:$0xff] %v7630_v0  ;;  %v7666_v2 = vsub.f32 %v6204_v22, %v7113_v55  ;;  %v7672_v25 = vsub.f32 %v5583_v1, %v7098_v35  ;;  %v15438_v0 = vld [vmem:[#allocation50_spill] sm:$0xff] }
  0xc4   :  { %15315 = vst [vmem:[#allocation164_spill] sm:$0xff] %v7637_v52  ;;  %15316 = vst [vmem:[#allocation165_spill] sm:$0xff] %v7643_v49  ;;  %v7656_v52 = vsub.f32 %v5581_v44, %v7108_v17  ;;  %v7662_v49 = vsub.f32 %v5582_v13, %v7111_v21  ;;  %v5584_v44 = vld [vmem:[%s14621_s0 + $0x3c0] sm:$0xff]  ;;  %v5585_v13 = vld [vmem:[%s14621_s0 + $0x3c8] sm:$0xff] }
  0xc5   :  { %15317 = vst [vmem:[#allocation166_spill] sm:$0xff] %v7649_v14  ;;  %15320 = vst [vmem:[#allocation169_spill] sm:$0xff] %v7666_v2  ;;  %v7684_v22 = vsub.f32 %v5585_v13, %v7108_v17  ;;  %v5586_v2 = vld [vmem:[%s14621_s0 + $0x3d0] sm:$0xff]  ;;  %v5588_v13 = vld [vmem:[%s14621_s0 + $0x3f8] sm:$0xff] }
  0xc6   :  { %15318 = vst [vmem:[#allocation167_spill] sm:$0xff] %v7656_v52  ;;  %15319 = vst [vmem:[#allocation168_spill] sm:$0xff] %v7662_v49  ;;  %v7678_v52 = vsub.f32 %v5584_v44, %v7101_v42  ;;  %v7690_v1 = vsub.f32 %v5586_v2, %v7111_v21  ;;  %v5587_v44 = vld [vmem:[%s14621_s0 + $0x3f0] sm:$0xff]  ;;  %v5589_v2 = vld [vmem:[%s14621_s0 + $0x400] sm:$0xff] }
  0xc7   :  { %15321 = vst [vmem:[#allocation170_spill] sm:$0xff] %v7672_v25  ;;  %15323 = vst [vmem:[#allocation172_spill] sm:$0xff] %v7684_v22  ;;  %v7694_v25 = vsub.f32 %v6221_v32, %v7113_v55  ;;  %v7706_v22 = vsub.f32 %v5588_v13, %v7101_v42  ;;  %v7712_v32 = vsub.f32 %v5589_v2, %v7108_v17  ;;  %v15428_v49 = vld [vmem:[#allocation32_spill] sm:$0xff] }
  0xc8   :  { %15322 = vst [vmem:[#allocation171_spill] sm:$0xff] %v7678_v52  ;;  %15324 = vst [vmem:[#allocation173_spill] sm:$0xff] %v7690_v1  ;;  %v7700_v52 = vsub.f32 %v5587_v44, %v7098_v35  ;;  %v5590_v44 = vld [vmem:[%s14621_s0 + $0x408] sm:$0xff]  ;;  %v7723_v13 = vsub.f32 %v6264_v53, %v7113_v55  ;;  %v5593_v53 = vld [vmem:[%s14621_s0 + $0x438] sm:$0xff] }
  0xc9   :  { %15325 = vst [vmem:[#allocation174_spill] sm:$0xff] %v7694_v25  ;;  %15327 = vst [vmem:[#allocation176_spill] sm:$0xff] %v7706_v22  ;;  %v726_v25 = vadd.f32 %v7019_v45, %v724_v39  ;;  %v5591_v22 = vld [vmem:[%s14621_s0 + $0x428] sm:$0xff]  ;;  %v786_v45 = vadd.f32 %v7130_v23, %v784_v54  ;;  %v5592_v39 = vld [vmem:[%s14621_s0 + $0x430] sm:$0xff]  ;;  %v7752_v54 = vsub.f32 %v6283_v63, %v7113_v55 }
  0xca   :  { %15326 = vst [vmem:[#allocation175_spill] sm:$0xff] %v7700_v52  ;;  %15328 = vst [vmem:[#allocation177_spill] sm:$0xff] %v7712_v32  ;;  %v7719_v52 = vsub.f32 %v5590_v44, %v7111_v21  ;;  %v7729_v2 = vsub.f32 %v5591_v22, %v7098_v35  ;;  %v7736_v44 = vsub.f32 %v5592_v39, %v7101_v42  ;;  %v5594_v22 = vld [vmem:[%s14621_s0 + $0x440] sm:$0xff]  ;;  %v15434_v14 = vld [vmem:[#allocation44_spill] sm:$0xff] }
  0xcb   :  { %15330 = vst [vmem:[#allocation179_spill] sm:$0xff] %v7723_v13  ;;  %v7742_v13 = vsub.f32 %v5593_v53, %v7108_v17  ;;  %v7748_v23 = vsub.f32 %v5594_v22, %v7111_v21  ;;  %15335 = vst [vmem:[#allocation184_spill] sm:$0xff] %v7752_v54  ;;  %v5595_v39 = vld [vmem:[%s14621_s0 + $0x460] sm:$0xff]  ;;  %v5596_v53 = vld [vmem:[%s14621_s0 + $0x468] sm:$0xff] }
  0xcc   :  { %15329 = vst [vmem:[#allocation178_spill] sm:$0xff] %v7719_v52  ;;  %15331 = vst [vmem:[#allocation180_spill] sm:$0xff] %v7729_v2  ;;  %v5597_v22 = vld [vmem:[%s14621_s0 + $0x470] sm:$0xff]  ;;  %v5598_v54 = vld [vmem:[%s14621_s0 + $0x478] sm:$0xff] }
  0xcd   :  { %15332 = vst [vmem:[#allocation181_spill] sm:$0xff] %v7736_v44  ;;  %15333 = vst [vmem:[#allocation182_spill] sm:$0xff] %v7742_v13  ;;  %v7758_v44 = vsub.f32 %v5595_v39, %v7098_v35  ;;  %v7764_v13 = vsub.f32 %v5596_v53, %v7101_v42  ;;  %v7770_v63 = vsub.f32 %v5597_v22, %v7108_v17  ;;  %v5599_v53 = vld [vmem:[%s14621_s0 + $0x498] sm:$0xff]  ;;  %v5600_v22 = vld [vmem:[%s14621_s0 + $0x4a0] sm:$0xff] }
  0xce   :  { %15334 = vst [vmem:[#allocation183_spill] sm:$0xff] %v7748_v23  ;;  %v7776_v39 = vsub.f32 %v5598_v54, %v7111_v21  ;;  %v7794_v54 = vmul.f32 0.03125, %v726_v25  ;;  %v788_v25 = vadd.f32 %v7134_v10, %v786_v45  ;;  %v5606_v45 = vld [vmem:[%s14621_s0 + $0x4e8] sm:$0xff] }
  0xcf   :  { %15336 = vst [vmem:[#allocation185_spill] sm:$0xff] %v7758_v44  ;;  %15337 = vst [vmem:[#allocation186_spill] sm:$0xff] %v7764_v13  ;;  %v7780_v44 = vsub.f32 %v6324_v20, %v7113_v55  ;;  %v7786_v13 = vsub.f32 %v5599_v53, %v7098_v35  ;;  %v5601_v20 = vld [vmem:[%s14621_s0 + $0x4a8] sm:$0xff]  ;;  %v5602_v53 = vld [vmem:[%s14621_s0 + $0x4b0] sm:$0xff] }
  0xd0   :  { %15338 = vst [vmem:[#allocation187_spill] sm:$0xff] %v7770_v63  ;;  %15339 = vst [vmem:[#allocation188_spill] sm:$0xff] %v7776_v39  ;;  %v7792_v63 = vsub.f32 %v5600_v22, %v7101_v42  ;;  %v7810_v22 = vsub.f32 %v6343_v29, %v7113_v55  ;;  %v5605_v29 = vld [vmem:[%s14621_s0 + $0x4e0] sm:$0xff]  ;;  %v15386_v39 = vld [vmem:[#allocation55_spill] sm:$0xff] }
  0xd1   :  { %15340 = vst [vmem:[#allocation189_spill] sm:$0xff] %v7780_v44  ;;  %15341 = vst [vmem:[#allocation190_spill] sm:$0xff] %v7786_v13  ;;  %v7800_v44 = vsub.f32 %v5601_v20, %v7108_v17  ;;  %v7806_v13 = vsub.f32 %v5602_v53, %v7111_v21  ;;  %v7829_v10 = vsub.f32 %v5605_v29, %v7108_v17  ;;  %v5608_v29 = vld [vmem:[%s14621_s0 + $0x510] sm:$0xff] }
  0xd2   :  { %15342 = vst [vmem:[#allocation191_spill] sm:$0xff] %v7792_v63  ;;  %15345 = vst [vmem:[#allocation194_spill] sm:$0xff] %v7810_v22  ;;  %v5603_v63 = vld [vmem:[%s14621_s0 + $0x4d0] sm:$0xff]  ;;  %v15382_v22 = vld [vmem:[#allocation51_spill] sm:$0xff] }
  0xd3   :  { %15343 = vst [vmem:[#allocation192_spill] sm:$0xff] %v7800_v44  ;;  %15344 = vst [vmem:[#allocation193_spill] sm:$0xff] %v7806_v13  ;;  %v7817_v20 = vsub.f32 %v5603_v63, %v7098_v35  ;;  %v5604_v44 = vld [vmem:[%s14621_s0 + $0x4d8] sm:$0xff]  ;;  %v7835_v63 = vsub.f32 %v5606_v45, %v7111_v21  ;;  %v7855_v45 = vsub.f32 %v6245_v46, %v7108_v17  ;;  %v15384_v13 = vld [vmem:[#allocation54_spill] sm:$0xff] }
  0xd4   :  { %v7823_v53 = vsub.f32 %v5604_v44, %v7101_v42  ;;  %15348 = vst [vmem:[#allocation197_spill] sm:$0xff] %v7829_v10  ;;  %v5607_v44 = vld [vmem:[%s14621_s0 + $0x508] sm:$0xff]  ;;  %v7851_v10 = vsub.f32 %v5608_v29, %v7101_v42  ;;  %v7871_v29 = vsub.f32 %v6370_v41, %v7794_v54  ;;  %v7875_v46 = vsub.f32 %v6393_v56, %v7794_v54 }
  0xd5   :  { %15346 = vst [vmem:[#allocation195_spill] sm:$0xff] %v7817_v20  ;;  %15349 = vst [vmem:[#allocation198_spill] sm:$0xff] %v7835_v63  ;;  %v7839_v20 = vsub.f32 %v6359_v37, %v7113_v55  ;;  %v7859_v37 = vsub.f32 %v6254_v50, %v7111_v21  ;;  %v7879_v50 = vsub.f32 %v6398_v58, %v7794_v54  ;;  %v15364_v58 = vld [vmem:[#allocation15_spill] sm:$0xff]  ;;  %v15380_v63 = vld [vmem:[#allocation48_spill] sm:$0xff] }
  0xd6   :  { %15347 = vst [vmem:[#allocation196_spill] sm:$0xff] %v7823_v53  ;;  %v7845_v53 = vsub.f32 %v5607_v44, %v7098_v35  ;;  %15352 = vst [vmem:[#allocation201_spill] sm:$0xff] %v7851_v10  ;;  %v7867_v44 = vsub.f32 %v6259_v51, %v7098_v35  ;;  %v7888_v51 = vsub.f32 %v6422_v6, %v7794_v54  ;;  %v15376_v10 = vld [vmem:[#allocation41_spill] sm:$0xff] }
  0xd7   :  { %15350 = vst [vmem:[#allocation199_spill] sm:$0xff] %v7839_v20  ;;  %15353 = vst [vmem:[#allocation202_spill] sm:$0xff] %v7855_v45  ;;  %v7863_v20 = vsub.f32 %v6384_v48, %v7113_v55  ;;  %v7883_v48 = vsub.f32 %v6273_v57, %v7101_v42  ;;  %v7892_v41 = vsub.f32 %v6453_v19, %v7794_v54  ;;  %v15366_v57 = vld [vmem:[#allocation21_spill] sm:$0xff] }
  0xd8   :  { %15351 = vst [vmem:[#allocation200_spill] sm:$0xff] %v7845_v53  ;;  %15354 = vst [vmem:[#allocation203_spill] sm:$0xff] %v7859_v37  ;;  %v7896_v56 = vsub.f32 %v6479_v38, %v7794_v54  ;;  %v15372_v37 = vld [vmem:[#allocation33_spill] sm:$0xff] }
  0xd9   :  { %15355 = vst [vmem:[#allocation204_spill] sm:$0xff] %v7863_v20  ;;  %15356 = vst [vmem:[#allocation205_spill] sm:$0xff] %v7867_v44  ;;  %v790_v20 = vadd.f32 %v7138_v26, %v788_v25  ;;  %v7900_v44 = vsub.f32 %v15364_v58, %v7794_v54  ;;  %v15368_v26 = vld [vmem:[#allocation25_spill] sm:$0xff]  ;;  %v7916_v38 = vsub.f32 %v15372_v37, %v7794_v54 }
  0xda   :  { %15357 = vst [vmem:[#allocation206_spill] sm:$0xff] %v7871_v29  ;;  %15358 = vst [vmem:[#allocation207_spill] sm:$0xff] %v7875_v46  ;;  %v7908_v6 = vsub.f32 %v15368_v26, %v7794_v54  ;;  %v15370_v25 = vld [vmem:[#allocation29_spill] sm:$0xff]  ;;  %v7936_v37 = vsub.f32 %v15382_v22, %v7794_v54  ;;  %v15392_v22 = vld [vmem:[#allocation59_spill] sm:$0xff] }
  0xdb   :  { %15359 = vst [vmem:[#allocation208_spill] sm:$0xff] %v7879_v50  ;;  %15360 = vst [vmem:[#allocation209_spill] sm:$0xff] %v7883_v48  ;;  %v7904_v48 = vsub.f32 %v15366_v57, %v7794_v54  ;;  %v7912_v19 = vsub.f32 %v15370_v25, %v7794_v54  ;;  %v15374_v45 = vld [vmem:[#allocation37_spill] sm:$0xff]  ;;  %v7924_v57 = vsub.f32 %v15376_v10, %v7794_v54  ;;  %v7946_v23 = vmul.f32 0.03125, %v790_v20 }
  0xdc   :  { %15361 = vst [vmem:[#allocation210_spill] sm:$0xff] %v7888_v51  ;;  %15362 = vst [vmem:[#allocation211_spill] sm:$0xff] %v7892_v41  ;;  %v7920_v58 = vsub.f32 %v15374_v45, %v7794_v54  ;;  %v15378_v53 = vld [vmem:[#allocation45_spill] sm:$0xff]  ;;  %v7932_v25 = vsub.f32 %v15380_v63, %v7794_v54  ;;  %v7940_v45 = vsub.f32 %v15384_v13, %v7794_v54  ;;  %v15394_v13 = vld [vmem:[#allocation60_spill] sm:$0xff] }
  0xdd   :  { %15363 = vst [vmem:[#allocation212_spill] sm:$0xff] %v7896_v56  ;;  %15365 = vst [vmem:[#allocation15_spill] sm:$0xff] %v7900_v44  ;;  %v7928_v26 = vsub.f32 %v15378_v53, %v7794_v54  ;;  %v7944_v10 = vsub.f32 %v15386_v39, %v7794_v54  ;;  %v15388_v53 = vld [vmem:[#allocation56_spill] sm:$0xff]  ;;  %v15390_v63 = vld [vmem:[#allocation57_spill] sm:$0xff]  ;;  %v7958_v32 = vsub.f32 %v15392_v22, %v7794_v54 }
  0xde   :  { %15367 = vst [vmem:[#allocation21_spill] sm:$0xff] %v7904_v48  ;;  %15369 = vst [vmem:[#allocation25_spill] sm:$0xff] %v7908_v6  ;;  %v7950_v2 = vsub.f32 %v15388_v53, %v7794_v54  ;;  %v7954_v52 = vsub.f32 %v15390_v63, %v7794_v54  ;;  %v7962_v1 = vsub.f32 %v15394_v13, %v7794_v54  ;;  %v15396_v39 = vld [vmem:[#allocation61_spill] sm:$0xff]  ;;  %v5609_v63 = vld [vmem:[%s14621_s0 + $0x550] sm:$0xff] }
  0xdf   :  { %15371 = vst [vmem:[#allocation29_spill] sm:$0xff] %v7912_v19  ;;  %15373 = vst [vmem:[#allocation33_spill] sm:$0xff] %v7916_v38  ;;  %v7966_v20 = vsub.f32 %v15396_v39, %v7794_v54  ;;  %v5610_v22 = vld [vmem:[%s14621_s0 + $0x558] sm:$0xff] }
  0xe0   :  { %15375 = vst [vmem:[#allocation37_spill] sm:$0xff] %v7920_v58  ;;  %15377 = vst [vmem:[#allocation41_spill] sm:$0xff] %v7924_v57  ;;  %v7982_v13 = vsub.f32 %v5610_v22, %v7111_v21  ;;  %v15402_v39 = vld [vmem:[#allocation9_spill] sm:$0xff]  ;;  %v5612_v22 = vld [vmem:[%s14621_s0 + $0x580] sm:$0xff] }
  0xe1   :  { %15379 = vst [vmem:[#allocation45_spill] sm:$0xff] %v7928_v26  ;;  %15381 = vst [vmem:[#allocation48_spill] sm:$0xff] %v7932_v25  ;;  %v15440_v25 = vld [vmem:[#allocation53_spill] sm:$0xff]  ;;  %v15442_v26 = vld [vmem:[#allocation58_spill] sm:$0xff] }
  0xe2   :  { %15383 = vst [vmem:[#allocation51_spill] sm:$0xff] %v7936_v37  ;;  %15385 = vst [vmem:[#allocation54_spill] sm:$0xff] %v7940_v45  ;;  %v15426_v45 = vld [vmem:[#allocation28_spill] sm:$0xff]  ;;  %v15436_v37 = vld [vmem:[#allocation47_spill] sm:$0xff] }
  0xe3   :  { %15387 = vst [vmem:[#allocation55_spill] sm:$0xff] %v7944_v10  ;;  %15389 = vst [vmem:[#allocation56_spill] sm:$0xff] %v7950_v2  ;;  %v15398_v10 = vld [vmem:[#allocation62_spill] sm:$0xff]  ;;  %v15416_v2 = vld [vmem:[#allocation20_spill] sm:$0xff] }
  0xe4   :  { %15391 = vst [vmem:[#allocation57_spill] sm:$0xff] %v7954_v52  ;;  %15393 = vst [vmem:[#allocation59_spill] sm:$0xff] %v7958_v32  ;;  %v7970_v53 = vsub.f32 %v15398_v10, %v7794_v54  ;;  %v7976_v52 = vsub.f32 %v5609_v63, %v7108_v17  ;;  %v15404_v10 = vld [vmem:[#allocation63_spill] sm:$0xff]  ;;  %v5611_v63 = vld [vmem:[%s14621_s0 + $0x578] sm:$0xff] }
  0xe5   :  { %15395 = vst [vmem:[#allocation60_spill] sm:$0xff] %v7962_v1  ;;  %15397 = vst [vmem:[#allocation61_spill] sm:$0xff] %v7966_v20  ;;  %v7986_v20 = vsub.f32 %v15402_v39, %v7113_v55  ;;  %v15408_v39 = vld [vmem:[#allocation2_spill] sm:$0xff]  ;;  %v15446_v57 = vld [vmem:[#allocation67_spill] sm:$0xff] }
  0xe6   :  { %15399 = vst [vmem:[#allocation62_spill] sm:$0xff] %v7970_v53  ;;  %15400 = vst [vmem:[#allocation213_spill] sm:$0xff] %v7976_v52  ;;  %v7990_v53 = vsub.f32 %v15404_v10, %v7794_v54  ;;  %v7996_v52 = vsub.f32 %v5611_v63, %v7098_v35  ;;  %v15410_v10 = vld [vmem:[#allocation3_spill] sm:$0xff]  ;;  %v15412_v1 = vld [vmem:[#allocation14_spill] sm:$0xff] }
  0xe7   :  { %15401 = vst [vmem:[#allocation214_spill] sm:$0xff] %v7982_v13  ;;  %15403 = vst [vmem:[#allocation9_spill] sm:$0xff] %v7986_v20  ;;  %v8002_v13 = vsub.f32 %v5612_v22, %v7101_v42  ;;  %v8006_v20 = vsub.f32 %v15408_v39, %v7108_v17  ;;  %v8014_v32 = vsub.f32 %v15412_v1, %v7113_v55  ;;  %v15414_v63 = vld [vmem:[#allocation19_spill] sm:$0xff] }
  0xe8   :  { %15405 = vst [vmem:[#allocation63_spill] sm:$0xff] %v7990_v53  ;;  %15406 = vst [vmem:[#allocation215_spill] sm:$0xff] %v7996_v52  ;;  %v8010_v53 = vsub.f32 %v15410_v10, %v7111_v21  ;;  %v8018_v52 = vsub.f32 %v15414_v63, %v7946_v23  ;;  %v8022_v22 = vsub.f32 %v15416_v2, %v7946_v23 }
  0xe9   :  { %15407 = vst [vmem:[#allocation216_spill] sm:$0xff] %v8002_v13  ;;  %15409 = vst [vmem:[#allocation2_spill] sm:$0xff] %v8006_v20  ;;  %v15418_v13 = vld [vmem:[#allocation65_spill] sm:$0xff]  ;;  %v15420_v20 = vld [vmem:[#allocation4_spill] sm:$0xff]  ;;  %v8042_v2 = vsub.f32 %v15426_v45, %v7946_v23  ;;  %v8062_v45 = vsub.f32 %v15436_v37, %v7946_v23  ;;  %v8082_v37 = vsub.f32 %v15446_v57, %v7946_v23 }
  0xea   :  { %15411 = vst [vmem:[#allocation3_spill] sm:$0xff] %v8010_v53  ;;  %15413 = vst [vmem:[#allocation14_spill] sm:$0xff] %v8014_v32  ;;  %v8026_v39 = vsub.f32 %v15418_v13, %v7794_v54  ;;  %v8030_v10 = vsub.f32 %v15420_v20, %v7098_v35  ;;  %v15422_v53 = vld [vmem:[#allocation22_spill] sm:$0xff]  ;;  %v15424_v32 = vld [vmem:[#allocation24_spill] sm:$0xff]  ;;  %v8046_v13 = vsub.f32 %v15428_v49, %v7946_v23 }
  0xeb   :  { %15415 = vst [vmem:[#allocation19_spill] sm:$0xff] %v8018_v52  ;;  %15417 = vst [vmem:[#allocation20_spill] sm:$0xff] %v8022_v22  ;;  %v8034_v1 = vsub.f32 %v15422_v53, %v7946_v23  ;;  %v8038_v63 = vsub.f32 %v15424_v32, %v7946_v23  ;;  %v8058_v32 = vsub.f32 %v15434_v14, %v7946_v23 }
  0xec   :  { %15419 = vst [vmem:[#allocation65_spill] sm:$0xff] %v8026_v39  ;;  %15421 = vst [vmem:[#allocation4_spill] sm:$0xff] %v8030_v10  ;;  %v15430_v39 = vld [vmem:[#allocation36_spill] sm:$0xff]  ;;  %v8066_v49 = vsub.f32 %v15438_v0, %v7946_v23  ;;  %v8078_v14 = vsub.f32 %v15444_v31, %v7946_v23  ;;  %v8086_v0 = vsub.f32 %v15448_v5, %v7946_v23 }
  0xed   :  { %15423 = vst [vmem:[#allocation22_spill] sm:$0xff] %v8034_v1  ;;  %15425 = vst [vmem:[#allocation24_spill] sm:$0xff] %v8038_v63  ;;  %v8050_v20 = vsub.f32 %v15430_v39, %v7946_v23  ;;  %v15432_v10 = vld [vmem:[#allocation40_spill] sm:$0xff]  ;;  %v8070_v39 = vsub.f32 %v15440_v25, %v7946_v23  ;;  %v8090_v25 = vsub.f32 %v15450_v16, %v7946_v23 }
  0xee   :  { %15427 = vst [vmem:[#allocation28_spill] sm:$0xff] %v8042_v2  ;;  %15429 = vst [vmem:[#allocation32_spill] sm:$0xff] %v8046_v13  ;;  %v8054_v53 = vsub.f32 %v15432_v10, %v7946_v23  ;;  %v8074_v10 = vsub.f32 %v15442_v26, %v7946_v23 }
  0xef   :  { %15431 = vst [vmem:[#allocation36_spill] sm:$0xff] %v8050_v20  ;;  %15435 = vst [vmem:[#allocation44_spill] sm:$0xff] %v8058_v32 }
  0xf0   :  { %15433 = vst [vmem:[#allocation40_spill] sm:$0xff] %v8054_v53  ;;  %15437 = vst [vmem:[#allocation47_spill] sm:$0xff] %v8062_v45 }
  0xf1   :  { %15439 = vst [vmem:[#allocation50_spill] sm:$0xff] %v8066_v49  ;;  %15441 = vst [vmem:[#allocation53_spill] sm:$0xff] %v8070_v39  ;;  %v15452_v39 = vld [vmem:[#allocation72_spill] sm:$0xff] }
  0xf2   :  { %15443 = vst [vmem:[#allocation58_spill] sm:$0xff] %v8074_v10  ;;  %15445 = vst [vmem:[#allocation64_spill] sm:$0xff] %v8078_v14  ;;  %v8094_v26 = vsub.f32 %v15452_v39, %v7946_v23  ;;  %v15454_v10 = vld [vmem:[#allocation73_spill] sm:$0xff] }
  0xf3   :  { %15447 = vst [vmem:[#allocation67_spill] sm:$0xff] %v8082_v37  ;;  %15449 = vst [vmem:[#allocation68_spill] sm:$0xff] %v8086_v0  ;;  %v8098_v31 = vsub.f32 %v15454_v10, %v7946_v23  ;;  %v15456_v14 = vld [vmem:[#allocation77_spill] sm:$0xff]  ;;  %v15458_v37 = vld [vmem:[#allocation78_spill] sm:$0xff] }
  0xf4   :  { %15451 = vst [vmem:[#allocation71_spill] sm:$0xff] %v8090_v25  ;;  %15453 = vst [vmem:[#allocation72_spill] sm:$0xff] %v8094_v26  ;;  %v8102_v57 = vsub.f32 %v15456_v14, %v7946_v23  ;;  %v8106_v5 = vsub.f32 %v15458_v37, %v7946_v23  ;;  %v15460_v0 = vld [vmem:[#allocation79_spill] sm:$0xff]  ;;  %v15462_v25 = vld [vmem:[#allocation80_spill] sm:$0xff]  ;;  %v8126_v37 = vsub.f32 %v7031_v4, %v7946_v23 }
  0xf5   :  { %15455 = vst [vmem:[#allocation73_spill] sm:$0xff] %v8098_v31  ;;  %v8110_v16 = vsub.f32 %v15460_v0, %v7946_v23  ;;  %v8114_v39 = vsub.f32 %v15462_v25, %v7946_v23  ;;  %v15464_v26 = vld [vmem:[#allocation81_spill] sm:$0xff]  ;;  %v15466_v31 = vld [vmem:[#allocation82_spill] sm:$0xff] }
  0xf6   :  { %15457 = vst [vmem:[#allocation77_spill] sm:$0xff] %v8102_v57  ;;  %15459 = vst [vmem:[#allocation78_spill] sm:$0xff] %v8106_v5  ;;  %v8118_v10 = vsub.f32 %v15464_v26, %v7946_v23  ;;  %v8122_v14 = vsub.f32 %v15466_v31, %v7946_v23  ;;  %v5613_v0 = vld [vmem:[%s14621_s0 + $0x5b8] sm:$0xff]  ;;  %v5614_v25 = vld [vmem:[%s14621_s0 + $0x5c0] sm:$0xff] }
  0xf7   :  { %15461 = vst [vmem:[#allocation79_spill] sm:$0xff] %v8110_v16  ;;  %15463 = vst [vmem:[#allocation80_spill] sm:$0xff] %v8114_v39  ;;  %v8132_v16 = vsub.f32 %v5613_v0, %v7101_v42  ;;  %v8138_v26 = vsub.f32 %v5614_v25, %v7108_v17  ;;  %v5615_v31 = vld [vmem:[%s14621_s0 + $0x5c8] sm:$0xff]  ;;  %v15474_v0 = vld [vmem:[#allocation66_spill] sm:$0xff] }
  0xf8   :  { %15465 = vst [vmem:[#allocation81_spill] sm:$0xff] %v8118_v10  ;;  %15467 = vst [vmem:[#allocation82_spill] sm:$0xff] %v8122_v14  ;;  %v8144_v4 = vsub.f32 %v5615_v31, %v7111_v21  ;;  %v8156_v10 = vsub.f32 %v7040_v9, %v7946_v23  ;;  %v5616_v25 = vld [vmem:[%s14621_s0 + $0x5e8] sm:$0xff]  ;;  %v15478_v31 = vld [vmem:[#allocation5_spill] sm:$0xff] }
  0xf9   :  { %15468 = vst [vmem:[#allocation217_spill] sm:$0xff] %v8126_v37  ;;  %15469 = vst [vmem:[#allocation218_spill] sm:$0xff] %v8132_v16  ;;  %v15472_v37 = vld [vmem:[#allocation23_spill] sm:$0xff]  ;;  %v8152_v16 = vsub.f32 %v15474_v0, %v7794_v54  ;;  %v15484_v9 = vld [vmem:[#allocation30_spill] sm:$0xff] }
  0xfa   :  { %15470 = vst [vmem:[#allocation219_spill] sm:$0xff] %v8138_v26  ;;  %15471 = vst [vmem:[#allocation220_spill] sm:$0xff] %v8144_v4  ;;  %v8148_v14 = vsub.f32 %v15472_v37, %v7113_v55  ;;  %v8162_v26 = vsub.f32 %v5616_v25, %v7098_v35  ;;  %v8166_v4 = vsub.f32 %v15478_v31, %v7101_v42  ;;  %v15480_v37 = vld [vmem:[#allocation6_spill] sm:$0xff]  ;;  %v15482_v0 = vld [vmem:[#allocation7_spill] sm:$0xff] }
  0xfb   :  { %15475 = vst [vmem:[#allocation66_spill] sm:$0xff] %v8152_v16  ;;  %15476 = vst [vmem:[#allocation221_spill] sm:$0xff] %v8156_v10  ;;  %v8174_v16 = vsub.f32 %v15482_v0, %v7111_v21  ;;  %v8178_v10 = vsub.f32 %v15484_v9, %v7113_v55  ;;  %v15486_v39 = vld [vmem:[#allocation69_spill] sm:$0xff]  ;;  %v8186_v31 = vsub.f32 %v7051_v24, %v7946_v23 }
  0xfc   :  { %15473 = vst [vmem:[#allocation23_spill] sm:$0xff] %v8148_v14  ;;  %15477 = vst [vmem:[#allocation222_spill] sm:$0xff] %v8162_v26  ;;  %v8170_v14 = vsub.f32 %v15480_v37, %v7108_v17  ;;  %v8182_v25 = vsub.f32 %v15486_v39, %v7794_v54 }
  0xfd   :  { %15479 = vst [vmem:[#allocation5_spill] sm:$0xff] %v8166_v4  ;;  %15483 = vst [vmem:[#allocation7_spill] sm:$0xff] %v8174_v16  ;;  %v15489_v4 = vld [vmem:[#allocation8_spill] sm:$0xff]  ;;  %v15493_v16 = vld [vmem:[#allocation11_spill] sm:$0xff] }
  0xfe   :  { %15481 = vst [vmem:[#allocation6_spill] sm:$0xff] %v8170_v14  ;;  %15485 = vst [vmem:[#allocation30_spill] sm:$0xff] %v8178_v10  ;;  %v8190_v37 = vsub.f32 %v15489_v4, %v7098_v35  ;;  %v15491_v14 = vld [vmem:[#allocation10_spill] sm:$0xff]  ;;  %v8198_v9 = vsub.f32 %v15493_v16, %v7108_v17  ;;  %v15495_v10 = vld [vmem:[#allocation12_spill] sm:$0xff] }
  0xff   :  { %15487 = vst [vmem:[#allocation69_spill] sm:$0xff] %v8182_v25  ;;  %15488 = vst [vmem:[#allocation223_spill] sm:$0xff] %v8186_v31  ;;  %v8194_v0 = vsub.f32 %v15491_v14, %v7101_v42  ;;  %v8202_v39 = vsub.f32 %v15495_v10, %v7111_v21  ;;  %v15497_v25 = vld [vmem:[#allocation38_spill] sm:$0xff]  ;;  %v8214_v14 = vsub.f32 %v7056_v47, %v7946_v23 }
 0x100   :  { %15490 = vst [vmem:[#allocation8_spill] sm:$0xff] %v8190_v37  ;;  %15494 = vst [vmem:[#allocation11_spill] sm:$0xff] %v8198_v9  ;;  %v8206_v24 = vsub.f32 %v15497_v25, %v7113_v55  ;;  %v15499_v31 = vld [vmem:[#allocation70_spill] sm:$0xff]  ;;  %v15504_v9 = vld [vmem:[#allocation16_spill] sm:$0xff] }
 0x101   :  { %15492 = vst [vmem:[#allocation10_spill] sm:$0xff] %v8194_v0  ;;  %15496 = vst [vmem:[#allocation12_spill] sm:$0xff] %v8202_v39  ;;  %v8210_v4 = vsub.f32 %v15499_v31, %v7794_v54  ;;  %v15502_v0 = vld [vmem:[#allocation13_spill] sm:$0xff]  ;;  %v8222_v10 = vsub.f32 %v15504_v9, %v7101_v42  ;;  %v8242_v9 = vsub.f32 %v7069_v62, %v7946_v23 }
 0x102   :  { %15498 = vst [vmem:[#allocation38_spill] sm:$0xff] %v8206_v24  ;;  %15501 = vst [vmem:[#allocation224_spill] sm:$0xff] %v8214_v14  ;;  %v8218_v16 = vsub.f32 %v15502_v0, %v7098_v35  ;;  %v15506_v39 = vld [vmem:[#allocation17_spill] sm:$0xff]  ;;  %v15508_v24 = vld [vmem:[#allocation18_spill] sm:$0xff] }
 0x103   :  { %15500 = vst [vmem:[#allocation70_spill] sm:$0xff] %v8210_v4  ;;  %15505 = vst [vmem:[#allocation16_spill] sm:$0xff] %v8222_v10  ;;  %v8226_v25 = vsub.f32 %v15506_v39, %v7108_v17  ;;  %v8230_v31 = vsub.f32 %v15508_v24, %v7111_v21  ;;  %v15510_v4 = vld [vmem:[#allocation46_spill] sm:$0xff] }
 0x104   :  { %15503 = vst [vmem:[#allocation13_spill] sm:$0xff] %v8218_v16  ;;  %v8234_v47 = vsub.f32 %v15510_v4, %v7113_v55  ;;  %v15512_v14 = vld [vmem:[#allocation74_spill] sm:$0xff]  ;;  %15514 = vst [vmem:[#allocation225_spill] sm:$0xff] %v8242_v9  ;;  %v15525_v9 = vld [vmem:[#allocation75_spill] sm:$0xff] }
 0x105   :  { %15507 = vst [vmem:[#allocation17_spill] sm:$0xff] %v8226_v25  ;;  %15509 = vst [vmem:[#allocation18_spill] sm:$0xff] %v8230_v31  ;;  %v8238_v0 = vsub.f32 %v15512_v14, %v7794_v54  ;;  %v15515_v10 = vld [vmem:[#allocation26_spill] sm:$0xff]  ;;  %v15517_v25 = vld [vmem:[#allocation27_spill] sm:$0xff] }
 0x106   :  { %15511 = vst [vmem:[#allocation46_spill] sm:$0xff] %v8234_v47  ;;  %v8246_v39 = vsub.f32 %v15515_v10, %v7098_v35  ;;  %v8250_v24 = vsub.f32 %v15517_v25, %v7101_v42  ;;  %v15519_v31 = vld [vmem:[#allocation31_spill] sm:$0xff]  ;;  %v15521_v47 = vld [vmem:[#allocation34_spill] sm:$0xff]  ;;  %v8266_v10 = vsub.f32 %v15525_v9, %v7794_v54 }
 0x107   :  { %15513 = vst [vmem:[#allocation74_spill] sm:$0xff] %v8238_v0  ;;  %v8254_v4 = vsub.f32 %v15519_v31, %v7108_v17  ;;  %v8258_v14 = vsub.f32 %v15521_v47, %v7111_v21  ;;  %v15523_v0 = vld [vmem:[#allocation49_spill] sm:$0xff] }
 0x108   :  { %15516 = vst [vmem:[#allocation26_spill] sm:$0xff] %v8246_v39  ;;  %15518 = vst [vmem:[#allocation27_spill] sm:$0xff] %v8250_v24  ;;  %v8262_v62 = vsub.f32 %v15523_v0, %v7113_v55  ;;  %v15527_v39 = vld [vmem:[#allocation83_spill] sm:$0xff] }
 0x109   :  { %15520 = vst [vmem:[#allocation31_spill] sm:$0xff] %v8254_v4  ;;  %15522 = vst [vmem:[#allocation34_spill] sm:$0xff] %v8258_v14  ;;  %v8270_v25 = vsub.f32 %v15527_v39, %v7946_v23  ;;  %v15529_v24 = vld [vmem:[#allocation35_spill] sm:$0xff]  ;;  %v15533_v14 = vld [vmem:[#allocation42_spill] sm:$0xff] }
 0x10a   :  { %15524 = vst [vmem:[#allocation49_spill] sm:$0xff] %v8262_v62  ;;  %15526 = vst [vmem:[#allocation75_spill] sm:$0xff] %v8266_v10  ;;  %v8274_v31 = vsub.f32 %v15529_v24, %v7098_v35  ;;  %v15531_v4 = vld [vmem:[#allocation39_spill] sm:$0xff]  ;;  %v8282_v0 = vsub.f32 %v15533_v14, %v7108_v17  ;;  %v15537_v10 = vld [vmem:[#allocation52_spill] sm:$0xff]  ;;  %v8302_v17 = vmul.f32 %v7145_v11, %v7145_v11 }
 0x10b   :  { %15528 = vst [vmem:[#allocation83_spill] sm:$0xff] %v8270_v25  ;;  %v8278_v47 = vsub.f32 %v15531_v4, %v7101_v42  ;;  %v15535_v62 = vld [vmem:[#allocation43_spill] sm:$0xff]  ;;  %v8290_v39 = vsub.f32 %v15537_v10, %v7113_v55  ;;  %v15539_v25 = vld [vmem:[#allocation76_spill] sm:$0xff]  ;;  %v15543_v4 = vld [vmem:[#allocation86_spill] sm:$0xff] }
 0x10c   :  { %15530 = vst [vmem:[#allocation35_spill] sm:$0xff] %v8274_v31  ;;  %15534 = vst [vmem:[#allocation42_spill] sm:$0xff] %v8282_v0  ;;  %v8286_v9 = vsub.f32 %v15535_v62, %v7111_v21  ;;  %v8294_v35 = vsub.f32 %v15539_v25, %v7794_v54  ;;  %v15541_v24 = vld [vmem:[#allocation84_spill] sm:$0xff]  ;;  %v8306_v21 = vmul.f32 %v15543_v4, %v15543_v4  ;;  %v15544_v14 = vld [vmem:[#allocation87_spill] sm:$0xff] }
 0x10d   :  { %15532 = vst [vmem:[#allocation39_spill] sm:$0xff] %v8278_v47  ;;  %15538 = vst [vmem:[#allocation52_spill] sm:$0xff] %v8290_v39  ;;  %v8298_v42 = vsub.f32 %v15541_v24, %v7946_v23  ;;  %v8310_v55 = vmul.f32 %v15544_v14, %v15544_v14  ;;  %v15545_v62 = vld [vmem:[#allocation88_spill] sm:$0xff]  ;;  %v15547_v10 = vld [vmem:[#allocation89_spill] sm:$0xff]  ;;  %v8322_v25 = vmul.f32 %v7871_v29, %v7871_v29 }
 0x10e   :  { %15536 = vst [vmem:[#allocation43_spill] sm:$0xff] %v8286_v9  ;;  %15540 = vst [vmem:[#allocation76_spill] sm:$0xff] %v8294_v35  ;;  %v8314_v54 = vmul.f32 %v15545_v62, %v15545_v62  ;;  %v8318_v23 = vmul.f32 %v15547_v10, %v15547_v10  ;;  %v8326_v24 = vmul.f32 %v8018_v52, %v8018_v52  ;;  %v15551_v4 = vld [vmem:[#allocation92_spill] sm:$0xff]  ;;  %v15552_v11 = vld [vmem:[#allocation93_spill] sm:$0xff] }
 0x10f   :  { %15542 = vst [vmem:[#allocation84_spill] sm:$0xff] %v8298_v42  ;;  %15549 = vst [vmem:[#allocation228_spill] sm:$0xff] %v8322_v25  ;;  %v8330_v14 = vmul.f32 %v7175_v61, %v7175_v61  ;;  %v8334_v62 = vmul.f32 %v7182_v7, %v7182_v7  ;;  %v8338_v10 = vmul.f32 %v15551_v4, %v15551_v4  ;;  %v15554_v42 = vld [vmem:[#allocation94_spill] sm:$0xff]  ;;  %v15558_v35 = vld [vmem:[#allocation95_spill] sm:$0xff] }
 0x110   :  { %15546 = vst [vmem:[#allocation226_spill] sm:$0xff] %v8314_v54  ;;  %15548 = vst [vmem:[#allocation227_spill] sm:$0xff] %v8318_v23  ;;  %v8342_v29 = vmul.f32 %v15552_v11, %v15552_v11  ;;  %v8346_v52 = vmul.f32 %v15554_v42, %v15554_v42  ;;  %v8350_v61 = vmul.f32 %v7875_v46, %v7875_v46  ;;  %v15566_v25 = vld [vmem:[#allocation101_spill] sm:$0xff]  ;;  %v15573_v39 = vld [vmem:[#allocation106_spill] sm:$0xff] }
 0x111   :  { %15550 = vst [vmem:[#allocation229_spill] sm:$0xff] %v8326_v24  ;;  %v8354_v7 = vmul.f32 %v8022_v22, %v8022_v22  ;;  %v8358_v4 = vmul.f32 %v15558_v35, %v15558_v35  ;;  %v8362_v11 = vmul.f32 %v7212_v27, %v7212_v27  ;;  %v8366_v42 = vmul.f32 %v7219_v59, %v7219_v59  ;;  %v15559_v24 = vld [vmem:[#allocation98_spill] sm:$0xff]  ;;  %v15613_v23 = vld [vmem:[#allocation132_spill] sm:$0xff]  ;;  %v15764_v54 = vld [vmem:[#allocation79_spill] sm:$0xff] }
 0x112   :  { %15553 = vst [vmem:[#allocation230_spill] sm:$0xff] %v8342_v29  ;;  %15555 = vst [vmem:[#allocation231_spill] sm:$0xff] %v8346_v52  ;;  %v8370_v46 = vmul.f32 %v15559_v24, %v15559_v24  ;;  %v8378_v35 = vmul.f32 %v7879_v50, %v7879_v50  ;;  %v8382_v27 = vmul.f32 %v8034_v1, %v8034_v1  ;;  %v15612_v52 = vld [vmem:[#allocation131_spill] sm:$0xff]  ;;  %v15649_v9 = vld [vmem:[#allocation58_spill] sm:$0xff] }
 0x113   :  { %15556 = vst [vmem:[#allocation232_spill] sm:$0xff] %v8350_v61  ;;  %15557 = vst [vmem:[#allocation233_spill] sm:$0xff] %v8354_v7  ;;  %v15561_v61 = vld [vmem:[#allocation99_spill] sm:$0xff]  ;;  %v15565_v7 = vld [vmem:[#allocation100_spill] sm:$0xff]  ;;  %v8390_v24 = vmul.f32 %v15566_v25, %v15566_v25  ;;  %v8398_v50 = vmul.f32 %v7257_v28, %v7257_v28  ;;  %v8410_v25 = vmul.f32 %v8038_v63, %v8038_v63 }
 0x114   :  { %15560 = vst [vmem:[#allocation234_spill] sm:$0xff] %v8370_v46  ;;  %v8374_v22 = vmul.f32 %v15561_v61, %v15561_v61  ;;  %15563 = vst [vmem:[#allocation236_spill] sm:$0xff] %v8378_v35  ;;  %v8386_v59 = vmul.f32 %v15565_v7, %v15565_v7  ;;  %v8394_v61 = vmul.f32 %v7249_v30, %v7249_v30  ;;  %v15568_v35 = vld [vmem:[#allocation104_spill] sm:$0xff]  ;;  %v15701_v46 = vld [vmem:[#allocation71_spill] sm:$0xff] }
 0x115   :  { %15564 = vst [vmem:[#allocation237_spill] sm:$0xff] %v8382_v27  ;;  %15567 = vst [vmem:[#allocation238_spill] sm:$0xff] %v8398_v50  ;;  %v8402_v1 = vmul.f32 %v15568_v35, %v15568_v35  ;;  %v8406_v7 = vmul.f32 %v7888_v51, %v7888_v51  ;;  %v15572_v27 = vld [vmem:[#allocation105_spill] sm:$0xff]  ;;  %v8418_v28 = vmul.f32 %v15573_v39, %v15573_v39 }
 0x116   :  { %15562 = vst [vmem:[#allocation235_spill] sm:$0xff] %v8374_v22  ;;  %15571 = vst [vmem:[#allocation241_spill] sm:$0xff] %v8410_v25  ;;  %v8414_v30 = vmul.f32 %v15572_v27, %v15572_v27  ;;  %v15574_v22 = vld [vmem:[#allocation107_spill] sm:$0xff]  ;;  %v8426_v51 = vmul.f32 %v7287_v33, %v7287_v33  ;;  %v8430_v63 = vmul.f32 %v7295_v12, %v7295_v12  ;;  %v15579_v25 = vld [vmem:[#allocation110_spill] sm:$0xff] }
 0x117   :  { %15569 = vst [vmem:[#allocation239_spill] sm:$0xff] %v8402_v1  ;;  %15570 = vst [vmem:[#allocation240_spill] sm:$0xff] %v8406_v7  ;;  %v8422_v35 = vmul.f32 %v15574_v22, %v15574_v22  ;;  %v8434_v27 = vmul.f32 %v7892_v41, %v7892_v41  ;;  %v8438_v39 = vmul.f32 %v8042_v2, %v8042_v2  ;;  %v15580_v7 = vld [vmem:[#allocation111_spill] sm:$0xff]  ;;  %v15581_v1 = vld [vmem:[#allocation112_spill] sm:$0xff] }
 0x118   :  { %15575 = vst [vmem:[#allocation242_spill] sm:$0xff] %v8426_v51  ;;  %15576 = vst [vmem:[#allocation243_spill] sm:$0xff] %v8430_v63  ;;  %v8442_v22 = vmul.f32 %v15579_v25, %v15579_v25  ;;  %v8446_v33 = vmul.f32 %v15580_v7, %v15580_v7  ;;  %v8450_v12 = vmul.f32 %v15581_v1, %v15581_v1  ;;  %v15582_v63 = vld [vmem:[#allocation113_spill] sm:$0xff]  ;;  %v15677_v51 = vld [vmem:[#allocation160_spill] sm:$0xff] }
 0x119   :  { %15577 = vst [vmem:[#allocation244_spill] sm:$0xff] %v8434_v27  ;;  %15578 = vst [vmem:[#allocation245_spill] sm:$0xff] %v8438_v39  ;;  %v8454_v41 = vmul.f32 %v15582_v63, %v15582_v63  ;;  %v8458_v2 = vmul.f32 %v7325_v36, %v7325_v36  ;;  %v8462_v25 = vmul.f32 %v7896_v56, %v7896_v56  ;;  %v15587_v39 = vld [vmem:[#allocation117_spill] sm:$0xff]  ;;  %v15588_v27 = vld [vmem:[#allocation118_spill] sm:$0xff] }
 0x11a   :  { %v8466_v7 = vmul.f32 %v8046_v13, %v8046_v13  ;;  %v8470_v1 = vmul.f32 %v7333_v34, %v7333_v34  ;;  %v8474_v63 = vmul.f32 %v7339_v15, %v7339_v15  ;;  %v8478_v36 = vmul.f32 %v15587_v39, %v15587_v39  ;;  %v15690_v50 = vld [vmem:[#allocation165_spill] sm:$0xff] }
 0x11b   :  { %15583 = vst [vmem:[#allocation246_spill] sm:$0xff] %v8454_v41  ;;  %15584 = vst [vmem:[#allocation247_spill] sm:$0xff] %v8458_v2  ;;  %v8482_v56 = vmul.f32 %v15588_v27, %v15588_v27  ;;  %v8490_v34 = vmul.f32 %v7900_v44, %v7900_v44  ;;  %v8494_v15 = vmul.f32 %v8050_v20, %v8050_v20  ;;  %v15595_v2 = vld [vmem:[#allocation122_spill] sm:$0xff]  ;;  %v15664_v41 = vld [vmem:[#allocation155_spill] sm:$0xff] }
 0x11c   :  { %15585 = vst [vmem:[#allocation248_spill] sm:$0xff] %v8462_v25  ;;  %15586 = vst [vmem:[#allocation249_spill] sm:$0xff] %v8466_v7  ;;  %v15590_v25 = vld [vmem:[#allocation119_spill] sm:$0xff]  ;;  %v8498_v39 = vmul.f32 %v7363_v18, %v7363_v18  ;;  %v15594_v7 = vld [vmem:[#allocation121_spill] sm:$0xff]  ;;  %v8510_v44 = vmul.f32 %v7382_v40, %v7382_v40  ;;  %v8518_v18 = vmul.f32 %v7904_v48, %v7904_v48 }
 0x11d   :  { %15589 = vst [vmem:[#allocation250_spill] sm:$0xff] %v8482_v56  ;;  %v8486_v13 = vmul.f32 %v15590_v25, %v15590_v25  ;;  %15592 = vst [vmem:[#allocation252_spill] sm:$0xff] %v8490_v34  ;;  %v8502_v27 = vmul.f32 %v15594_v7, %v15594_v7  ;;  %v8506_v25 = vmul.f32 %v15595_v2, %v15595_v2  ;;  %v15598_v34 = vld [vmem:[#allocation124_spill] sm:$0xff]  ;;  %v15652_v56 = vld [vmem:[#allocation151_spill] sm:$0xff] }
 0x11e   :  { %15593 = vst [vmem:[#allocation253_spill] sm:$0xff] %v8494_v15  ;;  %15597 = vst [vmem:[#allocation255_spill] sm:$0xff] %v8510_v44  ;;  %v8514_v20 = vmul.f32 %v15598_v34, %v15598_v34  ;;  %v8522_v7 = vmul.f32 %v8054_v53, %v8054_v53  ;;  %v15602_v15 = vld [vmem:[#allocation125_spill] sm:$0xff]  ;;  %v8530_v40 = vmul.f32 %v7401_v8, %v7401_v8  ;;  %v15651_v44 = vld [vmem:[#allocation150_spill] sm:$0xff] }
 0x11f   :  { %15591 = vst [vmem:[#allocation251_spill] sm:$0xff] %v8486_v13  ;;  %15596 = vst [vmem:[#allocation254_spill] sm:$0xff] %v8506_v25  ;;  %v8526_v2 = vmul.f32 %v15602_v15, %v15602_v15  ;;  %v15603_v13 = vld [vmem:[#allocation127_spill] sm:$0xff]  ;;  %v8546_v15 = vmul.f32 %v7908_v6, %v7908_v6  ;;  %v8550_v8 = vmul.f32 %v8058_v32, %v8058_v32  ;;  %v15727_v29 = vld [vmem:[#allocation73_spill] sm:$0xff] }
 0x120   :  { %15599 = vst [vmem:[#allocation256_spill] sm:$0xff] %v8514_v20  ;;  %15600 = vst [vmem:[#allocation257_spill] sm:$0xff] %v8518_v18  ;;  %v8534_v34 = vmul.f32 %v15603_v13, %v15603_v13  ;;  %v15605_v20 = vld [vmem:[#allocation128_spill] sm:$0xff]  ;;  %v15607_v18 = vld [vmem:[#allocation129_spill] sm:$0xff]  ;;  %v8566_v6 = vmul.f32 %v7444_v43, %v7444_v43  ;;  %v8586_v43 = vmul.f32 %v7463_v3, %v7463_v3 }
 0x121   :  { %15601 = vst [vmem:[#allocation258_spill] sm:$0xff] %v8522_v7  ;;  %v8538_v48 = vmul.f32 %v15605_v20, %v15605_v20  ;;  %v8542_v53 = vmul.f32 %v15607_v18, %v15607_v18  ;;  %15609 = vst [vmem:[#allocation262_spill] sm:$0xff] %v8546_v15  ;;  %v15611_v7 = vld [vmem:[#allocation130_spill] sm:$0xff]  ;;  %v8558_v20 = vmul.f32 %v15612_v52, %v15612_v52  ;;  %v15815_v25 = vld [vmem:[#allocation217_spill] sm:$0xff] }
 0x122   :  { %15604 = vst [vmem:[#allocation259_spill] sm:$0xff] %v8534_v34  ;;  %15610 = vst [vmem:[#allocation263_spill] sm:$0xff] %v8550_v8  ;;  %v8554_v13 = vmul.f32 %v15611_v7, %v15611_v7  ;;  %v8562_v18 = vmul.f32 %v15613_v23, %v15613_v23  ;;  %v15616_v15 = vld [vmem:[#allocation134_spill] sm:$0xff]  ;;  %v8574_v7 = vmul.f32 %v7912_v19, %v7912_v19  ;;  %v15620_v8 = vld [vmem:[#allocation135_spill] sm:$0xff] }
 0x123   :  { %15606 = vst [vmem:[#allocation260_spill] sm:$0xff] %v8538_v48  ;;  %15608 = vst [vmem:[#allocation261_spill] sm:$0xff] %v8542_v53  ;;  %v8570_v32 = vmul.f32 %v15616_v15, %v15616_v15  ;;  %v8578_v52 = vmul.f32 %v8062_v45, %v8062_v45  ;;  %v8582_v23 = vmul.f32 %v15620_v8, %v15620_v8  ;;  %v15621_v53 = vld [vmem:[#allocation137_spill] sm:$0xff]  ;;  %v15640_v48 = vld [vmem:[#allocation146_spill] sm:$0xff] }
 0x124   :  { %15614 = vst [vmem:[#allocation264_spill] sm:$0xff] %v8562_v18  ;;  %15615 = vst [vmem:[#allocation265_spill] sm:$0xff] %v8566_v6  ;;  %v8590_v15 = vmul.f32 %v15621_v53, %v15621_v53  ;;  %v8598_v45 = vmul.f32 %v7482_v60, %v7482_v60  ;;  %v8602_v8 = vmul.f32 %v7916_v38, %v7916_v38  ;;  %v15639_v6 = vld [vmem:[#allocation145_spill] sm:$0xff]  ;;  %v15714_v18 = vld [vmem:[#allocation72_spill] sm:$0xff] }
 0x125   :  { %15617 = vst [vmem:[#allocation266_spill] sm:$0xff] %v8570_v32  ;;  %15618 = vst [vmem:[#allocation267_spill] sm:$0xff] %v8574_v7  ;;  %v15623_v32 = vld [vmem:[#allocation138_spill] sm:$0xff]  ;;  %v8606_v3 = vmul.f32 %v8066_v49, %v8066_v49  ;;  %v15629_v7 = vld [vmem:[#allocation141_spill] sm:$0xff] }
 0x126   :  { %15619 = vst [vmem:[#allocation268_spill] sm:$0xff] %v8578_v52  ;;  %15622 = vst [vmem:[#allocation269_spill] sm:$0xff] %v8590_v15  ;;  %v8594_v19 = vmul.f32 %v15623_v32, %v15623_v32  ;;  %v15628_v52 = vld [vmem:[#allocation140_spill] sm:$0xff]  ;;  %v8614_v32 = vmul.f32 %v15629_v7, %v15629_v7 }
 0x127   :  { %15625 = vst [vmem:[#allocation271_spill] sm:$0xff] %v8598_v45  ;;  %15626 = vst [vmem:[#allocation272_spill] sm:$0xff] %v8602_v8  ;;  %v8610_v53 = vmul.f32 %v15628_v52, %v15628_v52  ;;  %v15632_v45 = vld [vmem:[#allocation143_spill] sm:$0xff]  ;;  %v15634_v8 = vld [vmem:[#allocation144_spill] sm:$0xff]  ;;  %v8630_v52 = vmul.f32 %v7920_v58, %v7920_v58 }
 0x128   :  { %15624 = vst [vmem:[#allocation270_spill] sm:$0xff] %v8594_v19  ;;  %15627 = vst [vmem:[#allocation273_spill] sm:$0xff] %v8606_v3  ;;  %v15630_v19 = vld [vmem:[#allocation142_spill] sm:$0xff]  ;;  %v8622_v38 = vmul.f32 %v15632_v45, %v15632_v45  ;;  %v8626_v49 = vmul.f32 %v15634_v8, %v15634_v8  ;;  %v15637_v3 = vld [vmem:[#allocation53_spill] sm:$0xff]  ;;  %v8642_v45 = vmul.f32 %v15640_v48, %v15640_v48 }
 0x129   :  { %v8618_v60 = vmul.f32 %v15630_v19, %v15630_v19  ;;  %15636 = vst [vmem:[#allocation277_spill] sm:$0xff] %v8630_v52  ;;  %v8634_v7 = vmul.f32 %v15637_v3, %v15637_v3  ;;  %v8638_v19 = vmul.f32 %v15639_v6, %v15639_v6  ;;  %v15645_v52 = vld [vmem:[#allocation149_spill] sm:$0xff]  ;;  %v8662_v48 = vmul.f32 %v15649_v9, %v15649_v9  ;;  %v15688_v15 = vld [vmem:[#allocation68_spill] sm:$0xff] }
 0x12a   :  { %15633 = vst [vmem:[#allocation275_spill] sm:$0xff] %v8622_v38  ;;  %15635 = vst [vmem:[#allocation276_spill] sm:$0xff] %v8626_v49  ;;  %v15641_v38 = vld [vmem:[#allocation147_spill] sm:$0xff]  ;;  %v15643_v49 = vld [vmem:[#allocation148_spill] sm:$0xff]  ;;  %v8654_v3 = vmul.f32 %v15645_v52, %v15645_v52 }
 0x12b   :  { %15631 = vst [vmem:[#allocation274_spill] sm:$0xff] %v8618_v60  ;;  %15638 = vst [vmem:[#allocation278_spill] sm:$0xff] %v8634_v7  ;;  %v8646_v8 = vmul.f32 %v15641_v38, %v15641_v38  ;;  %v8650_v58 = vmul.f32 %v15643_v49, %v15643_v49  ;;  %v15647_v7 = vld [vmem:[#allocation41_spill] sm:$0xff]  ;;  %v8666_v38 = vmul.f32 %v15651_v44, %v15651_v44  ;;  %v15675_v60 = vld [vmem:[#allocation67_spill] sm:$0xff] }
 0x12c   :  { %15646 = vst [vmem:[#allocation281_spill] sm:$0xff] %v8654_v3  ;;  %v8658_v6 = vmul.f32 %v15647_v7, %v15647_v7  ;;  %15650 = vst [vmem:[#allocation283_spill] sm:$0xff] %v8662_v48  ;;  %v8670_v49 = vmul.f32 %v15652_v56, %v15652_v56  ;;  %v15656_v3 = vld [vmem:[#allocation153_spill] sm:$0xff]  ;;  %v15777_v34 = vld [vmem:[#allocation80_spill] sm:$0xff] }
 0x12d   :  { %15642 = vst [vmem:[#allocation279_spill] sm:$0xff] %v8646_v8  ;;  %15644 = vst [vmem:[#allocation280_spill] sm:$0xff] %v8650_v58  ;;  %v15654_v58 = vld [vmem:[#allocation152_spill] sm:$0xff]  ;;  %v8678_v7 = vmul.f32 %v15656_v3, %v15656_v3  ;;  %v15660_v48 = vld [vmem:[#allocation45_spill] sm:$0xff] }
 0x12e   :  { %15648 = vst [vmem:[#allocation282_spill] sm:$0xff] %v8658_v6  ;;  %15653 = vst [vmem:[#allocation284_spill] sm:$0xff] %v8670_v49  ;;  %v8674_v52 = vmul.f32 %v15654_v58, %v15654_v58  ;;  %v15658_v6 = vld [vmem:[#allocation154_spill] sm:$0xff]  ;;  %v8686_v44 = vmul.f32 %v15660_v48, %v15660_v48  ;;  %v15662_v8 = vld [vmem:[#allocation64_spill] sm:$0xff]  ;;  %v8694_v58 = vmul.f32 %v15664_v41, %v15664_v41 }
 0x12f   :  { %15657 = vst [vmem:[#allocation286_spill] sm:$0xff] %v8678_v7  ;;  %v8682_v9 = vmul.f32 %v15658_v6, %v15658_v6  ;;  %v8690_v56 = vmul.f32 %v15662_v8, %v15662_v8  ;;  %v15667_v7 = vld [vmem:[#allocation157_spill] sm:$0xff] }
 0x130   :  { %15655 = vst [vmem:[#allocation285_spill] sm:$0xff] %v8674_v52  ;;  %15661 = vst [vmem:[#allocation288_spill] sm:$0xff] %v8686_v44  ;;  %v15665_v52 = vld [vmem:[#allocation156_spill] sm:$0xff]  ;;  %v8702_v6 = vmul.f32 %v15667_v7, %v15667_v7  ;;  %v15671_v44 = vld [vmem:[#allocation159_spill] sm:$0xff]  ;;  %v8722_v7 = vmul.f32 %v15677_v51, %v15677_v51 }
 0x131   :  { %15659 = vst [vmem:[#allocation287_spill] sm:$0xff] %v8682_v9  ;;  %15663 = vst [vmem:[#allocation289_spill] sm:$0xff] %v8690_v56  ;;  %v8698_v3 = vmul.f32 %v15665_v52, %v15665_v52  ;;  %v15669_v9 = vld [vmem:[#allocation158_spill] sm:$0xff]  ;;  %v8710_v8 = vmul.f32 %v15671_v44, %v15671_v44  ;;  %v15673_v56 = vld [vmem:[#allocation48_spill] sm:$0xff]  ;;  %v8718_v52 = vmul.f32 %v15675_v60, %v15675_v60 }
 0x132   :  { %15668 = vst [vmem:[#allocation291_spill] sm:$0xff] %v8702_v6  ;;  %v8706_v48 = vmul.f32 %v15669_v9, %v15669_v9  ;;  %v8714_v41 = vmul.f32 %v15673_v56, %v15673_v56  ;;  %v15678_v6 = vld [vmem:[#allocation161_spill] sm:$0xff] }
 0x133   :  { %15666 = vst [vmem:[#allocation290_spill] sm:$0xff] %v8698_v3  ;;  %15672 = vst [vmem:[#allocation293_spill] sm:$0xff] %v8710_v8  ;;  %v8726_v9 = vmul.f32 %v15678_v6, %v15678_v6  ;;  %v15682_v8 = vld [vmem:[#allocation163_spill] sm:$0xff]  ;;  %v8746_v6 = vmul.f32 %v15688_v15, %v15688_v15 }
 0x134   :  { %15670 = vst [vmem:[#allocation292_spill] sm:$0xff] %v8706_v48  ;;  %15674 = vst [vmem:[#allocation294_spill] sm:$0xff] %v8714_v41  ;;  %v15680_v48 = vld [vmem:[#allocation162_spill] sm:$0xff]  ;;  %v8734_v56 = vmul.f32 %v15682_v8, %v15682_v8  ;;  %v15684_v41 = vld [vmem:[#allocation164_spill] sm:$0xff] }
 0x135   :  { %15676 = vst [vmem:[#allocation295_spill] sm:$0xff] %v8718_v52  ;;  %15679 = vst [vmem:[#allocation296_spill] sm:$0xff] %v8726_v9  ;;  %v8730_v44 = vmul.f32 %v15680_v48, %v15680_v48  ;;  %v8738_v60 = vmul.f32 %v15684_v41, %v15684_v41  ;;  %v15686_v52 = vld [vmem:[#allocation51_spill] sm:$0xff]  ;;  %v8750_v48 = vmul.f32 %v15690_v50, %v15690_v50  ;;  %v15790_v9 = vld [vmem:[#allocation81_spill] sm:$0xff] }
 0x136   :  { %15683 = vst [vmem:[#allocation298_spill] sm:$0xff] %v8734_v56  ;;  %v8742_v51 = vmul.f32 %v15686_v52, %v15686_v52  ;;  %15689 = vst [vmem:[#allocation301_spill] sm:$0xff] %v8746_v6  ;;  %v15693_v56 = vld [vmem:[#allocation167_spill] sm:$0xff]  ;;  %v15699_v6 = vld [vmem:[#allocation54_spill] sm:$0xff] }
 0x137   :  { %15681 = vst [vmem:[#allocation297_spill] sm:$0xff] %v8730_v44  ;;  %15685 = vst [vmem:[#allocation299_spill] sm:$0xff] %v8738_v60  ;;  %v15691_v44 = vld [vmem:[#allocation166_spill] sm:$0xff]  ;;  %v8758_v41 = vmul.f32 %v15693_v56, %v15693_v56  ;;  %v15695_v60 = vld [vmem:[#allocation168_spill] sm:$0xff]  ;;  %v8770_v50 = vmul.f32 %v15699_v6, %v15699_v6 }
 0x138   :  { %15687 = vst [vmem:[#allocation300_spill] sm:$0xff] %v8742_v51  ;;  %v8754_v8 = vmul.f32 %v15691_v44, %v15691_v44  ;;  %v8762_v52 = vmul.f32 %v15695_v60, %v15695_v60  ;;  %v15697_v51 = vld [vmem:[#allocation169_spill] sm:$0xff]  ;;  %v8774_v44 = vmul.f32 %v15701_v46, %v15701_v46 }
 0x139   :  { %15694 = vst [vmem:[#allocation303_spill] sm:$0xff] %v8758_v41  ;;  %v8766_v15 = vmul.f32 %v15697_v51, %v15697_v51  ;;  %15700 = vst [vmem:[#allocation306_spill] sm:$0xff] %v8770_v50  ;;  %v15704_v41 = vld [vmem:[#allocation171_spill] sm:$0xff]  ;;  %v15710_v50 = vld [vmem:[#allocation174_spill] sm:$0xff] }
 0x13a   :  { %15692 = vst [vmem:[#allocation302_spill] sm:$0xff] %v8754_v8  ;;  %15696 = vst [vmem:[#allocation304_spill] sm:$0xff] %v8762_v52  ;;  %v15703_v8 = vld [vmem:[#allocation170_spill] sm:$0xff]  ;;  %v8782_v60 = vmul.f32 %v15704_v41, %v15704_v41  ;;  %v15706_v52 = vld [vmem:[#allocation172_spill] sm:$0xff]  ;;  %v8794_v46 = vmul.f32 %v15710_v50, %v15710_v50  ;;  %v8802_v41 = vmul.f32 %v15714_v18, %v15714_v18 }
 0x13b   :  { %15698 = vst [vmem:[#allocation305_spill] sm:$0xff] %v8766_v15  ;;  %15702 = vst [vmem:[#allocation307_spill] sm:$0xff] %v8774_v44  ;;  %v8778_v56 = vmul.f32 %v15703_v8, %v15703_v8  ;;  %v8786_v51 = vmul.f32 %v15706_v52, %v15706_v52  ;;  %v15708_v15 = vld [vmem:[#allocation173_spill] sm:$0xff]  ;;  %v15712_v44 = vld [vmem:[#allocation55_spill] sm:$0xff] }
 0x13c   :  { %15705 = vst [vmem:[#allocation308_spill] sm:$0xff] %v8782_v60  ;;  %v8790_v6 = vmul.f32 %v15708_v15, %v15708_v15  ;;  %15711 = vst [vmem:[#allocation311_spill] sm:$0xff] %v8794_v46  ;;  %v8798_v8 = vmul.f32 %v15712_v44, %v15712_v44  ;;  %v15716_v60 = vld [vmem:[#allocation175_spill] sm:$0xff]  ;;  %v15721_v46 = vld [vmem:[#allocation178_spill] sm:$0xff] }
 0x13d   :  { %15707 = vst [vmem:[#allocation309_spill] sm:$0xff] %v8786_v51  ;;  %15715 = vst [vmem:[#allocation313_spill] sm:$0xff] %v8802_v41  ;;  %v8806_v52 = vmul.f32 %v15716_v60, %v15716_v60  ;;  %v15717_v51 = vld [vmem:[#allocation176_spill] sm:$0xff]  ;;  %v8818_v44 = vmul.f32 %v15721_v46, %v15721_v46 }
 0x13e   :  { %15709 = vst [vmem:[#allocation310_spill] sm:$0xff] %v8790_v6  ;;  %15713 = vst [vmem:[#allocation312_spill] sm:$0xff] %v8798_v8  ;;  %v8810_v15 = vmul.f32 %v15717_v51, %v15717_v51  ;;  %v15719_v6 = vld [vmem:[#allocation177_spill] sm:$0xff]  ;;  %v15723_v8 = vld [vmem:[#allocation179_spill] sm:$0xff]  ;;  %v8830_v51 = vmul.f32 %v15727_v29, %v15727_v29 }
 0x13f   :  { %v8814_v50 = vmul.f32 %v15719_v6, %v15719_v6  ;;  %15722 = vst [vmem:[#allocation316_spill] sm:$0xff] %v8818_v44  ;;  %v8822_v18 = vmul.f32 %v15723_v8, %v15723_v8  ;;  %v15725_v41 = vld [vmem:[#allocation56_spill] sm:$0xff]  ;;  %v15732_v44 = vld [vmem:[#allocation182_spill] sm:$0xff] }
 0x140   :  { %15718 = vst [vmem:[#allocation314_spill] sm:$0xff] %v8810_v15  ;;  %v8826_v60 = vmul.f32 %v15725_v41, %v15725_v41  ;;  %15728 = vst [vmem:[#allocation319_spill] sm:$0xff] %v8830_v51  ;;  %v15729_v15 = vld [vmem:[#allocation180_spill] sm:$0xff]  ;;  %v8842_v8 = vmul.f32 %v15732_v44, %v15732_v44  ;;  %v15738_v51 = vld [vmem:[#allocation57_spill] sm:$0xff] }
 0x141   :  { %15720 = vst [vmem:[#allocation315_spill] sm:$0xff] %v8814_v50  ;;  %15724 = vst [vmem:[#allocation317_spill] sm:$0xff] %v8822_v18  ;;  %v8834_v6 = vmul.f32 %v15729_v15, %v15729_v15  ;;  %v15730_v50 = vld [vmem:[#allocation181_spill] sm:$0xff]  ;;  %v15734_v18 = vld [vmem:[#allocation183_spill] sm:$0xff]  ;;  %v8854_v15 = vmul.f32 %v15738_v51, %v15738_v51 }
 0x142   :  { %15726 = vst [vmem:[#allocation318_spill] sm:$0xff] %v8826_v60  ;;  %v8838_v46 = vmul.f32 %v15730_v50, %v15730_v50  ;;  %15733 = vst [vmem:[#allocation321_spill] sm:$0xff] %v8842_v8  ;;  %v8846_v41 = vmul.f32 %v15734_v18, %v15734_v18  ;;  %v15736_v60 = vld [vmem:[#allocation184_spill] sm:$0xff]  ;;  %v8858_v50 = vmul.f32 %v8102_v57, %v8102_v57  ;;  %v15742_v8 = vld [vmem:[#allocation186_spill] sm:$0xff] }
 0x143   :  { %v8850_v29 = vmul.f32 %v15736_v60, %v15736_v60  ;;  %15739 = vst [vmem:[#allocation324_spill] sm:$0xff] %v8854_v15  ;;  %v8866_v18 = vmul.f32 %v15742_v8, %v15742_v8  ;;  %v15748_v15 = vld [vmem:[#allocation189_spill] sm:$0xff]  ;;  %v8886_v8 = vmul.f32 %v8106_v5, %v8106_v5 }
 0x144   :  { %15731 = vst [vmem:[#allocation320_spill] sm:$0xff] %v8838_v46  ;;  %15735 = vst [vmem:[#allocation322_spill] sm:$0xff] %v8846_v41  ;;  %v15741_v46 = vld [vmem:[#allocation185_spill] sm:$0xff]  ;;  %v15744_v41 = vld [vmem:[#allocation187_spill] sm:$0xff]  ;;  %v8878_v57 = vmul.f32 %v15748_v15, %v15748_v15 }
 0x145   :  { %15737 = vst [vmem:[#allocation323_spill] sm:$0xff] %v8850_v29  ;;  %15740 = vst [vmem:[#allocation325_spill] sm:$0xff] %v8858_v50  ;;  %v8862_v44 = vmul.f32 %v15741_v46, %v15741_v46  ;;  %v8870_v60 = vmul.f32 %v15744_v41, %v15744_v41  ;;  %v15746_v29 = vld [vmem:[#allocation188_spill] sm:$0xff]  ;;  %v15750_v50 = vld [vmem:[#allocation59_spill] sm:$0xff] }
 0x146   :  { %15743 = vst [vmem:[#allocation326_spill] sm:$0xff] %v8866_v18  ;;  %v8874_v51 = vmul.f32 %v15746_v29, %v15746_v29  ;;  %15749 = vst [vmem:[#allocation329_spill] sm:$0xff] %v8878_v57  ;;  %v8882_v46 = vmul.f32 %v15750_v50, %v15750_v50  ;;  %v15753_v18 = vld [vmem:[#allocation190_spill] sm:$0xff]  ;;  %v15758_v57 = vld [vmem:[#allocation193_spill] sm:$0xff] }
 0x147   :  { %15745 = vst [vmem:[#allocation327_spill] sm:$0xff] %v8870_v60  ;;  %15752 = vst [vmem:[#allocation331_spill] sm:$0xff] %v8886_v8  ;;  %v8890_v41 = vmul.f32 %v15753_v18, %v15753_v18  ;;  %v15754_v60 = vld [vmem:[#allocation191_spill] sm:$0xff]  ;;  %v8902_v50 = vmul.f32 %v15758_v57, %v15758_v57  ;;  %v15762_v8 = vld [vmem:[#allocation60_spill] sm:$0xff] }
 0x148   :  { %15747 = vst [vmem:[#allocation328_spill] sm:$0xff] %v8874_v51  ;;  %15751 = vst [vmem:[#allocation330_spill] sm:$0xff] %v8882_v46  ;;  %v8894_v29 = vmul.f32 %v15754_v60, %v15754_v60  ;;  %v15756_v51 = vld [vmem:[#allocation192_spill] sm:$0xff]  ;;  %v15760_v46 = vld [vmem:[#allocation194_spill] sm:$0xff]  ;;  %v8910_v18 = vmul.f32 %v15762_v8, %v15762_v8  ;;  %v8914_v60 = vmul.f32 %v15764_v54, %v15764_v54 }
 0x149   :  { %v8898_v15 = vmul.f32 %v15756_v51, %v15756_v51  ;;  %15759 = vst [vmem:[#allocation334_spill] sm:$0xff] %v8902_v50  ;;  %v8906_v5 = vmul.f32 %v15760_v46, %v15760_v46  ;;  %v15769_v50 = vld [vmem:[#allocation197_spill] sm:$0xff] }
 0x14a   :  { %15755 = vst [vmem:[#allocation332_spill] sm:$0xff] %v8894_v29  ;;  %15763 = vst [vmem:[#allocation336_spill] sm:$0xff] %v8910_v18  ;;  %v15766_v29 = vld [vmem:[#allocation195_spill] sm:$0xff]  ;;  %v8926_v46 = vmul.f32 %v15769_v50, %v15769_v50 }
 0x14b   :  { %15757 = vst [vmem:[#allocation333_spill] sm:$0xff] %v8898_v15  ;;  %15761 = vst [vmem:[#allocation335_spill] sm:$0xff] %v8906_v5  ;;  %v8918_v51 = vmul.f32 %v15766_v29, %v15766_v29  ;;  %v15767_v15 = vld [vmem:[#allocation196_spill] sm:$0xff]  ;;  %v15771_v5 = vld [vmem:[#allocation198_spill] sm:$0xff] }
 0x14c   :  { %15765 = vst [vmem:[#allocation337_spill] sm:$0xff] %v8914_v60  ;;  %v8922_v57 = vmul.f32 %v15767_v15, %v15767_v15  ;;  %15770 = vst [vmem:[#allocation339_spill] sm:$0xff] %v8926_v46  ;;  %v8930_v8 = vmul.f32 %v15771_v5, %v15771_v5  ;;  %v15773_v18 = vld [vmem:[#allocation199_spill] sm:$0xff]  ;;  %v15775_v60 = vld [vmem:[#allocation61_spill] sm:$0xff]  ;;  %v8942_v15 = vmul.f32 %v15777_v34, %v15777_v34 }
 0x14d   :  { %v8934_v54 = vmul.f32 %v15773_v18, %v15773_v18  ;;  %v8938_v29 = vmul.f32 %v15775_v60, %v15775_v60  ;;  %v15780_v46 = vld [vmem:[#allocation201_spill] sm:$0xff] }
 0x14e   :  { %15768 = vst [vmem:[#allocation338_spill] sm:$0xff] %v8922_v57  ;;  %15772 = vst [vmem:[#allocation340_spill] sm:$0xff] %v8930_v8  ;;  %v15779_v57 = vld [vmem:[#allocation200_spill] sm:$0xff]  ;;  %v8950_v5 = vmul.f32 %v15780_v46, %v15780_v46  ;;  %v15782_v8 = vld [vmem:[#allocation202_spill] sm:$0xff]  ;;  %v8970_v46 = vmul.f32 %v15790_v9, %v15790_v9 }
 0x14f   :  { %15774 = vst [vmem:[#allocation341_spill] sm:$0xff] %v8934_v54  ;;  %15776 = vst [vmem:[#allocation342_spill] sm:$0xff] %v8938_v29  ;;  %v8946_v50 = vmul.f32 %v15779_v57, %v15779_v57  ;;  %v8954_v18 = vmul.f32 %v15782_v8, %v15782_v8  ;;  %v15784_v54 = vld [vmem:[#allocation203_spill] sm:$0xff]  ;;  %v15786_v29 = vld [vmem:[#allocation204_spill] sm:$0xff] }
 0x150   :  { %15778 = vst [vmem:[#allocation343_spill] sm:$0xff] %v8942_v15  ;;  %15781 = vst [vmem:[#allocation344_spill] sm:$0xff] %v8950_v5  ;;  %v8958_v60 = vmul.f32 %v15784_v54, %v15784_v54  ;;  %v8962_v34 = vmul.f32 %v15786_v29, %v15786_v29  ;;  %v15788_v15 = vld [vmem:[#allocation62_spill] sm:$0xff]  ;;  %v15792_v5 = vld [vmem:[#allocation205_spill] sm:$0xff] }
 0x151   :  { %15783 = vst [vmem:[#allocation345_spill] sm:$0xff] %v8954_v18  ;;  %v8966_v57 = vmul.f32 %v15788_v15, %v15788_v15  ;;  %15791 = vst [vmem:[#allocation349_spill] sm:$0xff] %v8970_v46  ;;  %v8974_v8 = vmul.f32 %v15792_v5, %v15792_v5  ;;  %v15793_v18 = vld [vmem:[#allocation209_spill] sm:$0xff]  ;;  %v15801_v46 = vld [vmem:[#allocation63_spill] sm:$0xff] }
 0x152   :  { %15785 = vst [vmem:[#allocation346_spill] sm:$0xff] %v8958_v60  ;;  %15787 = vst [vmem:[#allocation347_spill] sm:$0xff] %v8962_v34  ;;  %v8978_v54 = vmul.f32 %v15793_v18, %v15793_v18  ;;  %v15795_v60 = vld [vmem:[#allocation213_spill] sm:$0xff]  ;;  %v15797_v34 = vld [vmem:[#allocation214_spill] sm:$0xff]  ;;  %v8994_v5 = vmul.f32 %v15801_v46, %v15801_v46  ;;  %v1247_v18 = vsel %vm348_vm0, %v8302_v17, 0.0 }
 0x153   :  { %15789 = vst [vmem:[#allocation348_spill] sm:$0xff] %v8966_v57  ;;  %v8982_v29 = vmul.f32 %v15795_v60, %v15795_v60  ;;  %v8986_v15 = vmul.f32 %v15797_v34, %v15797_v34  ;;  %v15799_v57 = vld [vmem:[#allocation9_spill] sm:$0xff]  ;;  %v15805_v60 = vld [vmem:[#allocation215_spill] sm:$0xff]  ;;  %v1248_v34 = vsel %vm348_vm0, %v8330_v14, 0.0 }
 0x154   :  { %15794 = vst [vmem:[#allocation350_spill] sm:$0xff] %v8978_v54  ;;  %v8990_v9 = vmul.f32 %v15799_v57, %v15799_v57  ;;  %15802 = vst [vmem:[#allocation354_spill] sm:$0xff] %v8994_v5  ;;  %v15803_v54 = vld [vmem:[#allocation82_spill] sm:$0xff]  ;;  %v1250_v57 = vsel %vm348_vm0, %v8358_v4, 0.0  ;;  %v15813_v14 = vld [vmem:[#allocation65_spill] sm:$0xff] }
 0x155   :  { %15796 = vst [vmem:[#allocation351_spill] sm:$0xff] %v8982_v29  ;;  %15798 = vst [vmem:[#allocation352_spill] sm:$0xff] %v8986_v15  ;;  %v9000_v3 = vmul.f32 %v15803_v54, %v15803_v54  ;;  %v9004_v29 = vmul.f32 %v15805_v60, %v15805_v60  ;;  %v15807_v5 = vld [vmem:[#allocation2_spill] sm:$0xff]  ;;  %v15809_v54 = vld [vmem:[#allocation3_spill] sm:$0xff]  ;;  %v1249_v60 = vadd.f32 %v1248_v34, %v1247_v18 }
 0x156   :  { %15800 = vst [vmem:[#allocation353_spill] sm:$0xff] %v8990_v9  ;;  %v15806_v9 = vld [vmem:[#allocation216_spill] sm:$0xff]  ;;  %v9016_v17 = vmul.f32 %v15807_v5, %v15807_v5  ;;  %v15811_v15 = vld [vmem:[#allocation14_spill] sm:$0xff]  ;;  %v9028_v4 = vmul.f32 %v15813_v14, %v15813_v14  ;;  %v1252_v5 = vsel %vm348_vm0, %v8386_v59, 0.0 }
 0x157   :  { %15804 = vst [vmem:[#allocation355_spill] sm:$0xff] %v9000_v3  ;;  %v9012_v46 = vmul.f32 %v15806_v9, %v15806_v9  ;;  %v9020_v3 = vmul.f32 %v15809_v54, %v15809_v54  ;;  %v9024_v49 = vmul.f32 %v15811_v15, %v15811_v15  ;;  %v9032_v9 = vmul.f32 %v15815_v25, %v15815_v25  ;;  %v15818_v34 = vld [vmem:[#allocation218_spill] sm:$0xff]  ;;  %v15820_v15 = vld [vmem:[#allocation219_spill] sm:$0xff] }
 0x158   :  { %15808 = vst [vmem:[#allocation356_spill] sm:$0xff] %v9016_v17  ;;  %15814 = vst [vmem:[#allocation359_spill] sm:$0xff] %v9028_v4  ;;  %v15817_v17 = vld [vmem:[#allocation4_spill] sm:$0xff]  ;;  %v9042_v18 = vmul.f32 %v15818_v34, %v15818_v34  ;;  %v1251_v14 = vadd.f32 %v1250_v57, %v1249_v60  ;;  %v1254_v34 = vsel %vm348_vm0, %v8414_v30, 0.0  ;;  %v9068_v60 = vmul.f32 %v8162_v26, %v8162_v26  ;;  %v15829_v57 = vld [vmem:[#allocation5_spill] sm:$0xff] }
 0x159   :  { %15810 = vst [vmem:[#allocation357_spill] sm:$0xff] %v9020_v3  ;;  %15812 = vst [vmem:[#allocation358_spill] sm:$0xff] %v9024_v49  ;;  %v9038_v54 = vmul.f32 %v15817_v17, %v15817_v17  ;;  %v9046_v49 = vmul.f32 %v15820_v15, %v15820_v15  ;;  %v15821_v4 = vld [vmem:[#allocation220_spill] sm:$0xff]  ;;  %v15825_v3 = vld [vmem:[#allocation66_spill] sm:$0xff]  ;;  %v1256_v26 = vsel %vm348_vm0, %v8442_v22, 0.0 }
 0x15a   :  { %15816 = vst [vmem:[#allocation360_spill] sm:$0xff] %v9032_v9  ;;  %15819 = vst [vmem:[#allocation361_spill] sm:$0xff] %v9042_v18  ;;  %v9050_v25 = vmul.f32 %v15821_v4, %v15821_v4  ;;  %v15823_v9 = vld [vmem:[#allocation23_spill] sm:$0xff]  ;;  %v9058_v17 = vmul.f32 %v15825_v3, %v15825_v3  ;;  %v15827_v18 = vld [vmem:[#allocation221_spill] sm:$0xff]  ;;  %v9072_v4 = vmul.f32 %v15829_v57, %v15829_v57 }
 0x15b   :  { %v9054_v59 = vmul.f32 %v15823_v9, %v15823_v9  ;;  %v9064_v15 = vmul.f32 %v15827_v18, %v15827_v18  ;;  %v1253_v9 = vadd.f32 %v1252_v5, %v1251_v14  ;;  %v15837_v5 = vld [vmem:[#allocation223_spill] sm:$0xff] }
 0x15c   :  { %15822 = vst [vmem:[#allocation362_spill] sm:$0xff] %v9050_v25  ;;  %15826 = vst [vmem:[#allocation364_spill] sm:$0xff] %v9058_v17  ;;  %v15831_v17 = vld [vmem:[#allocation7_spill] sm:$0xff]  ;;  %v15833_v25 = vld [vmem:[#allocation30_spill] sm:$0xff]  ;;  %v9094_v14 = vmul.f32 %v15837_v5, %v15837_v5  ;;  %v1310_v5 = vsel %vm348_vm0, %v8306_v21, 0.0  ;;  %v1260_v21 = vsel %vm348_vm0, %v8498_v39, 0.0 }
 0x15d   :  { %15824 = vst [vmem:[#allocation363_spill] sm:$0xff] %v9054_v59  ;;  %15828 = vst [vmem:[#allocation365_spill] sm:$0xff] %v9064_v15  ;;  %v15830_v59 = vld [vmem:[#allocation6_spill] sm:$0xff]  ;;  %v9080_v30 = vmul.f32 %v15831_v17, %v15831_v17  ;;  %v9084_v18 = vmul.f32 %v15833_v25, %v15833_v25  ;;  %v15835_v15 = vld [vmem:[#allocation69_spill] sm:$0xff]  ;;  %v1255_v17 = vadd.f32 %v1254_v34, %v1253_v9  ;;  %v1311_v9 = vsel %vm348_vm0, %v8334_v62, 0.0 }
 0x15e   :  { %v9076_v3 = vmul.f32 %v15830_v59, %v15830_v59  ;;  %v9090_v57 = vmul.f32 %v15835_v15, %v15835_v15  ;;  %15838 = vst [vmem:[#allocation369_spill] sm:$0xff] %v9094_v14  ;;  %v9098_v59 = vmul.f32 %v8190_v37, %v8190_v37  ;;  %v1258_v15 = vsel %vm348_vm0, %v8470_v1, 0.0  ;;  %v15842_v14 = vld [vmem:[#allocation12_spill] sm:$0xff]  ;;  %v15847_v62 = vld [vmem:[#allocation17_spill] sm:$0xff] }
 0x15f   :  { %15832 = vst [vmem:[#allocation366_spill] sm:$0xff] %v9080_v30  ;;  %15834 = vst [vmem:[#allocation367_spill] sm:$0xff] %v9084_v18  ;;  %v15839_v30 = vld [vmem:[#allocation10_spill] sm:$0xff]  ;;  %v15840_v18 = vld [vmem:[#allocation11_spill] sm:$0xff]  ;;  %v1257_v37 = vadd.f32 %v1256_v26, %v1255_v17  ;;  %v1313_v34 = vsel %vm348_vm0, %v8362_v11, 0.0  ;;  %v9126_v1 = vmul.f32 %v8218_v16, %v8218_v16  ;;  %v9136_v17 = vmul.f32 %v15847_v62, %v15847_v62 }
 0x160   :  { %15836 = vst [vmem:[#allocation368_spill] sm:$0xff] %v9090_v57  ;;  %v9102_v25 = vmul.f32 %v15839_v30, %v15839_v30  ;;  %v9106_v22 = vmul.f32 %v15840_v18, %v15840_v18  ;;  %v9114_v57 = vmul.f32 %v15842_v14, %v15842_v14  ;;  %v15844_v30 = vld [vmem:[#allocation38_spill] sm:$0xff]  ;;  %v1312_v14 = vadd.f32 %v1311_v9, %v1310_v5 }
 0x161   :  { %v9122_v18 = vmul.f32 %v15844_v30, %v15844_v30  ;;  %v1259_v11 = vadd.f32 %v1258_v15, %v1257_v37  ;;  %v1315_v30 = vsel %vm348_vm0, %v8390_v24, 0.0  ;;  %v1262_v5 = vsel %vm348_vm0, %v8526_v2, 0.0  ;;  %v15853_v15 = vld [vmem:[#allocation27_spill] sm:$0xff] }
 0x162   :  { %15841 = vst [vmem:[#allocation370_spill] sm:$0xff] %v9106_v22  ;;  %15843 = vst [vmem:[#allocation371_spill] sm:$0xff] %v9114_v57  ;;  %v15846_v57 = vld [vmem:[#allocation16_spill] sm:$0xff]  ;;  %v15850_v22 = vld [vmem:[#allocation46_spill] sm:$0xff]  ;;  %v1314_v9 = vadd.f32 %v1313_v34, %v1312_v14  ;;  %v9156_v37 = vmul.f32 %v15853_v15, %v15853_v15  ;;  %v1264_v14 = vsel %vm348_vm0, %v8554_v13, 0.0 }
 0x163   :  { %15845 = vst [vmem:[#allocation372_spill] sm:$0xff] %v9122_v18  ;;  %v9132_v26 = vmul.f32 %v15846_v57, %v15846_v57  ;;  %v15848_v18 = vld [vmem:[#allocation18_spill] sm:$0xff]  ;;  %v9146_v39 = vmul.f32 %v15850_v22, %v15850_v22  ;;  %v1261_v24 = vadd.f32 %v1260_v21, %v1259_v11  ;;  %v15856_v21 = vld [vmem:[#allocation49_spill] sm:$0xff]  ;;  %v5317_v13 = vld [vmem:[%s14620_s1 + $0x35] ss:$0 sm:$0xff] }
 0x164   :  { %v9142_v16 = vmul.f32 %v15848_v18, %v15848_v18  ;;  %v15852_v57 = vld [vmem:[#allocation26_spill] sm:$0xff]  ;;  %v1317_v18 = vsel %vm348_vm0, %v8418_v28, 0.0  ;;  %v1316_v34 = vadd.f32 %v1315_v30, %v1314_v9  ;;  %v9175_v11 = vmul.f32 %v15856_v21, %v15856_v21  ;;  %2690 = vperm.xlu0 %5453, %v5317_v13  }
 0x165   :  { %15851 = vst [vmem:[#allocation374_spill] sm:$0xff] %v9146_v39  ;;  %v9152_v62 = vmul.f32 %v15852_v57, %v15852_v57  ;;  %v15855_v39 = vld [vmem:[#allocation34_spill] sm:$0xff]  ;;  %v5348_v57 = vld [vmem:[%s14620_s1 + $0x54] ss:$0 sm:$0xff]  ;;  %v9179_v28 = vmul.f32 %v8274_v31, %v8274_v31  ;;  %v9188_v30 = vmul.f32 %v8278_v47, %v8278_v47  ;;  %v9192_v9 = vmul.f32 %v8282_v0, %v8282_v0 }
 0x166   :  { %15849 = vst [vmem:[#allocation373_spill] sm:$0xff] %v9142_v16  ;;  %v15854_v16 = vld [vmem:[#allocation31_spill] sm:$0xff]  ;;  %v9166_v2 = vmul.f32 %v15855_v39, %v15855_v39  ;;  %v1319_v39 = vsel %vm348_vm0, %v8446_v33, 0.0  ;;  %3198 = vperm.xlu1 %5454, %v5348_v57   ;;  %v1266_v21 = vsel %vm348_vm0, %v8582_v23, 0.0  ;;  %v1268_v33 = vsel %vm348_vm0, %v8610_v53, 0.0 }
 0x167   :  { %v9162_v22 = vmul.f32 %v15854_v16, %v15854_v16  ;;  %v1263_v16 = vadd.f32 %v1262_v5, %v1261_v24  ;;  %v1318_v5 = vadd.f32 %v1317_v18, %v1316_v34  ;;  %v1270_v57 = vsel %vm348_vm0, %v8638_v19, 0.0  ;;  %v5318_v53 = vld [vmem:[%s14620_s1 + $0x36] ss:$0 sm:$0xff] }
 0x168   :  { %v1321_v31 = vsel %vm348_vm0, %v8474_v63, 0.0  ;;  %v1272_v47 = vsel %vm348_vm0, %v8666_v38, 0.0  ;;  %v1274_v0 = vsel %vm348_vm0, %v8694_v58, 0.0  ;;  %v1276_v23 = vsel %vm348_vm0, %v8722_v7, 0.0  ;;  %v5287_v7 = vld [vmem:[%s14620_s1 + $0x17] ss:$0 sm:$0xff] }
 0x169   :  { %v1265_v24 = vadd.f32 %v1264_v14, %v1263_v16  ;;  %v1320_v18 = vadd.f32 %v1319_v39, %v1318_v5  ;;  %v1323_v19 = vsel %vm348_vm0, %v8502_v27, 0.0  ;;  %v1373_v63 = vsel %vm348_vm0, %v8310_v55, 0.0  ;;  %2186 = vperm.xlu0 %5453, %v5287_v7  }
 0x16a   :  { %v1374_v38 = vsel %vm348_vm0, %v8338_v10, 0.0  ;;  %2694 = vperm.xlu1 %5454, %v5318_v53   ;;  %v9222_v58 = vsel %vm348_vm0, %v8750_v48, 0.0  ;;  %v1376_v27 = vsel %vm348_vm0, %v8366_v42, 0.0  ;;  %v9228_v55 = vsel %vm348_vm0, %v8778_v56, 0.0  ;;  %v5288_v56 = vld [vmem:[%s14620_s1 + $0x18] ss:$0 sm:$0xff] }
 0x16b   :  { %v1267_v16 = vadd.f32 %v1266_v21, %v1265_v24  ;;  %v1322_v39 = vadd.f32 %v1321_v31, %v1320_v18  ;;  %v1375_v14 = vadd.f32 %v1374_v38, %v1373_v63  ;;  %v1325_v10 = vsel %vm348_vm0, %v8530_v40, 0.0  ;;  %v5349_v40 = vld [vmem:[%s14620_s1 + $0x55] ss:$0 sm:$0xff] }
 0x16c   :  { %v1378_v21 = vsel %vm348_vm0, %v8394_v61, 0.0  ;;  %v9236_v48 = vsel %vm348_vm0, %v8806_v52, 0.0  ;;  %v9240_v31 = vsel %vm348_vm0, %v8834_v6, 0.0  ;;  %v9250_v61 = vsel %vm348_vm0, %v8862_v44, 0.0 }
 0x16d   :  { %v1269_v34 = vadd.f32 %v1268_v33, %v1267_v16  ;;  %v1324_v42 = vadd.f32 %v1323_v19, %v1322_v39  ;;  %v1377_v13 = vadd.f32 %v1376_v27, %v1375_v14  ;;  %v1327_v52 = vsel %vm348_vm0, %v8558_v20, 0.0  ;;  %3202 = vperm.xlu0 %5453, %v5349_v40  }
 0x16e   :  { %v1380_v6 = vsel %vm348_vm0, %v8422_v35, 0.0  ;;  %2190 = vperm.xlu1 %5454, %v5288_v56   ;;  %v9258_v24 = vsel %vm348_vm0, %v8890_v41, 0.0  ;;  %v9262_v33 = vsel %vm348_vm0, %v8918_v51, 0.0  ;;  %v9266_v53 = vsel %vm348_vm0, %v8946_v50, 0.0  ;;  %v5350_v50 = vld [vmem:[%s14620_s1 + $0x56] ss:$0 sm:$0xff] }
 0x16f   :  { %v1271_v5 = vadd.f32 %v1270_v57, %v1269_v34  ;;  %v1326_v57 = vadd.f32 %v1325_v10, %v1324_v42  ;;  %v1379_v18 = vadd.f32 %v1378_v21, %v1377_v13  ;;  %v1329_v20 = vsel %vm348_vm0, %v8586_v43, 0.0  ;;  %v5319_v43 = vld [vmem:[%s14620_s1 + $0x37] ss:$0 sm:$0xff]  ;;  %v15859_v21 = vld [vmem:[#allocation290_spill] sm:$0xff]  ;;  %v15861_v13 = vld [vmem:[#allocation259_spill] sm:$0xff] }
 0x170   :  { %v1382_v35 = vsel %vm348_vm0, %v8450_v12, 0.0  ;;  %v9274_v41 = vsel %vm348_vm0, %v8974_v8, 0.0  ;;  %v9278_v51 = vsel %vm348_vm0, %v9004_v29, 0.0  ;;  %v9288_v12 = vsel %vm348_vm0, %v9038_v54, 0.0  ;;  %v15858_v34 = vld [vmem:[#allocation284_spill] sm:$0xff] }
 0x171   :  { %v1273_v44 = vadd.f32 %v1272_v47, %v1271_v5  ;;  %v1328_v16 = vadd.f32 %v1327_v52, %v1326_v57  ;;  %v1381_v47 = vadd.f32 %v1380_v6, %v1379_v18  ;;  %v1331_v8 = vsel %vm348_vm0, %v8614_v32, 0.0  ;;  %2698 = vperm.xlu0 %5453, %v5319_v43   ;;  %v15857_v32 = vld [vmem:[#allocation254_spill] sm:$0xff]  ;;  %v15860_v42 = vld [vmem:[#allocation296_spill] sm:$0xff] }
 0x172   :  { %v1384_v29 = vsel %vm348_vm0, %v8478_v36, 0.0  ;;  %3206 = vperm.xlu1 %5454, %v5350_v50   ;;  %v9296_v63 = vsel %vm348_vm0, %v9068_v60, 0.0  ;;  %v9300_v38 = vsel %vm348_vm0, %v9098_v59, 0.0  ;;  %v9304_v39 = vsel %vm348_vm0, %v9126_v1, 0.0  ;;  %v5320_v1 = vld [vmem:[%s14620_s1 + $0x38] ss:$0 sm:$0xff] }
 0x173   :  { %v1275_v19 = vadd.f32 %v1274_v0, %v1273_v44  ;;  %v1330_v0 = vadd.f32 %v1329_v20, %v1328_v16  ;;  %v1383_v7 = vadd.f32 %v1382_v35, %v1381_v47  ;;  %v1333_v36 = vsel %vm348_vm0, %v8642_v45, 0.0  ;;  %v5289_v45 = vld [vmem:[%s14620_s1 + $0x19] ss:$0 sm:$0xff]  ;;  %v15862_v52 = vld [vmem:[#allocation226_spill] sm:$0xff]  ;;  %v15864_v20 = vld [vmem:[#allocation264_spill] sm:$0xff] }
 0x174   :  { %v1386_v14 = vsel %vm348_vm0, %v15857_v32, 0.0  ;;  %v9312_v60 = vsel %vm348_vm0, %v9152_v62, 0.0  ;;  %v9316_v59 = vsel %vm348_vm0, %v9179_v28, 0.0  ;;  %v1335_v10 = vsel %vm348_vm0, %v15858_v34, 0.0  ;;  %v15863_v57 = vld [vmem:[#allocation230_spill] sm:$0xff] }
 0x175   :  { %v1277_v54 = vadd.f32 %v1276_v23, %v1275_v19  ;;  %v1332_v27 = vadd.f32 %v1331_v8, %v1330_v0  ;;  %v1385_v23 = vadd.f32 %v1384_v29, %v1383_v7  ;;  %v1337_v62 = vsel %vm348_vm0, %v15859_v21, 0.0  ;;  %2194 = vperm.xlu0 %5453, %v5289_v45   ;;  %v15865_v47 = vld [vmem:[#allocation234_spill] sm:$0xff] }
 0x176   :  { %v1339_v28 = vsel %vm348_vm0, %v15860_v42, 0.0  ;;  %v1388_v56 = vsel %vm348_vm0, %v15861_v13, 0.0  ;;  %2702 = vperm.xlu1 %5454, %v5320_v1   ;;  %v1436_v6 = vsel %vm348_vm0, %v15862_v52, 0.0  ;;  %v1437_v18 = vsel %vm348_vm0, %v15863_v57, 0.0  ;;  %v15866_v19 = vld [vmem:[#allocation302_spill] sm:$0xff] }
 0x177   :  { %v1334_v40 = vadd.f32 %v1333_v36, %v1332_v27  ;;  %v1387_v5 = vadd.f32 %v1386_v14, %v1385_v23  ;;  %v1279_v44 = vadd.f32 %v9222_v58, %v1277_v54  ;;  %v1390_v35 = vsel %vm348_vm0, %v15864_v20, 0.0  ;;  %v15867_v0 = vld [vmem:[#allocation238_spill] sm:$0xff]  ;;  %v5290_v36 = vld [vmem:[%s14620_s1 + $0x1a] ss:$0 sm:$0xff]  ;;  %v5351_v58 = vld [vmem:[%s14620_s1 + $0x57] ss:$0 sm:$0xff] }
 0x178   :  { %v1438_v16 = vadd.f32 %v1437_v18, %v1436_v6  ;;  %v1439_v50 = vsel %vm348_vm0, %v15865_v47, 0.0  ;;  %v1341_v8 = vsel %vm348_vm0, %v15866_v19, 0.0  ;;  %v1441_v7 = vsel %vm348_vm0, %v15867_v0, 0.0  ;;  %v15868_v54 = vld [vmem:[#allocation308_spill] sm:$0xff]  ;;  %v15869_v14 = vld [vmem:[#allocation314_spill] sm:$0xff]  ;;  %v15870_v23 = vld [vmem:[#allocation269_spill] sm:$0xff] }
 0x179   :  { %v1336_v43 = vadd.f32 %v1335_v10, %v1334_v40  ;;  %v1389_v29 = vadd.f32 %v1388_v56, %v1387_v5  ;;  %v1343_v32 = vsel %vm348_vm0, %v15868_v54, 0.0  ;;  %v1345_v27 = vsel %vm348_vm0, %v15869_v14, 0.0  ;;  %v15871_v10 = vld [vmem:[#allocation320_spill] sm:$0xff]  ;;  %v15872_v13 = vld [vmem:[#allocation242_spill] sm:$0xff]  ;;  %3210 = vperm.xlu0 %5453, %v5351_v58   ;;  %v15879_v0 = vld [vmem:[#allocation279_spill] sm:$0xff] }
 0x17a   :  { %v1392_v1 = vsel %vm348_vm0, %v15870_v23, 0.0  ;;  %v1440_v45 = vadd.f32 %v1439_v50, %v1438_v16  ;;  %2198 = vperm.xlu1 %5454, %v5290_v36   ;;  %v1347_v21 = vsel %vm348_vm0, %v15871_v10, 0.0  ;;  %v1443_v56 = vsel %vm348_vm0, %v15872_v13, 0.0  ;;  %v15873_v5 = vld [vmem:[#allocation326_spill] sm:$0xff]  ;;  %v15875_v16 = vld [vmem:[#allocation332_spill] sm:$0xff] }
 0x17b   :  { %v1338_v34 = vadd.f32 %v1337_v62, %v1336_v43  ;;  %v1391_v42 = vadd.f32 %v1390_v35, %v1389_v29  ;;  %v1281_v40 = vadd.f32 %v9228_v55, %v1279_v44  ;;  %v1349_v52 = vsel %vm348_vm0, %v15873_v5, 0.0  ;;  %v15874_v6 = vld [vmem:[#allocation274_spill] sm:$0xff]  ;;  %v5352_v55 = vld [vmem:[%s14620_s1 + $0x58] ss:$0 sm:$0xff]  ;;  %v5321_v44 = vld [vmem:[%s14620_s1 + $0x39] ss:$0 sm:$0xff] }
 0x17c   :  { %v1394_v57 = vsel %vm348_vm0, %v15874_v6, 0.0  ;;  %v1442_v18 = vadd.f32 %v1441_v7, %v1440_v45  ;;  %v9368_v62 = vsel %vm348_vm0, %v15875_v16, 0.0  ;;  %v15876_v35 = vld [vmem:[#allocation246_spill] sm:$0xff]  ;;  %v1396_v7 = vsel %vm348_vm0, %v15879_v0, 0.0  ;;  %v15883_v5 = vld [vmem:[#allocation361_spill] sm:$0xff]  ;;  %v15885_v16 = vld [vmem:[#allocation43_spill] sm:$0xff] }
 0x17d   :  { %v1340_v20 = vadd.f32 %v1339_v28, %v1338_v34  ;;  %v1393_v47 = vadd.f32 %v1392_v1, %v1391_v42  ;;  %v1445_v50 = vsel %vm348_vm0, %v15876_v35, 0.0  ;;  %v15877_v43 = vld [vmem:[#allocation338_spill] sm:$0xff]  ;;  %v15878_v28 = vld [vmem:[#allocation344_spill] sm:$0xff]  ;;  %2706 = vperm.xlu0 %5453, %v5321_v44   ;;  %v1283_v34 = vadd.f32 %v9236_v48, %v1281_v40  ;;  %v15882_v42 = vld [vmem:[#allocation285_spill] sm:$0xff] }
 0x17e   :  { %v9380_v19 = vsel %vm348_vm0, %v15877_v43, 0.0  ;;  %v9384_v29 = vsel %vm348_vm0, %v15878_v28, 0.0  ;;  %v1444_v36 = vadd.f32 %v1443_v56, %v1442_v18  ;;  %3214 = vperm.xlu1 %5454, %v5352_v55   ;;  %v15880_v54 = vld [vmem:[#allocation350_spill] sm:$0xff]  ;;  %v9397_v10 = vsel %vm348_vm0, %v9012_v46, 0.0  ;;  %v15884_v18 = vld [vmem:[#allocation255_spill] sm:$0xff] }
 0x17f   :  { %v1342_v58 = vadd.f32 %v1341_v8, %v1340_v20  ;;  %v9390_v14 = vsel %vm348_vm0, %v15880_v54, 0.0  ;;  %v1395_v23 = vadd.f32 %v1394_v57, %v1393_v47  ;;  %v15881_v1 = vld [vmem:[#allocation250_spill] sm:$0xff]  ;;  %v1398_v13 = vsel %vm348_vm0, %v15882_v42, 0.0  ;;  %v15886_v40 = vld [vmem:[#allocation291_spill] sm:$0xff]  ;;  %v5322_v35 = vld [vmem:[%s14620_s1 + $0x3a] ss:$0 sm:$0xff] }
 0x180   :  { %v1447_v45 = vsel %vm348_vm0, %v15881_v1, 0.0  ;;  %v1446_v56 = vadd.f32 %v1445_v50, %v1444_v36  ;;  %v9403_v6 = vsel %vm348_vm0, %v15883_v5, 0.0  ;;  %v1449_v20 = vsel %vm348_vm0, %v15884_v18, 0.0  ;;  %v5291_v50 = vld [vmem:[%s14620_s1 + $0x1b] ss:$0 sm:$0xff]  ;;  %v15893_v5 = vld [vmem:[#allocation227_spill] sm:$0xff] }
 0x181   :  { %v1344_v8 = vadd.f32 %v1343_v32, %v1342_v58  ;;  %v1397_v57 = vadd.f32 %v1396_v7, %v1395_v23  ;;  %v9409_v48 = vmul.f32 %v15885_v16, %v15885_v16  ;;  %v9413_v46 = vsel %vm348_vm0, %v9072_v4, 0.0  ;;  %v15887_v4 = vld [vmem:[#allocation260_spill] sm:$0xff]  ;;  %2202 = vperm.xlu0 %5453, %v5291_v50   ;;  %v15888_v36 = vld [vmem:[#allocation297_spill] sm:$0xff]  ;;  %v15894_v18 = vld [vmem:[#allocation231_spill] sm:$0xff] }
 0x182   :  { %v1400_v47 = vsel %vm348_vm0, %v15886_v40, 0.0  ;;  %v1448_v32 = vadd.f32 %v1447_v45, %v1446_v56  ;;  %v9425_v44 = vsel %vm348_vm0, %v9102_v25, 0.0  ;;  %v1451_v28 = vsel %vm348_vm0, %v15887_v4, 0.0  ;;  %2710 = vperm.xlu1 %5454, %v5322_v35   ;;  %v15889_v1 = vld [vmem:[#allocation265_spill] sm:$0xff] }
 0x183   :  { %v1346_v55 = vadd.f32 %v1345_v27, %v1344_v8  ;;  %v1399_v43 = vadd.f32 %v1398_v13, %v1397_v57  ;;  %v1285_v0 = vadd.f32 %v9240_v31, %v1283_v34  ;;  %v9432_v7 = vsel %vm348_vm0, %v9132_v26, 0.0  ;;  %v15890_v34 = vld [vmem:[#allocation303_spill] sm:$0xff]  ;;  %v15891_v42 = vld [vmem:[#allocation309_spill] sm:$0xff]  ;;  %v15892_v8 = vld [vmem:[#allocation270_spill] sm:$0xff] }
 0x184   :  { %v1402_v58 = vsel %vm348_vm0, %v15888_v36, 0.0  ;;  %v1450_v27 = vadd.f32 %v1449_v20, %v1448_v32  ;;  %v9438_v25 = vsel %vm348_vm0, %v9156_v37, 0.0  ;;  %v1453_v45 = vsel %vm348_vm0, %v15889_v1, 0.0  ;;  %v15895_v32 = vld [vmem:[#allocation235_spill] sm:$0xff] }
 0x185   :  { %v1348_v54 = vadd.f32 %v1347_v21, %v1346_v55  ;;  %v1401_v23 = vadd.f32 %v1400_v47, %v1399_v43  ;;  %v9444_v31 = vsel %vm348_vm0, %v9188_v30, 0.0  ;;  %v1404_v26 = vsel %vm348_vm0, %v15890_v34, 0.0  ;;  %v15896_v43 = vld [vmem:[#allocation275_spill] sm:$0xff] }
 0x186   :  { %v1406_v13 = vsel %vm348_vm0, %v15891_v42, 0.0  ;;  %v1452_v56 = vadd.f32 %v1451_v28, %v1450_v27  ;;  %v1455_v37 = vsel %vm348_vm0, %v15892_v8, 0.0  ;;  %v1499_v57 = vsel %vm348_vm0, %v15893_v5, 0.0  ;;  %v15897_v28 = vld [vmem:[#allocation239_spill] sm:$0xff]  ;;  %v15903_v8 = vld [vmem:[#allocation333_spill] sm:$0xff] }
 0x187   :  { %v1403_v21 = vadd.f32 %v1402_v58, %v1401_v23  ;;  %v1500_v20 = vsel %vm348_vm0, %v15894_v18, 0.0  ;;  %v1287_v30 = vadd.f32 %v9250_v61, %v1285_v0  ;;  %v1502_v35 = vsel %vm348_vm0, %v15895_v32, 0.0  ;;  %v15898_v58 = vld [vmem:[#allocation315_spill] sm:$0xff]  ;;  %v15899_v23 = vld [vmem:[#allocation321_spill] sm:$0xff] }
 0x188   :  { %v1454_v40 = vadd.f32 %v1453_v45, %v1452_v56  ;;  %v1501_v47 = vadd.f32 %v1500_v20, %v1499_v57  ;;  %v1350_v50 = vadd.f32 %v1349_v52, %v1348_v54  ;;  %v1457_v4 = vsel %vm348_vm0, %v15896_v43, 0.0  ;;  %v15900_v34 = vld [vmem:[#allocation327_spill] sm:$0xff]  ;;  %v15901_v52 = vld [vmem:[#allocation280_spill] sm:$0xff]  ;;  %v15907_v43 = vld [vmem:[#allocation345_spill] sm:$0xff] }
 0x189   :  { %v1405_v55 = vadd.f32 %v1404_v26, %v1403_v21  ;;  %v1504_v36 = vsel %vm348_vm0, %v15897_v28, 0.0  ;;  %v1408_v27 = vsel %vm348_vm0, %v15898_v58, 0.0  ;;  %v1410_v1 = vsel %vm348_vm0, %v15899_v23, 0.0  ;;  %v15902_v26 = vld [vmem:[#allocation243_spill] sm:$0xff] }
 0x18a   :  { %v1456_v61 = vadd.f32 %v1455_v37, %v1454_v40  ;;  %v1503_v0 = vadd.f32 %v1502_v35, %v1501_v47  ;;  %v1412_v42 = vsel %vm348_vm0, %v15900_v34, 0.0  ;;  %v1459_v54 = vsel %vm348_vm0, %v15901_v52, 0.0  ;;  %v5353_v37 = vld [vmem:[%s14620_s1 + $0x59] ss:$0 sm:$0xff]  ;;  %v15904_v47 = vld [vmem:[#allocation286_spill] sm:$0xff]  ;;  %v15906_v35 = vld [vmem:[#allocation339_spill] sm:$0xff] }
 0x18b   :  { %v1407_v45 = vadd.f32 %v1406_v13, %v1405_v55  ;;  %v1506_v56 = vsel %vm348_vm0, %v15902_v26, 0.0  ;;  %v1289_v21 = vadd.f32 %v9258_v24, %v1287_v30  ;;  %v1414_v5 = vsel %vm348_vm0, %v15903_v8, 0.0  ;;  %v5292_v13 = vld [vmem:[%s14620_s1 + $0x1c] ss:$0 sm:$0xff]  ;;  %v15905_v24 = vld [vmem:[#allocation247_spill] sm:$0xff]  ;;  %3218 = vperm.xlu0 %5453, %v5353_v37   ;;  %v15911_v34 = vld [vmem:[#allocation356_spill] sm:$0xff] }
 0x18c   :  { %v1458_v57 = vadd.f32 %v1457_v4, %v1456_v61  ;;  %v1505_v18 = vadd.f32 %v1504_v36, %v1503_v0  ;;  %v1352_v20 = vadd.f32 %v9368_v62, %v1350_v50  ;;  %v1461_v32 = vsel %vm348_vm0, %v15904_v47, 0.0  ;;  %2206 = vperm.xlu1 %5454, %v5292_v13   ;;  %v15908_v23 = vld [vmem:[#allocation351_spill] sm:$0xff]  ;;  %v15909_v50 = vld [vmem:[#allocation292_spill] sm:$0xff]  ;;  %v5354_v37 = vld [vmem:[%s14620_s1 + $0x5a] ss:$0 sm:$0xff] }
 0x18d   :  { %v1409_v40 = vadd.f32 %v1408_v27, %v1407_v45  ;;  %v1508_v30 = vsel %vm348_vm0, %v15905_v24, 0.0  ;;  %v1416_v55 = vsel %vm348_vm0, %v15906_v35, 0.0  ;;  %v1418_v4 = vsel %vm348_vm0, %v15907_v43, 0.0  ;;  %v15910_v61 = vld [vmem:[#allocation251_spill] sm:$0xff]  ;;  %v15914_v47 = vld [vmem:[#allocation370_spill] sm:$0xff]  ;;  %v15915_v24 = vld [vmem:[#allocation304_spill] sm:$0xff] }
 0x18e   :  { %v1460_v28 = vadd.f32 %v1459_v54, %v1458_v57  ;;  %v1507_v36 = vadd.f32 %v1506_v56, %v1505_v18  ;;  %v1420_v62 = vsel %vm348_vm0, %v15908_v23, 0.0  ;;  %v1463_v27 = vsel %vm348_vm0, %v15909_v50, 0.0  ;;  %v15912_v56 = vld [vmem:[#allocation298_spill] sm:$0xff]  ;;  %v15913_v18 = vld [vmem:[#allocation256_spill] sm:$0xff]  ;;  %v15916_v35 = vld [vmem:[#allocation261_spill] sm:$0xff] }
 0x18f   :  { %v1411_v58 = vadd.f32 %v1410_v1, %v1409_v40  ;;  %v1510_v0 = vsel %vm348_vm0, %v15910_v61, 0.0  ;;  %v1291_v45 = vadd.f32 %v9262_v33, %v1289_v21  ;;  %v9500_v52 = vsel %vm348_vm0, %v15911_v34, 0.0  ;;  %v5323_v33 = vld [vmem:[%s14620_s1 + $0x3b] ss:$0 sm:$0xff]  ;;  %v15917_v23 = vld [vmem:[#allocation310_spill] sm:$0xff] }
 0x190   :  { %v1462_v26 = vadd.f32 %v1461_v32, %v1460_v28  ;;  %v1509_v8 = vadd.f32 %v1508_v30, %v1507_v36  ;;  %v1354_v54 = vadd.f32 %v9380_v19, %v1352_v20  ;;  %v1465_v57 = vsel %vm348_vm0, %v15912_v56, 0.0  ;;  %3222 = vperm.xlu1 %5454, %v5354_v37   ;;  %2714 = vperm.xlu0 %5453, %v5323_v33   ;;  %v15924_v33 = vld [vmem:[#allocation334_spill] sm:$0xff] }
 0x191   :  { %v1413_v1 = vadd.f32 %v1412_v42, %v1411_v58  ;;  %v1512_v13 = vsel %vm348_vm0, %v15913_v18, 0.0  ;;  %v9515_v21 = vsel %vm348_vm0, %v9046_v49, 0.0  ;;  %v9519_v19 = vsel %vm348_vm0, %v9076_v3, 0.0 }
 0x192   :  { %v1464_v42 = vadd.f32 %v1463_v27, %v1462_v26  ;;  %v1511_v20 = vadd.f32 %v1510_v0, %v1509_v8  ;;  %v9523_v32 = vsel %vm348_vm0, %v15914_v47, 0.0  ;;  %v1467_v30 = vsel %vm348_vm0, %v15915_v24, 0.0  ;;  %v15918_v27 = vld [vmem:[#allocation266_spill] sm:$0xff]  ;;  %v15919_v26 = vld [vmem:[#allocation316_spill] sm:$0xff]  ;;  %v5293_v47 = vld [vmem:[%s14620_s1 + $0x1d] ss:$0 sm:$0xff] }
 0x193   :  { %v1415_v40 = vadd.f32 %v1414_v5, %v1413_v1  ;;  %v1514_v49 = vsel %vm348_vm0, %v15916_v35, 0.0  ;;  %v1293_v43 = vadd.f32 %v9266_v53, %v1291_v45  ;;  %v9532_v3 = vsel %vm348_vm0, %v9136_v17, 0.0 }
 0x194   :  { %v1466_v28 = vadd.f32 %v1465_v57, %v1464_v42  ;;  %v1513_v36 = vadd.f32 %v1512_v13, %v1511_v20  ;;  %v1356_v5 = vadd.f32 %v9384_v29, %v1354_v54  ;;  %v1469_v50 = vsel %vm348_vm0, %v15917_v23, 0.0  ;;  %v15921_v54 = vld [vmem:[#allocation271_spill] sm:$0xff]  ;;  %v15922_v57 = vld [vmem:[#allocation328_spill] sm:$0xff]  ;;  %2210 = vperm.xlu0 %5453, %v5293_v47  }
 0x195   :  { %v1417_v58 = vadd.f32 %v1416_v55, %v1415_v40  ;;  %v1516_v61 = vsel %vm348_vm0, %v15918_v27, 0.0  ;;  %v9541_v0 = vsel %vm348_vm0, %v9162_v22, 0.0  ;;  %v9545_v53 = vsel %vm348_vm0, %v9192_v9, 0.0  ;;  %v15920_v55 = vld [vmem:[#allocation322_spill] sm:$0xff]  ;;  %v15923_v13 = vld [vmem:[#allocation52_spill] sm:$0xff] }
 0x196   :  { %v1468_v17 = vadd.f32 %v1467_v30, %v1466_v28  ;;  %v1515_v45 = vadd.f32 %v1514_v49, %v1513_v36  ;;  %v1471_v29 = vsel %vm348_vm0, %v15919_v26, 0.0  ;;  %v1473_v8 = vsel %vm348_vm0, %v15920_v55, 0.0  ;;  %v15925_v20 = vld [vmem:[#allocation276_spill] sm:$0xff]  ;;  %v15928_v36 = vld [vmem:[#allocation281_spill] sm:$0xff]  ;;  %v15931_v55 = vld [vmem:[#allocation346_spill] sm:$0xff] }
 0x197   :  { %v1419_v34 = vadd.f32 %v1418_v4, %v1417_v58  ;;  %v1518_v1 = vsel %vm348_vm0, %v15921_v54, 0.0  ;;  %v1295_v56 = vadd.f32 %v9274_v41, %v1293_v43  ;;  %v1475_v18 = vsel %vm348_vm0, %v15922_v57, 0.0  ;;  %v5324_v41 = vld [vmem:[%s14620_s1 + $0x3c] ss:$0 sm:$0xff]  ;;  %v15926_v30 = vld [vmem:[#allocation340_spill] sm:$0xff] }
 0x198   :  { %v1470_v22 = vadd.f32 %v1469_v50, %v1468_v17  ;;  %v1517_v9 = vadd.f32 %v1516_v61, %v1515_v45  ;;  %v9558_v37 = vmul.f32 %v15923_v13, %v15923_v13  ;;  %v1358_v4 = vadd.f32 %v9390_v14, %v1356_v5  ;;  %v15927_v14 = vld [vmem:[#allocation228_spill] sm:$0xff]  ;;  %2718 = vperm.xlu1 %5454, %v5324_v41  }
 0x199   :  { %v1477_v42 = vsel %vm348_vm0, %v15924_v33, 0.0  ;;  %v1520_v40 = vsel %vm348_vm0, %v15925_v20, 0.0  ;;  %v1479_v35 = vsel %vm348_vm0, %v15926_v30, 0.0  ;;  %v1562_v43 = vsel %vm348_vm0, %v15927_v14, 0.0  ;;  %v15929_v58 = vld [vmem:[#allocation232_spill] sm:$0xff] }
 0x19a   :  { %v1472_v24 = vadd.f32 %v1471_v29, %v1470_v22  ;;  %v1519_v49 = vadd.f32 %v1518_v1, %v1517_v9  ;;  %v1421_v28 = vadd.f32 %v1420_v62, %v1419_v34  ;;  %v1522_v5 = vsel %vm348_vm0, %v15928_v36, 0.0  ;;  %v15930_v50 = vld [vmem:[#allocation236_spill] sm:$0xff]  ;;  %v15932_v62 = vld [vmem:[#allocation287_spill] sm:$0xff] }
 0x19b   :  { %v1563_v23 = vsel %vm348_vm0, %v15929_v58, 0.0  ;;  %v1565_v27 = vsel %vm348_vm0, %v15930_v50, 0.0  ;;  %v1297_v61 = vadd.f32 %v9278_v51, %v1295_v56  ;;  %v1360_v29 = vadd.f32 %v9397_v10, %v1358_v4  ;;  %v15933_v1 = vld [vmem:[#allocation240_spill] sm:$0xff]  ;;  %v15935_v56 = vld [vmem:[#allocation357_spill] sm:$0xff] }
 0x19c   :  { %v1474_v17 = vadd.f32 %v1473_v8, %v1472_v24  ;;  %v1521_v45 = vadd.f32 %v1520_v40, %v1519_v49  ;;  %v1564_v26 = vadd.f32 %v1563_v23, %v1562_v43  ;;  %v1481_v54 = vsel %vm348_vm0, %v15931_v55, 0.0  ;;  %v15934_v9 = vld [vmem:[#allocation352_spill] sm:$0xff]  ;;  %v15936_v4 = vld [vmem:[#allocation293_spill] sm:$0xff] }
 0x19d   :  { %v1524_v34 = vsel %vm348_vm0, %v15932_v62, 0.0  ;;  %v1567_v22 = vsel %vm348_vm0, %v15933_v1, 0.0  ;;  %v1483_v33 = vsel %vm348_vm0, %v15934_v9, 0.0  ;;  %v1423_v8 = vadd.f32 %v9500_v52, %v1421_v28  ;;  %v15937_v41 = vld [vmem:[#allocation244_spill] sm:$0xff]  ;;  %v5355_v52 = vld [vmem:[%s14620_s1 + $0x5b] ss:$0 sm:$0xff] }
 0x19e   :  { %v1476_v57 = vadd.f32 %v1475_v18, %v1474_v17  ;;  %v1523_v20 = vadd.f32 %v1522_v5, %v1521_v45  ;;  %v1566_v51 = vadd.f32 %v1565_v27, %v1564_v26  ;;  %v1485_v10 = vsel %vm348_vm0, %v15935_v56, 0.0  ;;  %v5294_v18 = vld [vmem:[%s14620_s1 + $0x1e] ss:$0 sm:$0xff]  ;;  %v15938_v28 = vld [vmem:[#allocation362_spill] sm:$0xff]  ;;  %v15939_v5 = vld [vmem:[#allocation299_spill] sm:$0xff]  ;;  %3226 = vperm.xlu0 %5453, %v5355_v52  }
 0x19f   :  { %v1526_v40 = vsel %vm348_vm0, %v15936_v4, 0.0  ;;  %v1569_v47 = vsel %vm348_vm0, %v15937_v41, 0.0  ;;  %v1299_v24 = vadd.f32 %v9288_v12, %v1297_v61  ;;  %2214 = vperm.xlu1 %5454, %v5294_v18   ;;  %v1362_v43 = vadd.f32 %v9403_v6, %v1360_v29  ;;  %v15940_v23 = vld [vmem:[#allocation248_spill] sm:$0xff]  ;;  %v15942_v26 = vld [vmem:[#allocation371_spill] sm:$0xff]  ;;  %v15943_v29 = vld [vmem:[#allocation305_spill] sm:$0xff] }
 0x1a0   :  { %v1478_v30 = vadd.f32 %v1477_v42, %v1476_v57  ;;  %v1525_v49 = vadd.f32 %v1524_v34, %v1523_v20  ;;  %v1568_v14 = vadd.f32 %v1567_v22, %v1566_v51  ;;  %v1487_v36 = vsel %vm348_vm0, %v15938_v28, 0.0  ;;  %v15941_v42 = vld [vmem:[#allocation366_spill] sm:$0xff]  ;;  %v15944_v62 = vld [vmem:[#allocation252_spill] sm:$0xff]  ;;  %v15945_v20 = vld [vmem:[#allocation373_spill] sm:$0xff] }
 0x1a1   :  { %v1528_v58 = vsel %vm348_vm0, %v15939_v5, 0.0  ;;  %v1571_v50 = vsel %vm348_vm0, %v15940_v23, 0.0  ;;  %v1489_v27 = vsel %vm348_vm0, %v15941_v42, 0.0  ;;  %v1425_v45 = vadd.f32 %v9515_v21, %v1423_v8  ;;  %v15946_v21 = vld [vmem:[#allocation311_spill] sm:$0xff]  ;;  %v15947_v56 = vld [vmem:[#allocation257_spill] sm:$0xff]  ;;  %v16059_v13 = vld [vmem:[#allocation104_spill] sm:$0xff] }
 0x1a2   :  { %v1480_v12 = vadd.f32 %v1479_v35, %v1478_v30  ;;  %v1527_v61 = vadd.f32 %v1526_v40, %v1525_v49  ;;  %v1570_v17 = vadd.f32 %v1569_v47, %v1568_v14  ;;  %v1491_v6 = vsel %vm348_vm0, %v15942_v26, 0.0  ;;  %v5356_v40 = vld [vmem:[%s14620_s1 + $0x5c] ss:$0 sm:$0xff]  ;;  %v5325_v47 = vld [vmem:[%s14620_s1 + $0x3d] ss:$0 sm:$0xff]  ;;  %v15949_v49 = vld [vmem:[#allocation262_spill] sm:$0xff] }
 0x1a3   :  { %v1530_v55 = vsel %vm348_vm0, %v15943_v29, 0.0  ;;  %v1573_v34 = vsel %vm348_vm0, %v15944_v62, 0.0  ;;  %v1301_v1 = vadd.f32 %v9296_v63, %v1299_v24  ;;  %v1364_v9 = vadd.f32 %v9413_v46, %v1362_v43  ;;  %3230 = vperm.xlu1 %5454, %v5356_v40   ;;  %v15948_v30 = vld [vmem:[#allocation317_spill] sm:$0xff]  ;;  %2722 = vperm.xlu0 %5453, %v5325_v47  }
 0x1a4   :  { %v1482_v22 = vadd.f32 %v1481_v54, %v1480_v12  ;;  %v1529_v35 = vadd.f32 %v1528_v58, %v1527_v61  ;;  %v1572_v57 = vadd.f32 %v1571_v50, %v1570_v17  ;;  %v1493_v51 = vsel %vm348_vm0, %v15945_v20, 0.0  ;;  %v15950_v58 = vld [vmem:[#allocation323_spill] sm:$0xff]  ;;  %v15951_v23 = vld [vmem:[#allocation329_spill] sm:$0xff] }
 0x1a5   :  { %v1532_v8 = vsel %vm348_vm0, %v15946_v21, 0.0  ;;  %v1575_v4 = vsel %vm348_vm0, %v15947_v56, 0.0  ;;  %v9634_v63 = vsel %vm348_vm0, %v9166_v2, 0.0  ;;  %v1427_v18 = vadd.f32 %v9519_v19, %v1425_v45  ;;  %v15952_v50 = vld [vmem:[#allocation267_spill] sm:$0xff]  ;;  %v15953_v45 = vld [vmem:[#allocation272_spill] sm:$0xff]  ;;  %v15954_v26 = vld [vmem:[#allocation229_spill] sm:$0xff] }
 0x1a6   :  { %v1484_v41 = vadd.f32 %v1483_v33, %v1482_v22  ;;  %v1531_v54 = vadd.f32 %v1530_v55, %v1529_v35  ;;  %v1574_v46 = vadd.f32 %v1573_v34, %v1572_v57  ;;  %v9642_v24 = vsel %vm348_vm0, %v9409_v48, 0.0  ;;  %v15955_v29 = vld [vmem:[#allocation233_spill] sm:$0xff]  ;;  %v15957_v20 = vld [vmem:[#allocation335_spill] sm:$0xff] }
 0x1a7   :  { %v1534_v33 = vsel %vm348_vm0, %v15948_v30, 0.0  ;;  %v1577_v2 = vsel %vm348_vm0, %v15949_v49, 0.0  ;;  %v1303_v14 = vadd.f32 %v9300_v38, %v1301_v1  ;;  %v1366_v5 = vadd.f32 %v9425_v44, %v1364_v9  ;;  %v15956_v62 = vld [vmem:[#allocation237_spill] sm:$0xff] }
 0x1a8   :  { %v1486_v52 = vadd.f32 %v1485_v10, %v1484_v41  ;;  %v1533_v43 = vadd.f32 %v1532_v8, %v1531_v54  ;;  %v1576_v28 = vadd.f32 %v1575_v4, %v1574_v46  ;;  %v1536_v19 = vsel %vm348_vm0, %v15950_v58, 0.0  ;;  %v15958_v8 = vld [vmem:[#allocation277_spill] sm:$0xff]  ;;  %v15963_v58 = vld [vmem:[#allocation347_spill] sm:$0xff] }
 0x1a9   :  { %v1538_v48 = vsel %vm348_vm0, %v15951_v23, 0.0  ;;  %v1579_v12 = vsel %vm348_vm0, %v15952_v50, 0.0  ;;  %v1581_v38 = vsel %vm348_vm0, %v15953_v45, 0.0  ;;  %v1429_v10 = vadd.f32 %v9523_v32, %v1427_v18  ;;  %v5295_v32 = vld [vmem:[%s14620_s1 + $0x1f] ss:$0 sm:$0xff]  ;;  %v15964_v23 = vld [vmem:[#allocation288_spill] sm:$0xff] }
 0x1aa   :  { %v1488_v42 = vadd.f32 %v1487_v36, %v1486_v52  ;;  %v1535_v61 = vadd.f32 %v1534_v33, %v1533_v43  ;;  %v1578_v17 = vadd.f32 %v1577_v2, %v1576_v28  ;;  %v1625_v44 = vsel %vm727_vm1, %v15954_v26, 0.0  ;;  %v5326_v36 = vld [vmem:[%s14620_s1 + $0x3e] ss:$0 sm:$0xff]  ;;  %2218 = vperm.xlu0 %5453, %v5295_v32  }
 0x1ab   :  { %v1626_v55 = vsel %vm727_vm1, %v15955_v29, 0.0  ;;  %v1628_v34 = vsel %vm727_vm1, %v15956_v62, 0.0  ;;  %2726 = vperm.xlu1 %5454, %v5326_v36   ;;  %v1305_v9 = vadd.f32 %v9304_v39, %v1303_v14  ;;  %v1540_v21 = vsel %vm348_vm0, %v15957_v20, 0.0  ;;  %v15959_v4 = vld [vmem:[#allocation241_spill] sm:$0xff]  ;;  %v15961_v39 = vld [vmem:[#allocation282_spill] sm:$0xff] }
 0x1ac   :  { %v1490_v1 = vadd.f32 %v1489_v27, %v1488_v42  ;;  %v1537_v22 = vadd.f32 %v1536_v19, %v1535_v61  ;;  %v1580_v35 = vadd.f32 %v1579_v12, %v1578_v17  ;;  %v1627_v57 = vadd.f32 %v1626_v55, %v1625_v44  ;;  %v15960_v18 = vld [vmem:[#allocation341_spill] sm:$0xff]  ;;  %v15969_v36 = vld [vmem:[#allocation358_spill] sm:$0xff] }
 0x1ad   :  { %v1583_v56 = vsel %vm348_vm0, %v15958_v8, 0.0  ;;  %v1630_v40 = vsel %vm727_vm1, %v15959_v4, 0.0  ;;  %v1368_v47 = vadd.f32 %v9432_v7, %v1366_v5  ;;  %v1542_v30 = vsel %vm348_vm0, %v15960_v18, 0.0  ;;  %v15962_v49 = vld [vmem:[#allocation245_spill] sm:$0xff]  ;;  %v15973_v4 = vld [vmem:[#allocation306_spill] sm:$0xff] }
 0x1ae   :  { %v1492_v27 = vadd.f32 %v1491_v6, %v1490_v1  ;;  %v1539_v41 = vadd.f32 %v1538_v48, %v1537_v22  ;;  %v1582_v54 = vadd.f32 %v1581_v38, %v1580_v35  ;;  %v1629_v46 = vadd.f32 %v1628_v34, %v1627_v57  ;;  %v15965_v5 = vld [vmem:[#allocation249_spill] sm:$0xff]  ;;  %v15970_v22 = vld [vmem:[#allocation300_spill] sm:$0xff] }
 0x1af   :  { %v1585_v33 = vsel %vm348_vm0, %v15961_v39, 0.0  ;;  %v1632_v2 = vsel %vm727_vm1, %v15962_v49, 0.0  ;;  %v1431_v14 = vadd.f32 %v9532_v3, %v1429_v10  ;;  %v1544_v19 = vsel %vm348_vm0, %v15963_v58, 0.0  ;;  %v15966_v17 = vld [vmem:[#allocation353_spill] sm:$0xff]  ;;  %v15977_v49 = vld [vmem:[#allocation268_spill] sm:$0xff] }
 0x1b0   :  { %v1541_v52 = vadd.f32 %v1540_v21, %v1539_v41  ;;  %v1584_v43 = vadd.f32 %v1583_v56, %v1582_v54  ;;  %v1631_v28 = vadd.f32 %v1630_v40, %v1629_v46  ;;  %v1494_v6 = vadd.f32 %v1493_v51, %v1492_v27  ;;  %v15967_v51 = vld [vmem:[#allocation294_spill] sm:$0xff]  ;;  %v15968_v10 = vld [vmem:[#allocation253_spill] sm:$0xff]  ;;  %v15972_v56 = vld [vmem:[#allocation363_spill] sm:$0xff] }
 0x1b1   :  { %v1587_v7 = vsel %vm348_vm0, %v15964_v23, 0.0  ;;  %v1634_v48 = vsel %vm727_vm1, %v15965_v5, 0.0  ;;  %v1307_v50 = vadd.f32 %v9312_v60, %v1305_v9  ;;  %v1370_v3 = vadd.f32 %v9438_v25, %v1368_v47  ;;  %v5327_v60 = vld [vmem:[%s14620_s1 + $0x3f] ss:$0 sm:$0xff]  ;;  %v5357_v25 = vld [vmem:[%s14620_s1 + $0x5d] ss:$0 sm:$0xff] }
 0x1b2   :  { %v1543_v12 = vadd.f32 %v1542_v30, %v1541_v52  ;;  %v1586_v42 = vadd.f32 %v1585_v33, %v1584_v43  ;;  %v1633_v61 = vadd.f32 %v1632_v2, %v1631_v28  ;;  %v1546_v45 = vsel %vm348_vm0, %v15966_v17, 0.0  ;;  %2730 = vperm.xlu1 %5454, %v5327_v60   ;;  %3234 = vperm.xlu0 %5453, %v5357_v25   ;;  %v15974_v27 = vld [vmem:[#allocation263_spill] sm:$0xff] }
 0x1b3   :  { %v1589_v38 = vsel %vm348_vm0, %v15967_v51, 0.0  ;;  %v1636_v26 = vsel %vm727_vm1, %v15968_v10, 0.0  ;;  %v1433_v44 = vadd.f32 %v9541_v0, %v1431_v14  ;;  %v1496_v34 = vadd.f32 %v9634_v63, %v1494_v6  ;;  %v15971_v0 = vld [vmem:[#allocation258_spill] sm:$0xff]  ;;  %v15975_v30 = vld [vmem:[#allocation367_spill] sm:$0xff]  ;;  %v15978_v6 = vld [vmem:[#allocation372_spill] sm:$0xff] }
 0x1b4   :  { %v1545_v29 = vadd.f32 %v1544_v19, %v1543_v12  ;;  %v1588_v55 = vadd.f32 %v1587_v7, %v1586_v42  ;;  %v1635_v62 = vadd.f32 %v1634_v48, %v1633_v61  ;;  %v1548_v1 = vsel %vm348_vm0, %v15969_v36, 0.0  ;;  %v15979_v19 = vld [vmem:[#allocation318_spill] sm:$0xff]  ;;  %v15980_v7 = vld [vmem:[#allocation273_spill] sm:$0xff] }
 0x1b5   :  { %v1591_v35 = vsel %vm348_vm0, %v15970_v22, 0.0  ;;  %v1638_v57 = vsel %vm727_vm1, %v15971_v0, 0.0  ;;  %v1309_v32 = vadd.f32 %v9316_v59, %v1307_v50  ;;  %v1372_v8 = vadd.f32 %v9444_v31, %v1370_v3  ;;  %v15976_v31 = vld [vmem:[#allocation312_spill] sm:$0xff]  ;;  %v15981_v3 = vld [vmem:[#allocation374_spill] sm:$0xff] }
 0x1b6   :  { %v1547_v9 = vadd.f32 %v1546_v45, %v1545_v29  ;;  %v1590_v20 = vadd.f32 %v1589_v38, %v1588_v55  ;;  %v1637_v21 = vadd.f32 %v1636_v26, %v1635_v62  ;;  %v1550_v63 = vsel %vm348_vm0, %v15972_v56, 0.0  ;;  %v15982_v45 = vld [vmem:[#allocation324_spill] sm:$0xff]  ;;  %v15983_v38 = vld [vmem:[#allocation278_spill] sm:$0xff] }
 0x1b7   :  { %v1593_v40 = vsel %vm348_vm0, %v15973_v4, 0.0  ;;  %v1640_v41 = vsel %vm727_vm1, %v15974_v27, 0.0  ;;  %v1435_v54 = vadd.f32 %v9545_v53, %v1433_v44  ;;  %v1498_v59 = vadd.f32 %v9642_v24, %v1496_v34  ;;  %v5359_v53 = vld [vmem:[%s14620_s1 + $0x5f] ss:$0 sm:$0xff]  ;;  %v5358_v24 = vld [vmem:[%s14620_s1 + $0x5e] ss:$0 sm:$0xff]  ;;  %v9748_v44 = vpop.permute.xlu1 %2102 }
 0x1b8   :  { %v1549_v46 = vadd.f32 %v1548_v1, %v1547_v9  ;;  %v1592_v47 = vadd.f32 %v1591_v35, %v1590_v20  ;;  %v1639_v18 = vadd.f32 %v1638_v57, %v1637_v21  ;;  %v1552_v39 = vsel %vm348_vm0, %v15975_v30, 0.0  ;;  %3242 = vperm.xlu1 %5454, %v5359_v53   ;;  %3238 = vperm.xlu0 %5453, %v5358_v24   ;;  %v15984_v34 = vld [vmem:[#allocation330_spill] sm:$0xff]  ;;  %v15985_v1 = vld [vmem:[#allocation283_spill] sm:$0xff]  ;;  %v15993_v53 = vld [vmem:[#allocation301_spill] sm:$0xff] }
 0x1b9   :  { %v1595_v33 = vsel %vm348_vm0, %v15976_v31, 0.0  ;;  %v1642_v2 = vsel %vm727_vm1, %v15977_v49, 0.0  ;;  %v1688_v28 = vmul.f32 0.03125, %v1309_v32  ;;  %v1554_v58 = vsel %vm348_vm0, %v15978_v6, 0.0  ;;  %v3911_v20 = vld [vmem:[%s14622_s2 + $0x8] sm:$0xff]  ;;  %v3910_v21 = vld [vmem:[%s14622_s2] sm:$0xff] }
 0x1ba   :  { %v1551_v14 = vadd.f32 %v1550_v63, %v1549_v46  ;;  %v1594_v52 = vadd.f32 %v1593_v40, %v1592_v47  ;;  %v1641_v43 = vadd.f32 %v1640_v41, %v1639_v18  ;;  %v1597_v23 = vsel %vm348_vm0, %v15979_v19, 0.0  ;;  %v15987_v63 = vld [vmem:[#allocation289_spill] sm:$0xff]  ;;  %v9768_v46 = vpop.permute.xlu0 %2094  ;;  %v15988_v47 = vld [vmem:[#allocation70_spill] sm:$0xff]  ;;  %v15990_v30 = vld [vmem:[#allocation295_spill] sm:$0xff] }
 0x1bb   :  { %v1644_v5 = vsel %vm727_vm1, %v15980_v7, 0.0  ;;  %v1689_v48 = vmul.f32 0.03125, %v1372_v8  ;;  %v1690_v61 = vmul.f32 0.03125, %v1435_v54  ;;  %v1556_v17 = vsel %vm348_vm0, %v15981_v3, 0.0  ;;  %v15986_v8 = vld [vmem:[#allocation336_spill] sm:$0xff]  ;;  %v15994_v6 = vld [vmem:[#allocation74_spill] sm:$0xff] }
 0x1bc   :  { %v1553_v50 = vadd.f32 %v1552_v39, %v1551_v14  ;;  %v1596_v12 = vadd.f32 %v1595_v33, %v1594_v52  ;;  %v1643_v42 = vadd.f32 %v1642_v2, %v1641_v43  ;;  %v1599_v51 = vsel %vm348_vm0, %v15982_v45, 0.0  ;;  %3924 = vperm.xlu1 %5454, %v3911_v20   ;;  %3919 = vperm.xlu0 %5453, %v3910_v21   ;;  %v9776_v2 = vpop.permute.xlu1 %2606  ;;  %v15991_v14 = vld [vmem:[#allocation224_spill] sm:$0xff]  ;;  %v15998_v3 = vld [vmem:[#allocation307_spill] sm:$0xff] }
 0x1bd   :  { %v1646_v10 = vsel %vm727_vm1, %v15983_v38, 0.0  ;;  %v1691_v26 = vmul.f32 0.03125, %v1498_v59  ;;  %v1695_v60 = vadd.f32 1e-05, %v1688_v28  ;;  %v1558_v25 = vsel %vm348_vm0, %v9175_v11, 0.0  ;;  %v15989_v59 = vld [vmem:[#allocation342_spill] sm:$0xff] }
 0x1be   :  { %v1555_v29 = vadd.f32 %v1554_v58, %v1553_v50  ;;  %v1598_v55 = vadd.f32 %v1597_v23, %v1596_v12  ;;  %v1645_v62 = vadd.f32 %v1644_v5, %v1643_v42  ;;  %v1601_v36 = vsel %vm348_vm0, %v15984_v34, 0.0  ;;  %v15992_v43 = vld [vmem:[#allocation348_spill] sm:$0xff]  ;;  %v15995_v5 = vld [vmem:[#allocation225_spill] sm:$0xff]  ;;  %v15996_v50 = vld [vmem:[#allocation75_spill] sm:$0xff] }
 0x1bf   :  { %v1648_v22 = vsel %vm727_vm1, %v15985_v1, 0.0  ;;  %v1696_v35 = vadd.f32 1e-05, %v1689_v48  ;;  %v1697_v9 = vadd.f32 1e-05, %v1690_v61  ;;  %v1560_v11 = vsel %vm348_vm0, %v9558_v37, 0.0 }
 0x1c0   :  { %v1557_v0 = vadd.f32 %v1556_v17, %v1555_v29  ;;  %v1600_v57 = vadd.f32 %v1599_v51, %v1598_v55  ;;  %v1647_v32 = vadd.f32 %v1646_v10, %v1645_v62  ;;  %v1603_v56 = vsel %vm348_vm0, %v15986_v8, 0.0  ;;  %v15997_v42 = vld [vmem:[#allocation354_spill] sm:$0xff]  ;;  %v15999_v45 = vld [vmem:[#allocation76_spill] sm:$0xff]  ;;  %v9796_v29 = vpop.permute.xlu0 %2098  ;;  %v16000_v55 = vld [vmem:[#allocation83_spill] sm:$0xff]  ;;  %v9816_v21 = vpop.permute.xlu1 %2106 }
 0x1c1   :  { %v1650_v4 = vsel %vm727_vm1, %v15987_v63, 0.0  ;;  %v1698_v40 = vadd.f32 1e-05, %v1691_v26  ;;  %5455 = vrsqrt.f32 %v1695_v60  ;;  %v1224_v18 = vmul.f32 %v15988_v47, %v15988_v47  ;;  %v16001_v60 = vld [vmem:[#allocation84_spill] sm:$0xff]  ;;  %v16002_v34 = vld [vmem:[#allocation359_spill] sm:$0xff]  ;;  %v16003_v1 = vld [vmem:[#allocation313_spill] sm:$0xff] }
 0x1c2   :  { %v1559_v27 = vadd.f32 %v1558_v25, %v1557_v0  ;;  %v1602_v41 = vadd.f32 %v1601_v36, %v1600_v57  ;;  %v1649_v54 = vadd.f32 %v1648_v22, %v1647_v32  ;;  %v1605_v37 = vsel %vm348_vm0, %v15989_v59, 0.0  ;;  %v3912_v0 = vld [vmem:[%s14622_s2 + $0x10] sm:$0xff] }
 0x1c3   :  { %v1652_v39 = vsel %vm727_vm1, %v15990_v30, 0.0  ;;  %5457 = vrsqrt.f32 %v1696_v35  ;;  %v1225_v52 = vmul.f32 %v15991_v14, %v15991_v14  ;;  %v1607_v28 = vsel %vm348_vm0, %v15992_v43, 0.0  ;;  %v3913_v35 = vld [vmem:[%s14622_s2 + $0x18] sm:$0xff]  ;;  %v16004_v32 = vld [vmem:[#allocation364_spill] sm:$0xff]  ;;  %3929 = vperm.xlu0 %5453, %v3912_v0   ;;  %v16058_v14 = vld [vmem:[#allocation119_spill] sm:$0xff] }
 0x1c4   :  { %v1561_v31 = vadd.f32 %v1560_v11, %v1559_v27  ;;  %v1604_v33 = vadd.f32 %v1603_v56, %v1602_v41  ;;  %v1651_v49 = vadd.f32 %v1650_v4, %v1649_v54  ;;  %5459 = vrsqrt.f32 %v1697_v9  ;;  %3934 = vperm.xlu1 %5454, %v3913_v35   ;;  %v16005_v11 = vld [vmem:[#allocation368_spill] sm:$0xff]  ;;  %v16006_v4 = vld [vmem:[#allocation319_spill] sm:$0xff]  ;;  %v3914_v35 = vld [vmem:[%s14622_s2 + $0x20] sm:$0xff] }
 0x1c5   :  { %v1654_v24 = vsel %vm727_vm1, %v15993_v53, 0.0  ;;  %5461 = vrsqrt.f32 %v1698_v40  ;;  %v1231_v58 = vmul.f32 %v15994_v6, %v15994_v6  ;;  %v1232_v48 = vmul.f32 %v15995_v5, %v15995_v5  ;;  %v16057_v5 = vld [vmem:[#allocation208_spill] sm:$0xff] }
 0x1c6   :  { %v1606_v19 = vadd.f32 %v1605_v37, %v1604_v33  ;;  %v1653_v23 = vadd.f32 %v1652_v39, %v1651_v49  ;;  %v1692_v7 = vmul.f32 0.03125, %v1561_v31  ;;  %v1238_v12 = vmul.f32 %v15996_v50, %v15996_v50  ;;  %v16007_v39 = vld [vmem:[#allocation325_spill] sm:$0xff] }
 0x1c7   :  { %v1609_v61 = vsel %vm348_vm0, %v15997_v42, 0.0  ;;  %v1656_v17 = vsel %vm727_vm1, %v15998_v3, 0.0  ;;  %v1245_v51 = vmul.f32 %v15999_v45, %v15999_v45  ;;  %v1239_v62 = vmul.f32 %v16000_v55, %v16000_v55  ;;  %v16009_v49 = vld [vmem:[#allocation337_spill] sm:$0xff]  ;;  %3939 = vperm.xlu0 %5453, %v3914_v35   ;;  %v16060_v45 = vld [vmem:[#allocation210_spill] sm:$0xff] }
 0x1c8   :  { %v1608_v38 = vadd.f32 %v1607_v28, %v1606_v19  ;;  %v1655_v10 = vadd.f32 %v1654_v24, %v1653_v23  ;;  %v1699_v26 = vadd.f32 1e-05, %v1692_v7  ;;  %v9802_v25 = vmul.f32 %v16001_v60, %v16001_v60  ;;  %v16010_v28 = vld [vmem:[#allocation343_spill] sm:$0xff]  ;;  %v16011_v23 = vld [vmem:[#allocation349_spill] sm:$0xff]  ;;  %v16056_v60 = vld [vmem:[#allocation118_spill] sm:$0xff] }
 0x1c9   :  { %v1611_v36 = vsel %vm348_vm0, %v16002_v34, 0.0  ;;  %v1658_v22 = vsel %vm727_vm1, %v16003_v1, 0.0  ;;  %v1613_v9 = vsel %vm348_vm0, %v16004_v32, 0.0  ;;  %v1615_v8 = vsel %vm348_vm0, %v16005_v11, 0.0  ;;  %v9875_v11 = vpop.permute.xlu1 %3118 }
 0x1ca   :  { %v1610_v57 = vadd.f32 %v1609_v61, %v1608_v38  ;;  %v1657_v20 = vadd.f32 %v1656_v17, %v1655_v10  ;;  %5463 = vrsqrt.f32 %v1699_v26  ;;  %v1617_v56 = vsel %vm348_vm0, %v1224_v18, 0.0  ;;  %v16008_v18 = vld [vmem:[#allocation331_spill] sm:$0xff]  ;;  %v9846_v61 = vpop.permute.xlu0 %2610  ;;  %v16013_v17 = vld [vmem:[#allocation360_spill] sm:$0xff]  ;;  %v16014_v38 = vld [vmem:[#allocation365_spill] sm:$0xff] }
 0x1cb   :  { %v1619_v63 = vsel %vm348_vm0, %v1231_v58, 0.0  ;;  %v1660_v40 = vsel %vm727_vm1, %v16006_v4, 0.0  ;;  %v9824_v27 = vpop.eup %5455  ;;  %v1621_v54 = vsel %vm348_vm0, %v1238_v12, 0.0  ;;  %v9828_v59 = vsel %vm348_vm0, %v1245_v51, 0.0  ;;  %v16012_v12 = vld [vmem:[#allocation355_spill] sm:$0xff]  ;;  %v16015_v26 = vld [vmem:[#allocation369_spill] sm:$0xff] }
 0x1cc   :  { %v1612_v41 = vadd.f32 %v1611_v36, %v1610_v57  ;;  %v1659_v37 = vadd.f32 %v1658_v22, %v1657_v20  ;;  %v1662_v31 = vsel %vm727_vm1, %v16007_v39, 0.0  ;;  %v1664_v33 = vsel %vm727_vm1, %v16008_v18, 0.0  ;;  %v16016_v36 = vld [vmem:[#allocation85_spill] sm:$0xff]  ;;  %v3915_v22 = vld [vmem:[%s14622_s2 + $0x28] sm:$0xff]  ;;  %v16020_v18 = vld [vmem:[#allocation96_spill] sm:$0xff] }
 0x1cd   :  { %v9830_v30 = vpop.eup %5457  ;;  %v1666_v43 = vsel %vm727_vm1, %v16009_v49, 0.0  ;;  %v1668_v53 = vsel %vm727_vm1, %v16010_v28, 0.0  ;;  %v1670_v7 = vsel %vm727_vm1, %v16011_v23, 0.0  ;;  %v1672_v42 = vsel %vm727_vm1, %v16012_v12, 0.0  ;;  %3944 = vperm.xlu1 %5454, %v3915_v22   ;;  %v16021_v28 = vld [vmem:[#allocation88_spill] sm:$0xff]  ;;  %v16026_v22 = vld [vmem:[#allocation91_spill] sm:$0xff] }
 0x1ce   :  { %v9840_v24 = vpop.eup %5459  ;;  %v1614_v58 = vadd.f32 %v1613_v9, %v1612_v41  ;;  %v1661_v19 = vadd.f32 %v1660_v40, %v1659_v37  ;;  %v9852_v51 = vsel %vm727_vm1, %v16013_v17, 0.0  ;;  %v9856_v10 = vsel %vm727_vm1, %v16014_v38, 0.0  ;;  %v16017_v9 = vld [vmem:[#allocation86_spill] sm:$0xff]  ;;  %v16018_v41 = vld [vmem:[#allocation95_spill] sm:$0xff] }
 0x1cf   :  { %v9848_v3 = vpop.eup %5461  ;;  %v9860_v34 = vsel %vm727_vm1, %v16015_v26, 0.0  ;;  %v1709_v1 = vmul.f32 %v9824_v27, %v16016_v36  ;;  %v9871_v32 = vsel %vm727_vm1, %v1225_v52, 0.0  ;;  %v1710_v20 = vmul.f32 %v9830_v30, %v16017_v9  ;;  %v16024_v17 = vld [vmem:[#allocation90_spill] sm:$0xff] }
 0x1d0   :  { %v1616_v0 = vadd.f32 %v1615_v8, %v1614_v58  ;;  %v1663_v57 = vadd.f32 %v1662_v31, %v1661_v19  ;;  %v9878_v4 = vsel %vm727_vm1, %v1232_v48, 0.0  ;;  %v9881_v40 = vsel %vm727_vm1, %v1239_v62, 0.0  ;;  %v16019_v8 = vld [vmem:[#allocation87_spill] sm:$0xff]  ;;  %v16022_v48 = vld [vmem:[#allocation97_spill] sm:$0xff]  ;;  %v16023_v62 = vld [vmem:[#allocation98_spill] sm:$0xff] }
 0x1d1   :  { %v1723_v37 = vmul.f32 %v9824_v27, %v16018_v41  ;;  %v1711_v39 = vmul.f32 %v9840_v24, %v16019_v8  ;;  %v1724_v49 = vmul.f32 %v9830_v30, %v16020_v18  ;;  %v1712_v58 = vmul.f32 %v9848_v3, %v16021_v28  ;;  %v16029_v18 = vld [vmem:[#allocation93_spill] sm:$0xff] }
 0x1d2   :  { %v1618_v52 = vadd.f32 %v1617_v56, %v1616_v0  ;;  %v1665_v31 = vadd.f32 %v1664_v33, %v1663_v57  ;;  %v1725_v19 = vmul.f32 %v9840_v24, %v16022_v48  ;;  %v1726_v23 = vmul.f32 %v9848_v3, %v16023_v62  ;;  %v9903_v0 = vpop.permute.xlu0 %2614  ;;  %v16027_v57 = vld [vmem:[#allocation89_spill] sm:$0xff]  ;;  %v9923_v48 = vpop.permute.xlu1 %2110 }
 0x1d3   :  { %v2221_v12 = vmul.f32 %v9768_v46, %v1709_v1  ;;  %v1716_v38 = vmul.f32 %v9824_v27, %v16024_v17  ;;  %v2222_v36 = vmul.f32 %v9768_v46, %v1710_v20  ;;  %v1717_v35 = vmul.f32 %v9830_v30, %v16026_v22  ;;  %v16028_v1 = vld [vmem:[#allocation92_spill] sm:$0xff]  ;;  %v16031_v22 = vld [vmem:[#allocation94_spill] sm:$0xff] }
 0x1d4   :  { %v9898_v26 = vpop.eup %5463  ;;  %v1620_v56 = vadd.f32 %v1619_v63, %v1618_v52  ;;  %v1667_v33 = vadd.f32 %v1666_v43, %v1665_v31  ;;  %v2223_v41 = vmul.f32 %v9768_v46, %v1711_v39  ;;  %v1718_v8 = vmul.f32 %v9840_v24, %v16028_v1  ;;  %v4857_v63 = vld [vmem:[%s14623_s4] sm:$0xff]  ;;  %v3916_v43 = vld [vmem:[%s14622_s2 + $0x30] sm:$0x1] }
 0x1d5   :  { %16025 = vst [vmem:[#allocation254_spill] sm:$0xff] %v9898_v26  ;;  %v1713_v9 = vmul.f32 %v9898_v26, %v16027_v57  ;;  %v1719_v28 = vmul.f32 %v9848_v3, %v16029_v18  ;;  %v9920_v31 = vsel %vm727_vm1, %v9802_v25, 0.0  ;;  %v2224_v39 = vmul.f32 %v9768_v46, %v1712_v58  ;;  %4867 = vperm.xlu1 %5454, %v4857_v63  }
 0x1d6   :  { %v1622_v20 = vadd.f32 %v1621_v54, %v1620_v56  ;;  %v1669_v52 = vadd.f32 %v1668_v53, %v1667_v33  ;;  %3949 = vperm.xlu0 %5453, %v3916_v43   ;;  %v2235_v62 = vmul.f32 %v9748_v44, %v1723_v37  ;;  %v9927_v17 = vadd.f32 %v9776_v2, %v2221_v12 }
 0x1d7   :  { %v1720_v57 = vmul.f32 %v9898_v26, %v16031_v22  ;;  %v2228_v54 = vmul.f32 %v9796_v29, %v1716_v38  ;;  %v2225_v56 = vmul.f32 %v9768_v46, %v1713_v9  ;;  %v2229_v58 = vmul.f32 %v9796_v29, %v1717_v35  ;;  %v16035_v35 = vld [vmem:[#allocation99_spill] sm:$0xff] }
 0x1d8   :  { %16030 = vst [vmem:[#allocation284_spill] sm:$0xff] %v9927_v17  ;;  %v1624_v53 = vadd.f32 %v9828_v59, %v1622_v20  ;;  %v1671_v25 = vadd.f32 %v1670_v7, %v1669_v52  ;;  %v2236_v33 = vmul.f32 %v9748_v44, %v1724_v49  ;;  %v9937_v1 = vadd.f32 %v9776_v2, %v2222_v36  ;;  %v9947_v7 = vpop.permute.xlu0 %3122  ;;  %v9964_v20 = vpop.permute.xlu1 %3126 }
 0x1d9   :  { %v2230_v37 = vmul.f32 %v9796_v29, %v1718_v8  ;;  %v2231_v12 = vmul.f32 %v9796_v29, %v1719_v28  ;;  %v9942_v38 = vadd.f32 %v9776_v2, %v2223_v41  ;;  %v9945_v59 = vadd.f32 %v9776_v2, %v2224_v39 }
 0x1da   :  { %16032 = vst [vmem:[#allocation290_spill] sm:$0xff] %v9937_v1  ;;  %v1673_v18 = vadd.f32 %v1672_v42, %v1671_v25  ;;  %v1693_v63 = vmul.f32 0.03125, %v1624_v53  ;;  %v1727_v49 = vmul.f32 %v9898_v26, %v16035_v35  ;;  %v2232_v36 = vmul.f32 %v9796_v29, %v1720_v57  ;;  %v4858_v25 = vld [vmem:[%s14623_s4 + $0x8] sm:$0xff] }
 0x1db   :  { %16033 = vst [vmem:[#allocation296_spill] sm:$0xff] %v9942_v38  ;;  %16034 = vst [vmem:[#allocation259_spill] sm:$0xff] %v9945_v59  ;;  %v9953_v9 = vadd.f32 %v9846_v61, %v2228_v54  ;;  %v3245_v42 = vmul.f32 %v9875_v11, %v9927_v17  ;;  %v9959_v28 = vadd.f32 %v9776_v2, %v2225_v56  ;;  %4872 = vperm.xlu0 %5453, %v4858_v25   ;;  %v16055_v17 = vld [vmem:[#allocation207_spill] sm:$0xff] }
 0x1dc   :  { %v1675_v8 = vadd.f32 %v9852_v51, %v1673_v18  ;;  %v1700_v41 = vadd.f32 1e-05, %v1693_v63  ;;  %v9962_v43 = vadd.f32 %v9846_v61, %v2229_v58  ;;  %v2237_v52 = vmul.f32 %v9748_v44, %v1725_v19  ;;  %v4859_v19 = vld [vmem:[%s14623_s4 + $0x10] sm:$0xff]  ;;  %v10001_v35 = vpop.permute.xlu0 %2618 }
 0x1dd   :  { %16036 = vst [vmem:[#allocation226_spill] sm:$0xff] %v9953_v9  ;;  %16037 = vst [vmem:[#allocation230_spill] sm:$0xff] %v9959_v28  ;;  %v9968_v39 = vadd.f32 %v9846_v61, %v2230_v37  ;;  %v9971_v22 = vadd.f32 %v9846_v61, %v2231_v12  ;;  %v3246_v51 = vmul.f32 %v9875_v11, %v9937_v1  ;;  %4877 = vperm.xlu1 %5454, %v4859_v19   ;;  %v10023_v19 = vpop.permute.xlu1 %2622  ;;  %v16054_v1 = vld [vmem:[#allocation206_spill] sm:$0xff] }
 0x1de   :  { %16038 = vst [vmem:[#allocation264_spill] sm:$0xff] %v9962_v43  ;;  %v1677_v57 = vadd.f32 %v9856_v10, %v1675_v8  ;;  %5465 = vrsqrt.f32 %v1700_v41  ;;  %v2238_v54 = vmul.f32 %v9748_v44, %v1726_v23  ;;  %v3247_v53 = vmul.f32 %v9875_v11, %v9942_v38  ;;  %v16053_v38 = vld [vmem:[#allocation103_spill] sm:$0xff] }
 0x1df   :  { %16039 = vst [vmem:[#allocation234_spill] sm:$0xff] %v9968_v39  ;;  %16040 = vst [vmem:[#allocation302_spill] sm:$0xff] %v9971_v22  ;;  %v2239_v56 = vmul.f32 %v9748_v44, %v1727_v49  ;;  %v9987_v58 = vadd.f32 %v9846_v61, %v2232_v36  ;;  %v3248_v10 = vmul.f32 %v9875_v11, %v9945_v59  ;;  %v9992_v23 = vsel %vm348_vm0, %v3245_v42, 0.0 }
 0x1e0   :  { %v1679_v37 = vadd.f32 %v9860_v34, %v1677_v57  ;;  %v3249_v12 = vmul.f32 %v9875_v11, %v9959_v28  ;;  %v3252_v18 = vmul.f32 %v9947_v7, %v9953_v9  ;;  %v3253_v63 = vmul.f32 %v9947_v7, %v9962_v43  ;;  %v16051_v9 = vld [vmem:[#allocation117_spill] sm:$0xff] }
 0x1e1   :  { %16041 = vst [vmem:[#allocation238_spill] sm:$0xff] %v9987_v58  ;;  %v10004_v49 = vsel %vm348_vm0, %v3246_v51, 0.0  ;;  %v10007_v36 = vadd.f32 %v9903_v0, %v2235_v62  ;;  %v3254_v34 = vmul.f32 %v9947_v7, %v9968_v39  ;;  %v3255_v42 = vmul.f32 %v9947_v7, %v9971_v22  ;;  %v10088_v43 = vpop.permute.xlu1 %2118 }
 0x1e2   :  { %v1681_v8 = vadd.f32 %v9871_v32, %v1679_v37  ;;  %v10015_v41 = vadd.f32 %v9903_v0, %v2236_v33  ;;  %v10018_v57 = vadd.f32 %v9903_v0, %v2237_v52  ;;  %v10021_v51 = vadd.f32 %v9903_v0, %v2238_v54 }
 0x1e3   :  { %16042 = vst [vmem:[#allocation308_spill] sm:$0xff] %v10007_v36  ;;  %v10026_v62 = vsel %vm348_vm0, %v3247_v53, 0.0  ;;  %v10029_v25 = vsel %vm348_vm0, %v3248_v10, 0.0  ;;  %v10032_v22 = vadd.f32 %v9903_v0, %v2239_v56  ;;  %v10036_v32 = vmul.f32 %v9947_v7, %v9987_v58  ;;  %v4861_v10 = vld [vmem:[%s14623_s4 + $0x20] sm:$0xff]  ;;  %v4860_v56 = vld [vmem:[%s14623_s4 + $0x18] sm:$0xff] }
 0x1e4   :  { %16043 = vst [vmem:[#allocation314_spill] sm:$0xff] %v10015_v41  ;;  %16044 = vst [vmem:[#allocation269_spill] sm:$0xff] %v10018_v57  ;;  %v1683_v33 = vadd.f32 %v9878_v4, %v1681_v8  ;;  %v10040_v52 = vsel %vm348_vm0, %v3249_v12, 0.0  ;;  %v3470_v54 = vsel %vm348_vm0, %v3252_v18, 0.0  ;;  %v3533_v53 = vsel %vm348_vm0, %v3253_v63, 0.0  ;;  %v16047_v18 = vld [vmem:[#allocation100_spill] sm:$0xff]  ;;  %4887 = vperm.xlu1 %5454, %v4861_v10   ;;  %4882 = vperm.xlu0 %5453, %v4860_v56  }
 0x1e5   :  { %16045 = vst [vmem:[#allocation320_spill] sm:$0xff] %v10021_v51  ;;  %16046 = vst [vmem:[#allocation242_spill] sm:$0xff] %v10032_v22  ;;  %v10051_v37 = vsel %vm348_vm0, %v3254_v34, 0.0  ;;  %v10054_v4 = vsel %vm348_vm0, %v3255_v42, 0.0  ;;  %v3259_v12 = vmul.f32 %v9964_v20, %v10007_v36  ;;  %v1730_v63 = vmul.f32 %v9824_v27, %v16047_v18  ;;  %v10073_v36 = vpop.permute.xlu0 %2114  ;;  %v16048_v56 = vld [vmem:[#allocation115_spill] sm:$0xff] }
 0x1e6   :  { %v1685_v8 = vadd.f32 %v9881_v40, %v1683_v33  ;;  %v10063_v58 = vmul.f32 %v9964_v20, %v10015_v41  ;;  %v10067_v34 = vmul.f32 %v9964_v20, %v10018_v57  ;;  %v10071_v42 = vmul.f32 %v9964_v20, %v10021_v51  ;;  %v16049_v33 = vld [vmem:[#allocation116_spill] sm:$0xff]  ;;  %v16050_v41 = vld [vmem:[#allocation101_spill] sm:$0xff] }
 0x1e7   :  { %v10077_v10 = vmul.f32 %v9964_v20, %v10032_v22  ;;  %v1751_v40 = vmul.f32 %v9824_v27, %v16048_v56  ;;  %v1752_v18 = vmul.f32 %v9830_v30, %v16049_v33  ;;  %v1731_v57 = vmul.f32 %v9830_v30, %v16050_v41  ;;  %v16052_v22 = vld [vmem:[#allocation102_spill] sm:$0xff] }
 0x1e8   :  { %v10085_v39 = vpop.eup %5465  ;;  %v1687_v51 = vadd.f32 %v9920_v31, %v1685_v8  ;;  %v1753_v28 = vmul.f32 %v9840_v24, %v16051_v9  ;;  %v1732_v59 = vmul.f32 %v9840_v24, %v16052_v22  ;;  %v1733_v56 = vmul.f32 %v9848_v3, %v16053_v38 }
 0x1e9   :  { %v1714_v33 = vmul.f32 %v10085_v39, %v16054_v1  ;;  %v1721_v41 = vmul.f32 %v10085_v39, %v16055_v17  ;;  %v1754_v31 = vmul.f32 %v9848_v3, %v16056_v60  ;;  %v2242_v8 = vmul.f32 %v9816_v21, %v1730_v63  ;;  %v4863_v1 = vld [vmem:[%s14623_s4 + $0x30] sm:$0xff]  ;;  %v4862_v60 = vld [vmem:[%s14623_s4 + $0x28] sm:$0xff] }
 0x1ea   :  { %v1694_v55 = vmul.f32 0.03125, %v1687_v51  ;;  %v1728_v9 = vmul.f32 %v10085_v39, %v16057_v5  ;;  %v1755_v22 = vmul.f32 %v9898_v26, %v16058_v14  ;;  %v1734_v38 = vmul.f32 %v9898_v26, %v16059_v13  ;;  %4897 = vperm.xlu1 %5454, %v4863_v1   ;;  %v10121_v13 = vpop.permute.xlu0 %3130  ;;  %4892 = vperm.xlu0 %5453, %v4862_v60  }
 0x1eb   :  { %v2226_v17 = vmul.f32 %v9768_v46, %v1714_v33  ;;  %v2233_v51 = vmul.f32 %v9796_v29, %v1721_v41  ;;  %v10118_v5 = vmul.f32 %v10088_v43, %v1751_v40  ;;  %v2243_v14 = vmul.f32 %v9816_v21, %v1731_v57 }
 0x1ec   :  { %v1701_v63 = vadd.f32 1e-05, %v1694_v55  ;;  %v1735_v50 = vmul.f32 %v10085_v39, %v16060_v45  ;;  %v2244_v6 = vmul.f32 %v9816_v21, %v1732_v59  ;;  %v2245_v47 = vmul.f32 %v9816_v21, %v1733_v56 }
 0x1ed   :  { %v10128_v33 = vmul.f32 %v10088_v43, %v1752_v18  ;;  %v10131_v40 = vmul.f32 %v10088_v43, %v1753_v28  ;;  %v10134_v57 = vadd.f32 %v10001_v35, %v2242_v8  ;;  %v3471_v55 = vadd.f32 %v3470_v54, %v9992_v23 }
 0x1ee   :  { %5467 = vrsqrt.f32 %v1701_v63  ;;  %v2240_v41 = vmul.f32 %v9748_v44, %v1728_v9  ;;  %v2246_v45 = vmul.f32 %v9816_v21, %v1734_v38  ;;  %v3472_v59 = vsel %vm348_vm0, %v3259_v12, 0.0  ;;  %v16067_v38 = vld [vmem:[#allocation15_spill] sm:$0xff] }
 0x1ef   :  { %16061 = vst [vmem:[#allocation326_spill] sm:$0xff] %v10134_v57  ;;  %v10141_v56 = vadd.f32 %v9776_v2, %v2226_v17  ;;  %v10144_v18 = vadd.f32 %v9846_v61, %v2233_v51  ;;  %v10147_v28 = vadd.f32 %v10001_v35, %v2243_v14  ;;  %v3266_v8 = vmul.f32 %v10121_v13, %v10134_v57 }
 0x1f0   :  { %v2247_v23 = vmul.f32 %v9816_v21, %v1735_v50  ;;  %v10153_v54 = vadd.f32 %v10001_v35, %v2244_v6  ;;  %v10156_v9 = vadd.f32 %v10001_v35, %v2245_v47  ;;  %v3534_v12 = vadd.f32 %v3533_v53, %v10004_v49 }
 0x1f1   :  { %16062 = vst [vmem:[#allocation274_spill] sm:$0xff] %v10141_v56  ;;  %16063 = vst [vmem:[#allocation332_spill] sm:$0xff] %v10144_v18  ;;  %v1756_v1 = vmul.f32 %v10085_v39, %v16067_v38  ;;  %v10162_v60 = vmul.f32 %v10088_v43, %v1754_v31  ;;  %v3267_v17 = vmul.f32 %v10121_v13, %v10147_v28  ;;  %v3474_v14 = vsel %vm348_vm0, %v3266_v8, 0.0 }
 0x1f2   :  { %16064 = vst [vmem:[#allocation246_spill] sm:$0xff] %v10147_v28  ;;  %16065 = vst [vmem:[#allocation338_spill] sm:$0xff] %v10153_v54  ;;  %v3473_v51 = vadd.f32 %v3472_v59, %v3471_v55  ;;  %v10167_v50 = vadd.f32 %v9903_v0, %v2240_v41  ;;  %v10170_v6 = vadd.f32 %v10001_v35, %v2246_v45  ;;  %v3535_v63 = vsel %vm348_vm0, %v10063_v58, 0.0  ;;  %v5115_v55 = vld [vmem:[%s14624_s6] sm:$0xff]  ;;  %v4864_v41 = vld [vmem:[%s14623_s4 + $0x38] sm:$0xff] }
 0x1f3   :  { %16066 = vst [vmem:[#allocation344_spill] sm:$0xff] %v10156_v9  ;;  %v3268_v47 = vmul.f32 %v10121_v13, %v10153_v54  ;;  %v3269_v49 = vmul.f32 %v10121_v13, %v10156_v9  ;;  %v3250_v53 = vmul.f32 %v9875_v11, %v10141_v56  ;;  %v3257_v31 = vmul.f32 %v9947_v7, %v10144_v18  ;;  %v16077_v28 = vld [vmem:[#allocation106_spill] sm:$0xff] }
 0x1f4   :  { %16068 = vst [vmem:[#allocation279_spill] sm:$0xff] %v10167_v50  ;;  %16069 = vst [vmem:[#allocation350_spill] sm:$0xff] %v10170_v6  ;;  %v3722_v45 = vsel %vm348_vm0, %v10036_v32, 0.0  ;;  %v10192_v59 = vadd.f32 %v10001_v35, %v2247_v23  ;;  %v3536_v38 = vadd.f32 %v3535_v63, %v3534_v12  ;;  %v3597_v8 = vadd.f32 %v10051_v37, %v10026_v62 }
 0x1f5   :  { %5118 = vperm.xlu1 %5454, %v5115_v55   ;;  %4902 = vperm.xlu0 %5453, %v4864_v41   ;;  %v10197_v58 = vmul.f32 %v10088_v43, %v1755_v22  ;;  %v10200_v9 = vmul.f32 %v10088_v43, %v1756_v1  ;;  %v3270_v54 = vmul.f32 %v10121_v13, %v10170_v6  ;;  %v3537_v32 = vsel %vm348_vm0, %v3267_v17, 0.0 }
 0x1f6   :  { %16070 = vst [vmem:[#allocation250_spill] sm:$0xff] %v10192_v59  ;;  %v3264_v23 = vmul.f32 %v9964_v20, %v10167_v50  ;;  %v3271_v12 = vmul.f32 %v10121_v13, %v10192_v59  ;;  %v10209_v62 = vadd.f32 %v3474_v14, %v3473_v51  ;;  %v3660_v37 = vadd.f32 %v10054_v4, %v10029_v25  ;;  %v16072_v4 = vld [vmem:[#allocation22_spill] sm:$0xff]  ;;  %v16074_v14 = vld [vmem:[#allocation20_spill] sm:$0xff]  ;;  %v16078_v50 = vld [vmem:[#allocation107_spill] sm:$0xff] }
 0x1f7   :  { %v3784_v22 = vsel %vm348_vm0, %v3250_v53, 0.0  ;;  %v3785_v1 = vsel %vm348_vm0, %v3257_v31, 0.0  ;;  %v3598_v63 = vsel %vm348_vm0, %v10067_v34, 0.0  ;;  %v10218_v17 = vsel %vm348_vm0, %v3268_v47, 0.0  ;;  %v16073_v31 = vld [vmem:[#allocation19_spill] sm:$0xff] }
 0x1f8   :  { %v10220_v55 = vpop.eup %5467  ;;  %v10222_v41 = vadd.f32 %v3537_v32, %v3536_v38  ;;  %v10224_v59 = vadd.f32 %v3598_v63, %v3597_v8  ;;  %v3661_v51 = vsel %vm348_vm0, %v10071_v42, 0.0  ;;  %v3663_v25 = vsel %vm348_vm0, %v3269_v49, 0.0  ;;  %v16075_v38 = vld [vmem:[#allocation24_spill] sm:$0xff]  ;;  %v16076_v63 = vld [vmem:[#allocation105_spill] sm:$0xff] }
 0x1f9   :  { %16071 = vst [vmem:[#allocation285_spill] sm:$0xff] %v10220_v55  ;;  %v1729_v53 = vmul.f32 %v10220_v55, %v16072_v4  ;;  %v1715_v34 = vmul.f32 %v10220_v55, %v16073_v31  ;;  %v1722_v47 = vmul.f32 %v10220_v55, %v16074_v14  ;;  %v3723_v6 = vadd.f32 %v3722_v45, %v10040_v52  ;;  %v16079_v45 = vld [vmem:[#allocation108_spill] sm:$0xff] }
 0x1fa   :  { %v1736_v8 = vmul.f32 %v10220_v55, %v16075_v38  ;;  %v3662_v32 = vadd.f32 %v3661_v51, %v3660_v37  ;;  %v1737_v42 = vmul.f32 %v9824_v27, %v16076_v63  ;;  %v1738_v49 = vmul.f32 %v9830_v30, %v16077_v28  ;;  %v16080_v51 = vld [vmem:[#allocation109_spill] sm:$0xff]  ;;  %v16081_v63 = vld [vmem:[#allocation211_spill] sm:$0xff] }
 0x1fb   :  { %v2241_v4 = vmul.f32 %v9748_v44, %v1729_v53  ;;  %v2227_v57 = vmul.f32 %v9768_v46, %v1715_v34  ;;  %v2234_v31 = vmul.f32 %v9796_v29, %v1722_v47  ;;  %v1739_v14 = vmul.f32 %v9840_v24, %v16078_v50  ;;  %v10255_v44 = vpop.permute.xlu0 %2626 }
 0x1fc   :  { %v3724_v52 = vsel %vm348_vm0, %v10077_v10, 0.0  ;;  %v1740_v37 = vmul.f32 %v9848_v3, %v16079_v45  ;;  %v1741_v38 = vmul.f32 %v9898_v26, %v16080_v51  ;;  %v1742_v28 = vmul.f32 %v10085_v39, %v16081_v63  ;;  %v16084_v10 = vld [vmem:[#allocation28_spill] sm:$0xff] }
 0x1fd   :  { %v10258_v46 = vadd.f32 %v9776_v2, %v2227_v57  ;;  %v10261_v29 = vadd.f32 %v9846_v61, %v2234_v31  ;;  %v3726_v50 = vsel %vm348_vm0, %v3270_v54, 0.0  ;;  %v1743_v53 = vmul.f32 %v10220_v55, %v16084_v10  ;;  %v3135_v57 = vpop.permute.xlu1 %3134 }
 0x1fe   :  { %v10267_v34 = vadd.f32 %v9903_v0, %v2241_v4  ;;  %v2248_v47 = vmul.f32 %v9816_v21, %v1736_v8  ;;  %v3786_v45 = vadd.f32 %v3785_v1, %v3784_v22  ;;  %v2249_v51 = vmul.f32 %v9923_v48, %v1737_v42 }
 0x1ff   :  { %16082 = vst [vmem:[#allocation361_spill] sm:$0xff] %v10258_v46  ;;  %16083 = vst [vmem:[#allocation255_spill] sm:$0xff] %v10261_v29  ;;  %v3251_v2 = vmul.f32 %v9875_v11, %v10258_v46  ;;  %v3258_v61 = vmul.f32 %v9947_v7, %v10261_v29  ;;  %v2250_v54 = vmul.f32 %v9923_v48, %v1738_v49  ;;  %v3787_v11 = vsel %vm348_vm0, %v3264_v23, 0.0 }
 0x200   :  { %16085 = vst [vmem:[#allocation291_spill] sm:$0xff] %v10267_v34  ;;  %v2251_v31 = vmul.f32 %v9923_v48, %v1739_v14  ;;  %v3725_v63 = vadd.f32 %v3724_v52, %v3723_v6  ;;  %v2252_v0 = vmul.f32 %v9923_v48, %v1740_v37  ;;  %v2253_v4 = vmul.f32 %v9923_v48, %v1741_v38  ;;  %v10290_v14 = vpop.permute.xlu0 %2122 }
 0x201   :  { %v2254_v21 = vmul.f32 %v9923_v48, %v1742_v28  ;;  %v3847_v22 = vsel %vm727_vm1, %v3251_v2, 0.0  ;;  %v3848_v1 = vsel %vm727_vm1, %v3258_v61, 0.0  ;;  %v2255_v7 = vmul.f32 %v9923_v48, %v1743_v53 }
 0x202   :  { %v3265_v8 = vmul.f32 %v9964_v20, %v10267_v34  ;;  %v10287_v42 = vadd.f32 %v10001_v35, %v2248_v47  ;;  %v3788_v6 = vadd.f32 %v3787_v11, %v3786_v45  ;;  %v3789_v49 = vsel %vm348_vm0, %v3271_v12, 0.0  ;;  %v10318_v45 = vpop.permute.xlu1 %2630 }
 0x203   :  { %v3849_v52 = vadd.f32 %v3848_v1, %v3847_v22  ;;  %v10293_v37 = vadd.f32 %v10023_v19, %v2249_v51  ;;  %v10296_v38 = vadd.f32 %v10023_v19, %v2250_v54  ;;  %v10299_v48 = vadd.f32 %v10023_v19, %v2251_v31 }
 0x204   :  { %16086 = vst [vmem:[#allocation260_spill] sm:$0xff] %v10287_v42  ;;  %v3272_v20 = vmul.f32 %v10121_v13, %v10287_v42  ;;  %v10304_v35 = vadd.f32 %v10023_v19, %v2252_v0  ;;  %v10307_v23 = vadd.f32 %v10023_v19, %v2253_v4  ;;  %v10310_v12 = vadd.f32 %v10023_v19, %v2254_v21  ;;  %v16094_v4 = vld [vmem:[#allocation36_spill] sm:$0xff] }
 0x205   :  { %16087 = vst [vmem:[#allocation297_spill] sm:$0xff] %v10293_v37  ;;  %16088 = vst [vmem:[#allocation265_spill] sm:$0xff] %v10296_v38  ;;  %v10313_v28 = vadd.f32 %v10023_v19, %v2255_v7  ;;  %v3273_v10 = vmul.f32 %v3135_v57, %v10293_v37  ;;  %v3274_v53 = vmul.f32 %v3135_v57, %v10296_v38  ;;  %v3850_v13 = vsel %vm727_vm1, %v3265_v8, 0.0  ;;  %v10330_v7 = vpop.permute.xlu0 %3138  ;;  %v16129_v37 = vld [vmem:[#allocation44_spill] sm:$0xff] }
 0x206   :  { %16089 = vst [vmem:[#allocation303_spill] sm:$0xff] %v10299_v48  ;;  %16090 = vst [vmem:[#allocation309_spill] sm:$0xff] %v10304_v35  ;;  %v3275_v47 = vmul.f32 %v3135_v57, %v10299_v48  ;;  %v3276_v51 = vmul.f32 %v3135_v57, %v10304_v35  ;;  %v3277_v2 = vmul.f32 %v3135_v57, %v10307_v23  ;;  %v3852_v1 = vsel %vm727_vm1, %v3272_v20, 0.0  ;;  %v16098_v20 = vld [vmem:[#allocation113_spill] sm:$0xff] }
 0x207   :  { %16091 = vst [vmem:[#allocation270_spill] sm:$0xff] %v10307_v23  ;;  %16092 = vst [vmem:[#allocation227_spill] sm:$0xff] %v10310_v12  ;;  %v3278_v61 = vmul.f32 %v3135_v57, %v10310_v12  ;;  %v3601_v19 = vadd.f32 %v10218_v17, %v10224_v59  ;;  %v3664_v54 = vadd.f32 %v3663_v25, %v3662_v32  ;;  %v3476_v8 = vsel %vm348_vm0, %v3273_v10, 0.0  ;;  %v16095_v59 = vld [vmem:[#allocation110_spill] sm:$0xff]  ;;  %v16128_v48 = vld [vmem:[#allocation25_spill] sm:$0xff] }
 0x208   :  { %16093 = vst [vmem:[#allocation231_spill] sm:$0xff] %v10313_v28  ;;  %v3727_v31 = vadd.f32 %v3726_v50, %v3725_v63  ;;  %v3851_v0 = vadd.f32 %v3850_v13, %v3849_v52  ;;  %v1757_v21 = vmul.f32 %v10220_v55, %v16094_v4  ;;  %v3790_v22 = vadd.f32 %v3789_v49, %v3788_v6  ;;  %v16096_v63 = vld [vmem:[#allocation111_spill] sm:$0xff]  ;;  %v16097_v49 = vld [vmem:[#allocation112_spill] sm:$0xff]  ;;  %v10348_v13 = vpop.permute.xlu1 %2126 }
 0x209   :  { %v3279_v11 = vmul.f32 %v3135_v57, %v10313_v28  ;;  %v3539_v12 = vsel %vm348_vm0, %v3274_v53, 0.0  ;;  %v3602_v23 = vsel %vm348_vm0, %v3275_v47, 0.0  ;;  %v1744_v17 = vmul.f32 %v9824_v27, %v16095_v59  ;;  %v16099_v53 = vld [vmem:[#allocation114_spill] sm:$0xff]  ;;  %v16101_v59 = vld [vmem:[#allocation32_spill] sm:$0xff] }
 0x20a   :  { %v3665_v25 = vsel %vm348_vm0, %v3276_v51, 0.0  ;;  %v3728_v32 = vsel %vm348_vm0, %v3277_v2, 0.0  ;;  %v3791_v50 = vsel %vm348_vm0, %v3278_v61, 0.0  ;;  %v1745_v57 = vmul.f32 %v9830_v30, %v16096_v63  ;;  %v16100_v61 = vld [vmem:[#allocation212_spill] sm:$0xff] }
 0x20b   :  { %v3853_v6 = vadd.f32 %v3852_v1, %v3851_v0  ;;  %v1746_v52 = vmul.f32 %v9840_v24, %v16097_v49  ;;  %v1747_v10 = vmul.f32 %v9848_v3, %v16098_v20  ;;  %v1748_v47 = vmul.f32 %v9898_v26, %v16099_v53 }
 0x20c   :  { %v2269_v51 = vmul.f32 %v10088_v43, %v1757_v21  ;;  %v3854_v2 = vsel %vm727_vm1, %v3279_v11, 0.0  ;;  %v1749_v4 = vmul.f32 %v10085_v39, %v16100_v61  ;;  %v1750_v0 = vmul.f32 %v10220_v55, %v16101_v59  ;;  %v10372_v61 = vpop.permute.xlu0 %2634 }
 0x20d   :  { %v10357_v1 = vadd.f32 %v3476_v8, %v10209_v62  ;;  %v10360_v63 = vadd.f32 %v3539_v12, %v10222_v41  ;;  %v10362_v49 = vadd.f32 %v3602_v23, %v3601_v19  ;;  %v10364_v20 = vadd.f32 %v3665_v25, %v3664_v54  ;;  %v16107_v25 = vld [vmem:[#allocation120_spill] sm:$0xff] }
 0x20e   :  { %v10366_v53 = vadd.f32 %v3728_v32, %v3727_v31  ;;  %v10368_v43 = vadd.f32 %v3791_v50, %v3790_v22  ;;  %v2256_v21 = vmul.f32 %v10073_v36, %v1744_v17  ;;  %v2257_v11 = vmul.f32 %v10073_v36, %v1745_v57 }
 0x20f   :  { %v10374_v59 = vadd.f32 %v3854_v2, %v3853_v6  ;;  %v2258_v62 = vmul.f32 %v10073_v36, %v1746_v52  ;;  %v2259_v41 = vmul.f32 %v10073_v36, %v1747_v10  ;;  %v2260_v23 = vmul.f32 %v10073_v36, %v1748_v47  ;;  %v16112_v10 = vld [vmem:[#allocation121_spill] sm:$0xff]  ;;  %v16113_v47 = vld [vmem:[#allocation122_spill] sm:$0xff] }
 0x210   :  { %v2261_v12 = vmul.f32 %v10073_v36, %v1749_v4  ;;  %v2262_v19 = vmul.f32 %v10073_v36, %v1750_v0  ;;  %v10382_v54 = vadd.f32 %v10255_v44, %v2256_v21  ;;  %v10385_v31 = vadd.f32 %v10255_v44, %v2257_v11  ;;  %v3143_v36 = vpop.permute.xlu1 %3142  ;;  %v16114_v4 = vld [vmem:[#allocation123_spill] sm:$0xff]  ;;  %v16115_v21 = vld [vmem:[#allocation124_spill] sm:$0xff] }
 0x211   :  { %v10388_v22 = vadd.f32 %v10255_v44, %v2258_v62  ;;  %v10391_v8 = vadd.f32 %v10255_v44, %v2259_v41  ;;  %v10395_v17 = vadd.f32 %v10318_v45, %v10118_v5  ;;  %v1758_v32 = vmul.f32 %v9824_v27, %v16107_v25  ;;  %v16119_v41 = vld [vmem:[#allocation21_spill] sm:$0xff]  ;;  %v16122_v25 = vld [vmem:[#allocation40_spill] sm:$0xff] }
 0x212   :  { %16102 = vst [vmem:[#allocation235_spill] sm:$0xff] %v10382_v54  ;;  %16103 = vst [vmem:[#allocation275_spill] sm:$0xff] %v10385_v31  ;;  %v10400_v50 = vadd.f32 %v10255_v44, %v2260_v23  ;;  %v10403_v57 = vadd.f32 %v10255_v44, %v2261_v12  ;;  %v10406_v6 = vadd.f32 %v10255_v44, %v2262_v19  ;;  %v10434_v12 = vpop.permute.xlu0 %2130 }
 0x213   :  { %16104 = vst [vmem:[#allocation239_spill] sm:$0xff] %v10388_v22  ;;  %16105 = vst [vmem:[#allocation315_spill] sm:$0xff] %v10391_v8  ;;  %v10410_v52 = vadd.f32 %v10318_v45, %v10128_v33  ;;  %v1759_v5 = vmul.f32 %v9830_v30, %v16112_v10  ;;  %v1760_v2 = vmul.f32 %v9840_v24, %v16113_v47 }
 0x214   :  { %16106 = vst [vmem:[#allocation321_spill] sm:$0xff] %v10395_v17  ;;  %16108 = vst [vmem:[#allocation327_spill] sm:$0xff] %v10400_v50  ;;  %v1761_v0 = vmul.f32 %v9848_v3, %v16114_v4  ;;  %v1762_v11 = vmul.f32 %v9898_v26, %v16115_v21  ;;  %v10422_v44 = vadd.f32 %v10318_v45, %v10131_v40  ;;  %v16124_v4 = vld [vmem:[#allocation126_spill] sm:$0xff] }
 0x215   :  { %16109 = vst [vmem:[#allocation280_spill] sm:$0xff] %v10403_v57  ;;  %16110 = vst [vmem:[#allocation243_spill] sm:$0xff] %v10406_v6  ;;  %v10426_v33 = vadd.f32 %v10318_v45, %v10162_v60  ;;  %v10430_v62 = vadd.f32 %v10318_v45, %v10197_v58  ;;  %v1763_v23 = vmul.f32 %v10085_v39, %v16119_v41  ;;  %v16123_v58 = vld [vmem:[#allocation125_spill] sm:$0xff]  ;;  %v16125_v41 = vld [vmem:[#allocation127_spill] sm:$0xff] }
 0x216   :  { %16111 = vst [vmem:[#allocation333_spill] sm:$0xff] %v10410_v52  ;;  %16116 = vst [vmem:[#allocation286_spill] sm:$0xff] %v10422_v44  ;;  %v10438_v19 = vadd.f32 %v10318_v45, %v10200_v9  ;;  %v10441_v40 = vadd.f32 %v10318_v45, %v2269_v51  ;;  %v1764_v60 = vmul.f32 %v10220_v55, %v16122_v25  ;;  %v16126_v9 = vld [vmem:[#allocation128_spill] sm:$0xff] }
 0x217   :  { %16117 = vst [vmem:[#allocation247_spill] sm:$0xff] %v10426_v33  ;;  %16118 = vst [vmem:[#allocation339_spill] sm:$0xff] %v10430_v62  ;;  %v10446_v10 = vmul.f32 %v10290_v14, %v1758_v32  ;;  %v1765_v47 = vmul.f32 %v9824_v27, %v16123_v58  ;;  %v1766_v21 = vmul.f32 %v9830_v30, %v16124_v4  ;;  %v10468_v58 = vpop.permute.xlu1 %2638 }
 0x218   :  { %16120 = vst [vmem:[#allocation345_spill] sm:$0xff] %v10438_v19  ;;  %16121 = vst [vmem:[#allocation351_spill] sm:$0xff] %v10441_v40  ;;  %v1767_v28 = vmul.f32 %v9840_v24, %v16125_v41  ;;  %v1768_v35 = vmul.f32 %v9848_v3, %v16126_v9  ;;  %v10457_v45 = vmul.f32 %v10290_v14, %v1759_v5  ;;  %v16127_v9 = vld [vmem:[#allocation129_spill] sm:$0xff] }
 0x219   :  { %v10460_v51 = vmul.f32 %v10290_v14, %v1760_v2  ;;  %v10463_v32 = vmul.f32 %v10290_v14, %v1761_v0  ;;  %v10466_v25 = vmul.f32 %v10290_v14, %v1762_v11  ;;  %v10471_v4 = vmul.f32 %v10290_v14, %v1763_v23 }
 0x21a   :  { %v3280_v41 = vmul.f32 %v10330_v7, %v10382_v54  ;;  %v3281_v5 = vmul.f32 %v10330_v7, %v10385_v31  ;;  %v3282_v2 = vmul.f32 %v10330_v7, %v10388_v22  ;;  %v2276_v0 = vmul.f32 %v10290_v14, %v1764_v60  ;;  %v10494_v14 = vpop.permute.xlu0 %3146 }
 0x21b   :  { %v1769_v11 = vmul.f32 %v9898_v26, %v16127_v9  ;;  %v1770_v38 = vmul.f32 %v10085_v39, %v16128_v48  ;;  %v1771_v23 = vmul.f32 %v10220_v55, %v16129_v37  ;;  %v2277_v42 = vmul.f32 %v10348_v13, %v1765_v47 }
 0x21c   :  { %v2278_v54 = vmul.f32 %v10348_v13, %v1766_v21  ;;  %v10489_v31 = vmul.f32 %v10348_v13, %v1767_v28  ;;  %v10492_v22 = vmul.f32 %v10348_v13, %v1768_v35  ;;  %v3283_v60 = vmul.f32 %v10330_v7, %v10391_v8 }
 0x21d   :  { %v3284_v48 = vmul.f32 %v10330_v7, %v10400_v50  ;;  %v3285_v37 = vmul.f32 %v10330_v7, %v10403_v57  ;;  %v3286_v47 = vmul.f32 %v10330_v7, %v10406_v6  ;;  %v3478_v28 = vsel %vm348_vm0, %v3280_v41, 0.0  ;;  %v10512_v57 = vpop.permute.xlu1 %2134 }
 0x21e   :  { %v3541_v21 = vsel %vm348_vm0, %v3281_v5, 0.0  ;;  %v3604_v35 = vsel %vm348_vm0, %v3282_v2, 0.0  ;;  %v3287_v9 = vmul.f32 %v3143_v36, %v10395_v17  ;;  %v3288_v34 = vmul.f32 %v3143_v36, %v10410_v52  ;;  %v10526_v18 = vpop.permute.xlu0 %2642 }
 0x21f   :  { %v3289_v8 = vmul.f32 %v3143_v36, %v10422_v44  ;;  %v3290_v50 = vmul.f32 %v3143_v36, %v10426_v33  ;;  %v3291_v29 = vmul.f32 %v3143_v36, %v10430_v62  ;;  %v2281_v7 = vmul.f32 %v10348_v13, %v1769_v11 }
 0x220   :  { %v2282_v41 = vmul.f32 %v10348_v13, %v1770_v38  ;;  %v3292_v5 = vmul.f32 %v3143_v36, %v10438_v19  ;;  %v3293_v2 = vmul.f32 %v3143_v36, %v10441_v40  ;;  %v3479_v17 = vadd.f32 %v3478_v28, %v10357_v1 }
 0x221   :  { %v3542_v52 = vadd.f32 %v3541_v21, %v10360_v63  ;;  %v3667_v44 = vsel %vm348_vm0, %v3283_v60, 0.0  ;;  %v3730_v33 = vsel %vm348_vm0, %v3284_v48, 0.0  ;;  %v3605_v62 = vadd.f32 %v3604_v35, %v10362_v49 }
 0x222   :  { %v3793_v6 = vsel %vm348_vm0, %v3285_v37, 0.0  ;;  %v3856_v11 = vsel %vm727_vm1, %v3286_v47, 0.0  ;;  %v3480_v38 = vsel %vm348_vm0, %v3287_v9, 0.0  ;;  %v3543_v36 = vsel %vm348_vm0, %v3288_v34, 0.0 }
 0x223   :  { %v3606_v1 = vsel %vm348_vm0, %v3289_v8, 0.0  ;;  %v3669_v63 = vsel %vm348_vm0, %v3290_v50, 0.0  ;;  %v3732_v60 = vsel %vm348_vm0, %v3291_v29, 0.0  ;;  %v3668_v48 = vadd.f32 %v3667_v44, %v10364_v20  ;;  %v10541_v8 = vpop.permute.xlu1 %3150 }
 0x224   :  { %v3731_v49 = vadd.f32 %v3730_v33, %v10366_v53  ;;  %v3795_v37 = vsel %vm348_vm0, %v3292_v5, 0.0  ;;  %v3858_v47 = vsel %vm727_vm1, %v3293_v2, 0.0  ;;  %v2283_v28 = vmul.f32 %v10348_v13, %v1771_v23  ;;  %v16141_v5 = vld [vmem:[#allocation132_spill] sm:$0xff] }
 0x225   :  { %v3794_v21 = vadd.f32 %v3793_v6, %v10368_v43  ;;  %v3857_v34 = vadd.f32 %v3856_v11, %v10374_v59  ;;  %v10539_v35 = vadd.f32 %v3480_v38, %v3479_v17  ;;  %v10543_v50 = vadd.f32 %v3543_v36, %v3542_v52  ;;  %v16135_v52 = vld [vmem:[#allocation130_spill] sm:$0xff]  ;;  %v16142_v11 = vld [vmem:[#allocation133_spill] sm:$0xff] }
 0x226   :  { %v10545_v29 = vadd.f32 %v3606_v1, %v3605_v62  ;;  %v10547_v20 = vadd.f32 %v3669_v63, %v3668_v48  ;;  %v10549_v53 = vadd.f32 %v3732_v60, %v3731_v49  ;;  %v10557_v13 = vadd.f32 %v10372_v61, %v10446_v10  ;;  %v10577_v10 = vpop.permute.xlu0 %2138 }
 0x227   :  { %v10551_v44 = vadd.f32 %v3795_v37, %v3794_v21  ;;  %v10553_v33 = vadd.f32 %v3858_v47, %v3857_v34  ;;  %v10561_v43 = vadd.f32 %v10372_v61, %v10457_v45  ;;  %v10565_v59 = vadd.f32 %v10372_v61, %v10460_v51  ;;  %v10613_v63 = vpop.permute.xlu1 %2646  ;;  %v16151_v37 = vld [vmem:[#allocation135_spill] sm:$0xff]  ;;  %v16152_v47 = vld [vmem:[#allocation136_spill] sm:$0xff]  ;;  %v16153_v34 = vld [vmem:[#allocation137_spill] sm:$0xff] }
 0x228   :  { %16130 = vst [vmem:[#allocation292_spill] sm:$0xff] %v10557_v13  ;;  %v10569_v17 = vadd.f32 %v10372_v61, %v10463_v32  ;;  %v10573_v6 = vadd.f32 %v10372_v61, %v10466_v25  ;;  %v1772_v62 = vmul.f32 %v9824_v27, %v16135_v52  ;;  %v10581_v45 = vadd.f32 %v10372_v61, %v10471_v4  ;;  %v16140_v25 = vld [vmem:[#allocation131_spill] sm:$0xff]  ;;  %v16143_v4 = vld [vmem:[#allocation134_spill] sm:$0xff] }
 0x229   :  { %16131 = vst [vmem:[#allocation251_spill] sm:$0xff] %v10561_v43  ;;  %16132 = vst [vmem:[#allocation356_spill] sm:$0xff] %v10565_v59  ;;  %v10584_v51 = vadd.f32 %v10372_v61, %v2276_v0  ;;  %v10587_v23 = vadd.f32 %v10468_v58, %v2277_v42  ;;  %v10590_v32 = vadd.f32 %v10468_v58, %v2278_v54  ;;  %v16147_v0 = vld [vmem:[#allocation29_spill] sm:$0xff] }
 0x22a   :  { %16133 = vst [vmem:[#allocation298_spill] sm:$0xff] %v10569_v17  ;;  %16134 = vst [vmem:[#allocation256_spill] sm:$0xff] %v10573_v6  ;;  %v1773_v9 = vmul.f32 %v9830_v30, %v16140_v25  ;;  %v1774_v2 = vmul.f32 %v9840_v24, %v16141_v5  ;;  %v1775_v38 = vmul.f32 %v9848_v3, %v16142_v11  ;;  %v10646_v11 = vpop.permute.xlu0 %3154 }
 0x22b   :  { %16136 = vst [vmem:[#allocation370_spill] sm:$0xff] %v10581_v45  ;;  %16137 = vst [vmem:[#allocation304_spill] sm:$0xff] %v10584_v51  ;;  %v1776_v36 = vmul.f32 %v9898_v26, %v16143_v4  ;;  %v10602_v61 = vadd.f32 %v10468_v58, %v10489_v31  ;;  %v10606_v42 = vadd.f32 %v10468_v58, %v10492_v22  ;;  %v16150_v31 = vld [vmem:[#allocation47_spill] sm:$0xff] }
 0x22c   :  { %16138 = vst [vmem:[#allocation261_spill] sm:$0xff] %v10587_v23  ;;  %16139 = vst [vmem:[#allocation310_spill] sm:$0xff] %v10590_v32  ;;  %v10609_v54 = vadd.f32 %v10468_v58, %v2281_v7  ;;  %v1777_v1 = vmul.f32 %v10085_v39, %v16147_v0  ;;  %v10616_v60 = vadd.f32 %v10468_v58, %v2282_v41  ;;  %v16154_v41 = vld [vmem:[#allocation138_spill] sm:$0xff] }
 0x22d   :  { %16144 = vst [vmem:[#allocation266_spill] sm:$0xff] %v10602_v61  ;;  %16145 = vst [vmem:[#allocation316_spill] sm:$0xff] %v10606_v42  ;;  %v10619_v48 = vadd.f32 %v10468_v58, %v2283_v28  ;;  %v1778_v49 = vmul.f32 %v10220_v55, %v16150_v31  ;;  %v10624_v22 = vmul.f32 %v10434_v12, %v1772_v62  ;;  %v16155_v31 = vld [vmem:[#allocation139_spill] sm:$0xff] }
 0x22e   :  { %16146 = vst [vmem:[#allocation322_spill] sm:$0xff] %v10609_v54  ;;  %16148 = vst [vmem:[#allocation271_spill] sm:$0xff] %v10616_v60  ;;  %v1779_v7 = vmul.f32 %v9824_v27, %v16151_v37  ;;  %v1780_v21 = vmul.f32 %v9830_v30, %v16152_v47  ;;  %v1781_v52 = vmul.f32 %v9840_v24, %v16153_v34  ;;  %v16156_v37 = vld [vmem:[#allocation33_spill] sm:$0xff]  ;;  %v16157_v34 = vld [vmem:[#allocation50_spill] sm:$0xff] }
 0x22f   :  { %16149 = vst [vmem:[#allocation328_spill] sm:$0xff] %v10619_v48  ;;  %v1782_v25 = vmul.f32 %v9848_v3, %v16154_v41  ;;  %v10635_v58 = vmul.f32 %v10434_v12, %v1773_v9  ;;  %v10638_v28 = vmul.f32 %v10434_v12, %v1774_v2  ;;  %v10641_v62 = vmul.f32 %v10434_v12, %v1775_v38 }
 0x230   :  { %v10644_v5 = vmul.f32 %v10434_v12, %v1776_v36  ;;  %v10649_v4 = vmul.f32 %v10434_v12, %v1777_v1  ;;  %v3294_v0 = vmul.f32 %v10494_v14, %v10557_v13  ;;  %v3295_v9 = vmul.f32 %v10494_v14, %v10561_v43 }
 0x231   :  { %v3296_v2 = vmul.f32 %v10494_v14, %v10565_v59  ;;  %v2290_v38 = vmul.f32 %v10434_v12, %v1778_v49  ;;  %v1783_v36 = vmul.f32 %v9898_v26, %v16155_v31  ;;  %v1784_v47 = vmul.f32 %v10085_v39, %v16156_v37  ;;  %v10672_v12 = vpop.permute.xlu1 %2142 }
 0x232   :  { %v1785_v1 = vmul.f32 %v10220_v55, %v16157_v34  ;;  %v2291_v41 = vmul.f32 %v10512_v57, %v1779_v7  ;;  %v2292_v13 = vmul.f32 %v10512_v57, %v1780_v21  ;;  %v10667_v43 = vmul.f32 %v10512_v57, %v1781_v52 }
 0x233   :  { %v10670_v59 = vmul.f32 %v10512_v57, %v1782_v25  ;;  %v3297_v49 = vmul.f32 %v10494_v14, %v10569_v17  ;;  %v3298_v31 = vmul.f32 %v10494_v14, %v10573_v6  ;;  %v3299_v37 = vmul.f32 %v10494_v14, %v10581_v45 }
 0x234   :  { %v3300_v7 = vmul.f32 %v10494_v14, %v10584_v51  ;;  %v3482_v21 = vsel %vm348_vm0, %v3294_v0, 0.0  ;;  %v3545_v52 = vsel %vm348_vm0, %v3295_v9, 0.0  ;;  %v3608_v25 = vsel %vm348_vm0, %v3296_v2, 0.0  ;;  %v10695_v0 = vpop.permute.xlu0 %2650 }
 0x235   :  { %v3301_v34 = vmul.f32 %v10541_v8, %v10587_v23  ;;  %v3302_v17 = vmul.f32 %v10541_v8, %v10590_v32  ;;  %v3303_v6 = vmul.f32 %v10541_v8, %v10602_v61  ;;  %v3304_v45 = vmul.f32 %v10541_v8, %v10606_v42 }
 0x236   :  { %v3305_v14 = vmul.f32 %v10541_v8, %v10609_v54  ;;  %v2295_v9 = vmul.f32 %v10512_v57, %v1783_v36  ;;  %v2296_v2 = vmul.f32 %v10512_v57, %v1784_v47  ;;  %v3306_v51 = vmul.f32 %v10541_v8, %v10616_v60  ;;  %v10711_v60 = vpop.permute.xlu1 %3158 }
 0x237   :  { %v3307_v32 = vmul.f32 %v10541_v8, %v10619_v48  ;;  %v3483_v61 = vadd.f32 %v3482_v21, %v10539_v35  ;;  %v3546_v23 = vadd.f32 %v3545_v52, %v10543_v50  ;;  %v3671_v42 = vsel %vm348_vm0, %v3297_v49, 0.0 }
 0x238   :  { %v3734_v54 = vsel %vm348_vm0, %v3298_v31, 0.0  ;;  %v3609_v40 = vadd.f32 %v3608_v25, %v10545_v29  ;;  %v3797_v36 = vsel %vm348_vm0, %v3299_v37, 0.0  ;;  %v3860_v47 = vsel %vm727_vm1, %v3300_v7, 0.0 }
 0x239   :  { %v3484_v19 = vsel %vm348_vm0, %v3301_v34, 0.0  ;;  %v3547_v8 = vsel %vm348_vm0, %v3302_v17, 0.0  ;;  %v3610_v35 = vsel %vm348_vm0, %v3303_v6, 0.0  ;;  %v3673_v50 = vsel %vm348_vm0, %v3304_v45, 0.0  ;;  %v10726_v6 = vpop.permute.xlu0 %2146 }
 0x23a   :  { %v3736_v49 = vsel %vm348_vm0, %v3305_v14, 0.0  ;;  %v3672_v31 = vadd.f32 %v3671_v42, %v10547_v20  ;;  %v3735_v29 = vadd.f32 %v3734_v54, %v10549_v53  ;;  %v3799_v37 = vsel %vm348_vm0, %v3306_v51, 0.0  ;;  %v10762_v42 = vpop.permute.xlu1 %2654 }
 0x23b   :  { %v3862_v7 = vsel %vm727_vm1, %v3307_v32, 0.0  ;;  %v2297_v21 = vmul.f32 %v10512_v57, %v1785_v1  ;;  %v3798_v52 = vadd.f32 %v3797_v36, %v10551_v44  ;;  %v3861_v17 = vadd.f32 %v3860_v47, %v10553_v33  ;;  %v16169_v1 = vld [vmem:[#allocation142_spill] sm:$0xff]  ;;  %v16170_v36 = vld [vmem:[#allocation143_spill] sm:$0xff] }
 0x23c   :  { %v10724_v25 = vadd.f32 %v3484_v19, %v3483_v61  ;;  %v10728_v45 = vadd.f32 %v3547_v8, %v3546_v23  ;;  %v10730_v34 = vadd.f32 %v3610_v35, %v3609_v40  ;;  %v10732_v20 = vadd.f32 %v3673_v50, %v3672_v31  ;;  %v16163_v23 = vld [vmem:[#allocation140_spill] sm:$0xff] }
 0x23d   :  { %v10734_v53 = vadd.f32 %v3736_v49, %v3735_v29  ;;  %v10736_v51 = vadd.f32 %v3799_v37, %v3798_v52  ;;  %v10738_v32 = vadd.f32 %v3862_v7, %v3861_v17  ;;  %v10742_v57 = vadd.f32 %v10526_v18, %v10624_v22  ;;  %v10798_v50 = vpop.permute.xlu0 %3162  ;;  %v16179_v37 = vld [vmem:[#allocation145_spill] sm:$0xff]  ;;  %v16180_v7 = vld [vmem:[#allocation146_spill] sm:$0xff]  ;;  %v16181_v17 = vld [vmem:[#allocation147_spill] sm:$0xff] }
 0x23e   :  { %v10746_v19 = vadd.f32 %v10526_v18, %v10635_v58  ;;  %v10750_v40 = vadd.f32 %v10526_v18, %v10638_v28  ;;  %v10754_v44 = vadd.f32 %v10526_v18, %v10641_v62  ;;  %v10758_v33 = vadd.f32 %v10526_v18, %v10644_v5  ;;  %v16168_v62 = vld [vmem:[#allocation141_spill] sm:$0xff] }
 0x23f   :  { %16158 = vst [vmem:[#allocation334_spill] sm:$0xff] %v10742_v57  ;;  %v1786_v61 = vmul.f32 %v9824_v27, %v16163_v23  ;;  %v10766_v54 = vadd.f32 %v10526_v18, %v10649_v4  ;;  %v10769_v22 = vadd.f32 %v10526_v18, %v2290_v38  ;;  %v10772_v58 = vadd.f32 %v10613_v63, %v2291_v41  ;;  %v16171_v4 = vld [vmem:[#allocation144_spill] sm:$0xff]  ;;  %v16175_v41 = vld [vmem:[#allocation37_spill] sm:$0xff] }
 0x240   :  { %16159 = vst [vmem:[#allocation276_spill] sm:$0xff] %v10746_v19  ;;  %16160 = vst [vmem:[#allocation340_spill] sm:$0xff] %v10750_v40  ;;  %v10775_v28 = vadd.f32 %v10613_v63, %v2292_v13  ;;  %v1787_v5 = vmul.f32 %v9830_v30, %v16168_v62  ;;  %v1788_v14 = vmul.f32 %v9840_v24, %v16169_v1 }
 0x241   :  { %16161 = vst [vmem:[#allocation228_spill] sm:$0xff] %v10754_v44  ;;  %16162 = vst [vmem:[#allocation281_spill] sm:$0xff] %v10758_v33  ;;  %v1789_v47 = vmul.f32 %v9848_v3, %v16170_v36  ;;  %v1790_v8 = vmul.f32 %v9898_v26, %v16171_v4  ;;  %v10787_v18 = vadd.f32 %v10613_v63, %v10667_v43  ;;  %v16178_v43 = vld [vmem:[#allocation53_spill] sm:$0xff]  ;;  %v10831_v36 = vpop.permute.xlu1 %2150 }
 0x242   :  { %16164 = vst [vmem:[#allocation232_spill] sm:$0xff] %v10766_v54  ;;  %16165 = vst [vmem:[#allocation236_spill] sm:$0xff] %v10769_v22  ;;  %v10791_v13 = vadd.f32 %v10613_v63, %v10670_v59  ;;  %v10794_v38 = vadd.f32 %v10613_v63, %v2295_v9  ;;  %v1791_v35 = vmul.f32 %v10085_v39, %v16175_v41 }
 0x243   :  { %16166 = vst [vmem:[#allocation346_spill] sm:$0xff] %v10772_v58  ;;  %16167 = vst [vmem:[#allocation287_spill] sm:$0xff] %v10775_v28  ;;  %v10801_v49 = vadd.f32 %v10613_v63, %v2296_v2  ;;  %v10804_v31 = vadd.f32 %v10613_v63, %v2297_v21  ;;  %v1792_v29 = vmul.f32 %v10220_v55, %v16178_v43  ;;  %v16182_v2 = vld [vmem:[#allocation148_spill] sm:$0xff]  ;;  %v16183_v43 = vld [vmem:[#allocation149_spill] sm:$0xff] }
 0x244   :  { %16172 = vst [vmem:[#allocation240_spill] sm:$0xff] %v10787_v18  ;;  %16173 = vst [vmem:[#allocation352_spill] sm:$0xff] %v10791_v13  ;;  %v10809_v59 = vmul.f32 %v10577_v10, %v1786_v61  ;;  %v1793_v9 = vmul.f32 %v9824_v27, %v16179_v37  ;;  %v1794_v52 = vmul.f32 %v9830_v30, %v16180_v7  ;;  %v16184_v37 = vld [vmem:[#allocation41_spill] sm:$0xff] }
 0x245   :  { %16174 = vst [vmem:[#allocation357_spill] sm:$0xff] %v10794_v38  ;;  %16176 = vst [vmem:[#allocation293_spill] sm:$0xff] %v10801_v49  ;;  %v1795_v23 = vmul.f32 %v9840_v24, %v16181_v17  ;;  %v1796_v62 = vmul.f32 %v9848_v3, %v16182_v2  ;;  %v10820_v63 = vmul.f32 %v10577_v10, %v1787_v5  ;;  %v16185_v17 = vld [vmem:[#allocation58_spill] sm:$0xff] }
 0x246   :  { %16177 = vst [vmem:[#allocation244_spill] sm:$0xff] %v10804_v31  ;;  %v10823_v21 = vmul.f32 %v10577_v10, %v1788_v14  ;;  %v10826_v61 = vmul.f32 %v10577_v10, %v1789_v47  ;;  %v10829_v1 = vmul.f32 %v10577_v10, %v1790_v8  ;;  %v10834_v4 = vmul.f32 %v10577_v10, %v1791_v35 }
 0x247   :  { %v3308_v41 = vmul.f32 %v10646_v11, %v10742_v57  ;;  %v3309_v5 = vmul.f32 %v10646_v11, %v10746_v19  ;;  %v3310_v14 = vmul.f32 %v10646_v11, %v10750_v40  ;;  %v2304_v47 = vmul.f32 %v10577_v10, %v1792_v29  ;;  %v10857_v10 = vpop.permute.xlu0 %2658 }
 0x248   :  { %v1797_v8 = vmul.f32 %v9898_v26, %v16183_v43  ;;  %v1798_v7 = vmul.f32 %v10085_v39, %v16184_v37  ;;  %v1799_v35 = vmul.f32 %v10220_v55, %v16185_v17  ;;  %v2305_v2 = vmul.f32 %v10672_v12, %v1793_v9 }
 0x249   :  { %v2306_v57 = vmul.f32 %v10672_v12, %v1794_v52  ;;  %v10852_v19 = vmul.f32 %v10672_v12, %v1795_v23  ;;  %v10855_v40 = vmul.f32 %v10672_v12, %v1796_v62  ;;  %v3311_v29 = vmul.f32 %v10646_v11, %v10754_v44 }
 0x24a   :  { %v3312_v43 = vmul.f32 %v10646_v11, %v10758_v33  ;;  %v3313_v37 = vmul.f32 %v10646_v11, %v10766_v54  ;;  %v3314_v9 = vmul.f32 %v10646_v11, %v10769_v22  ;;  %v3486_v52 = vsel %vm348_vm0, %v3308_v41, 0.0  ;;  %v10880_v41 = vpop.permute.xlu1 %3166 }
 0x24b   :  { %v3549_v23 = vsel %vm348_vm0, %v3309_v5, 0.0  ;;  %v3612_v62 = vsel %vm348_vm0, %v3310_v14, 0.0  ;;  %v3315_v17 = vmul.f32 %v10711_v60, %v10772_v58  ;;  %v3316_v44 = vmul.f32 %v10711_v60, %v10775_v28 }
 0x24c   :  { %v3317_v33 = vmul.f32 %v10711_v60, %v10787_v18  ;;  %v3318_v54 = vmul.f32 %v10711_v60, %v10791_v13  ;;  %v3319_v11 = vmul.f32 %v10711_v60, %v10794_v38  ;;  %v2309_v5 = vmul.f32 %v10672_v12, %v1797_v8 }
 0x24d   :  { %v2310_v14 = vmul.f32 %v10672_v12, %v1798_v7  ;;  %v3320_v58 = vmul.f32 %v10711_v60, %v10801_v49  ;;  %v3321_v28 = vmul.f32 %v10711_v60, %v10804_v31  ;;  %v3487_v18 = vadd.f32 %v3486_v52, %v10724_v25  ;;  %v10896_v49 = vpop.permute.xlu0 %2154 }
 0x24e   :  { %v3550_v22 = vadd.f32 %v3549_v23, %v10728_v45  ;;  %v3675_v13 = vsel %vm348_vm0, %v3311_v29, 0.0  ;;  %v3738_v38 = vsel %vm348_vm0, %v3312_v43, 0.0  ;;  %v3613_v48 = vadd.f32 %v3612_v62, %v10730_v34 }
 0x24f   :  { %v3801_v8 = vsel %vm348_vm0, %v3313_v37, 0.0  ;;  %v3864_v7 = vsel %vm727_vm1, %v3314_v9, 0.0  ;;  %v3488_v46 = vsel %vm348_vm0, %v3315_v17, 0.0  ;;  %v3551_v60 = vsel %vm348_vm0, %v3316_v44, 0.0 }
 0x250   :  { %v3614_v25 = vsel %vm348_vm0, %v3317_v33, 0.0  ;;  %v3677_v45 = vsel %vm348_vm0, %v3318_v54, 0.0  ;;  %v3740_v29 = vsel %vm348_vm0, %v3319_v11, 0.0  ;;  %v3676_v43 = vadd.f32 %v3675_v13, %v10732_v20  ;;  %v10911_v33 = vpop.permute.xlu1 %2662 }
 0x251   :  { %v3739_v34 = vadd.f32 %v3738_v38, %v10734_v53  ;;  %v3803_v37 = vsel %vm348_vm0, %v3320_v58, 0.0  ;;  %v3866_v9 = vsel %vm727_vm1, %v3321_v28, 0.0  ;;  %v2311_v52 = vmul.f32 %v10672_v12, %v1799_v35  ;;  %v10947_v13 = vpop.permute.xlu0 %3170  ;;  %v16197_v35 = vld [vmem:[#allocation152_spill] sm:$0xff] }
 0x252   :  { %v3802_v23 = vadd.f32 %v3801_v8, %v10736_v51  ;;  %v3865_v44 = vadd.f32 %v3864_v7, %v10738_v32  ;;  %v10909_v62 = vadd.f32 %v3488_v46, %v3487_v18  ;;  %v10913_v54 = vadd.f32 %v3551_v60, %v3550_v22  ;;  %v16191_v22 = vld [vmem:[#allocation150_spill] sm:$0xff]  ;;  %v16198_v8 = vld [vmem:[#allocation153_spill] sm:$0xff] }
 0x253   :  { %v10915_v17 = vadd.f32 %v3614_v25, %v3613_v48  ;;  %v10917_v20 = vadd.f32 %v3677_v45, %v3676_v43  ;;  %v10919_v53 = vadd.f32 %v3740_v29, %v3739_v34  ;;  %v10927_v12 = vadd.f32 %v10695_v0, %v10809_v59 }
 0x254   :  { %v10921_v58 = vadd.f32 %v3803_v37, %v3802_v23  ;;  %v10923_v28 = vadd.f32 %v3866_v9, %v3865_v44  ;;  %v10931_v46 = vadd.f32 %v10695_v0, %v10820_v63  ;;  %v10935_v48 = vadd.f32 %v10695_v0, %v10823_v21  ;;  %v10983_v45 = vpop.permute.xlu1 %2158  ;;  %v16207_v37 = vld [vmem:[#allocation155_spill] sm:$0xff]  ;;  %v16208_v9 = vld [vmem:[#allocation156_spill] sm:$0xff]  ;;  %v16209_v44 = vld [vmem:[#allocation157_spill] sm:$0xff] }
 0x255   :  { %16186 = vst [vmem:[#allocation362_spill] sm:$0xff] %v10927_v12  ;;  %v10939_v51 = vadd.f32 %v10695_v0, %v10826_v61  ;;  %v10943_v32 = vadd.f32 %v10695_v0, %v10829_v1  ;;  %v1800_v18 = vmul.f32 %v9824_v27, %v16191_v22  ;;  %v10951_v38 = vadd.f32 %v10695_v0, %v10834_v4  ;;  %v16196_v61 = vld [vmem:[#allocation151_spill] sm:$0xff]  ;;  %v16199_v4 = vld [vmem:[#allocation154_spill] sm:$0xff] }
 0x256   :  { %16187 = vst [vmem:[#allocation299_spill] sm:$0xff] %v10931_v46  ;;  %16188 = vst [vmem:[#allocation248_spill] sm:$0xff] %v10935_v48  ;;  %v10954_v59 = vadd.f32 %v10695_v0, %v2304_v47  ;;  %v10957_v63 = vadd.f32 %v10762_v42, %v2305_v2  ;;  %v10960_v21 = vadd.f32 %v10762_v42, %v2306_v57  ;;  %v16203_v2 = vld [vmem:[#allocation45_spill] sm:$0xff] }
 0x257   :  { %16189 = vst [vmem:[#allocation366_spill] sm:$0xff] %v10939_v51  ;;  %16190 = vst [vmem:[#allocation371_spill] sm:$0xff] %v10943_v32  ;;  %v1801_v1 = vmul.f32 %v9830_v30, %v16196_v61  ;;  %v1802_v11 = vmul.f32 %v9840_v24, %v16197_v35  ;;  %v1803_v7 = vmul.f32 %v9848_v3, %v16198_v8  ;;  %v11016_v8 = vpop.permute.xlu0 %2666 }
 0x258   :  { %16192 = vst [vmem:[#allocation305_spill] sm:$0xff] %v10951_v38  ;;  %16193 = vst [vmem:[#allocation252_spill] sm:$0xff] %v10954_v59  ;;  %v1804_v60 = vmul.f32 %v9898_v26, %v16199_v4  ;;  %v10972_v0 = vadd.f32 %v10762_v42, %v10852_v19  ;;  %v10976_v57 = vadd.f32 %v10762_v42, %v10855_v40  ;;  %v16206_v19 = vld [vmem:[#allocation64_spill] sm:$0xff] }
 0x259   :  { %16194 = vst [vmem:[#allocation373_spill] sm:$0xff] %v10957_v63  ;;  %16195 = vst [vmem:[#allocation311_spill] sm:$0xff] %v10960_v21  ;;  %v10979_v47 = vadd.f32 %v10762_v42, %v2309_v5  ;;  %v1805_v25 = vmul.f32 %v10085_v39, %v16203_v2  ;;  %v10986_v29 = vadd.f32 %v10762_v42, %v2310_v14  ;;  %v16210_v14 = vld [vmem:[#allocation158_spill] sm:$0xff] }
 0x25a   :  { %16200 = vst [vmem:[#allocation257_spill] sm:$0xff] %v10972_v0  ;;  %16201 = vst [vmem:[#allocation317_spill] sm:$0xff] %v10976_v57  ;;  %v10989_v43 = vadd.f32 %v10762_v42, %v2311_v52  ;;  %v1806_v34 = vmul.f32 %v10220_v55, %v16206_v19  ;;  %v10994_v40 = vmul.f32 %v10726_v6, %v1800_v18  ;;  %v16211_v19 = vld [vmem:[#allocation159_spill] sm:$0xff] }
 0x25b   :  { %16202 = vst [vmem:[#allocation262_spill] sm:$0xff] %v10979_v47  ;;  %16204 = vst [vmem:[#allocation323_spill] sm:$0xff] %v10986_v29  ;;  %v1807_v5 = vmul.f32 %v9824_v27, %v16207_v37  ;;  %v1808_v23 = vmul.f32 %v9830_v30, %v16208_v9  ;;  %v1809_v22 = vmul.f32 %v9840_v24, %v16209_v44  ;;  %v16212_v37 = vld [vmem:[#allocation48_spill] sm:$0xff]  ;;  %v16213_v44 = vld [vmem:[#allocation67_spill] sm:$0xff] }
 0x25c   :  { %16205 = vst [vmem:[#allocation329_spill] sm:$0xff] %v10989_v43  ;;  %v1810_v61 = vmul.f32 %v9848_v3, %v16210_v14  ;;  %v11005_v42 = vmul.f32 %v10726_v6, %v1801_v1  ;;  %v11008_v52 = vmul.f32 %v10726_v6, %v1802_v11  ;;  %v11011_v18 = vmul.f32 %v10726_v6, %v1803_v7 }
 0x25d   :  { %v11014_v35 = vmul.f32 %v10726_v6, %v1804_v60  ;;  %v11019_v4 = vmul.f32 %v10726_v6, %v1805_v25  ;;  %v3322_v2 = vmul.f32 %v10798_v50, %v10927_v12  ;;  %v3323_v1 = vmul.f32 %v10798_v50, %v10931_v46 }
 0x25e   :  { %v3324_v11 = vmul.f32 %v10798_v50, %v10935_v48  ;;  %v2318_v7 = vmul.f32 %v10726_v6, %v1806_v34  ;;  %v1811_v60 = vmul.f32 %v9898_v26, %v16211_v19  ;;  %v1812_v9 = vmul.f32 %v10085_v39, %v16212_v37  ;;  %v11042_v6 = vpop.permute.xlu1 %3174 }
 0x25f   :  { %v1813_v25 = vmul.f32 %v10220_v55, %v16213_v44  ;;  %v2319_v14 = vmul.f32 %v10831_v36, %v1807_v5  ;;  %v2320_v12 = vmul.f32 %v10831_v36, %v1808_v23  ;;  %v11037_v46 = vmul.f32 %v10831_v36, %v1809_v22 }
 0x260   :  { %v11040_v48 = vmul.f32 %v10831_v36, %v1810_v61  ;;  %v3325_v34 = vmul.f32 %v10798_v50, %v10939_v51  ;;  %v3326_v19 = vmul.f32 %v10798_v50, %v10943_v32  ;;  %v3327_v37 = vmul.f32 %v10798_v50, %v10951_v38 }
 0x261   :  { %v3328_v5 = vmul.f32 %v10798_v50, %v10954_v59  ;;  %v3490_v23 = vsel %vm348_vm0, %v3322_v2, 0.0  ;;  %v3553_v22 = vsel %vm348_vm0, %v3323_v1, 0.0  ;;  %v3616_v61 = vsel %vm348_vm0, %v3324_v11, 0.0  ;;  %v11065_v2 = vpop.permute.xlu0 %2162 }
 0x262   :  { %v3329_v44 = vmul.f32 %v10880_v41, %v10957_v63  ;;  %v3330_v51 = vmul.f32 %v10880_v41, %v10960_v21  ;;  %v3331_v32 = vmul.f32 %v10880_v41, %v10972_v0  ;;  %v3332_v38 = vmul.f32 %v10880_v41, %v10976_v57 }
 0x263   :  { %v3333_v50 = vmul.f32 %v10880_v41, %v10979_v47  ;;  %v2323_v1 = vmul.f32 %v10831_v36, %v1811_v60  ;;  %v2324_v11 = vmul.f32 %v10831_v36, %v1812_v9  ;;  %v3334_v63 = vmul.f32 %v10880_v41, %v10986_v29  ;;  %v11081_v29 = vpop.permute.xlu1 %2670 }
 0x264   :  { %v3335_v21 = vmul.f32 %v10880_v41, %v10989_v43  ;;  %v3491_v0 = vadd.f32 %v3490_v23, %v10909_v62  ;;  %v3554_v59 = vadd.f32 %v3553_v22, %v10913_v54  ;;  %v3679_v57 = vsel %vm348_vm0, %v3325_v34, 0.0 }
 0x265   :  { %v3742_v47 = vsel %vm348_vm0, %v3326_v19, 0.0  ;;  %v3617_v31 = vadd.f32 %v3616_v61, %v10915_v17  ;;  %v3805_v60 = vsel %vm348_vm0, %v3327_v37, 0.0  ;;  %v3868_v9 = vsel %vm727_vm1, %v3328_v5, 0.0 }
 0x266   :  { %v3492_v56 = vsel %vm348_vm0, %v3329_v44, 0.0  ;;  %v3555_v41 = vsel %vm348_vm0, %v3330_v51, 0.0  ;;  %v3618_v62 = vsel %vm348_vm0, %v3331_v32, 0.0  ;;  %v3681_v54 = vsel %vm348_vm0, %v3332_v38, 0.0  ;;  %v11096_v32 = vpop.permute.xlu0 %3178 }
 0x267   :  { %v3744_v34 = vsel %vm348_vm0, %v3333_v50, 0.0  ;;  %v3680_v19 = vadd.f32 %v3679_v57, %v10917_v20  ;;  %v3743_v17 = vadd.f32 %v3742_v47, %v10919_v53  ;;  %v3807_v37 = vsel %vm348_vm0, %v3334_v63, 0.0  ;;  %v11132_v57 = vpop.permute.xlu1 %2166 }
 0x268   :  { %v3870_v5 = vsel %vm727_vm1, %v3335_v21, 0.0  ;;  %v2325_v23 = vmul.f32 %v10831_v36, %v1813_v25  ;;  %v3806_v22 = vadd.f32 %v3805_v60, %v10921_v58  ;;  %v3869_v51 = vadd.f32 %v3868_v9, %v10923_v28  ;;  %v16225_v25 = vld [vmem:[#allocation162_spill] sm:$0xff]  ;;  %v16226_v60 = vld [vmem:[#allocation163_spill] sm:$0xff] }
 0x269   :  { %v11094_v61 = vadd.f32 %v3492_v56, %v3491_v0  ;;  %v11098_v38 = vadd.f32 %v3555_v41, %v3554_v59  ;;  %v11100_v44 = vadd.f32 %v3618_v62, %v3617_v31  ;;  %v11102_v20 = vadd.f32 %v3681_v54, %v3680_v19  ;;  %v16219_v59 = vld [vmem:[#allocation160_spill] sm:$0xff] }
 0x26a   :  { %v11104_v53 = vadd.f32 %v3744_v34, %v3743_v17  ;;  %v11106_v63 = vadd.f32 %v3807_v37, %v3806_v22  ;;  %v11108_v21 = vadd.f32 %v3870_v5, %v3869_v51  ;;  %v11112_v36 = vadd.f32 %v10857_v10, %v10994_v40  ;;  %v11168_v54 = vpop.permute.xlu0 %2674  ;;  %v16235_v37 = vld [vmem:[#allocation165_spill] sm:$0xff]  ;;  %v16236_v5 = vld [vmem:[#allocation166_spill] sm:$0xff]  ;;  %v16237_v51 = vld [vmem:[#allocation167_spill] sm:$0xff] }
 0x26b   :  { %v11116_v56 = vadd.f32 %v10857_v10, %v11005_v42  ;;  %v11120_v31 = vadd.f32 %v10857_v10, %v11008_v52  ;;  %v11124_v58 = vadd.f32 %v10857_v10, %v11011_v18  ;;  %v11128_v28 = vadd.f32 %v10857_v10, %v11014_v35  ;;  %v16224_v18 = vld [vmem:[#allocation161_spill] sm:$0xff] }
 0x26c   :  { %16214 = vst [vmem:[#allocation267_spill] sm:$0xff] %v11112_v36  ;;  %v1814_v0 = vmul.f32 %v9824_v27, %v16219_v59  ;;  %v11136_v47 = vadd.f32 %v10857_v10, %v11019_v4  ;;  %v11139_v40 = vadd.f32 %v10857_v10, %v2318_v7  ;;  %v11142_v42 = vadd.f32 %v10911_v33, %v2319_v14  ;;  %v16227_v4 = vld [vmem:[#allocation164_spill] sm:$0xff]  ;;  %v16231_v14 = vld [vmem:[#allocation51_spill] sm:$0xff] }
 0x26d   :  { %16215 = vst [vmem:[#allocation272_spill] sm:$0xff] %v11116_v56  ;;  %16216 = vst [vmem:[#allocation229_spill] sm:$0xff] %v11120_v31  ;;  %v11145_v52 = vadd.f32 %v10911_v33, %v2320_v12  ;;  %v1815_v35 = vmul.f32 %v9830_v30, %v16224_v18  ;;  %v1816_v50 = vmul.f32 %v9840_v24, %v16225_v25 }
 0x26e   :  { %16217 = vst [vmem:[#allocation233_spill] sm:$0xff] %v11124_v58  ;;  %16218 = vst [vmem:[#allocation237_spill] sm:$0xff] %v11128_v28  ;;  %v1817_v9 = vmul.f32 %v9848_v3, %v16226_v60  ;;  %v1818_v41 = vmul.f32 %v9898_v26, %v16227_v4  ;;  %v11157_v10 = vadd.f32 %v10911_v33, %v11037_v46  ;;  %v16234_v46 = vld [vmem:[#allocation68_spill] sm:$0xff]  ;;  %v11201_v60 = vpop.permute.xlu1 %3182 }
 0x26f   :  { %16220 = vst [vmem:[#allocation335_spill] sm:$0xff] %v11136_v47  ;;  %16221 = vst [vmem:[#allocation277_spill] sm:$0xff] %v11139_v40  ;;  %v11161_v12 = vadd.f32 %v10911_v33, %v11040_v48  ;;  %v11164_v7 = vadd.f32 %v10911_v33, %v2323_v1  ;;  %v1819_v62 = vmul.f32 %v10085_v39, %v16231_v14 }
 0x270   :  { %16222 = vst [vmem:[#allocation241_spill] sm:$0xff] %v11142_v42  ;;  %16223 = vst [vmem:[#allocation341_spill] sm:$0xff] %v11145_v52  ;;  %v11171_v34 = vadd.f32 %v10911_v33, %v2324_v11  ;;  %v11174_v19 = vadd.f32 %v10911_v33, %v2325_v23  ;;  %v1820_v17 = vmul.f32 %v10220_v55, %v16234_v46  ;;  %v16238_v11 = vld [vmem:[#allocation168_spill] sm:$0xff]  ;;  %v16239_v46 = vld [vmem:[#allocation169_spill] sm:$0xff] }
 0x271   :  { %16228 = vst [vmem:[#allocation282_spill] sm:$0xff] %v11157_v10  ;;  %16229 = vst [vmem:[#allocation245_spill] sm:$0xff] %v11161_v12  ;;  %v11179_v48 = vmul.f32 %v10896_v49, %v1814_v0  ;;  %v1821_v1 = vmul.f32 %v9824_v27, %v16235_v37  ;;  %v1822_v22 = vmul.f32 %v9830_v30, %v16236_v5  ;;  %v16240_v37 = vld [vmem:[#allocation54_spill] sm:$0xff] }
 0x272   :  { %16230 = vst [vmem:[#allocation347_spill] sm:$0xff] %v11164_v7  ;;  %16232 = vst [vmem:[#allocation288_spill] sm:$0xff] %v11171_v34  ;;  %v1823_v59 = vmul.f32 %v9840_v24, %v16237_v51  ;;  %v1824_v18 = vmul.f32 %v9848_v3, %v16238_v11  ;;  %v11190_v33 = vmul.f32 %v10896_v49, %v1815_v35  ;;  %v16241_v51 = vld [vmem:[#allocation71_spill] sm:$0xff] }
 0x273   :  { %16233 = vst [vmem:[#allocation249_spill] sm:$0xff] %v11174_v19  ;;  %v11193_v23 = vmul.f32 %v10896_v49, %v1816_v50  ;;  %v11196_v0 = vmul.f32 %v10896_v49, %v1817_v9  ;;  %v11199_v25 = vmul.f32 %v10896_v49, %v1818_v41  ;;  %v11204_v4 = vmul.f32 %v10896_v49, %v1819_v62 }
 0x274   :  { %v3336_v14 = vmul.f32 %v10947_v13, %v11112_v36  ;;  %v3337_v35 = vmul.f32 %v10947_v13, %v11116_v56  ;;  %v3338_v50 = vmul.f32 %v10947_v13, %v11120_v31  ;;  %v2332_v9 = vmul.f32 %v10896_v49, %v1820_v17  ;;  %v11227_v49 = vpop.permute.xlu0 %2170 }
 0x275   :  { %v1825_v41 = vmul.f32 %v9898_v26, %v16239_v46  ;;  %v1826_v5 = vmul.f32 %v10085_v39, %v16240_v37  ;;  %v1827_v62 = vmul.f32 %v10220_v55, %v16241_v51  ;;  %v2333_v11 = vmul.f32 %v10983_v45, %v1821_v1 }
 0x276   :  { %v2334_v36 = vmul.f32 %v10983_v45, %v1822_v22  ;;  %v11222_v56 = vmul.f32 %v10983_v45, %v1823_v59  ;;  %v11225_v31 = vmul.f32 %v10983_v45, %v1824_v18  ;;  %v3339_v17 = vmul.f32 %v10947_v13, %v11124_v58 }
 0x277   :  { %v3340_v46 = vmul.f32 %v10947_v13, %v11128_v28  ;;  %v3341_v37 = vmul.f32 %v10947_v13, %v11136_v47  ;;  %v3342_v1 = vmul.f32 %v10947_v13, %v11139_v40  ;;  %v3494_v22 = vsel %vm348_vm0, %v3336_v14, 0.0  ;;  %v11250_v14 = vpop.permute.xlu1 %2678 }
 0x278   :  { %v3557_v59 = vsel %vm348_vm0, %v3337_v35, 0.0  ;;  %v3620_v18 = vsel %vm348_vm0, %v3338_v50, 0.0  ;;  %v3343_v51 = vmul.f32 %v11042_v6, %v11142_v42  ;;  %v3344_v58 = vmul.f32 %v11042_v6, %v11145_v52 }
 0x279   :  { %v3345_v28 = vmul.f32 %v11042_v6, %v11157_v10  ;;  %v3346_v47 = vmul.f32 %v11042_v6, %v11161_v12  ;;  %v3347_v13 = vmul.f32 %v11042_v6, %v11164_v7  ;;  %v2337_v35 = vmul.f32 %v10983_v45, %v1825_v41 }
 0x27a   :  { %v2338_v50 = vmul.f32 %v10983_v45, %v1826_v5  ;;  %v3348_v42 = vmul.f32 %v11042_v6, %v11171_v34  ;;  %v3349_v52 = vmul.f32 %v11042_v6, %v11174_v19  ;;  %v3495_v10 = vadd.f32 %v3494_v22, %v11094_v61  ;;  %v11266_v34 = vpop.permute.xlu0 %3186 }
 0x27b   :  { %v3558_v40 = vadd.f32 %v3557_v59, %v11098_v38  ;;  %v3683_v12 = vsel %vm348_vm0, %v3339_v17, 0.0  ;;  %v3746_v7 = vsel %vm348_vm0, %v3340_v46, 0.0  ;;  %v3621_v43 = vadd.f32 %v3620_v18, %v11100_v44 }
 0x27c   :  { %v3809_v41 = vsel %vm348_vm0, %v3341_v37, 0.0  ;;  %v3872_v5 = vsel %vm727_vm1, %v3342_v1, 0.0  ;;  %v3496_v16 = vsel %vm348_vm0, %v3343_v51, 0.0  ;;  %v3559_v6 = vsel %vm348_vm0, %v3344_v58, 0.0 }
 0x27d   :  { %v3622_v61 = vsel %vm348_vm0, %v3345_v28, 0.0  ;;  %v3685_v38 = vsel %vm348_vm0, %v3346_v47, 0.0  ;;  %v3748_v17 = vsel %vm348_vm0, %v3347_v13, 0.0  ;;  %v3684_v46 = vadd.f32 %v3683_v12, %v11102_v20  ;;  %v11281_v28 = vpop.permute.xlu1 %2174 }
 0x27e   :  { %v3747_v44 = vadd.f32 %v3746_v7, %v11104_v53  ;;  %v3811_v37 = vsel %vm348_vm0, %v3348_v42, 0.0  ;;  %v3874_v1 = vsel %vm727_vm1, %v3349_v52, 0.0  ;;  %v2339_v22 = vmul.f32 %v10983_v45, %v1827_v62  ;;  %v11317_v12 = vpop.permute.xlu0 %2682  ;;  %v16253_v62 = vld [vmem:[#allocation172_spill] sm:$0xff] }
 0x27f   :  { %v3810_v59 = vadd.f32 %v3809_v41, %v11106_v63  ;;  %v3873_v58 = vadd.f32 %v3872_v5, %v11108_v21  ;;  %v11279_v18 = vadd.f32 %v3496_v16, %v3495_v10  ;;  %v11283_v47 = vadd.f32 %v3559_v6, %v3558_v40  ;;  %v16247_v40 = vld [vmem:[#allocation170_spill] sm:$0xff]  ;;  %v16254_v41 = vld [vmem:[#allocation173_spill] sm:$0xff] }
 0x280   :  { %v11285_v51 = vadd.f32 %v3622_v61, %v3621_v43  ;;  %v11287_v20 = vadd.f32 %v3685_v38, %v3684_v46  ;;  %v11289_v53 = vadd.f32 %v3748_v17, %v3747_v44  ;;  %v11297_v45 = vadd.f32 %v11016_v8, %v11179_v48 }
 0x281   :  { %v11291_v42 = vadd.f32 %v3811_v37, %v3810_v59  ;;  %v11293_v52 = vadd.f32 %v3874_v1, %v3873_v58  ;;  %v11301_v16 = vadd.f32 %v11016_v8, %v11190_v33  ;;  %v11305_v43 = vadd.f32 %v11016_v8, %v11193_v23  ;;  %v11353_v38 = vpop.permute.xlu1 %3190  ;;  %v16263_v37 = vld [vmem:[#allocation175_spill] sm:$0xff]  ;;  %v16264_v1 = vld [vmem:[#allocation176_spill] sm:$0xff]  ;;  %v16265_v58 = vld [vmem:[#allocation177_spill] sm:$0xff] }
 0x282   :  { %16242 = vst [vmem:[#allocation353_spill] sm:$0xff] %v11297_v45  ;;  %v11309_v63 = vadd.f32 %v11016_v8, %v11196_v0  ;;  %v11313_v21 = vadd.f32 %v11016_v8, %v11199_v25  ;;  %v1828_v10 = vmul.f32 %v9824_v27, %v16247_v40  ;;  %v11321_v7 = vadd.f32 %v11016_v8, %v11204_v4  ;;  %v16252_v0 = vld [vmem:[#allocation171_spill] sm:$0xff]  ;;  %v16255_v4 = vld [vmem:[#allocation174_spill] sm:$0xff] }
 0x283   :  { %16243 = vst [vmem:[#allocation294_spill] sm:$0xff] %v11301_v16  ;;  %16244 = vst [vmem:[#allocation253_spill] sm:$0xff] %v11305_v43  ;;  %v11324_v48 = vadd.f32 %v11016_v8, %v2332_v9  ;;  %v11327_v33 = vadd.f32 %v11081_v29, %v2333_v11  ;;  %v11330_v23 = vadd.f32 %v11081_v29, %v2334_v36  ;;  %v16259_v11 = vld [vmem:[#allocation55_spill] sm:$0xff] }
 0x284   :  { %16245 = vst [vmem:[#allocation358_spill] sm:$0xff] %v11309_v63  ;;  %16246 = vst [vmem:[#allocation300_spill] sm:$0xff] %v11313_v21  ;;  %v1829_v25 = vmul.f32 %v9830_v30, %v16252_v0  ;;  %v1830_v13 = vmul.f32 %v9840_v24, %v16253_v62  ;;  %v1831_v5 = vmul.f32 %v9848_v3, %v16254_v41  ;;  %v11386_v41 = vpop.permute.xlu0 %2178 }
 0x285   :  { %16248 = vst [vmem:[#allocation258_spill] sm:$0xff] %v11321_v7  ;;  %16249 = vst [vmem:[#allocation363_spill] sm:$0xff] %v11324_v48  ;;  %v1832_v6 = vmul.f32 %v9898_v26, %v16255_v4  ;;  %v11342_v8 = vadd.f32 %v11081_v29, %v11222_v56  ;;  %v11346_v36 = vadd.f32 %v11081_v29, %v11225_v31  ;;  %v16262_v56 = vld [vmem:[#allocation72_spill] sm:$0xff] }
 0x286   :  { %16250 = vst [vmem:[#allocation306_spill] sm:$0xff] %v11327_v33  ;;  %16251 = vst [vmem:[#allocation263_spill] sm:$0xff] %v11330_v23  ;;  %v11349_v9 = vadd.f32 %v11081_v29, %v2337_v35  ;;  %v1833_v61 = vmul.f32 %v10085_v39, %v16259_v11  ;;  %v11356_v17 = vadd.f32 %v11081_v29, %v2338_v50  ;;  %v16266_v50 = vld [vmem:[#allocation178_spill] sm:$0xff] }
 0x287   :  { %16256 = vst [vmem:[#allocation367_spill] sm:$0xff] %v11342_v8  ;;  %16257 = vst [vmem:[#allocation312_spill] sm:$0xff] %v11346_v36  ;;  %v11359_v46 = vadd.f32 %v11081_v29, %v2339_v22  ;;  %v1834_v44 = vmul.f32 %v10220_v55, %v16262_v56  ;;  %v11364_v31 = vmul.f32 %v11065_v2, %v1828_v10  ;;  %v16267_v56 = vld [vmem:[#allocation179_spill] sm:$0xff] }
 0x288   :  { %16258 = vst [vmem:[#allocation268_spill] sm:$0xff] %v11349_v9  ;;  %16260 = vst [vmem:[#allocation372_spill] sm:$0xff] %v11356_v17  ;;  %v1835_v35 = vmul.f32 %v9824_v27, %v16263_v37  ;;  %v1836_v59 = vmul.f32 %v9830_v30, %v16264_v1  ;;  %v1837_v40 = vmul.f32 %v9840_v24, %v16265_v58  ;;  %v16268_v37 = vld [vmem:[#allocation56_spill] sm:$0xff]  ;;  %v16269_v58 = vld [vmem:[#allocation73_spill] sm:$0xff] }
 0x289   :  { %16261 = vst [vmem:[#allocation318_spill] sm:$0xff] %v11359_v46  ;;  %v1838_v0 = vmul.f32 %v9848_v3, %v16266_v50  ;;  %v11375_v29 = vmul.f32 %v11065_v2, %v1829_v25  ;;  %v11378_v22 = vmul.f32 %v11065_v2, %v1830_v13  ;;  %v11381_v10 = vmul.f32 %v11065_v2, %v1831_v5 }
 0x28a   :  { %v11384_v62 = vmul.f32 %v11065_v2, %v1832_v6  ;;  %v11389_v4 = vmul.f32 %v11065_v2, %v1833_v61  ;;  %v3350_v11 = vmul.f32 %v11096_v32, %v11297_v45  ;;  %v3351_v25 = vmul.f32 %v11096_v32, %v11301_v16 }
 0x28b   :  { %v3352_v13 = vmul.f32 %v11096_v32, %v11305_v43  ;;  %v2346_v5 = vmul.f32 %v11065_v2, %v1834_v44  ;;  %v1839_v6 = vmul.f32 %v9898_v26, %v16267_v56  ;;  %v1840_v1 = vmul.f32 %v10085_v39, %v16268_v37  ;;  %v11412_v2 = vpop.permute.xlu1 %2686 }
 0x28c   :  { %v1841_v61 = vmul.f32 %v10220_v55, %v16269_v58  ;;  %v2347_v50 = vmul.f32 %v11132_v57, %v1835_v35  ;;  %v2348_v45 = vmul.f32 %v11132_v57, %v1836_v59  ;;  %v11407_v16 = vmul.f32 %v11132_v57, %v1837_v40 }
 0x28d   :  { %v11410_v43 = vmul.f32 %v11132_v57, %v1838_v0  ;;  %v3353_v44 = vmul.f32 %v11096_v32, %v11309_v63  ;;  %v3354_v56 = vmul.f32 %v11096_v32, %v11313_v21  ;;  %v3355_v37 = vmul.f32 %v11096_v32, %v11321_v7 }
 0x28e   :  { %v3356_v35 = vmul.f32 %v11096_v32, %v11324_v48  ;;  %v3498_v59 = vsel %vm348_vm0, %v3350_v11, 0.0  ;;  %v3561_v40 = vsel %vm348_vm0, %v3351_v25, 0.0  ;;  %v3624_v0 = vsel %vm348_vm0, %v3352_v13, 0.0  ;;  %v11435_v11 = vpop.permute.xlu0 %3194 }
 0x28f   :  { %v3357_v58 = vmul.f32 %v11201_v60, %v11327_v33  ;;  %v3358_v63 = vmul.f32 %v11201_v60, %v11330_v23  ;;  %v3359_v21 = vmul.f32 %v11201_v60, %v11342_v8  ;;  %v3360_v7 = vmul.f32 %v11201_v60, %v11346_v36 }
 0x290   :  { %v3361_v32 = vmul.f32 %v11201_v60, %v11349_v9  ;;  %v2351_v25 = vmul.f32 %v11132_v57, %v1839_v6  ;;  %v2352_v13 = vmul.f32 %v11132_v57, %v1840_v1  ;;  %v3362_v48 = vmul.f32 %v11201_v60, %v11356_v17  ;;  %v11451_v17 = vpop.permute.xlu1 %2182 }
 0x291   :  { %v3363_v23 = vmul.f32 %v11201_v60, %v11359_v46  ;;  %v3499_v8 = vadd.f32 %v3498_v59, %v11279_v18  ;;  %v3562_v33 = vadd.f32 %v3561_v40, %v11283_v47  ;;  %v3687_v36 = vsel %vm348_vm0, %v3353_v44, 0.0 }
 0x292   :  { %v3750_v9 = vsel %vm348_vm0, %v3354_v56, 0.0  ;;  %v3625_v19 = vadd.f32 %v3624_v0, %v11285_v51  ;;  %v3813_v6 = vsel %vm348_vm0, %v3355_v37, 0.0  ;;  %v3876_v1 = vsel %vm727_vm1, %v3356_v35, 0.0 }
 0x293   :  { %v3500_v15 = vsel %vm348_vm0, %v3357_v58, 0.0  ;;  %v3563_v60 = vsel %vm348_vm0, %v3358_v63, 0.0  ;;  %v3626_v18 = vsel %vm348_vm0, %v3359_v21, 0.0  ;;  %v3689_v47 = vsel %vm348_vm0, %v3360_v7, 0.0  ;;  %v11466_v21 = vpop.permute.xlu0 %2690 }
 0x294   :  { %v3752_v44 = vsel %vm348_vm0, %v3361_v32, 0.0  ;;  %v3688_v56 = vadd.f32 %v3687_v36, %v11287_v20  ;;  %v3751_v51 = vadd.f32 %v3750_v9, %v11289_v53  ;;  %v3815_v37 = vsel %vm348_vm0, %v3362_v48, 0.0  ;;  %v11502_v36 = vpop.permute.xlu1 %3198 }
 0x295   :  { %v3878_v35 = vsel %vm727_vm1, %v3363_v23, 0.0  ;;  %v2353_v59 = vmul.f32 %v11132_v57, %v1841_v61  ;;  %v3814_v40 = vadd.f32 %v3813_v6, %v11291_v42  ;;  %v3877_v63 = vadd.f32 %v3876_v1, %v11293_v52  ;;  %v16281_v61 = vld [vmem:[#allocation182_spill] sm:$0xff]  ;;  %v16282_v6 = vld [vmem:[#allocation183_spill] sm:$0xff] }
 0x296   :  { %v11464_v0 = vadd.f32 %v3500_v15, %v3499_v8  ;;  %v11468_v7 = vadd.f32 %v3563_v60, %v3562_v33  ;;  %v11470_v58 = vadd.f32 %v3626_v18, %v3625_v19  ;;  %v11472_v20 = vadd.f32 %v3689_v47, %v3688_v56  ;;  %v16275_v33 = vld [vmem:[#allocation180_spill] sm:$0xff] }
 0x297   :  { %v11474_v53 = vadd.f32 %v3752_v44, %v3751_v51  ;;  %v11476_v48 = vadd.f32 %v3815_v37, %v3814_v40  ;;  %v11478_v23 = vadd.f32 %v3878_v35, %v3877_v63  ;;  %v11482_v57 = vadd.f32 %v11168_v54, %v11364_v31  ;;  %v11538_v47 = vpop.permute.xlu0 %2186  ;;  %v16291_v37 = vld [vmem:[#allocation185_spill] sm:$0xff]  ;;  %v16292_v35 = vld [vmem:[#allocation186_spill] sm:$0xff]  ;;  %v16293_v63 = vld [vmem:[#allocation187_spill] sm:$0xff] }
 0x298   :  { %v11486_v15 = vadd.f32 %v11168_v54, %v11375_v29  ;;  %v11490_v19 = vadd.f32 %v11168_v54, %v11378_v22  ;;  %v11494_v42 = vadd.f32 %v11168_v54, %v11381_v10  ;;  %v11498_v52 = vadd.f32 %v11168_v54, %v11384_v62  ;;  %v16280_v10 = vld [vmem:[#allocation181_spill] sm:$0xff] }
 0x299   :  { %16270 = vst [vmem:[#allocation273_spill] sm:$0xff] %v11482_v57  ;;  %v1842_v8 = vmul.f32 %v9824_v27, %v16275_v33  ;;  %v11506_v9 = vadd.f32 %v11168_v54, %v11389_v4  ;;  %v11509_v31 = vadd.f32 %v11168_v54, %v2346_v5  ;;  %v11512_v29 = vadd.f32 %v11250_v14, %v2347_v50  ;;  %v16283_v4 = vld [vmem:[#allocation184_spill] sm:$0xff]  ;;  %v16287_v50 = vld [vmem:[#allocation57_spill] sm:$0xff] }
 0x29a   :  { %16271 = vst [vmem:[#allocation374_spill] sm:$0xff] %v11486_v15  ;;  %16272 = vst [vmem:[#allocation324_spill] sm:$0xff] %v11490_v19  ;;  %v11515_v22 = vadd.f32 %v11250_v14, %v2348_v45  ;;  %v1843_v62 = vmul.f32 %v9830_v30, %v16280_v10  ;;  %v1844_v32 = vmul.f32 %v9840_v24, %v16281_v61 }
 0x29b   :  { %16273 = vst [vmem:[#allocation278_spill] sm:$0xff] %v11494_v42  ;;  %16274 = vst [vmem:[#allocation330_spill] sm:$0xff] %v11498_v52  ;;  %v1845_v1 = vmul.f32 %v9848_v3, %v16282_v6  ;;  %v1846_v60 = vmul.f32 %v9898_v26, %v16283_v4  ;;  %v11527_v54 = vadd.f32 %v11250_v14, %v11407_v16  ;;  %v16290_v16 = vld [vmem:[#allocation77_spill] sm:$0xff]  ;;  %v11571_v6 = vpop.permute.xlu1 %2694 }
 0x29c   :  { %16276 = vst [vmem:[#allocation283_spill] sm:$0xff] %v11506_v9  ;;  %16277 = vst [vmem:[#allocation336_spill] sm:$0xff] %v11509_v31  ;;  %v11531_v45 = vadd.f32 %v11250_v14, %v11410_v43  ;;  %v11534_v5 = vadd.f32 %v11250_v14, %v2351_v25  ;;  %v1847_v18 = vmul.f32 %v10085_v39, %v16287_v50 }
 0x29d   :  { %16278 = vst [vmem:[#allocation289_spill] sm:$0xff] %v11512_v29  ;;  %16279 = vst [vmem:[#allocation342_spill] sm:$0xff] %v11515_v22  ;;  %v11541_v44 = vadd.f32 %v11250_v14, %v2352_v13  ;;  %v11544_v56 = vadd.f32 %v11250_v14, %v2353_v59  ;;  %v1848_v51 = vmul.f32 %v10220_v55, %v16290_v16  ;;  %v16294_v13 = vld [vmem:[#allocation188_spill] sm:$0xff]  ;;  %v16295_v16 = vld [vmem:[#allocation189_spill] sm:$0xff] }
 0x29e   :  { %16284 = vst [vmem:[#allocation295_spill] sm:$0xff] %v11527_v54  ;;  %16285 = vst [vmem:[#allocation348_spill] sm:$0xff] %v11531_v45  ;;  %v11549_v43 = vmul.f32 %v11227_v49, %v1842_v8  ;;  %v1849_v25 = vmul.f32 %v9824_v27, %v16291_v37  ;;  %v1850_v40 = vmul.f32 %v9830_v30, %v16292_v35  ;;  %v16296_v37 = vld [vmem:[#allocation59_spill] sm:$0xff] }
 0x29f   :  { %16286 = vst [vmem:[#allocation301_spill] sm:$0xff] %v11534_v5  ;;  %16288 = vst [vmem:[#allocation354_spill] sm:$0xff] %v11541_v44  ;;  %v1851_v33 = vmul.f32 %v9840_v24, %v16293_v63  ;;  %v1852_v10 = vmul.f32 %v9848_v3, %v16294_v13  ;;  %v11560_v14 = vmul.f32 %v11227_v49, %v1843_v62  ;;  %v16297_v63 = vld [vmem:[#allocation78_spill] sm:$0xff] }
 0x2a0   :  { %16289 = vst [vmem:[#allocation307_spill] sm:$0xff] %v11544_v56  ;;  %v11563_v59 = vmul.f32 %v11227_v49, %v1844_v32  ;;  %v11566_v8 = vmul.f32 %v11227_v49, %v1845_v1  ;;  %v11569_v61 = vmul.f32 %v11227_v49, %v1846_v60  ;;  %v11574_v4 = vmul.f32 %v11227_v49, %v1847_v18 }
 0x2a1   :  { %v3364_v50 = vmul.f32 %v11266_v34, %v11482_v57  ;;  %v3365_v62 = vmul.f32 %v11266_v34, %v11486_v15  ;;  %v3366_v32 = vmul.f32 %v11266_v34, %v11490_v19  ;;  %v2360_v1 = vmul.f32 %v11227_v49, %v1848_v51  ;;  %v11597_v49 = vpop.permute.xlu0 %3202 }
 0x2a2   :  { %v1853_v60 = vmul.f32 %v9898_v26, %v16295_v16  ;;  %v1854_v35 = vmul.f32 %v10085_v39, %v16296_v37  ;;  %v1855_v18 = vmul.f32 %v10220_v55, %v16297_v63  ;;  %v2361_v13 = vmul.f32 %v11281_v28, %v1849_v25 }
 0x2a3   :  { %v2362_v57 = vmul.f32 %v11281_v28, %v1850_v40  ;;  %v11592_v15 = vmul.f32 %v11281_v28, %v1851_v33  ;;  %v11595_v19 = vmul.f32 %v11281_v28, %v1852_v10  ;;  %v3367_v51 = vmul.f32 %v11266_v34, %v11494_v42 }
 0x2a4   :  { %v3368_v16 = vmul.f32 %v11266_v34, %v11498_v52  ;;  %v3369_v37 = vmul.f32 %v11266_v34, %v11506_v9  ;;  %v3370_v25 = vmul.f32 %v11266_v34, %v11509_v31  ;;  %v3502_v40 = vsel %vm348_vm0, %v3364_v50, 0.0  ;;  %v11620_v50 = vpop.permute.xlu1 %2190 }
 0x2a5   :  { %v3565_v33 = vsel %vm348_vm0, %v3365_v62, 0.0  ;;  %v3628_v10 = vsel %vm348_vm0, %v3366_v32, 0.0  ;;  %v3371_v63 = vmul.f32 %v11353_v38, %v11512_v29  ;;  %v3372_v42 = vmul.f32 %v11353_v38, %v11515_v22  ;;  %16298 = vst [vmem:[#allocation359_spill] sm:$0xff] %v11620_v50 }
 0x2a6   :  { %v3373_v52 = vmul.f32 %v11353_v38, %v11527_v54  ;;  %v3374_v9 = vmul.f32 %v11353_v38, %v11531_v45  ;;  %v3375_v34 = vmul.f32 %v11353_v38, %v11534_v5  ;;  %v2365_v62 = vmul.f32 %v11281_v28, %v1853_v60 }
 0x2a7   :  { %v2366_v32 = vmul.f32 %v11281_v28, %v1854_v35  ;;  %v3376_v29 = vmul.f32 %v11353_v38, %v11541_v44  ;;  %v3377_v22 = vmul.f32 %v11353_v38, %v11544_v56  ;;  %v3503_v54 = vadd.f32 %v3502_v40, %v11464_v0  ;;  %v11636_v44 = vpop.permute.xlu0 %2698 }
 0x2a8   :  { %v3566_v31 = vadd.f32 %v3565_v33, %v11468_v7  ;;  %v3691_v45 = vsel %vm348_vm0, %v3367_v51, 0.0  ;;  %v3754_v5 = vsel %vm348_vm0, %v3368_v16, 0.0  ;;  %v3629_v46 = vadd.f32 %v3628_v10, %v11470_v58 }
 0x2a9   :  { %v3817_v60 = vsel %vm348_vm0, %v3369_v37, 0.0  ;;  %v3880_v35 = vsel %vm727_vm1, %v3370_v25, 0.0  ;;  %v3504_v50 = vsel %vm348_vm0, %v3371_v63, 0.0  ;;  %v3567_v38 = vsel %vm348_vm0, %v3372_v42, 0.0 }
 0x2aa   :  { %v3630_v0 = vsel %vm348_vm0, %v3373_v52, 0.0  ;;  %v3693_v7 = vsel %vm348_vm0, %v3374_v9, 0.0  ;;  %v3756_v51 = vsel %vm348_vm0, %v3375_v34, 0.0  ;;  %v3692_v16 = vadd.f32 %v3691_v45, %v11472_v20  ;;  %v11651_v52 = vpop.permute.xlu1 %3206  ;;  %v16310_v34 = vld [vmem:[#allocation192_spill] sm:$0xff] }
 0x2ab   :  { %v3755_v58 = vadd.f32 %v3754_v5, %v11474_v53  ;;  %v3819_v37 = vsel %vm348_vm0, %v3376_v29, 0.0  ;;  %v3882_v25 = vsel %vm727_vm1, %v3377_v22, 0.0  ;;  %v2367_v40 = vmul.f32 %v11281_v28, %v1855_v18  ;;  %v11687_v5 = vpop.permute.xlu0 %2194 }
 0x2ac   :  { %v3818_v33 = vadd.f32 %v3817_v60, %v11476_v48  ;;  %v3881_v42 = vadd.f32 %v3880_v35, %v11478_v23  ;;  %v11649_v10 = vadd.f32 %v3504_v50, %v3503_v54  ;;  %v11653_v9 = vadd.f32 %v3567_v38, %v3566_v31  ;;  %v16304_v54 = vld [vmem:[#allocation190_spill] sm:$0xff]  ;;  %v16311_v60 = vld [vmem:[#allocation193_spill] sm:$0xff] }
 0x2ad   :  { %v11655_v63 = vadd.f32 %v3630_v0, %v3629_v46  ;;  %v11657_v20 = vadd.f32 %v3693_v7, %v3692_v16  ;;  %v11659_v53 = vadd.f32 %v3756_v51, %v3755_v58  ;;  %v11667_v28 = vadd.f32 %v11317_v12, %v11549_v43 }
 0x2ae   :  { %v11661_v29 = vadd.f32 %v3819_v37, %v3818_v33  ;;  %v11663_v22 = vadd.f32 %v3882_v25, %v3881_v42  ;;  %v11671_v48 = vadd.f32 %v11317_v12, %v11560_v14  ;;  %v11675_v46 = vadd.f32 %v11317_v12, %v11563_v59  ;;  %v11723_v7 = vpop.permute.xlu1 %2702  ;;  %v16320_v37 = vld [vmem:[#allocation195_spill] sm:$0xff]  ;;  %v16321_v25 = vld [vmem:[#allocation196_spill] sm:$0xff]  ;;  %v16322_v42 = vld [vmem:[#allocation197_spill] sm:$0xff] }
 0x2af   :  { %16299 = vst [vmem:[#allocation313_spill] sm:$0xff] %v11667_v28  ;;  %v11679_v23 = vadd.f32 %v11317_v12, %v11566_v8  ;;  %v11683_v31 = vadd.f32 %v11317_v12, %v11569_v61  ;;  %v1856_v45 = vmul.f32 %v9824_v27, %v16304_v54  ;;  %v11691_v43 = vadd.f32 %v11317_v12, %v11574_v4  ;;  %v16309_v61 = vld [vmem:[#allocation191_spill] sm:$0xff]  ;;  %v16312_v4 = vld [vmem:[#allocation194_spill] sm:$0xff] }
 0x2b0   :  { %16300 = vst [vmem:[#allocation364_spill] sm:$0xff] %v11671_v48  ;;  %16301 = vst [vmem:[#allocation368_spill] sm:$0xff] %v11675_v46  ;;  %v11694_v14 = vadd.f32 %v11317_v12, %v2360_v1  ;;  %v11697_v59 = vadd.f32 %v11412_v2, %v2361_v13  ;;  %v11700_v8 = vadd.f32 %v11412_v2, %v2362_v57  ;;  %v16316_v13 = vld [vmem:[#allocation60_spill] sm:$0xff] }
 0x2b1   :  { %16302 = vst [vmem:[#allocation319_spill] sm:$0xff] %v11679_v23  ;;  %16303 = vst [vmem:[#allocation325_spill] sm:$0xff] %v11683_v31  ;;  %v1857_v18 = vmul.f32 %v9830_v30, %v16309_v61  ;;  %v1858_v50 = vmul.f32 %v9840_v24, %v16310_v34  ;;  %v1859_v35 = vmul.f32 %v9848_v3, %v16311_v60  ;;  %v11756_v60 = vpop.permute.xlu0 %3210 }
 0x2b2   :  { %16305 = vst [vmem:[#allocation331_spill] sm:$0xff] %v11691_v43  ;;  %16306 = vst [vmem:[#allocation337_spill] sm:$0xff] %v11694_v14  ;;  %v1860_v38 = vmul.f32 %v9898_v26, %v16312_v4  ;;  %v11712_v12 = vadd.f32 %v11412_v2, %v11592_v15  ;;  %v11716_v57 = vadd.f32 %v11412_v2, %v11595_v19  ;;  %v16319_v15 = vld [vmem:[#allocation79_spill] sm:$0xff] }
 0x2b3   :  { %16307 = vst [vmem:[#allocation343_spill] sm:$0xff] %v11697_v59  ;;  %16308 = vst [vmem:[#allocation349_spill] sm:$0xff] %v11700_v8  ;;  %v11719_v1 = vadd.f32 %v11412_v2, %v2365_v62  ;;  %v1861_v0 = vmul.f32 %v10085_v39, %v16316_v13  ;;  %v11726_v51 = vadd.f32 %v11412_v2, %v2366_v32  ;;  %v16323_v32 = vld [vmem:[#allocation198_spill] sm:$0xff] }
 0x2b4   :  { %16313 = vst [vmem:[#allocation355_spill] sm:$0xff] %v11712_v12  ;;  %16314 = vst [vmem:[#allocation360_spill] sm:$0xff] %v11716_v57  ;;  %v11729_v16 = vadd.f32 %v11412_v2, %v2367_v40  ;;  %v1862_v58 = vmul.f32 %v10220_v55, %v16319_v15  ;;  %v11734_v19 = vmul.f32 %v11386_v41, %v1856_v45  ;;  %v16324_v15 = vld [vmem:[#allocation199_spill] sm:$0xff] }
 0x2b5   :  { %16315 = vst [vmem:[#allocation365_spill] sm:$0xff] %v11719_v1  ;;  %16317 = vst [vmem:[#allocation369_spill] sm:$0xff] %v11726_v51  ;;  %v1863_v62 = vmul.f32 %v9824_v27, %v16320_v37  ;;  %v1864_v33 = vmul.f32 %v9830_v30, %v16321_v25  ;;  %v1865_v54 = vmul.f32 %v9840_v24, %v16322_v42  ;;  %v16325_v37 = vld [vmem:[#allocation61_spill] sm:$0xff]  ;;  %v16326_v42 = vld [vmem:[#allocation80_spill] sm:$0xff] }
 0x2b6   :  { %16318 = vst [vmem:[#allocation85_spill] sm:$0xff] %v11729_v16  ;;  %v1866_v61 = vmul.f32 %v9848_v3, %v16323_v32  ;;  %v11745_v2 = vmul.f32 %v11386_v41, %v1857_v18  ;;  %v11748_v40 = vmul.f32 %v11386_v41, %v1858_v50  ;;  %v11751_v45 = vmul.f32 %v11386_v41, %v1859_v35 }
 0x2b7   :  { %v11754_v34 = vmul.f32 %v11386_v41, %v1860_v38  ;;  %v11759_v4 = vmul.f32 %v11386_v41, %v1861_v0  ;;  %v3378_v13 = vmul.f32 %v11435_v11, %v11667_v28  ;;  %v3379_v18 = vmul.f32 %v11435_v11, %v11671_v48 }
 0x2b8   :  { %v3380_v50 = vmul.f32 %v11435_v11, %v11675_v46  ;;  %v2374_v35 = vmul.f32 %v11386_v41, %v1862_v58  ;;  %v1867_v38 = vmul.f32 %v9898_v26, %v16324_v15  ;;  %v1868_v25 = vmul.f32 %v10085_v39, %v16325_v37  ;;  %v11782_v41 = vpop.permute.xlu1 %2198 }
 0x2b9   :  { %v1869_v0 = vmul.f32 %v10220_v55, %v16326_v42  ;;  %v2375_v32 = vmul.f32 %v11451_v17, %v1863_v62  ;;  %v2376_v28 = vmul.f32 %v11451_v17, %v1864_v33  ;;  %v11777_v48 = vmul.f32 %v11451_v17, %v1865_v54 }
 0x2ba   :  { %v11780_v46 = vmul.f32 %v11451_v17, %v1866_v61  ;;  %v3381_v58 = vmul.f32 %v11435_v11, %v11679_v23  ;;  %v3382_v15 = vmul.f32 %v11435_v11, %v11683_v31  ;;  %v3383_v37 = vmul.f32 %v11435_v11, %v11691_v43 }
 0x2bb   :  { %v3384_v62 = vmul.f32 %v11435_v11, %v11694_v14  ;;  %v3506_v33 = vsel %vm348_vm0, %v3378_v13, 0.0  ;;  %v3569_v54 = vsel %vm348_vm0, %v3379_v18, 0.0  ;;  %v3632_v61 = vsel %vm348_vm0, %v3380_v50, 0.0  ;;  %v11805_v13 = vpop.permute.xlu0 %2706 }
 0x2bc   :  { %v3385_v42 = vmul.f32 %v11502_v36, %v11697_v59  ;;  %v3386_v23 = vmul.f32 %v11502_v36, %v11700_v8  ;;  %v3387_v31 = vmul.f32 %v11502_v36, %v11712_v12  ;;  %v3388_v43 = vmul.f32 %v11502_v36, %v11716_v57  ;;  %16327 = vst [vmem:[#allocation86_spill] sm:$0xff] %v11805_v13 }
 0x2bd   :  { %v3389_v11 = vmul.f32 %v11502_v36, %v11719_v1  ;;  %v2379_v18 = vmul.f32 %v11451_v17, %v1867_v38  ;;  %v2380_v50 = vmul.f32 %v11451_v17, %v1868_v25  ;;  %v3390_v59 = vmul.f32 %v11502_v36, %v11726_v51  ;;  %v11821_v51 = vpop.permute.xlu1 %3214 }
 0x2be   :  { %v3391_v8 = vmul.f32 %v11502_v36, %v11729_v16  ;;  %v3507_v12 = vadd.f32 %v3506_v33, %v11649_v10  ;;  %v3570_v14 = vadd.f32 %v3569_v54, %v11653_v9  ;;  %v3695_v57 = vsel %vm348_vm0, %v3381_v58, 0.0 }
 0x2bf   :  { %v3758_v1 = vsel %vm348_vm0, %v3382_v15, 0.0  ;;  %v3633_v56 = vadd.f32 %v3632_v61, %v11655_v63  ;;  %v3821_v38 = vsel %vm348_vm0, %v3383_v37, 0.0  ;;  %v3884_v25 = vsel %vm727_vm1, %v3384_v62, 0.0 }
 0x2c0   :  { %v3508_v13 = vsel %vm348_vm0, %v3385_v42, 0.0  ;;  %v3571_v36 = vsel %vm348_vm0, %v3386_v23, 0.0  ;;  %v3634_v10 = vsel %vm348_vm0, %v3387_v31, 0.0  ;;  %v3697_v9 = vsel %vm348_vm0, %v3388_v43, 0.0  ;;  %v11836_v31 = vpop.permute.xlu0 %2202 }
 0x2c1   :  { %v3760_v58 = vsel %vm348_vm0, %v3389_v11, 0.0  ;;  %v3696_v15 = vadd.f32 %v3695_v57, %v11657_v20  ;;  %v3759_v63 = vadd.f32 %v3758_v1, %v11659_v53  ;;  %v3823_v37 = vsel %vm348_vm0, %v3390_v59, 0.0  ;;  %v11872_v1 = vpop.permute.xlu1 %2710  ;;  %v16339_v11 = vld [vmem:[#allocation202_spill] sm:$0xff] }
 0x2c2   :  { %v3886_v62 = vsel %vm727_vm1, %v3391_v8, 0.0  ;;  %v2381_v33 = vmul.f32 %v11451_v17, %v1869_v0  ;;  %v3822_v54 = vadd.f32 %v3821_v38, %v11661_v29  ;;  %v3885_v23 = vadd.f32 %v3884_v25, %v11663_v22  ;;  %v16340_v38 = vld [vmem:[#allocation203_spill] sm:$0xff] }
 0x2c3   :  { %v11834_v61 = vadd.f32 %v3508_v13, %v3507_v12  ;;  %v11838_v43 = vadd.f32 %v3571_v36, %v3570_v14  ;;  %v11840_v42 = vadd.f32 %v3634_v10, %v3633_v56  ;;  %v11842_v20 = vadd.f32 %v3697_v9, %v3696_v15  ;;  %v16333_v12 = vld [vmem:[#allocation200_spill] sm:$0xff] }
 0x2c4   :  { %v11844_v53 = vadd.f32 %v3760_v58, %v3759_v63  ;;  %v11846_v59 = vadd.f32 %v3823_v37, %v3822_v54  ;;  %v11848_v8 = vadd.f32 %v3886_v62, %v3885_v23  ;;  %v11852_v17 = vadd.f32 %v11466_v21, %v11734_v19  ;;  %v11908_v9 = vpop.permute.xlu0 %3218  ;;  %v16349_v37 = vld [vmem:[#allocation205_spill] sm:$0xff] }
 0x2c5   :  { %v11856_v29 = vadd.f32 %v11466_v21, %v11745_v2  ;;  %v11860_v56 = vadd.f32 %v11466_v21, %v11748_v40  ;;  %v11864_v22 = vadd.f32 %v11466_v21, %v11751_v45  ;;  %v11868_v14 = vadd.f32 %v11466_v21, %v11754_v34  ;;  %v16338_v34 = vld [vmem:[#allocation201_spill] sm:$0xff] }
 0x2c6   :  { %16328 = vst [vmem:[#allocation95_spill] sm:$0xff] %v11852_v17  ;;  %v1870_v57 = vmul.f32 %v9824_v27, %v16333_v12  ;;  %v11876_v19 = vadd.f32 %v11466_v21, %v11759_v4  ;;  %v11879_v2 = vadd.f32 %v11466_v21, %v2374_v35  ;;  %v11882_v40 = vadd.f32 %v11571_v6, %v2375_v32  ;;  %v16341_v4 = vld [vmem:[#allocation204_spill] sm:$0xff]  ;;  %v16345_v32 = vld [vmem:[#allocation62_spill] sm:$0xff]  ;;  %v16350_v62 = vld [vmem:[#allocation209_spill] sm:$0xff] }
 0x2c7   :  { %16329 = vst [vmem:[#allocation87_spill] sm:$0xff] %v11856_v29  ;;  %16330 = vst [vmem:[#allocation96_spill] sm:$0xff] %v11860_v56  ;;  %v11885_v45 = vadd.f32 %v11571_v6, %v2376_v28  ;;  %v1871_v0 = vmul.f32 %v9830_v30, %v16338_v34  ;;  %v1872_v13 = vmul.f32 %v9840_v24, %v16339_v11  ;;  %v16351_v23 = vld [vmem:[#allocation213_spill] sm:$0xff] }
 0x2c8   :  { %16331 = vst [vmem:[#allocation88_spill] sm:$0xff] %v11864_v22  ;;  %16332 = vst [vmem:[#allocation97_spill] sm:$0xff] %v11868_v14  ;;  %v1873_v25 = vmul.f32 %v9848_v3, %v16340_v38  ;;  %v1874_v36 = vmul.f32 %v9898_v26, %v16341_v4  ;;  %v11897_v21 = vadd.f32 %v11571_v6, %v11777_v48  ;;  %v16348_v48 = vld [vmem:[#allocation81_spill] sm:$0xff]  ;;  %v11941_v38 = vpop.permute.xlu1 %2206 }
 0x2c9   :  { %16334 = vst [vmem:[#allocation98_spill] sm:$0xff] %v11876_v19  ;;  %16335 = vst [vmem:[#allocation90_spill] sm:$0xff] %v11879_v2  ;;  %v11901_v28 = vadd.f32 %v11571_v6, %v11780_v46  ;;  %v11904_v35 = vadd.f32 %v11571_v6, %v2379_v18  ;;  %v1875_v10 = vmul.f32 %v10085_v39, %v16345_v32 }
 0x2ca   :  { %16336 = vst [vmem:[#allocation91_spill] sm:$0xff] %v11882_v40  ;;  %16337 = vst [vmem:[#allocation89_spill] sm:$0xff] %v11885_v45  ;;  %v11911_v58 = vadd.f32 %v11571_v6, %v2380_v50  ;;  %v11914_v15 = vadd.f32 %v11571_v6, %v2381_v33  ;;  %v1876_v63 = vmul.f32 %v10220_v55, %v16348_v48  ;;  %v16352_v50 = vld [vmem:[#allocation214_spill] sm:$0xff]  ;;  %v16354_v48 = vld [vmem:[#allocation9_spill] sm:$0xff] }
 0x2cb   :  { %16342 = vst [vmem:[#allocation92_spill] sm:$0xff] %v11897_v21  ;;  %16343 = vst [vmem:[#allocation93_spill] sm:$0xff] %v11901_v28  ;;  %v11919_v46 = vmul.f32 %v11538_v47, %v1870_v57  ;;  %v1877_v18 = vmul.f32 %v9824_v27, %v16349_v37  ;;  %v1878_v54 = vmul.f32 %v9830_v30, %v16350_v62  ;;  %v16355_v37 = vld [vmem:[#allocation63_spill] sm:$0xff] }
 0x2cc   :  { %16344 = vst [vmem:[#allocation94_spill] sm:$0xff] %v11904_v35  ;;  %16346 = vst [vmem:[#allocation99_spill] sm:$0xff] %v11911_v58  ;;  %v1879_v12 = vmul.f32 %v9840_v24, %v16351_v23  ;;  %v1880_v34 = vmul.f32 %v9848_v3, %v16352_v50  ;;  %v11930_v6 = vmul.f32 %v11538_v47, %v1871_v0  ;;  %v16357_v50 = vld [vmem:[#allocation359_spill] sm:$0xff] }
 0x2cd   :  { %16347 = vst [vmem:[#allocation100_spill] sm:$0xff] %v11914_v15  ;;  %v11933_v33 = vmul.f32 %v11538_v47, %v1872_v13  ;;  %v11936_v57 = vmul.f32 %v11538_v47, %v1873_v25  ;;  %v11939_v11 = vmul.f32 %v11538_v47, %v1874_v36  ;;  %16353 = vst [vmem:[#allocation115_spill] sm:$0xff] %v11941_v38 }
 0x2ce   :  { %v11944_v4 = vmul.f32 %v11538_v47, %v1875_v10  ;;  %v3392_v32 = vmul.f32 %v11597_v49, %v11852_v17  ;;  %v3393_v0 = vmul.f32 %v11597_v49, %v11856_v29  ;;  %v3394_v13 = vmul.f32 %v11597_v49, %v11860_v56  ;;  %v16356_v10 = vld [vmem:[#allocation82_spill] sm:$0xff] }
 0x2cf   :  { %v11953_v25 = vmul.f32 %v11538_v47, %v1876_v63  ;;  %v1881_v36 = vmul.f32 %v9898_v26, %v16354_v48  ;;  %v1882_v62 = vmul.f32 %v10085_v39, %v16355_v37  ;;  %v1883_v23 = vmul.f32 %v10220_v55, %v16356_v10  ;;  %v11969_v47 = vpop.permute.xlu0 %2714 }
 0x2d0   :  { %v2389_v17 = vmul.f32 %v16357_v50, %v1877_v18  ;;  %v2390_v16 = vmul.f32 %v16357_v50, %v1878_v54  ;;  %v11964_v29 = vmul.f32 %v16357_v50, %v1879_v12  ;;  %v11967_v56 = vmul.f32 %v16357_v50, %v1880_v34 }
 0x2d1   :  { %v3395_v63 = vmul.f32 %v11597_v49, %v11864_v22  ;;  %v3396_v48 = vmul.f32 %v11597_v49, %v11868_v14  ;;  %v3397_v37 = vmul.f32 %v11597_v49, %v11876_v19  ;;  %v3398_v18 = vmul.f32 %v11597_v49, %v11879_v2 }
 0x2d2   :  { %v3510_v54 = vsel %vm348_vm0, %v3392_v32, 0.0  ;;  %v3573_v12 = vsel %vm348_vm0, %v3393_v0, 0.0  ;;  %v3636_v34 = vsel %vm348_vm0, %v3394_v13, 0.0  ;;  %v3399_v10 = vmul.f32 %v11651_v52, %v11882_v40  ;;  %v11992_v32 = vpop.permute.xlu1 %3222 }
 0x2d3   :  { %v3400_v22 = vmul.f32 %v11651_v52, %v11885_v45  ;;  %v3401_v14 = vmul.f32 %v11651_v52, %v11897_v21  ;;  %v3402_v19 = vmul.f32 %v11651_v52, %v11901_v28  ;;  %v3403_v49 = vmul.f32 %v11651_v52, %v11904_v35  ;;  %16358 = vst [vmem:[#allocation116_spill] sm:$0xff] %v11992_v32 }
 0x2d4   :  { %v2393_v0 = vmul.f32 %v16357_v50, %v1881_v36  ;;  %v2394_v13 = vmul.f32 %v16357_v50, %v1882_v62  ;;  %v3404_v40 = vmul.f32 %v11651_v52, %v11911_v58  ;;  %v3405_v45 = vmul.f32 %v11651_v52, %v11914_v15  ;;  %v12008_v58 = vpop.permute.xlu0 %2210 }
 0x2d5   :  { %v3511_v21 = vadd.f32 %v3510_v54, %v11834_v61  ;;  %v3574_v2 = vadd.f32 %v3573_v12, %v11838_v43  ;;  %v3699_v28 = vsel %vm348_vm0, %v3395_v63, 0.0  ;;  %v3762_v35 = vsel %vm348_vm0, %v3396_v48, 0.0 }
 0x2d6   :  { %v3637_v32 = vadd.f32 %v3636_v34, %v11840_v42  ;;  %v3825_v36 = vsel %vm348_vm0, %v3397_v37, 0.0  ;;  %v3888_v62 = vsel %vm727_vm1, %v3398_v18, 0.0  ;;  %v3512_v38 = vsel %vm348_vm0, %v3399_v10, 0.0 }
 0x2d7   :  { %v3575_v52 = vsel %vm348_vm0, %v3400_v22, 0.0  ;;  %v3638_v61 = vsel %vm348_vm0, %v3401_v14, 0.0  ;;  %v3701_v43 = vsel %vm348_vm0, %v3402_v19, 0.0  ;;  %v3764_v63 = vsel %vm348_vm0, %v3403_v49, 0.0  ;;  %v12023_v14 = vpop.permute.xlu1 %2718  ;;  %v16371_v49 = vld [vmem:[#allocation3_spill] sm:$0xff] }
 0x2d8   :  { %v3700_v48 = vadd.f32 %v3699_v28, %v11842_v20  ;;  %v3763_v42 = vadd.f32 %v3762_v35, %v11844_v53  ;;  %v3827_v37 = vsel %vm348_vm0, %v3404_v40, 0.0  ;;  %v3890_v18 = vsel %vm727_vm1, %v3405_v45, 0.0  ;;  %v16367_v35 = vld [vmem:[#allocation215_spill] sm:$0xff] }
 0x2d9   :  { %v2395_v54 = vmul.f32 %v16357_v50, %v1883_v23  ;;  %v3826_v12 = vadd.f32 %v3825_v36, %v11846_v59  ;;  %v3889_v22 = vadd.f32 %v3888_v62, %v11848_v8  ;;  %v12021_v34 = vadd.f32 %v3512_v38, %v3511_v21  ;;  %v12059_v38 = vpop.permute.xlu0 %3226  ;;  %v16369_v23 = vld [vmem:[#allocation216_spill] sm:$0xff]  ;;  %v16370_v50 = vld [vmem:[#allocation2_spill] sm:$0xff] }
 0x2da   :  { %v12025_v19 = vadd.f32 %v3575_v52, %v3574_v2  ;;  %v12027_v10 = vadd.f32 %v3638_v61, %v3637_v32  ;;  %v12029_v20 = vadd.f32 %v3701_v43, %v3700_v48  ;;  %v12031_v53 = vadd.f32 %v3764_v63, %v3763_v42  ;;  %v16381_v63 = vld [vmem:[#allocation65_spill] sm:$0xff] }
 0x2db   :  { %v12033_v40 = vadd.f32 %v3827_v37, %v3826_v12  ;;  %v12035_v45 = vadd.f32 %v3890_v18, %v3889_v22  ;;  %v12039_v59 = vadd.f32 %v11636_v44, %v11919_v46  ;;  %v12043_v8 = vadd.f32 %v11636_v44, %v11930_v6  ;;  %v16383_v18 = vld [vmem:[#allocation4_spill] sm:$0xff] }
 0x2dc   :  { %16359 = vst [vmem:[#allocation101_spill] sm:$0xff] %v12031_v53  ;;  %v12047_v2 = vadd.f32 %v11636_v44, %v11933_v33  ;;  %v12051_v21 = vadd.f32 %v11636_v44, %v11936_v57  ;;  %v12055_v28 = vadd.f32 %v11636_v44, %v11939_v11  ;;  %v1884_v46 = vmul.f32 %v9824_v27, %v16367_v35  ;;  %v16385_v35 = vld [vmem:[#allocation219_spill] sm:$0xff]  ;;  %v16418_v53 = vld [vmem:[#allocation30_spill] sm:$0xff] }
 0x2dd   :  { %16360 = vst [vmem:[#allocation117_spill] sm:$0xff] %v12033_v40  ;;  %16361 = vst [vmem:[#allocation102_spill] sm:$0xff] %v12035_v45  ;;  %v12063_v6 = vadd.f32 %v11636_v44, %v11944_v4  ;;  %v1885_v33 = vmul.f32 %v9830_v30, %v16369_v23  ;;  %v1886_v57 = vmul.f32 %v9840_v24, %v16370_v50  ;;  %v16375_v4 = vld [vmem:[#allocation14_spill] sm:$0xff]  ;;  %v16386_v50 = vld [vmem:[#allocation220_spill] sm:$0xff] }
 0x2de   :  { %16362 = vst [vmem:[#allocation103_spill] sm:$0xff] %v12039_v59  ;;  %16363 = vst [vmem:[#allocation206_spill] sm:$0xff] %v12043_v8  ;;  %v1887_v32 = vmul.f32 %v9848_v3, %v16371_v49  ;;  %v12073_v11 = vadd.f32 %v11636_v44, %v11953_v25  ;;  %v12076_v36 = vadd.f32 %v11723_v7, %v2389_v17  ;;  %v12097_v25 = vpop.permute.xlu1 %2214  ;;  %v12119_v49 = vpop.permute.xlu0 %2722 }
 0x2df   :  { %16364 = vst [vmem:[#allocation207_spill] sm:$0xff] %v12047_v2  ;;  %16365 = vst [vmem:[#allocation118_spill] sm:$0xff] %v12051_v21  ;;  %v12079_v62 = vadd.f32 %v11723_v7, %v2390_v16  ;;  %v1888_v52 = vmul.f32 %v9898_v26, %v16375_v4  ;;  %v12085_v61 = vadd.f32 %v11723_v7, %v11964_v29  ;;  %v16382_v29 = vld [vmem:[#allocation217_spill] sm:$0xff] }
 0x2e0   :  { %16366 = vst [vmem:[#allocation208_spill] sm:$0xff] %v12055_v28  ;;  %16368 = vst [vmem:[#allocation119_spill] sm:$0xff] %v12063_v6  ;;  %v12089_v43 = vadd.f32 %v11723_v7, %v11967_v56  ;;  %v12092_v44 = vadd.f32 %v11723_v7, %v2393_v0  ;;  %v12095_v17 = vadd.f32 %v11723_v7, %v2394_v13 }
 0x2e1   :  { %16372 = vst [vmem:[#allocation104_spill] sm:$0xff] %v12073_v11  ;;  %16373 = vst [vmem:[#allocation210_spill] sm:$0xff] %v12076_v36  ;;  %v12100_v16 = vadd.f32 %v11723_v7, %v2395_v54  ;;  %v1889_v48 = vmul.f32 %v10085_v39, %v16381_v63  ;;  %v1890_v42 = vmul.f32 %v10220_v55, %v16382_v29  ;;  %v16384_v54 = vld [vmem:[#allocation218_spill] sm:$0xff]  ;;  %v16389_v63 = vld [vmem:[#allocation221_spill] sm:$0xff] }
 0x2e2   :  { %16374 = vst [vmem:[#allocation15_spill] sm:$0xff] %v12079_v62  ;;  %16376 = vst [vmem:[#allocation22_spill] sm:$0xff] %v12085_v61  ;;  %v2396_v56 = vmul.f32 %v11687_v5, %v1884_v46  ;;  %v2397_v37 = vmul.f32 %v11687_v5, %v1885_v33  ;;  %v2398_v0 = vmul.f32 %v11687_v5, %v1886_v57  ;;  %v16387_v33 = vld [vmem:[#allocation23_spill] sm:$0xff] }
 0x2e3   :  { %16377 = vst [vmem:[#allocation19_spill] sm:$0xff] %v12089_v43  ;;  %16378 = vst [vmem:[#allocation20_spill] sm:$0xff] %v12092_v44  ;;  %v2399_v13 = vmul.f32 %v11687_v5, %v1887_v32  ;;  %v1891_v12 = vmul.f32 %v9824_v27, %v16383_v18  ;;  %v2400_v7 = vmul.f32 %v11687_v5, %v1888_v52  ;;  %v16388_v32 = vld [vmem:[#allocation66_spill] sm:$0xff] }
 0x2e4   :  { %16379 = vst [vmem:[#allocation24_spill] sm:$0xff] %v12095_v17  ;;  %16380 = vst [vmem:[#allocation105_spill] sm:$0xff] %v12100_v16  ;;  %v1892_v22 = vmul.f32 %v9830_v30, %v16384_v54  ;;  %v1893_v23 = vmul.f32 %v9840_v24, %v16385_v35  ;;  %v1894_v46 = vmul.f32 %v9848_v3, %v16386_v50 }
 0x2e5   :  { %v1895_v57 = vmul.f32 %v9898_v26, %v16387_v33  ;;  %v1896_v4 = vmul.f32 %v10085_v39, %v16388_v32  ;;  %v1897_v52 = vmul.f32 %v10220_v55, %v16389_v63  ;;  %v3406_v29 = vmul.f32 %v11756_v60, %v12039_v59  ;;  %v12143_v59 = vpop.permute.xlu1 %3230 }
 0x2e6   :  { %v2401_v18 = vmul.f32 %v11687_v5, %v1889_v48  ;;  %v3407_v54 = vmul.f32 %v11756_v60, %v12043_v8  ;;  %v3408_v35 = vmul.f32 %v11756_v60, %v12047_v2  ;;  %v3409_v50 = vmul.f32 %v11756_v60, %v12051_v21 }
 0x2e7   :  { %v2402_v33 = vmul.f32 %v11687_v5, %v1890_v42  ;;  %v3410_v32 = vmul.f32 %v11756_v60, %v12055_v28  ;;  %v3411_v63 = vmul.f32 %v11756_v60, %v12063_v6  ;;  %v3412_v48 = vmul.f32 %v11756_v60, %v12073_v11 }
 0x2e8   :  { %v2403_v8 = vmul.f32 %v11782_v41, %v1891_v12  ;;  %v2404_v2 = vmul.f32 %v11782_v41, %v1892_v22  ;;  %v2405_v15 = vmul.f32 %v11782_v41, %v1893_v23  ;;  %v2406_v21 = vmul.f32 %v11782_v41, %v1894_v46  ;;  %v12166_v23 = vpop.permute.xlu0 %2218 }
 0x2e9   :  { %v2407_v5 = vmul.f32 %v11782_v41, %v1895_v57  ;;  %v2408_v42 = vmul.f32 %v11782_v41, %v1896_v4  ;;  %v2409_v28 = vmul.f32 %v11782_v41, %v1897_v52  ;;  %v12153_v6 = vsel %vm348_vm0, %v3406_v29, 0.0 }
 0x2ea   :  { %v3577_v60 = vsel %vm348_vm0, %v3407_v54, 0.0  ;;  %v12157_v11 = vsel %vm348_vm0, %v3408_v35, 0.0  ;;  %v12160_v12 = vsel %vm348_vm0, %v3409_v50, 0.0  ;;  %v12164_v22 = vmul.f32 %v11821_v51, %v12076_v36  ;;  %v16410_v36 = vld [vmem:[#allocation10_spill] sm:$0xff] }
 0x2eb   :  { %v12169_v46 = vsel %vm348_vm0, %v3410_v32, 0.0  ;;  %v12172_v41 = vsel %vm348_vm0, %v3411_v63, 0.0  ;;  %v12175_v57 = vsel %vm727_vm1, %v3412_v48, 0.0  ;;  %v3414_v4 = vmul.f32 %v11821_v51, %v12079_v62  ;;  %v16396_v32 = vld [vmem:[#allocation86_spill] sm:$0xff]  ;;  %v12207_v62 = vpop.permute.xlu1 %2726 }
 0x2ec   :  { %16390 = vst [vmem:[#allocation106_spill] sm:$0xff] %v12169_v46  ;;  %16391 = vst [vmem:[#allocation107_spill] sm:$0xff] %v12172_v41  ;;  %v12181_v52 = vmul.f32 %v11821_v51, %v12085_v61  ;;  %v12185_v29 = vmul.f32 %v11821_v51, %v12089_v43  ;;  %v12189_v54 = vmul.f32 %v11821_v51, %v12092_v44  ;;  %v16399_v43 = vld [vmem:[#allocation5_spill] sm:$0xff]  ;;  %v16417_v46 = vld [vmem:[#allocation7_spill] sm:$0xff] }
 0x2ed   :  { %16392 = vst [vmem:[#allocation108_spill] sm:$0xff] %v12175_v57  ;;  %v12193_v35 = vmul.f32 %v11821_v51, %v12095_v17  ;;  %v12197_v50 = vmul.f32 %v11821_v51, %v12100_v16  ;;  %v12200_v63 = vadd.f32 %v16396_v32, %v2396_v56  ;;  %v12203_v48 = vadd.f32 %v16396_v32, %v2397_v37  ;;  %v16414_v57 = vld [vmem:[#allocation27_spill] sm:$0xff] }
 0x2ee   :  { %16393 = vst [vmem:[#allocation109_spill] sm:$0xff] %v12189_v54  ;;  %v1899_v61 = vmul.f32 %v9830_v30, %v16399_v43  ;;  %v12210_v44 = vadd.f32 %v16396_v32, %v2398_v0  ;;  %v12213_v17 = vadd.f32 %v16396_v32, %v2399_v13  ;;  %v12216_v51 = vadd.f32 %v16396_v32, %v2400_v7  ;;  %v16416_v54 = vld [vmem:[#allocation6_spill] sm:$0xff] }
 0x2ef   :  { %16394 = vst [vmem:[#allocation211_spill] sm:$0xff] %v12193_v35  ;;  %16395 = vst [vmem:[#allocation28_spill] sm:$0xff] %v12197_v50  ;;  %v12219_v56 = vadd.f32 %v16396_v32, %v2401_v18  ;;  %v12222_v37 = vadd.f32 %v16396_v32, %v2402_v33  ;;  %v12225_v16 = vadd.f32 %v11872_v1, %v2403_v8  ;;  %v12239_v18 = vpop.permute.xlu0 %3234  ;;  %v16411_v32 = vld [vmem:[#allocation16_spill] sm:$0xff]  ;;  %v16413_v50 = vld [vmem:[#allocation222_spill] sm:$0xff]  ;;  %v12266_v41 = vpop.permute.xlu1 %2730 }
 0x2f0   :  { %16397 = vst [vmem:[#allocation36_spill] sm:$0xff] %v12200_v63  ;;  %16398 = vst [vmem:[#allocation110_spill] sm:$0xff] %v12203_v48  ;;  %v12228_v43 = vadd.f32 %v11872_v1, %v2404_v2  ;;  %v12231_v0 = vadd.f32 %v11872_v1, %v2405_v15  ;;  %v12234_v13 = vadd.f32 %v11872_v1, %v2406_v21 }
 0x2f1   :  { %16400 = vst [vmem:[#allocation111_spill] sm:$0xff] %v12210_v44  ;;  %16401 = vst [vmem:[#allocation112_spill] sm:$0xff] %v12213_v17  ;;  %v12237_v7 = vadd.f32 %v11872_v1, %v2407_v5  ;;  %v1906_v33 = vmul.f32 %v9830_v30, %v16410_v36  ;;  %v1913_v8 = vmul.f32 %v9830_v30, %v16411_v32 }
 0x2f2   :  { %16402 = vst [vmem:[#allocation113_spill] sm:$0xff] %v12216_v51  ;;  %16403 = vst [vmem:[#allocation114_spill] sm:$0xff] %v12219_v56  ;;  %v12246_v2 = vadd.f32 %v11872_v1, %v2408_v42  ;;  %v1898_v15 = vmul.f32 %v9824_v27, %v16413_v50  ;;  %v2411_v21 = vmul.f32 %v11836_v31, %v1899_v61 }
 0x2f3   :  { %16404 = vst [vmem:[#allocation212_spill] sm:$0xff] %v12222_v37  ;;  %16405 = vst [vmem:[#allocation32_spill] sm:$0xff] %v12225_v16  ;;  %v1920_v5 = vmul.f32 %v9830_v30, %v16414_v57  ;;  %v12254_v45 = vadd.f32 %v11872_v1, %v2409_v28  ;;  %v1900_v36 = vmul.f32 %v9840_v24, %v16416_v54  ;;  %v16420_v57 = vld [vmem:[#allocation39_spill] sm:$0xff] }
 0x2f4   :  { %16406 = vst [vmem:[#allocation120_spill] sm:$0xff] %v12228_v43  ;;  %16407 = vst [vmem:[#allocation121_spill] sm:$0xff] %v12231_v0  ;;  %v1901_v32 = vmul.f32 %v9848_v3, %v16417_v46  ;;  %v3421_v42 = vmul.f32 %v11908_v9, %v12203_v48  ;;  %v1902_v50 = vmul.f32 %v9898_v26, %v16418_v53  ;;  %v16422_v54 = vld [vmem:[#allocation115_spill] sm:$0xff]  ;;  %v16423_v48 = vld [vmem:[#allocation116_spill] sm:$0xff]  ;;  %v3579_v53 = vsel %vm348_vm0, %v3414_v4, 0.0 }
 0x2f5   :  { %16408 = vst [vmem:[#allocation122_spill] sm:$0xff] %v12234_v13  ;;  %16409 = vst [vmem:[#allocation123_spill] sm:$0xff] %v12237_v7  ;;  %v16419_v7 = vld [vmem:[#allocation69_spill] sm:$0xff]  ;;  %v1927_v1 = vmul.f32 %v9830_v30, %v16420_v57  ;;  %v12271_v28 = vadd.f32 %v11969_v47, %v2411_v21  ;;  %v2425_v46 = vmul.f32 %v12008_v58, %v1913_v8  ;;  %v16424_v26 = vld [vmem:[#allocation223_spill] sm:$0xff]  ;;  %v12283_v21 = vpop.permute.xlu0 %3238 }
 0x2f6   :  { %16412 = vst [vmem:[#allocation124_spill] sm:$0xff] %v12246_v2  ;;  %16415 = vst [vmem:[#allocation21_spill] sm:$0xff] %v12254_v45  ;;  %v1903_v61 = vmul.f32 %v10085_v39, %v16419_v7  ;;  %v2418_v45 = vmul.f32 %v16422_v54, %v1906_v33  ;;  %v3428_v40 = vmul.f32 %v16423_v48, %v12228_v43  ;;  %v3581_v57 = vsel %vm348_vm0, %v3421_v42, 0.0  ;;  %v16428_v43 = vld [vmem:[#allocation8_spill] sm:$0xff] }
 0x2f7   :  { %16421 = vst [vmem:[#allocation40_spill] sm:$0xff] %v12271_v28  ;;  %v1904_v7 = vmul.f32 %v10220_v55, %v16424_v26  ;;  %v2410_v35 = vmul.f32 %v11836_v31, %v1898_v15  ;;  %v2432_v2 = vmul.f32 %v12097_v25, %v1920_v5  ;;  %v3578_v30 = vadd.f32 %v3577_v60, %v12025_v19 }
 0x2f8   :  { %v12286_v33 = vadd.f32 %v12023_v14, %v2418_v45  ;;  %v12289_v8 = vadd.f32 %v12119_v49, %v2425_v46  ;;  %v3435_v4 = vmul.f32 %v12059_v38, %v12271_v28  ;;  %v3420_v26 = vmul.f32 %v11908_v9, %v12200_v63  ;;  %v12307_v28 = vpop.permute.xlu1 %3242 }
 0x2f9   :  { %v2439_v15 = vmul.f32 %v12166_v23, %v1927_v1  ;;  %v12298_v19 = vadd.f32 %v12207_v62, %v2432_v2  ;;  %v3580_v60 = vadd.f32 %v3579_v53, %v3578_v30  ;;  %v3583_v46 = vsel %vm348_vm0, %v3428_v40, 0.0  ;;  %v16429_v2 = vld [vmem:[#allocation13_spill] sm:$0xff]  ;;  %v16430_v30 = vld [vmem:[#allocation26_spill] sm:$0xff] }
 0x2fa   :  { %16425 = vst [vmem:[#allocation125_spill] sm:$0xff] %v12286_v33  ;;  %16426 = vst [vmem:[#allocation126_spill] sm:$0xff] %v12289_v8  ;;  %v3442_v45 = vmul.f32 %v12143_v59, %v12286_v33  ;;  %v3449_v5 = vmul.f32 %v12239_v18, %v12289_v8  ;;  %v1905_v42 = vmul.f32 %v9824_v27, %v16428_v43  ;;  %v3585_v43 = vsel %vm348_vm0, %v3435_v4, 0.0  ;;  %v16432_v8 = vld [vmem:[#allocation35_spill] sm:$0xff] }
 0x2fb   :  { %16427 = vst [vmem:[#allocation127_spill] sm:$0xff] %v12298_v19  ;;  %v3456_v1 = vmul.f32 %v12283_v21, %v12298_v19  ;;  %v3582_v63 = vadd.f32 %v3581_v57, %v3580_v60  ;;  %v1912_v53 = vmul.f32 %v9824_v27, %v16429_v2  ;;  %v1919_v33 = vmul.f32 %v9824_v27, %v16430_v30 }
 0x2fc   :  { %v12316_v55 = vmul.f32 %v11836_v31, %v1900_v36  ;;  %v12319_v40 = vadd.f32 %v12266_v41, %v2439_v15  ;;  %v1926_v37 = vmul.f32 %v9824_v27, %v16432_v8  ;;  %v2413_v19 = vmul.f32 %v11836_v31, %v1901_v32 }
 0x2fd   :  { %v12326_v57 = vmul.f32 %v11836_v31, %v1902_v50  ;;  %v12329_v60 = vmul.f32 %v11836_v31, %v1903_v61  ;;  %v3584_v2 = vadd.f32 %v3583_v46, %v3582_v63  ;;  %v3587_v15 = vsel %vm348_vm0, %v3442_v45, 0.0 }
 0x2fe   :  { %16431 = vst [vmem:[#allocation128_spill] sm:$0xff] %v12319_v40  ;;  %v3463_v36 = vmul.f32 %v12307_v28, %v12319_v40  ;;  %v3589_v30 = vsel %vm348_vm0, %v3449_v5, 0.0  ;;  %v2417_v4 = vmul.f32 %v16422_v54, %v1905_v42  ;;  %v3591_v27 = vsel %vm348_vm0, %v3456_v1, 0.0 }
 0x2ff   :  { %v3586_v56 = vadd.f32 %v3585_v43, %v3584_v2  ;;  %v2424_v32 = vmul.f32 %v12008_v58, %v1912_v53  ;;  %v2431_v50 = vmul.f32 %v12097_v25, %v1919_v33  ;;  %v2438_v61 = vmul.f32 %v12166_v23, %v1926_v37 }
 0x300   :  { %v12341_v63 = vadd.f32 %v11969_v47, %v2410_v35  ;;  %v3427_v8 = vmul.f32 %v16423_v48, %v12225_v16  ;;  %v3516_v45 = vsel %vm348_vm0, %v12164_v22, 0.0  ;;  %v12348_v46 = vadd.f32 %v12023_v14, %v2417_v4 }
 0x301   :  { %v3588_v5 = vadd.f32 %v3587_v15, %v3586_v56  ;;  %v12351_v42 = vadd.f32 %v12119_v49, %v2424_v32  ;;  %v3515_v33 = vadd.f32 %v12153_v6, %v12021_v34  ;;  %v12356_v37 = vadd.f32 %v12207_v62, %v2431_v50  ;;  %v16434_v32 = vld [vmem:[#allocation12_spill] sm:$0xff] }
 0x302   :  { %v12359_v35 = vadd.f32 %v12266_v41, %v2438_v61  ;;  %v3434_v1 = vmul.f32 %v12059_v38, %v12341_v63  ;;  %v3518_v22 = vsel %vm348_vm0, %v3420_v26, 0.0  ;;  %v3441_v53 = vmul.f32 %v12143_v59, %v12348_v46  ;;  %v16435_v61 = vld [vmem:[#allocation18_spill] sm:$0xff] }
 0x303   :  { %v3590_v56 = vadd.f32 %v3589_v30, %v3588_v5  ;;  %v3448_v43 = vmul.f32 %v12239_v18, %v12351_v42  ;;  %v3517_v2 = vadd.f32 %v3516_v45, %v3515_v33  ;;  %v12369_v34 = vmul.f32 %v11836_v31, %v1904_v7  ;;  %v16436_v33 = vld [vmem:[#allocation34_spill] sm:$0xff] }
 0x304   :  { %16433 = vst [vmem:[#allocation129_spill] sm:$0xff] %v12359_v35  ;;  %v3455_v6 = vmul.f32 %v12283_v21, %v12356_v37  ;;  %v3462_v15 = vmul.f32 %v12307_v28, %v12359_v35  ;;  %v3520_v4 = vsel %vm348_vm0, %v3427_v8, 0.0  ;;  %v1908_v50 = vmul.f32 %v9848_v3, %v16434_v32 }
 0x305   :  { %v3592_v26 = vadd.f32 %v3591_v27, %v3590_v56  ;;  %v3519_v30 = vadd.f32 %v3518_v22, %v3517_v2  ;;  %v1915_v5 = vmul.f32 %v9848_v3, %v16435_v61  ;;  %v3422_v31 = vmul.f32 %v11908_v9, %v12210_v44  ;;  %v16437_v61 = vld [vmem:[#allocation43_spill] sm:$0xff] }
 0x306   :  { %v3423_v7 = vmul.f32 %v11908_v9, %v12213_v17  ;;  %v3522_v45 = vsel %vm348_vm0, %v3434_v1, 0.0  ;;  %v1922_v16 = vmul.f32 %v9848_v3, %v16436_v33  ;;  %v3593_v27 = vsel %vm348_vm0, %v3463_v36, 0.0 }
 0x307   :  { %v3521_v8 = vadd.f32 %v3520_v4, %v3519_v30  ;;  %v3524_v22 = vsel %vm348_vm0, %v3441_v53, 0.0  ;;  %v3526_v56 = vsel %vm348_vm0, %v3448_v43, 0.0  ;;  %v3528_v2 = vsel %vm348_vm0, %v3455_v6, 0.0 }
 0x308   :  { %v3530_v32 = vsel %vm348_vm0, %v3462_v15, 0.0  ;;  %v1929_v44 = vmul.f32 %v9848_v3, %v16437_v61  ;;  %v12395_v17 = vadd.f32 %v11969_v47, %v2413_v19  ;;  %v3594_v1 = vadd.f32 %v3593_v27, %v3592_v26 }
 0x309   :  { %v3523_v40 = vadd.f32 %v3522_v45, %v3521_v8  ;;  %v2420_v33 = vmul.f32 %v16422_v54, %v1908_v50  ;;  %v2427_v36 = vmul.f32 %v12008_v58, %v1915_v5  ;;  %v2434_v53 = vmul.f32 %v12097_v25, %v1922_v16  ;;  %v16438_v5 = vld [vmem:[#allocation11_spill] sm:$0xff] }
 0x30a   :  { %v3430_v43 = vmul.f32 %v16423_v48, %v12234_v13  ;;  %v3437_v6 = vmul.f32 %v12059_v38, %v12395_v17  ;;  %v3705_v3 = vsel %vm348_vm0, %v12185_v29, 0.0  ;;  %v3704_v26 = vadd.f32 %v12160_v12, %v12029_v20 }
 0x30b   :  { %v3525_v15 = vadd.f32 %v3524_v22, %v3523_v40  ;;  %v12407_v19 = vadd.f32 %v12023_v14, %v2420_v33  ;;  %v12410_v4 = vadd.f32 %v12119_v49, %v2427_v36  ;;  %v2441_v16 = vmul.f32 %v12166_v23, %v1929_v44  ;;  %v16439_v22 = vld [vmem:[#allocation17_spill] sm:$0xff] }
 0x30c   :  { %v12416_v30 = vadd.f32 %v12207_v62, %v2434_v53  ;;  %v3707_v50 = vsel %vm348_vm0, %v3423_v7, 0.0  ;;  %v1907_v29 = vmul.f32 %v9840_v24, %v16438_v5  ;;  %v3706_v8 = vadd.f32 %v3705_v3, %v3704_v26  ;;  %v16441_v53 = vld [vmem:[#allocation42_spill] sm:$0xff] }
 0x30d   :  { %v3527_v40 = vadd.f32 %v3526_v56, %v3525_v15  ;;  %v3444_v45 = vmul.f32 %v12143_v59, %v12407_v19  ;;  %v3451_v27 = vmul.f32 %v12239_v18, %v12410_v4  ;;  %v3709_v44 = vsel %vm348_vm0, %v3430_v43, 0.0  ;;  %v16440_v56 = vld [vmem:[#allocation31_spill] sm:$0xff] }
 0x30e   :  { %v3458_v20 = vmul.f32 %v12283_v21, %v12416_v30  ;;  %v3711_v12 = vsel %vm348_vm0, %v3437_v6, 0.0  ;;  %v1914_v7 = vmul.f32 %v9840_v24, %v16439_v22  ;;  %v3708_v33 = vadd.f32 %v3707_v50, %v3706_v8 }
 0x30f   :  { %v3529_v61 = vadd.f32 %v3528_v2, %v3527_v40  ;;  %v1921_v36 = vmul.f32 %v9840_v24, %v16440_v56  ;;  %v1928_v15 = vmul.f32 %v9840_v24, %v16441_v53  ;;  %v2419_v3 = vmul.f32 %v16422_v54, %v1907_v29 }
 0x310   :  { %v12438_v26 = vadd.f32 %v11969_v47, %v12316_v55  ;;  %v3429_v43 = vmul.f32 %v16423_v48, %v12231_v0  ;;  %v3642_v6 = vsel %vm348_vm0, %v12181_v52, 0.0  ;;  %v3710_v2 = vadd.f32 %v3709_v44, %v3708_v33 }
 0x311   :  { %v3713_v50 = vsel %vm348_vm0, %v3444_v45, 0.0  ;;  %v3715_v5 = vsel %vm348_vm0, %v3451_v27, 0.0  ;;  %v3641_v24 = vadd.f32 %v12157_v11, %v12027_v10  ;;  %v2426_v29 = vmul.f32 %v12008_v58, %v1914_v7 }
 0x312   :  { %v12450_v40 = vadd.f32 %v12023_v14, %v2419_v3  ;;  %v3436_v55 = vmul.f32 %v12059_v38, %v12438_v26  ;;  %v3644_v8 = vsel %vm348_vm0, %v3422_v31, 0.0  ;;  %v3531_v22 = vadd.f32 %v3530_v32, %v3529_v61 }
 0x313   :  { %v3712_v52 = vadd.f32 %v3711_v12, %v3710_v2  ;;  %v2433_v44 = vmul.f32 %v12097_v25, %v1921_v36  ;;  %v3643_v45 = vadd.f32 %v3642_v6, %v3641_v24  ;;  %v2440_v27 = vmul.f32 %v12166_v23, %v1928_v15  ;;  %v3925_v12 = vpop.permute.xlu1 %3924 }
 0x314   :  { %v12458_v33 = vadd.f32 %v12119_v49, %v2426_v29  ;;  %v3443_v10 = vmul.f32 %v12143_v59, %v12450_v40  ;;  %v3646_v11 = vsel %vm348_vm0, %v3429_v43, 0.0  ;;  %v12464_v7 = vadd.f32 %v12266_v41, %v2441_v16  ;;  %v3920_v43 = vpop.permute.xlu0 %3919 }
 0x315   :  { %v3714_v56 = vadd.f32 %v3713_v50, %v3712_v52  ;;  %v3717_v31 = vsel %vm348_vm0, %v3458_v20, 0.0  ;;  %v3645_v32 = vadd.f32 %v3644_v8, %v3643_v45  ;;  %v12468_v61 = vadd.f32 %v12207_v62, %v2433_v44  ;;  %v16444_v52 = vld [vmem:[#allocation70_spill] sm:$0xff] }
 0x316   :  { %16442 = vst [vmem:[#allocation25_spill] sm:$0xff] %v12464_v7  ;;  %v12471_v36 = vadd.f32 %v12266_v41, %v2440_v27  ;;  %v3450_v53 = vmul.f32 %v12239_v18, %v12458_v33  ;;  %v3648_v15 = vsel %vm348_vm0, %v3436_v55, 0.0  ;;  %v3953_v3 = vadd.f32 %v3925_v12, %v3594_v1  ;;  %v16445_v45 = vld [vmem:[#allocation114_spill] sm:$0xff] }
 0x317   :  { %v3465_v16 = vmul.f32 %v12307_v28, %v12464_v7  ;;  %v3716_v6 = vadd.f32 %v3715_v5, %v3714_v56  ;;  %v3647_v20 = vadd.f32 %v3646_v11, %v3645_v32  ;;  %v3952_v2 = vadd.f32 %v3920_v43, %v3531_v22  ;;  %v16446_v27 = vld [vmem:[#allocation74_spill] sm:$0xff]  ;;  %v16447_v56 = vld [vmem:[#allocation75_spill] sm:$0xff]  ;;  %v16463_v7 = vld [vmem:[#allocation109_spill] sm:$0xff] }
 0x318   :  { %16443 = vst [vmem:[#allocation44_spill] sm:$0xff] %v12471_v36  ;;  %v3457_v50 = vmul.f32 %v12283_v21, %v12468_v61  ;;  %v3464_v24 = vmul.f32 %v12307_v28, %v12471_v36  ;;  %v3650_v29 = vsel %vm348_vm0, %v3443_v10, 0.0  ;;  %v3424_v8 = vmul.f32 %v11908_v9, %v12216_v51  ;;  %v16448_v10 = vld [vmem:[#allocation212_spill] sm:$0xff] }
 0x319   :  { %v3718_v55 = vadd.f32 %v3717_v31, %v3716_v6  ;;  %v3649_v1 = vadd.f32 %v3648_v15, %v3647_v20  ;;  %v1910_v44 = vmul.f32 %v10085_v39, %v16444_v52  ;;  %v3425_v5 = vmul.f32 %v11908_v9, %v16445_v45  ;;  %v16449_v15 = vld [vmem:[#allocation76_spill] sm:$0xff] }
 0x31a   :  { %v3652_v22 = vsel %vm348_vm0, %v3450_v53, 0.0  ;;  %v1917_v11 = vmul.f32 %v10085_v39, %v16446_v27  ;;  %v1924_v32 = vmul.f32 %v10085_v39, %v16447_v56  ;;  %v12496_v12 = vmul.f32 %v11908_v9, %v16448_v10  ;;  %v16460_v45 = vld [vmem:[#allocation52_spill] sm:$0xff] }
 0x31b   :  { %5469 = vtanh.f32 %v3953_v3  ;;  %v3651_v31 = vadd.f32 %v3650_v29, %v3649_v1  ;;  %v1931_v43 = vmul.f32 %v10085_v39, %v16449_v15  ;;  %v3719_v6 = vsel %vm348_vm0, %v3465_v16, 0.0  ;;  %v3935_v3 = vpop.permute.xlu1 %3934  ;;  %v16451_v1 = vld [vmem:[#allocation211_spill] sm:$0xff] }
 0x31c   :  { %5471 = vtanh.f32 %v3952_v2  ;;  %v3654_v53 = vsel %vm348_vm0, %v3457_v50, 0.0  ;;  %v3656_v20 = vsel %vm348_vm0, %v3464_v24, 0.0  ;;  %v3720_v52 = vadd.f32 %v3719_v6, %v3718_v55  ;;  %v16450_v2 = vld [vmem:[#allocation124_spill] sm:$0xff]  ;;  %v16454_v6 = vld [vmem:[#allocation38_spill] sm:$0xff] }
 0x31d   :  { %v3653_v27 = vadd.f32 %v3652_v22, %v3651_v31  ;;  %v2422_v56 = vmul.f32 %v16422_v54, %v1910_v44  ;;  %v12506_v9 = vadd.f32 %v11969_v47, %v12329_v60  ;;  %v2429_v29 = vmul.f32 %v12008_v58, %v1917_v11  ;;  %v16452_v22 = vld [vmem:[#allocation117_spill] sm:$0xff]  ;;  %v16453_v60 = vld [vmem:[#allocation107_spill] sm:$0xff] }
 0x31e   :  { %v2436_v39 = vmul.f32 %v12097_v25, %v1924_v32  ;;  %v3432_v16 = vmul.f32 %v16423_v48, %v16450_v2  ;;  %v3831_v50 = vsel %vm348_vm0, %v16451_v1, 0.0  ;;  %v2443_v55 = vmul.f32 %v12166_v23, %v1931_v43  ;;  %v16455_v2 = vld [vmem:[#allocation254_spill] sm:$0xff] }
 0x31f   :  { %v3655_v24 = vadd.f32 %v3654_v53, %v3653_v27  ;;  %v3439_v44 = vmul.f32 %v12059_v38, %v12506_v9  ;;  %v3830_v31 = vadd.f32 %v16453_v60, %v16452_v22  ;;  %v12520_v15 = vadd.f32 %v12023_v14, %v2422_v56 }
 0x320   :  { %v12523_v11 = vadd.f32 %v12119_v49, %v2429_v29  ;;  %v3833_v32 = vsel %vm348_vm0, %v3425_v5, 0.0  ;;  %v1909_v1 = vmul.f32 %v16455_v2, %v16454_v6  ;;  %v3955_v53 = vadd.f32 %v3935_v3, %v3720_v52  ;;  %v16457_v5 = vld [vmem:[#allocation46_spill] sm:$0xff] }
 0x321   :  { %v12529_v43 = vadd.f32 %v12207_v62, %v2436_v39  ;;  %v12532_v27 = vadd.f32 %v12266_v41, %v2443_v55  ;;  %v3832_v13 = vadd.f32 %v3831_v50, %v3830_v31  ;;  %v3446_v56 = vmul.f32 %v12143_v59, %v12520_v15  ;;  %v3930_v55 = vpop.permute.xlu0 %3929  ;;  %v16458_v50 = vld [vmem:[#allocation49_spill] sm:$0xff] }
 0x322   :  { %v3453_v29 = vmul.f32 %v12239_v18, %v12523_v11  ;;  %v3835_v22 = vsel %vm348_vm0, %v3432_v16, 0.0  ;;  %v1916_v60 = vmul.f32 %v16455_v2, %v16457_v5  ;;  %v3657_v6 = vadd.f32 %v3656_v20, %v3655_v24  ;;  %v16459_v16 = vld [vmem:[#allocation123_spill] sm:$0xff] }
 0x323   :  { %16456 = vst [vmem:[#allocation130_spill] sm:$0xff] %v12529_v43  ;;  %v3460_v52 = vmul.f32 %v12283_v21, %v12529_v43  ;;  %v3834_v3 = vadd.f32 %v3833_v32, %v3832_v13  ;;  %v3837_v39 = vsel %vm348_vm0, %v3439_v44, 0.0  ;;  %v1923_v31 = vmul.f32 %v16455_v2, %v16458_v50  ;;  %v16461_v32 = vld [vmem:[#allocation101_spill] sm:$0xff]  ;;  %v16462_v44 = vld [vmem:[#allocation106_spill] sm:$0xff] }
 0x324   :  { %v2421_v0 = vmul.f32 %v16422_v54, %v1909_v1  ;;  %v12549_v10 = vadd.f32 %v11969_v47, %v12326_v57  ;;  %v3431_v5 = vmul.f32 %v16423_v48, %v16459_v16  ;;  %v1930_v13 = vmul.f32 %v16455_v2, %v16460_v45 }
 0x325   :  { %v5470_v20 = vpop.eup %5469  ;;  %v3836_v24 = vadd.f32 %v3835_v22, %v3834_v3  ;;  %v3767_v51 = vadd.f32 %v16462_v44, %v16461_v32  ;;  %v3768_v50 = vsel %vm348_vm0, %v16463_v7, 0.0  ;;  %v2428_v1 = vmul.f32 %v12008_v58, %v1916_v60 }
 0x326   :  { %v5472_v36 = vpop.eup %5471  ;;  %v12561_v57 = vadd.f32 %v12023_v14, %v2421_v0  ;;  %v3438_v16 = vmul.f32 %v12059_v38, %v12549_v10  ;;  %v3770_v22 = vsel %vm348_vm0, %v3424_v8, 0.0  ;;  %v3954_v3 = vadd.f32 %v3930_v55, %v3657_v6 }
 0x327   :  { %v3838_v35 = vadd.f32 %v3837_v39, %v3836_v24  ;;  %v3839_v45 = vsel %vm348_vm0, %v3446_v56, 0.0  ;;  %v3769_v2 = vadd.f32 %v3768_v50, %v3767_v51  ;;  %v2435_v32 = vmul.f32 %v12097_v25, %v1923_v31  ;;  %v16465_v24 = vld [vmem:[#allocation285_spill] sm:$0xff] }
 0x328   :  { %v12569_v7 = vadd.f32 %v12119_v49, %v2428_v1  ;;  %v3445_v60 = vmul.f32 %v12143_v59, %v12561_v57  ;;  %v3772_v0 = vsel %vm348_vm0, %v3431_v5, 0.0  ;;  %v3841_v44 = vsel %vm348_vm0, %v3453_v29, 0.0  ;;  %v16464_v29 = vld [vmem:[#allocation224_spill] sm:$0xff]  ;;  %v16466_v1 = vld [vmem:[#allocation225_spill] sm:$0xff] }
 0x329   :  { %v3843_v43 = vsel %vm348_vm0, %v3460_v52, 0.0  ;;  %v2442_v8 = vmul.f32 %v12166_v23, %v1930_v13  ;;  %v3771_v6 = vadd.f32 %v3770_v22, %v3769_v2  ;;  %v3840_v39 = vadd.f32 %v3839_v45, %v3838_v35 }
 0x32a   :  { %v12578_v51 = vadd.f32 %v12207_v62, %v2435_v32  ;;  %v3452_v56 = vmul.f32 %v12239_v18, %v12569_v7  ;;  %v3774_v55 = vsel %vm348_vm0, %v3438_v16, 0.0  ;;  %5473 = vtanh.f32 %v3954_v3 }
 0x32b   :  { %v12584_v31 = vadd.f32 %v12266_v41, %v2442_v8  ;;  %v3773_v5 = vadd.f32 %v3772_v0, %v3771_v6  ;;  %v1911_v52 = vmul.f32 %v16465_v24, %v16464_v29  ;;  %v3842_v50 = vadd.f32 %v3841_v44, %v3840_v39  ;;  %v16467_v44 = vld [vmem:[#allocation83_spill] sm:$0xff]  ;;  %v16470_v29 = vld [vmem:[#allocation108_spill] sm:$0xff] }
 0x32c   :  { %v3459_v35 = vmul.f32 %v12283_v21, %v12578_v51  ;;  %v3776_v13 = vsel %vm348_vm0, %v3445_v60, 0.0  ;;  %v1918_v22 = vmul.f32 %v16465_v24, %v16466_v1  ;;  %v3968_v45 = vmul.f32 1.442695, %v5470_v20 }
 0x32d   :  { %5475 = vtanh.f32 %v3955_v53  ;;  %v3467_v16 = vmul.f32 %v12307_v28, %v12532_v27  ;;  %v3775_v3 = vadd.f32 %v3774_v55, %v3773_v5  ;;  %v3844_v2 = vadd.f32 %v3843_v43, %v3842_v50  ;;  %v16468_v53 = vld [vmem:[#allocation21_spill] sm:$0xff]  ;;  %v16469_v5 = vld [vmem:[#allocation102_spill] sm:$0xff]  ;;  %v16471_v50 = vld [vmem:[#allocation28_spill] sm:$0xff] }
 0x32e   :  { %v3466_v32 = vmul.f32 %v12307_v28, %v12584_v31  ;;  %v3778_v0 = vsel %vm348_vm0, %v3452_v56, 0.0  ;;  %v1925_v8 = vmul.f32 %v16465_v24, %v16467_v44  ;;  %v2423_v60 = vmul.f32 %v16422_v54, %v1911_v52  ;;  %v16472_v52 = vld [vmem:[#allocation84_spill] sm:$0xff] }
 0x32f   :  { %v3777_v6 = vadd.f32 %v3776_v13, %v3775_v3  ;;  %v12603_v20 = vadd.f32 %v11969_v47, %v12369_v34  ;;  %v3433_v39 = vmul.f32 %v16423_v48, %v16468_v53  ;;  %v3780_v43 = vsel %vm348_vm0, %v3459_v35, 0.0  ;;  %v3945_v3 = vpop.permute.xlu1 %3944 }
 0x330   :  { %v2430_v55 = vmul.f32 %v12008_v58, %v1918_v22  ;;  %v3893_v56 = vadd.f32 %v16470_v29, %v16469_v5  ;;  %v3894_v1 = vsel %vm727_vm1, %v16471_v50, 0.0  ;;  %v12614_v54 = vadd.f32 %v12023_v14, %v2423_v60  ;;  %v3940_v60 = vpop.permute.xlu0 %3939 }
 0x331   :  { %v3779_v13 = vadd.f32 %v3778_v0, %v3777_v6  ;;  %v3440_v47 = vmul.f32 %v12059_v38, %v12603_v20  ;;  %v3896_v48 = vsel %vm727_vm1, %v12496_v12, 0.0  ;;  %v3845_v34 = vsel %vm348_vm0, %v3467_v16, 0.0 }
 0x332   :  { %v1932_v58 = vmul.f32 %v16465_v24, %v16472_v52  ;;  %v2437_v35 = vmul.f32 %v12097_v25, %v1925_v8  ;;  %v3895_v22 = vadd.f32 %v3894_v1, %v3893_v56  ;;  %v12625_v0 = vadd.f32 %v12119_v49, %v2430_v55 }
 0x333   :  { %v3781_v44 = vadd.f32 %v3780_v43, %v3779_v13  ;;  %v3447_v14 = vmul.f32 %v12143_v59, %v12614_v54  ;;  %v3898_v38 = vsel %vm727_vm1, %v3433_v39, 0.0  ;;  %v3966_v6 = vmul.f32 1.442695, %v5472_v36 }
 0x334   :  { %v3846_v12 = vadd.f32 %v3845_v34, %v3844_v2  ;;  %v3782_v16 = vsel %vm348_vm0, %v3466_v32, 0.0  ;;  %v3897_v5 = vadd.f32 %v3896_v48, %v3895_v22  ;;  %v5474_v24 = vpop.eup %5473  ;;  %v12632_v25 = vadd.f32 %v12207_v62, %v2437_v35  ;;  %v3950_v48 = vpop.permute.xlu0 %3949 }
 0x335   :  { %v3783_v29 = vadd.f32 %v3782_v16, %v3781_v44  ;;  %v3454_v49 = vmul.f32 %v12239_v18, %v12625_v0  ;;  %v3900_v8 = vsel %vm727_vm1, %v3440_v47, 0.0  ;;  %5477 = vpow2.f32 %v3968_v45 }
 0x336   :  { %v3957_v59 = vadd.f32 %v3945_v3, %v3846_v12  ;;  %v3899_v43 = vadd.f32 %v3898_v38, %v3897_v5  ;;  %v2444_v2 = vmul.f32 %v12166_v23, %v1932_v58  ;;  %v3461_v32 = vmul.f32 %v12283_v21, %v12632_v25 }
 0x337   :  { %v5476_v39 = vpop.eup %5475  ;;  %v3956_v36 = vadd.f32 %v3940_v60, %v3783_v29  ;;  %v3902_v55 = vsel %vm727_vm1, %v3447_v14, 0.0  ;;  %5479 = vpow2.f32 %v3966_v6  ;;  %v3970_v56 = vmul.f32 1.442695, %v5474_v24 }
 0x338   :  { %v3901_v62 = vadd.f32 %v3900_v8, %v3899_v43  ;;  %v12642_v18 = vadd.f32 %v12266_v41, %v2444_v2  ;;  %v3904_v45 = vsel %vm727_vm1, %v3454_v49, 0.0  ;;  %v3906_v23 = vsel %vm727_vm1, %v3461_v32, 0.0 }
 0x339   :  { %5481 = vtanh.f32 %v3956_v36  ;;  %v3972_v47 = vmul.f32 1.442695, %v5476_v39 }
 0x33a   :  { %5483 = vtanh.f32 %v3957_v59  ;;  %v3903_v50 = vadd.f32 %v3902_v55, %v3901_v62  ;;  %v3468_v1 = vmul.f32 %v12307_v28, %v12642_v18 }
 0x33b   :  { %5485 = vpow2.f32 %v3970_v56 }
 0x33c   :  { %v3905_v13 = vadd.f32 %v3904_v45, %v3903_v50  ;;  %v3908_v34 = vsel %vm727_vm1, %v3468_v1, 0.0  ;;  %5487 = vpow2.f32 %v3972_v47 }
 0x33e   :  { %v3907_v21 = vadd.f32 %v3906_v23, %v3905_v13 }
 0x33f   :  { %v5478_v52 = vpop.eup %5477 }
 0x340   :  { %v3909_v58 = vadd.f32 %v3908_v34, %v3907_v21  ;;  %v3981_v28 = vsel %vm348_vm0, %v5478_v52, 0.0 }
 0x341   :  { %v5480_v41 = vpop.eup %5479 }
 0x342   :  { %v3958_v35 = vadd.f32 %v3950_v48, %v3909_v58  ;;  %v3980_v14 = vsel %vm348_vm0, %v5480_v41, 0.0 }
 0x343   :  { %v5482_v22 = vpop.eup %5481  ;;  %v3982_v12 = vadd.f32 %v3981_v28, %v3980_v14 }
 0x344   :  { %v5484_v3 = vpop.eup %5483  ;;  %v3974_v44 = vmul.f32 1.442695, %v5482_v22  ;;  %5489 = vtanh.f32 %v3958_v35 }
 0x345   :  { %v5486_v38 = vpop.eup %5485  ;;  %v3976_v6 = vmul.f32 1.442695, %v5484_v3 }
 0x346   :  { %5491 = vpow2.f32 %v3974_v44  ;;  %v3983_v60 = vsel %vm348_vm0, %v5486_v38, 0.0  ;;  %v5488_v16 = vpop.eup %5487 }
 0x347   :  { %5493 = vpow2.f32 %v3976_v6  ;;  %v3984_v5 = vadd.f32 %v3983_v60, %v3982_v12  ;;  %v3985_v8 = vsel %vm348_vm0, %v5488_v16, 0.0 }
 0x349   :  { %v3986_v59 = vadd.f32 %v3985_v8, %v3984_v5 }
 0x34e   :  { %v5490_v24 = vpop.eup %5489 }
 0x34f   :  { %v3978_v29 = vmul.f32 1.442695, %v5490_v24 }
 0x350   :  { %v5492_v49 = vpop.eup %5491 }
 0x351   :  { %5495 = vpow2.f32 %v3978_v29  ;;  %v3987_v43 = vsel %vm348_vm0, %v5492_v49, 0.0  ;;  %v5494_v39 = vpop.eup %5493 }
 0x352   :  { %v3988_v36 = vadd.f32 %v3987_v43, %v3986_v59  ;;  %v3989_v2 = vsel %vm348_vm0, %v5494_v39, 0.0 }
 0x354   :  { %v3990_v32 = vadd.f32 %v3989_v2, %v3988_v36  ;;  %v16475_v2 = vld [vmem:[#allocation125_spill] sm:$0xff] }
 0x35b   :  { %v5496_v55 = vpop.eup %5495 }
 0x35c   :  { %v3991_v62 = vsel %vm727_vm1, %v5496_v55, 0.0 }
 0x35d   :  { %v3992_v56 = vadd.f32 %v3991_v62, %v3990_v32 }
 0x35f   :  { %v3993_v45 = vrot.slane %v3992_v56, 4 }
 0x361   :  { %v3994_v50 = vadd.f32 %v3993_v45, %v3992_v56  ;;  %v16477_v56 = vld [vmem:[#allocation127_spill] sm:$0xff] }
 0x363   :  { %v3995_v1 = vrot.slane %v3994_v50, 2 }
 0x365   :  { %v3996_v23 = vadd.f32 %v3995_v1, %v3994_v50  ;;  %v16478_v50 = vld [vmem:[#allocation130_spill] sm:$0xff]  ;;  %v16479_v1 = vld [vmem:[#allocation129_spill] sm:$0xff] }
 0x367   :  { %v3997_v13 = vrot.slane %v3996_v23, 1 }
 0x369   :  { %v3998_v21 = vadd.f32 %v3997_v13, %v3996_v23  ;;  %v16480_v23 = vld [vmem:[#allocation128_spill] sm:$0xff] }
 0x36b   :  { %5497 = vrcp.f32 %v3998_v21 }
 0x375   :  { %v5498_v47 = vpop.eup %5497 }
 0x376   :  { %v4000_v48 = vmul.f32 %v5498_v47, %v3998_v21  ;;  %v16481_v21 = vld [vmem:[#allocation44_spill] sm:$0xff] }
 0x378   :  { %v4001_v34 = vsub.f32 2.0, %v4000_v48 }
 0x37a   :  { %v4002_v58 = vmul.f32 %v5498_v47, %v4001_v34  ;;  %v16482_v47 = vld [vmem:[#allocation25_spill] sm:$0xff] }
 0x37c   :  { %v4003_v35 = vmul.f32 %v5480_v41, %v4002_v58  ;;  %v4004_v22 = vmul.f32 %v5478_v52, %v4002_v58  ;;  %v4005_v3 = vmul.f32 %v5486_v38, %v4002_v58  ;;  %v4006_v44 = vmul.f32 %v5488_v16, %v4002_v58  ;;  %v16474_v41 = vld [vmem:[#allocation40_spill] sm:$0xff] }
 0x37d   :  { %v4007_v28 = vmul.f32 %v5492_v49, %v4002_v58  ;;  %v4008_v14 = vmul.f32 %v5494_v39, %v4002_v58  ;;  %v4009_v6 = vmul.f32 %v5496_v55, %v4002_v58  ;;  %v16476_v55 = vld [vmem:[#allocation126_spill] sm:$0xff] }
 0x37e   :  { %v12656_v12 = vadd.f32 1e-10, %v4003_v35  ;;  %v12658_v60 = vadd.f32 1e-10, %v4004_v22  ;;  %v12660_v5 = vadd.f32 1e-10, %v4005_v3 }
 0x37f   :  { %v12662_v24 = vadd.f32 1e-10, %v4006_v44  ;;  %v12664_v29 = vadd.f32 1e-10, %v4007_v28  ;;  %v12666_v8 = vadd.f32 1e-10, %v4008_v14 }
 0x380   :  { %v12668_v59 = vadd.f32 1e-10, %v4009_v6  ;;  %v4206_v52 = vmul.f32 %v12656_v12, %v12341_v63  ;;  %v4207_v38 = vmul.f32 %v12658_v60, %v16474_v41  ;;  %v4208_v16 = vmul.f32 %v12660_v5, %v12438_v26 }
 0x381   :  { %v4209_v49 = vmul.f32 %v12662_v24, %v12395_v17  ;;  %v4210_v43 = vmul.f32 %v12664_v29, %v12549_v10  ;;  %v4211_v39 = vmul.f32 %v12666_v8, %v12506_v9  ;;  %v4213_v63 = vmul.f32 %v12656_v12, %v12348_v46 }
 0x382   :  { %16473 = vst [vmem:[#allocation131_spill] sm:$0xff] %v12668_v59  ;;  %v4212_v36 = vmul.f32 %v12668_v59, %v12603_v20  ;;  %v4214_v32 = vmul.f32 %v12658_v60, %v16475_v2  ;;  %v4215_v26 = vmul.f32 %v12660_v5, %v12450_v40  ;;  %v4216_v17 = vmul.f32 %v12662_v24, %v12407_v19 }
 0x383   :  { %v4217_v10 = vmul.f32 %v12664_v29, %v12561_v57  ;;  %v4218_v9 = vmul.f32 %v12666_v8, %v12520_v15  ;;  %v4219_v20 = vmul.f32 %v12668_v59, %v12614_v54  ;;  %v4220_v46 = vmul.f32 %v12656_v12, %v12351_v42 }
 0x384   :  { %v4221_v62 = vmul.f32 %v12658_v60, %v16476_v55  ;;  %v4222_v40 = vmul.f32 %v12660_v5, %v12458_v33  ;;  %v4223_v19 = vmul.f32 %v12662_v24, %v12410_v4  ;;  %v4224_v57 = vmul.f32 %v12664_v29, %v12569_v7 }
 0x385   :  { %v4225_v15 = vmul.f32 %v12666_v8, %v12523_v11  ;;  %v4226_v54 = vmul.f32 %v12668_v59, %v12625_v0  ;;  %v4227_v42 = vmul.f32 %v12656_v12, %v12356_v37  ;;  %v4228_v45 = vmul.f32 %v12658_v60, %v16477_v56 }
 0x386   :  { %v4229_v33 = vmul.f32 %v12660_v5, %v12468_v61  ;;  %v4230_v4 = vmul.f32 %v12662_v24, %v12416_v30  ;;  %v4231_v7 = vmul.f32 %v12664_v29, %v12578_v51  ;;  %v4232_v11 = vmul.f32 %v12666_v8, %v16478_v50 }
 0x387   :  { %v4233_v0 = vmul.f32 %v12668_v59, %v12632_v25  ;;  %v4234_v37 = vmul.f32 %v12656_v12, %v16479_v1  ;;  %v4235_v13 = vmul.f32 %v12658_v60, %v16480_v23  ;;  %v4236_v61 = vmul.f32 %v12660_v5, %v16481_v21 }
 0x388   :  { %v4237_v30 = vmul.f32 %v12662_v24, %v16482_v47  ;;  %v4238_v51 = vmul.f32 %v12664_v29, %v12584_v31  ;;  %v4239_v48 = vmul.f32 %v12666_v8, %v12532_v27  ;;  %v4240_v25 = vmul.f32 %v12668_v59, %v12642_v18 }
 0x389   :  { %v4754_v34 = vsel %vm348_vm0, %v4206_v52, 0.0  ;;  %v4755_v58 = vsel %vm348_vm0, %v4207_v38, 0.0  ;;  %v4757_v22 = vsel %vm348_vm0, %v4208_v16, 0.0  ;;  %v4759_v3 = vsel %vm348_vm0, %v4209_v49, 0.0 }
 0x38a   :  { %v4756_v35 = vadd.f32 %v4755_v58, %v4754_v34  ;;  %v4761_v44 = vsel %vm348_vm0, %v4210_v43, 0.0  ;;  %v4763_v28 = vsel %vm348_vm0, %v4211_v39, 0.0  ;;  %v4765_v31 = vsel %vm727_vm1, %v4212_v36, 0.0 }
 0x38b   :  { %v4773_v27 = vsel %vm348_vm0, %v4213_v63, 0.0  ;;  %v4774_v14 = vsel %vm348_vm0, %v4214_v32, 0.0  ;;  %v4776_v52 = vsel %vm348_vm0, %v4215_v26, 0.0  ;;  %v4778_v41 = vsel %vm348_vm0, %v4216_v17, 0.0 }
 0x38c   :  { %v4758_v18 = vadd.f32 %v4757_v22, %v4756_v35  ;;  %v4775_v6 = vadd.f32 %v4774_v14, %v4773_v27  ;;  %v4780_v38 = vsel %vm348_vm0, %v4217_v10, 0.0  ;;  %v4782_v16 = vsel %vm348_vm0, %v4218_v9, 0.0 }
 0x38d   :  { %v4792_v49 = vsel %vm348_vm0, %v4220_v46, 0.0  ;;  %v4793_v43 = vsel %vm348_vm0, %v4221_v62, 0.0  ;;  %v4784_v63 = vsel %vm727_vm1, %v4219_v20, 0.0  ;;  %v4795_v32 = vsel %vm348_vm0, %v4222_v40, 0.0 }
 0x38e   :  { %v4760_v39 = vadd.f32 %v4759_v3, %v4758_v18  ;;  %v4777_v36 = vadd.f32 %v4776_v52, %v4775_v6  ;;  %v4794_v2 = vadd.f32 %v4793_v43, %v4792_v49  ;;  %v4797_v55 = vsel %vm348_vm0, %v4223_v19, 0.0  ;;  %v16486_v18 = vld [vmem:[#allocation284_spill] sm:$0xff]  ;;  %v16489_v49 = vld [vmem:[#allocation259_spill] sm:$0xff]  ;;  %v16490_v43 = vld [vmem:[#allocation230_spill] sm:$0xff] }
 0x38f   :  { %v4799_v26 = vsel %vm348_vm0, %v4224_v57, 0.0  ;;  %v4811_v17 = vsel %vm348_vm0, %v4227_v42, 0.0  ;;  %v4812_v46 = vsel %vm348_vm0, %v4228_v45, 0.0  ;;  %v4801_v62 = vsel %vm348_vm0, %v4225_v15, 0.0  ;;  %v16534_v6 = vld [vmem:[#allocation286_spill] sm:$0xff] }
 0x390   :  { %v4762_v10 = vadd.f32 %v4761_v44, %v4760_v39  ;;  %v4779_v56 = vadd.f32 %v4778_v41, %v4777_v36  ;;  %v4796_v9 = vadd.f32 %v4795_v32, %v4794_v2  ;;  %v4803_v50 = vsel %vm727_vm1, %v4226_v54, 0.0  ;;  %v16493_v32 = vld [vmem:[#allocation361_spill] sm:$0xff] }
 0x391   :  { %v4813_v1 = vadd.f32 %v4812_v46, %v4811_v17  ;;  %v4814_v20 = vsel %vm348_vm0, %v4229_v33, 0.0  ;;  %v4816_v19 = vsel %vm348_vm0, %v4230_v4, 0.0  ;;  %v4818_v42 = vsel %vm348_vm0, %v4231_v7, 0.0  ;;  %v16496_v46 = vld [vmem:[#allocation234_spill] sm:$0xff] }
 0x392   :  { %v4764_v23 = vadd.f32 %v4763_v28, %v4762_v10  ;;  %v4781_v40 = vadd.f32 %v4780_v38, %v4779_v56  ;;  %v4798_v21 = vadd.f32 %v4797_v55, %v4796_v9  ;;  %v4830_v47 = vsel %vm348_vm0, %v4234_v37, 0.0  ;;  %v16488_v38 = vld [vmem:[#allocation296_spill] sm:$0xff] }
 0x393   :  { %v4815_v57 = vadd.f32 %v4814_v20, %v4813_v1  ;;  %v4831_v34 = vsel %vm348_vm0, %v4235_v13, 0.0  ;;  %v4820_v33 = vsel %vm348_vm0, %v4232_v11, 0.0  ;;  %v4822_v22 = vsel %vm727_vm1, %v4233_v0, 0.0  ;;  %v16495_v56 = vld [vmem:[#allocation264_spill] sm:$0xff]  ;;  %v16532_v20 = vld [vmem:[#allocation321_spill] sm:$0xff]  ;;  %v16535_v13 = vld [vmem:[#allocation247_spill] sm:$0xff] }
 0x394   :  { %v12768_v45 = vadd.f32 %v4765_v31, %v4764_v23  ;;  %v4783_v15 = vadd.f32 %v4782_v16, %v4781_v40  ;;  %v4800_v58 = vadd.f32 %v4799_v26, %v4798_v21  ;;  %v4832_v54 = vadd.f32 %v4831_v34, %v4830_v47  ;;  %v16494_v26 = vld [vmem:[#allocation226_spill] sm:$0xff]  ;;  %v16499_v21 = vld [vmem:[#allocation332_spill] sm:$0xff] }
 0x395   :  { %v4817_v35 = vadd.f32 %v4816_v19, %v4815_v57  ;;  %v4833_v3 = vsel %vm348_vm0, %v4236_v61, 0.0  ;;  %v4835_v37 = vsel %vm348_vm0, %v4237_v30, 0.0  ;;  %v4837_v31 = vsel %vm348_vm0, %v4238_v51, 0.0  ;;  %v16487_v30 = vld [vmem:[#allocation290_spill] sm:$0xff]  ;;  %v16500_v57 = vld [vmem:[#allocation255_spill] sm:$0xff]  ;;  %v16502_v34 = vld [vmem:[#allocation308_spill] sm:$0xff] }
 0x396   :  { %16483 = vst [vmem:[#allocation132_spill] sm:$0xff] %v12768_v45  ;;  %v12773_v4 = vadd.f32 %v4784_v63, %v4783_v15  ;;  %v4802_v44 = vadd.f32 %v4801_v62, %v4800_v58  ;;  %v4834_v7 = vadd.f32 %v4833_v3, %v4832_v54  ;;  %v4839_v27 = vsel %vm348_vm0, %v4239_v48, 0.0  ;;  %v16492_v63 = vld [vmem:[#allocation274_spill] sm:$0xff]  ;;  %v16533_v48 = vld [vmem:[#allocation333_spill] sm:$0xff]  ;;  %v16543_v45 = vld [vmem:[#allocation251_spill] sm:$0xff] }
 0x397   :  { %v4819_v28 = vadd.f32 %v4818_v42, %v4817_v35  ;;  %v4841_v0 = vsel %vm727_vm1, %v4240_v25, 0.0  ;;  %v12784_v61 = vmul.f32 %v12656_v12, %v16486_v18  ;;  %v12789_v41 = vmul.f32 %v12658_v60, %v16487_v30  ;;  %v16498_v23 = vld [vmem:[#allocation238_spill] sm:$0xff]  ;;  %v16504_v35 = vld [vmem:[#allocation269_spill] sm:$0xff] }
 0x398   :  { %16484 = vst [vmem:[#allocation133_spill] sm:$0xff] %v12773_v4  ;;  %v12779_v14 = vadd.f32 %v4803_v50, %v4802_v44  ;;  %v4836_v11 = vadd.f32 %v4835_v37, %v4834_v7  ;;  %v12793_v51 = vmul.f32 %v12660_v5, %v16488_v38  ;;  %v12798_v25 = vmul.f32 %v12662_v24, %v16489_v49  ;;  %v16497_v50 = vld [vmem:[#allocation302_spill] sm:$0xff]  ;;  %v16507_v37 = vld [vmem:[#allocation279_spill] sm:$0xff]  ;;  %v16512_v49 = vld [vmem:[#allocation344_spill] sm:$0xff] }
 0x399   :  { %v4821_v52 = vadd.f32 %v4820_v33, %v4819_v28  ;;  %v12802_v39 = vmul.f32 %v12664_v29, %v16490_v43  ;;  %v12808_v2 = vmul.f32 %v12666_v8, %v16492_v63  ;;  %v12812_v55 = vmul.f32 %v12668_v59, %v16493_v32  ;;  %v16503_v58 = vld [vmem:[#allocation314_spill] sm:$0xff]  ;;  %v16541_v4 = vld [vmem:[#allocation292_spill] sm:$0xff] }
 0x39a   :  { %16485 = vst [vmem:[#allocation134_spill] sm:$0xff] %v12779_v14  ;;  %v4838_v16 = vadd.f32 %v4837_v31, %v4836_v11  ;;  %v12816_v17 = vmul.f32 %v12656_v12, %v16494_v26  ;;  %v12820_v9 = vmul.f32 %v12658_v60, %v16495_v56  ;;  %v12824_v62 = vmul.f32 %v12660_v5, %v16496_v46  ;;  %v16506_v44 = vld [vmem:[#allocation242_spill] sm:$0xff]  ;;  %v16508_v31 = vld [vmem:[#allocation291_spill] sm:$0xff]  ;;  %v16515_v56 = vld [vmem:[#allocation260_spill] sm:$0xff] }
 0x39b   :  { %v12804_v36 = vadd.f32 %v4822_v22, %v4821_v52  ;;  %v12828_v1 = vmul.f32 %v12662_v24, %v16497_v50  ;;  %v12833_v40 = vmul.f32 %v12664_v29, %v16498_v23  ;;  %v12837_v19 = vmul.f32 %v12666_v8, %v16499_v21  ;;  %v16505_v22 = vld [vmem:[#allocation320_spill] sm:$0xff]  ;;  %v16510_v52 = vld [vmem:[#allocation246_spill] sm:$0xff]  ;;  %v16516_v50 = vld [vmem:[#allocation297_spill] sm:$0xff] }
 0x39c   :  { %v4840_v10 = vadd.f32 %v4839_v27, %v4838_v16  ;;  %v12841_v42 = vmul.f32 %v12668_v59, %v16500_v57  ;;  %v12847_v15 = vmul.f32 %v12656_v12, %v16502_v34  ;;  %v12851_v54 = vmul.f32 %v12658_v60, %v16503_v58  ;;  %v16511_v38 = vld [vmem:[#allocation338_spill] sm:$0xff]  ;;  %v16517_v21 = vld [vmem:[#allocation265_spill] sm:$0xff]  ;;  %v16518_v34 = vld [vmem:[#allocation303_spill] sm:$0xff] }
 0x39d   :  { %16491 = vst [vmem:[#allocation29_spill] sm:$0xff] %v12804_v36  ;;  %v12855_v33 = vmul.f32 %v12660_v5, %v16504_v35  ;;  %v12859_v3 = vmul.f32 %v12662_v24, %v16505_v22  ;;  %v12863_v7 = vmul.f32 %v12664_v29, %v16506_v44  ;;  %v12867_v28 = vmul.f32 %v12666_v8, %v16507_v37  ;;  %v16513_v63 = vld [vmem:[#allocation350_spill] sm:$0xff]  ;;  %v16519_v35 = vld [vmem:[#allocation309_spill] sm:$0xff]  ;;  %v16530_v11 = vld [vmem:[#allocation243_spill] sm:$0xff] }
 0x39e   :  { %v12843_v47 = vadd.f32 %v4841_v0, %v4840_v10  ;;  %v12871_v27 = vmul.f32 %v12668_v59, %v16508_v31  ;;  %v16509_v0 = vld [vmem:[#allocation326_spill] sm:$0xff]  ;;  %v12880_v30 = vmul.f32 %v12658_v60, %v16510_v52  ;;  %v12884_v16 = vmul.f32 %v12660_v5, %v16511_v38  ;;  %v16521_v31 = vld [vmem:[#allocation227_spill] sm:$0xff]  ;;  %v16537_v36 = vld [vmem:[#allocation345_spill] sm:$0xff] }
 0x39f   :  { %v12876_v18 = vmul.f32 %v12656_v12, %v16509_v0  ;;  %v12888_v43 = vmul.f32 %v12662_v24, %v16512_v49  ;;  %v12892_v32 = vmul.f32 %v12664_v29, %v16513_v63  ;;  %v16514_v26 = vld [vmem:[#allocation250_spill] sm:$0xff]  ;;  %v12900_v46 = vmul.f32 %v12668_v59, %v16515_v56  ;;  %v16522_v52 = vld [vmem:[#allocation231_spill] sm:$0xff] }
 0x3a0   :  { %16501 = vst [vmem:[#allocation47_spill] sm:$0xff] %v12843_v47  ;;  %v12896_v10 = vmul.f32 %v12666_v8, %v16514_v26  ;;  %v12904_v23 = vmul.f32 %v12656_v12, %v16516_v50  ;;  %v12908_v57 = vmul.f32 %v12658_v60, %v16517_v21  ;;  %v12912_v58 = vmul.f32 %v12660_v5, %v16518_v34  ;;  %v16520_v44 = vld [vmem:[#allocation270_spill] sm:$0xff]  ;;  %v16524_v49 = vld [vmem:[#allocation235_spill] sm:$0xff] }
 0x3a1   :  { %v12916_v22 = vmul.f32 %v12662_v24, %v16519_v35  ;;  %v12920_v37 = vmul.f32 %v12664_v29, %v16520_v44  ;;  %v12924_v0 = vmul.f32 %v12666_v8, %v16521_v31  ;;  %v12928_v38 = vmul.f32 %v12668_v59, %v16522_v52  ;;  %v16525_v26 = vld [vmem:[#allocation275_spill] sm:$0xff]  ;;  %v16529_v52 = vld [vmem:[#allocation280_spill] sm:$0xff] }
 0x3a2   :  { %v12932_v63 = vmul.f32 %v12656_v12, %v16524_v49  ;;  %v12936_v56 = vmul.f32 %v12658_v60, %v16525_v26  ;;  %v16526_v50 = vld [vmem:[#allocation239_spill] sm:$0xff]  ;;  %v12952_v49 = vmul.f32 %v12666_v8, %v16529_v52  ;;  %v12956_v26 = vmul.f32 %v12668_v59, %v16530_v11 }
 0x3a3   :  { %16523 = vst [vmem:[#allocation135_spill] sm:$0xff] %v12928_v38  ;;  %v12940_v21 = vmul.f32 %v12660_v5, %v16526_v50  ;;  %v16527_v34 = vld [vmem:[#allocation315_spill] sm:$0xff]  ;;  %v12960_v50 = vmul.f32 %v12656_v12, %v16532_v20  ;;  %v12972_v52 = vmul.f32 %v12662_v24, %v16535_v13  ;;  %v12980_v20 = vmul.f32 %v12666_v8, %v16537_v36  ;;  %v16547_v38 = vld [vmem:[#allocation298_spill] sm:$0xff] }
 0x3a4   :  { %v12944_v35 = vmul.f32 %v12662_v24, %v16527_v34  ;;  %v16528_v44 = vld [vmem:[#allocation327_spill] sm:$0xff]  ;;  %16531 = vst [vmem:[#allocation136_spill] sm:$0xff] %v12956_v26  ;;  %v12964_v34 = vmul.f32 %v12658_v60, %v16533_v48  ;;  %v12992_v13 = vmul.f32 %v12658_v60, %v16543_v45  ;;  %v16545_v26 = vld [vmem:[#allocation356_spill] sm:$0xff]  ;;  %v13000_v36 = vmul.f32 %v12662_v24, %v16547_v38 }
 0x3a5   :  { %v12948_v31 = vmul.f32 %v12664_v29, %v16528_v44  ;;  %v12968_v44 = vmul.f32 %v12660_v5, %v16534_v6  ;;  %v16536_v47 = vld [vmem:[#allocation339_spill] sm:$0xff]  ;;  %16538 = vst [vmem:[#allocation137_spill] sm:$0xff] %v12980_v20  ;;  %v12988_v6 = vmul.f32 %v12656_v12, %v16541_v4  ;;  %v16549_v20 = vld [vmem:[#allocation256_spill] sm:$0xff] }
 0x3a6   :  { %v12976_v11 = vmul.f32 %v12664_v29, %v16536_v47  ;;  %v16539_v14 = vld [vmem:[#allocation351_spill] sm:$0xff]  ;;  %16544 = vst [vmem:[#allocation33_spill] sm:$0xff] %v12992_v13  ;;  %v12996_v47 = vmul.f32 %v12660_v5, %v16545_v26  ;;  %16548 = vst [vmem:[#allocation140_spill] sm:$0xff] %v13000_v36  ;;  %v16555_v13 = vld [vmem:[#allocation310_spill] sm:$0xff] }
 0x3a7   :  { %v12984_v48 = vmul.f32 %v12668_v59, %v16539_v14  ;;  %16542 = vst [vmem:[#allocation139_spill] sm:$0xff] %v12988_v6  ;;  %v13004_v14 = vmul.f32 %v12664_v29, %v16549_v20  ;;  %v16553_v6 = vld [vmem:[#allocation261_spill] sm:$0xff]  ;;  %v13016_v26 = vmul.f32 %v12658_v60, %v16555_v13  ;;  %v16559_v36 = vld [vmem:[#allocation316_spill] sm:$0xff] }
 0x3a8   :  { %16546 = vst [vmem:[#allocation50_spill] sm:$0xff] %v12996_v47  ;;  %v13012_v45 = vmul.f32 %v12656_v12, %v16553_v6  ;;  %v16557_v47 = vld [vmem:[#allocation266_spill] sm:$0xff]  ;;  %v13024_v20 = vmul.f32 %v12662_v24, %v16559_v36 }
 0x3a9   :  { %16540 = vst [vmem:[#allocation138_spill] sm:$0xff] %v12984_v48  ;;  %16550 = vst [vmem:[#allocation141_spill] sm:$0xff] %v13004_v14  ;;  %v16551_v48 = vld [vmem:[#allocation370_spill] sm:$0xff]  ;;  %v13020_v38 = vmul.f32 %v12660_v5, %v16557_v47 }
 0x3aa   :  { %v13008_v4 = vmul.f32 %v12666_v8, %v16551_v48  ;;  %16554 = vst [vmem:[#allocation143_spill] sm:$0xff] %v13012_v45  ;;  %16556 = vst [vmem:[#allocation144_spill] sm:$0xff] %v13016_v26  ;;  %v16561_v14 = vld [vmem:[#allocation322_spill] sm:$0xff]  ;;  %v16565_v45 = vld [vmem:[#allocation328_spill] sm:$0xff] }
 0x3ab   :  { %16558 = vst [vmem:[#allocation37_spill] sm:$0xff] %v13020_v38  ;;  %16560 = vst [vmem:[#allocation53_spill] sm:$0xff] %v13024_v20  ;;  %v13028_v48 = vmul.f32 %v12664_v29, %v16561_v14  ;;  %v13036_v13 = vmul.f32 %v12668_v59, %v16565_v45  ;;  %v16567_v26 = vld [vmem:[#allocation334_spill] sm:$0xff]  ;;  %v16569_v38 = vld [vmem:[#allocation276_spill] sm:$0xff] }
 0x3ac   :  { %16552 = vst [vmem:[#allocation142_spill] sm:$0xff] %v13008_v4  ;;  %v16563_v4 = vld [vmem:[#allocation271_spill] sm:$0xff]  ;;  %v13040_v47 = vmul.f32 %v12656_v12, %v16567_v26  ;;  %v13044_v36 = vmul.f32 %v12658_v60, %v16569_v38  ;;  %v16571_v20 = vld [vmem:[#allocation340_spill] sm:$0xff] }
 0x3ad   :  { %16562 = vst [vmem:[#allocation145_spill] sm:$0xff] %v13028_v48  ;;  %v13032_v6 = vmul.f32 %v12666_v8, %v16563_v4  ;;  %16566 = vst [vmem:[#allocation147_spill] sm:$0xff] %v13036_v13  ;;  %v13048_v14 = vmul.f32 %v12660_v5, %v16571_v20  ;;  %v16573_v48 = vld [vmem:[#allocation228_spill] sm:$0xff] }
 0x3ae   :  { %16568 = vst [vmem:[#allocation148_spill] sm:$0xff] %v13040_v47  ;;  %16570 = vst [vmem:[#allocation149_spill] sm:$0xff] %v13044_v36  ;;  %v13052_v4 = vmul.f32 %v12662_v24, %v16573_v48  ;;  %v16577_v13 = vld [vmem:[#allocation232_spill] sm:$0xff]  ;;  %v16581_v36 = vld [vmem:[#allocation346_spill] sm:$0xff] }
 0x3af   :  { %16564 = vst [vmem:[#allocation146_spill] sm:$0xff] %v13032_v6  ;;  %16572 = vst [vmem:[#allocation41_spill] sm:$0xff] %v13048_v14  ;;  %v16575_v6 = vld [vmem:[#allocation281_spill] sm:$0xff]  ;;  %v13060_v26 = vmul.f32 %v12666_v8, %v16577_v13  ;;  %v16579_v47 = vld [vmem:[#allocation236_spill] sm:$0xff]  ;;  %v13068_v20 = vmul.f32 %v12656_v12, %v16581_v36 }
 0x3b0   :  { %16574 = vst [vmem:[#allocation58_spill] sm:$0xff] %v13052_v4  ;;  %v13056_v45 = vmul.f32 %v12664_v29, %v16575_v6  ;;  %v13064_v38 = vmul.f32 %v12668_v59, %v16579_v47  ;;  %v16583_v14 = vld [vmem:[#allocation287_spill] sm:$0xff]  ;;  %v16585_v4 = vld [vmem:[#allocation240_spill] sm:$0xff] }
 0x3b1   :  { %16578 = vst [vmem:[#allocation151_spill] sm:$0xff] %v13060_v26  ;;  %16582 = vst [vmem:[#allocation153_spill] sm:$0xff] %v13068_v20  ;;  %v13072_v48 = vmul.f32 %v12658_v60, %v16583_v14  ;;  %v13076_v6 = vmul.f32 %v12660_v5, %v16585_v4  ;;  %v16589_v26 = vld [vmem:[#allocation357_spill] sm:$0xff]  ;;  %v16593_v20 = vld [vmem:[#allocation244_spill] sm:$0xff] }
 0x3b2   :  { %16576 = vst [vmem:[#allocation150_spill] sm:$0xff] %v13056_v45  ;;  %16580 = vst [vmem:[#allocation152_spill] sm:$0xff] %v13064_v38  ;;  %v16587_v45 = vld [vmem:[#allocation352_spill] sm:$0xff]  ;;  %v13084_v47 = vmul.f32 %v12664_v29, %v16589_v26  ;;  %v16591_v38 = vld [vmem:[#allocation293_spill] sm:$0xff]  ;;  %v13092_v14 = vmul.f32 %v12668_v59, %v16593_v20 }
 0x3b3   :  { %16584 = vst [vmem:[#allocation154_spill] sm:$0xff] %v13072_v48  ;;  %16586 = vst [vmem:[#allocation45_spill] sm:$0xff] %v13076_v6  ;;  %v13080_v13 = vmul.f32 %v12662_v24, %v16587_v45  ;;  %v13088_v36 = vmul.f32 %v12666_v8, %v16591_v38  ;;  %v16595_v48 = vld [vmem:[#allocation362_spill] sm:$0xff]  ;;  %v16597_v6 = vld [vmem:[#allocation299_spill] sm:$0xff] }
 0x3b4   :  { %16590 = vst [vmem:[#allocation155_spill] sm:$0xff] %v13084_v47  ;;  %16594 = vst [vmem:[#allocation157_spill] sm:$0xff] %v13092_v14  ;;  %v13096_v4 = vmul.f32 %v12656_v12, %v16595_v48  ;;  %v13100_v45 = vmul.f32 %v12658_v60, %v16597_v6  ;;  %v16601_v47 = vld [vmem:[#allocation366_spill] sm:$0xff]  ;;  %v16605_v14 = vld [vmem:[#allocation305_spill] sm:$0xff] }
 0x3b5   :  { %16588 = vst [vmem:[#allocation64_spill] sm:$0xff] %v13080_v13  ;;  %16592 = vst [vmem:[#allocation156_spill] sm:$0xff] %v13088_v36  ;;  %v16599_v13 = vld [vmem:[#allocation248_spill] sm:$0xff]  ;;  %v13108_v38 = vmul.f32 %v12662_v24, %v16601_v47  ;;  %v16603_v36 = vld [vmem:[#allocation371_spill] sm:$0xff]  ;;  %v13116_v48 = vmul.f32 %v12666_v8, %v16605_v14 }
 0x3b6   :  { %16596 = vst [vmem:[#allocation158_spill] sm:$0xff] %v13096_v4  ;;  %16598 = vst [vmem:[#allocation159_spill] sm:$0xff] %v13100_v45  ;;  %v13104_v26 = vmul.f32 %v12660_v5, %v16599_v13  ;;  %v13112_v20 = vmul.f32 %v12664_v29, %v16603_v36  ;;  %v16607_v4 = vld [vmem:[#allocation252_spill] sm:$0xff]  ;;  %v16609_v45 = vld [vmem:[#allocation373_spill] sm:$0xff] }
 0x3b7   :  { %16602 = vst [vmem:[#allocation67_spill] sm:$0xff] %v13108_v38  ;;  %16606 = vst [vmem:[#allocation161_spill] sm:$0xff] %v13116_v48  ;;  %v13120_v6 = vmul.f32 %v12668_v59, %v16607_v4  ;;  %v13124_v13 = vmul.f32 %v12656_v12, %v16609_v45  ;;  %v16613_v38 = vld [vmem:[#allocation257_spill] sm:$0xff]  ;;  %v16617_v48 = vld [vmem:[#allocation262_spill] sm:$0xff] }
 0x3b8   :  { %16600 = vst [vmem:[#allocation48_spill] sm:$0xff] %v13104_v26  ;;  %16604 = vst [vmem:[#allocation160_spill] sm:$0xff] %v13112_v20  ;;  %v16611_v26 = vld [vmem:[#allocation311_spill] sm:$0xff]  ;;  %v13132_v36 = vmul.f32 %v12660_v5, %v16613_v38  ;;  %v16615_v20 = vld [vmem:[#allocation317_spill] sm:$0xff]  ;;  %v13140_v4 = vmul.f32 %v12664_v29, %v16617_v48 }
 0x3b9   :  { %16608 = vst [vmem:[#allocation162_spill] sm:$0xff] %v13120_v6  ;;  %16610 = vst [vmem:[#allocation163_spill] sm:$0xff] %v13124_v13  ;;  %v13128_v47 = vmul.f32 %v12658_v60, %v16611_v26  ;;  %v13136_v14 = vmul.f32 %v12662_v24, %v16615_v20  ;;  %v16619_v6 = vld [vmem:[#allocation323_spill] sm:$0xff]  ;;  %v16621_v13 = vld [vmem:[#allocation329_spill] sm:$0xff] }
 0x3ba   :  { %16614 = vst [vmem:[#allocation51_spill] sm:$0xff] %v13132_v36  ;;  %16618 = vst [vmem:[#allocation165_spill] sm:$0xff] %v13140_v4  ;;  %v13144_v45 = vmul.f32 %v12666_v8, %v16619_v6  ;;  %v13148_v26 = vmul.f32 %v12668_v59, %v16621_v13  ;;  %v16625_v36 = vld [vmem:[#allocation272_spill] sm:$0xff]  ;;  %v16629_v4 = vld [vmem:[#allocation233_spill] sm:$0xff] }
 0x3bb   :  { %16612 = vst [vmem:[#allocation164_spill] sm:$0xff] %v13128_v47  ;;  %16616 = vst [vmem:[#allocation68_spill] sm:$0xff] %v13136_v14  ;;  %v16623_v47 = vld [vmem:[#allocation267_spill] sm:$0xff]  ;;  %v13156_v20 = vmul.f32 %v12658_v60, %v16625_v36  ;;  %v16627_v14 = vld [vmem:[#allocation229_spill] sm:$0xff]  ;;  %v13164_v6 = vmul.f32 %v12662_v24, %v16629_v4 }
 0x3bc   :  { %16620 = vst [vmem:[#allocation166_spill] sm:$0xff] %v13144_v45  ;;  %16622 = vst [vmem:[#allocation167_spill] sm:$0xff] %v13148_v26  ;;  %v13152_v38 = vmul.f32 %v12656_v12, %v16623_v47  ;;  %v13160_v48 = vmul.f32 %v12660_v5, %v16627_v14  ;;  %v16631_v45 = vld [vmem:[#allocation237_spill] sm:$0xff]  ;;  %v16633_v26 = vld [vmem:[#allocation335_spill] sm:$0xff] }
 0x3bd   :  { %16626 = vst [vmem:[#allocation169_spill] sm:$0xff] %v13156_v20  ;;  %16630 = vst [vmem:[#allocation71_spill] sm:$0xff] %v13164_v6  ;;  %v13168_v13 = vmul.f32 %v12664_v29, %v16631_v45  ;;  %v13172_v47 = vmul.f32 %v12666_v8, %v16633_v26  ;;  %v16637_v20 = vld [vmem:[#allocation241_spill] sm:$0xff]  ;;  %v16641_v6 = vld [vmem:[#allocation282_spill] sm:$0xff] }
 0x3be   :  { %16624 = vst [vmem:[#allocation168_spill] sm:$0xff] %v13152_v38  ;;  %16628 = vst [vmem:[#allocation54_spill] sm:$0xff] %v13160_v48  ;;  %v16635_v38 = vld [vmem:[#allocation277_spill] sm:$0xff]  ;;  %v13180_v14 = vmul.f32 %v12656_v12, %v16637_v20  ;;  %v13188_v45 = vmul.f32 %v12660_v5, %v16641_v6 }
 0x3bf   :  { %16632 = vst [vmem:[#allocation170_spill] sm:$0xff] %v13168_v13  ;;  %16634 = vst [vmem:[#allocation171_spill] sm:$0xff] %v13172_v47  ;;  %v13176_v36 = vmul.f32 %v12668_v59, %v16635_v38  ;;  %v16639_v48 = vld [vmem:[#allocation341_spill] sm:$0xff]  ;;  %v16645_v47 = vld [vmem:[#allocation347_spill] sm:$0xff] }
 0x3c0   :  { %16638 = vst [vmem:[#allocation173_spill] sm:$0xff] %v13180_v14  ;;  %v13184_v4 = vmul.f32 %v12658_v60, %v16639_v48  ;;  %16642 = vst [vmem:[#allocation55_spill] sm:$0xff] %v13188_v45  ;;  %v16643_v13 = vld [vmem:[#allocation245_spill] sm:$0xff]  ;;  %v13196_v38 = vmul.f32 %v12664_v29, %v16645_v47  ;;  %v16653_v45 = vld [vmem:[#allocation294_spill] sm:$0xff] }
 0x3c1   :  { %16636 = vst [vmem:[#allocation172_spill] sm:$0xff] %v13176_v36  ;;  %v13192_v26 = vmul.f32 %v12662_v24, %v16643_v13  ;;  %v16647_v36 = vld [vmem:[#allocation288_spill] sm:$0xff]  ;;  %v16649_v14 = vld [vmem:[#allocation249_spill] sm:$0xff]  ;;  %v13212_v13 = vmul.f32 %v12658_v60, %v16653_v45 }
 0x3c2   :  { %16640 = vst [vmem:[#allocation174_spill] sm:$0xff] %v13184_v4  ;;  %16646 = vst [vmem:[#allocation175_spill] sm:$0xff] %v13196_v38  ;;  %v13200_v20 = vmul.f32 %v12666_v8, %v16647_v36  ;;  %v13204_v48 = vmul.f32 %v12668_v59, %v16649_v14  ;;  %v16651_v4 = vld [vmem:[#allocation353_spill] sm:$0xff]  ;;  %v16657_v38 = vld [vmem:[#allocation358_spill] sm:$0xff] }
 0x3c3   :  { %16644 = vst [vmem:[#allocation72_spill] sm:$0xff] %v13192_v26  ;;  %v13208_v6 = vmul.f32 %v12656_v12, %v16651_v4  ;;  %16654 = vst [vmem:[#allocation179_spill] sm:$0xff] %v13212_v13  ;;  %v16655_v26 = vld [vmem:[#allocation253_spill] sm:$0xff]  ;;  %v13220_v36 = vmul.f32 %v12662_v24, %v16657_v38  ;;  %v16665_v13 = vld [vmem:[#allocation263_spill] sm:$0xff] }
 0x3c4   :  { %16648 = vst [vmem:[#allocation176_spill] sm:$0xff] %v13200_v20  ;;  %16650 = vst [vmem:[#allocation177_spill] sm:$0xff] %v13204_v48  ;;  %v13216_v47 = vmul.f32 %v12660_v5, %v16655_v26  ;;  %v16659_v20 = vld [vmem:[#allocation300_spill] sm:$0xff]  ;;  %v16661_v48 = vld [vmem:[#allocation258_spill] sm:$0xff]  ;;  %v13236_v26 = vmul.f32 %v12658_v60, %v16665_v13 }
 0x3c5   :  { %16652 = vst [vmem:[#allocation178_spill] sm:$0xff] %v13208_v6  ;;  %16658 = vst [vmem:[#allocation73_spill] sm:$0xff] %v13220_v36  ;;  %v13224_v14 = vmul.f32 %v12664_v29, %v16659_v20  ;;  %v13228_v4 = vmul.f32 %v12666_v8, %v16661_v48  ;;  %v16663_v6 = vld [vmem:[#allocation306_spill] sm:$0xff]  ;;  %v16669_v36 = vld [vmem:[#allocation312_spill] sm:$0xff] }
 0x3c6   :  { %16656 = vst [vmem:[#allocation56_spill] sm:$0xff] %v13216_v47  ;;  %v13232_v45 = vmul.f32 %v12656_v12, %v16663_v6  ;;  %16666 = vst [vmem:[#allocation183_spill] sm:$0xff] %v13236_v26  ;;  %v16667_v47 = vld [vmem:[#allocation367_spill] sm:$0xff]  ;;  %v13244_v20 = vmul.f32 %v12662_v24, %v16669_v36  ;;  %v16677_v26 = vld [vmem:[#allocation273_spill] sm:$0xff] }
 0x3c7   :  { %16660 = vst [vmem:[#allocation180_spill] sm:$0xff] %v13224_v14  ;;  %16662 = vst [vmem:[#allocation181_spill] sm:$0xff] %v13228_v4  ;;  %v13240_v38 = vmul.f32 %v12660_v5, %v16667_v47  ;;  %v16671_v14 = vld [vmem:[#allocation268_spill] sm:$0xff]  ;;  %v13260_v47 = vmul.f32 %v12656_v12, %v16677_v26 }
 0x3c8   :  { %16664 = vst [vmem:[#allocation182_spill] sm:$0xff] %v13232_v45  ;;  %16670 = vst [vmem:[#allocation57_spill] sm:$0xff] %v13244_v20  ;;  %v13248_v48 = vmul.f32 %v12664_v29, %v16671_v14  ;;  %v16673_v4 = vld [vmem:[#allocation372_spill] sm:$0xff]  ;;  %v16675_v45 = vld [vmem:[#allocation318_spill] sm:$0xff] }
 0x3c9   :  { %16668 = vst [vmem:[#allocation184_spill] sm:$0xff] %v13240_v38  ;;  %v13252_v6 = vmul.f32 %v12666_v8, %v16673_v4  ;;  %v13256_v13 = vmul.f32 %v12668_v59, %v16675_v45  ;;  %16678 = vst [vmem:[#allocation187_spill] sm:$0xff] %v13260_v47  ;;  %v16679_v38 = vld [vmem:[#allocation374_spill] sm:$0xff]  ;;  %v16681_v20 = vld [vmem:[#allocation324_spill] sm:$0xff] }
 0x3ca   :  { %16672 = vst [vmem:[#allocation77_spill] sm:$0xff] %v13248_v48  ;;  %v13264_v36 = vmul.f32 %v12658_v60, %v16679_v38  ;;  %v13268_v14 = vmul.f32 %v12660_v5, %v16681_v20  ;;  %v16683_v48 = vld [vmem:[#allocation278_spill] sm:$0xff]  ;;  %v16689_v47 = vld [vmem:[#allocation336_spill] sm:$0xff] }
 0x3cb   :  { %16674 = vst [vmem:[#allocation185_spill] sm:$0xff] %v13252_v6  ;;  %16676 = vst [vmem:[#allocation186_spill] sm:$0xff] %v13256_v13  ;;  %v13272_v4 = vmul.f32 %v12662_v24, %v16683_v48  ;;  %v16685_v6 = vld [vmem:[#allocation330_spill] sm:$0xff]  ;;  %v16687_v13 = vld [vmem:[#allocation283_spill] sm:$0xff]  ;;  %v13284_v38 = vmul.f32 %v12668_v59, %v16689_v47 }
 0x3cc   :  { %16680 = vst [vmem:[#allocation188_spill] sm:$0xff] %v13264_v36  ;;  %16682 = vst [vmem:[#allocation189_spill] sm:$0xff] %v13268_v14  ;;  %v13276_v45 = vmul.f32 %v12664_v29, %v16685_v6  ;;  %v13280_v26 = vmul.f32 %v12666_v8, %v16687_v13  ;;  %v16691_v36 = vld [vmem:[#allocation289_spill] sm:$0xff]  ;;  %v16693_v14 = vld [vmem:[#allocation342_spill] sm:$0xff] }
 0x3cd   :  { %16684 = vst [vmem:[#allocation59_spill] sm:$0xff] %v13272_v4  ;;  %16690 = vst [vmem:[#allocation191_spill] sm:$0xff] %v13284_v38  ;;  %v13288_v20 = vmul.f32 %v12656_v12, %v16691_v36  ;;  %v13292_v48 = vmul.f32 %v12658_v60, %v16693_v14  ;;  %v16695_v4 = vld [vmem:[#allocation295_spill] sm:$0xff]  ;;  %v16701_v38 = vld [vmem:[#allocation354_spill] sm:$0xff] }
 0x3ce   :  { %16686 = vst [vmem:[#allocation78_spill] sm:$0xff] %v13276_v45  ;;  %16688 = vst [vmem:[#allocation190_spill] sm:$0xff] %v13280_v26  ;;  %v13296_v6 = vmul.f32 %v12660_v5, %v16695_v4  ;;  %v16697_v45 = vld [vmem:[#allocation348_spill] sm:$0xff]  ;;  %v16699_v26 = vld [vmem:[#allocation301_spill] sm:$0xff]  ;;  %v13308_v36 = vmul.f32 %v12666_v8, %v16701_v38 }
 0x3cf   :  { %16692 = vst [vmem:[#allocation192_spill] sm:$0xff] %v13288_v20  ;;  %16694 = vst [vmem:[#allocation193_spill] sm:$0xff] %v13292_v48  ;;  %v13300_v13 = vmul.f32 %v12662_v24, %v16697_v45  ;;  %v13304_v47 = vmul.f32 %v12664_v29, %v16699_v26  ;;  %v16703_v20 = vld [vmem:[#allocation307_spill] sm:$0xff]  ;;  %v16705_v48 = vld [vmem:[#allocation313_spill] sm:$0xff] }
 0x3d0   :  { %16696 = vst [vmem:[#allocation194_spill] sm:$0xff] %v13296_v6  ;;  %16702 = vst [vmem:[#allocation195_spill] sm:$0xff] %v13308_v36  ;;  %v13312_v14 = vmul.f32 %v12668_v59, %v16703_v20  ;;  %v13316_v4 = vmul.f32 %v12656_v12, %v16705_v48  ;;  %v16707_v6 = vld [vmem:[#allocation364_spill] sm:$0xff]  ;;  %v16713_v36 = vld [vmem:[#allocation325_spill] sm:$0xff] }
 0x3d1   :  { %16698 = vst [vmem:[#allocation60_spill] sm:$0xff] %v13300_v13  ;;  %16700 = vst [vmem:[#allocation79_spill] sm:$0xff] %v13304_v47  ;;  %v13320_v45 = vmul.f32 %v12658_v60, %v16707_v6  ;;  %v16709_v13 = vld [vmem:[#allocation368_spill] sm:$0xff]  ;;  %v16711_v47 = vld [vmem:[#allocation319_spill] sm:$0xff]  ;;  %v13332_v20 = vmul.f32 %v12664_v29, %v16713_v36 }
 0x3d2   :  { %16704 = vst [vmem:[#allocation196_spill] sm:$0xff] %v13312_v14  ;;  %16706 = vst [vmem:[#allocation197_spill] sm:$0xff] %v13316_v4  ;;  %v13324_v26 = vmul.f32 %v12660_v5, %v16709_v13  ;;  %v13328_v38 = vmul.f32 %v12662_v24, %v16711_v47  ;;  %v16715_v14 = vld [vmem:[#allocation331_spill] sm:$0xff]  ;;  %v16717_v4 = vld [vmem:[#allocation337_spill] sm:$0xff] }
 0x3d3   :  { %16708 = vst [vmem:[#allocation198_spill] sm:$0xff] %v13320_v45  ;;  %16714 = vst [vmem:[#allocation80_spill] sm:$0xff] %v13332_v20  ;;  %v13336_v48 = vmul.f32 %v12666_v8, %v16715_v14  ;;  %v13340_v6 = vmul.f32 %v12668_v59, %v16717_v4  ;;  %v16719_v45 = vld [vmem:[#allocation343_spill] sm:$0xff]  ;;  %v16725_v20 = vld [vmem:[#allocation360_spill] sm:$0xff] }
 0x3d4   :  { %16710 = vst [vmem:[#allocation199_spill] sm:$0xff] %v13324_v26  ;;  %16712 = vst [vmem:[#allocation61_spill] sm:$0xff] %v13328_v38  ;;  %v13344_v13 = vmul.f32 %v12656_v12, %v16719_v45  ;;  %v16721_v26 = vld [vmem:[#allocation349_spill] sm:$0xff]  ;;  %v16723_v38 = vld [vmem:[#allocation355_spill] sm:$0xff]  ;;  %v13356_v14 = vmul.f32 %v12662_v24, %v16725_v20 }
 0x3d5   :  { %16716 = vst [vmem:[#allocation200_spill] sm:$0xff] %v13336_v48  ;;  %16718 = vst [vmem:[#allocation201_spill] sm:$0xff] %v13340_v6  ;;  %v13348_v47 = vmul.f32 %v12658_v60, %v16721_v26  ;;  %v13352_v36 = vmul.f32 %v12660_v5, %v16723_v38  ;;  %v16727_v48 = vld [vmem:[#allocation365_spill] sm:$0xff] }
 0x3d6   :  { %16720 = vst [vmem:[#allocation202_spill] sm:$0xff] %v13344_v13  ;;  %16726 = vst [vmem:[#allocation62_spill] sm:$0xff] %v13356_v14  ;;  %v13360_v4 = vmul.f32 %v12664_v29, %v16727_v48  ;;  %v16729_v6 = vld [vmem:[#allocation369_spill] sm:$0xff]  ;;  %v16737_v14 = vld [vmem:[#allocation96_spill] sm:$0xff] }
 0x3d7   :  { %16722 = vst [vmem:[#allocation203_spill] sm:$0xff] %v13348_v47  ;;  %16724 = vst [vmem:[#allocation204_spill] sm:$0xff] %v13352_v36  ;;  %v13364_v45 = vmul.f32 %v12666_v8, %v16729_v6  ;;  %v16731_v13 = vld [vmem:[#allocation85_spill] sm:$0xff]  ;;  %v16733_v47 = vld [vmem:[#allocation95_spill] sm:$0xff]  ;;  %v13380_v48 = vmul.f32 %v12660_v5, %v16737_v14 }
 0x3d8   :  { %16728 = vst [vmem:[#allocation81_spill] sm:$0xff] %v13360_v4  ;;  %v13368_v26 = vmul.f32 %v12668_v59, %v16731_v13  ;;  %v13372_v38 = vmul.f32 %v12656_v12, %v16733_v47  ;;  %v16735_v36 = vld [vmem:[#allocation87_spill] sm:$0xff]  ;;  %v16739_v4 = vld [vmem:[#allocation88_spill] sm:$0xff] }
 0x3d9   :  { %16730 = vst [vmem:[#allocation205_spill] sm:$0xff] %v13364_v45  ;;  %v13376_v20 = vmul.f32 %v12658_v60, %v16735_v36  ;;  %16738 = vst [vmem:[#allocation9_spill] sm:$0xff] %v13380_v48  ;;  %v13384_v6 = vmul.f32 %v12662_v24, %v16739_v4  ;;  %v16741_v45 = vld [vmem:[#allocation97_spill] sm:$0xff] }
 0x3da   :  { %16732 = vst [vmem:[#allocation209_spill] sm:$0xff] %v13368_v26  ;;  %16734 = vst [vmem:[#allocation213_spill] sm:$0xff] %v13372_v38  ;;  %v13388_v13 = vmul.f32 %v12664_v29, %v16741_v45  ;;  %v16743_v26 = vld [vmem:[#allocation98_spill] sm:$0xff]  ;;  %v16749_v48 = vld [vmem:[#allocation89_spill] sm:$0xff] }
 0x3db   :  { %16736 = vst [vmem:[#allocation214_spill] sm:$0xff] %v13376_v20  ;;  %16740 = vst [vmem:[#allocation63_spill] sm:$0xff] %v13384_v6  ;;  %v13392_v47 = vmul.f32 %v12666_v8, %v16743_v26  ;;  %v16745_v38 = vld [vmem:[#allocation90_spill] sm:$0xff]  ;;  %v16747_v20 = vld [vmem:[#allocation91_spill] sm:$0xff]  ;;  %v13404_v4 = vmul.f32 %v12658_v60, %v16749_v48 }
 0x3dc   :  { %16742 = vst [vmem:[#allocation82_spill] sm:$0xff] %v13388_v13  ;;  %v13396_v36 = vmul.f32 %v12668_v59, %v16745_v38  ;;  %v13400_v14 = vmul.f32 %v12656_v12, %v16747_v20  ;;  %v16751_v6 = vld [vmem:[#allocation92_spill] sm:$0xff]  ;;  %v16753_v13 = vld [vmem:[#allocation93_spill] sm:$0xff] }
 0x3dd   :  { %16744 = vst [vmem:[#allocation359_spill] sm:$0xff] %v13392_v47  ;;  %16750 = vst [vmem:[#allocation2_spill] sm:$0xff] %v13404_v4  ;;  %v13408_v45 = vmul.f32 %v12660_v5, %v16751_v6  ;;  %v13412_v26 = vmul.f32 %v12662_v24, %v16753_v13  ;;  %v16755_v47 = vld [vmem:[#allocation94_spill] sm:$0xff]  ;;  %v16761_v4 = vld [vmem:[#allocation103_spill] sm:$0xff] }
 0x3de   :  { %16746 = vst [vmem:[#allocation215_spill] sm:$0xff] %v13396_v36  ;;  %16748 = vst [vmem:[#allocation216_spill] sm:$0xff] %v13400_v14  ;;  %v13416_v38 = vmul.f32 %v12664_v29, %v16755_v47  ;;  %v16757_v36 = vld [vmem:[#allocation99_spill] sm:$0xff]  ;;  %v16759_v14 = vld [vmem:[#allocation100_spill] sm:$0xff]  ;;  %v13428_v6 = vmul.f32 %v12656_v12, %v16761_v4 }
 0x3df   :  { %16752 = vst [vmem:[#allocation3_spill] sm:$0xff] %v13408_v45  ;;  %16754 = vst [vmem:[#allocation14_spill] sm:$0xff] %v13412_v26  ;;  %v13420_v20 = vmul.f32 %v12666_v8, %v16757_v36  ;;  %v13424_v48 = vmul.f32 %v12668_v59, %v16759_v14  ;;  %v16763_v45 = vld [vmem:[#allocation206_spill] sm:$0xff]  ;;  %v16765_v26 = vld [vmem:[#allocation207_spill] sm:$0xff] }
 0x3e0   :  { %16756 = vst [vmem:[#allocation65_spill] sm:$0xff] %v13416_v38  ;;  %16762 = vst [vmem:[#allocation218_spill] sm:$0xff] %v13428_v6  ;;  %v13432_v13 = vmul.f32 %v12658_v60, %v16763_v45  ;;  %v13436_v47 = vmul.f32 %v12660_v5, %v16765_v26  ;;  %v16767_v38 = vld [vmem:[#allocation118_spill] sm:$0xff]  ;;  %v16773_v6 = vld [vmem:[#allocation104_spill] sm:$0xff] }
 0x3e1   :  { %16758 = vst [vmem:[#allocation217_spill] sm:$0xff] %v13420_v20  ;;  %16760 = vst [vmem:[#allocation4_spill] sm:$0xff] %v13424_v48  ;;  %v13440_v36 = vmul.f32 %v12662_v24, %v16767_v38  ;;  %v16769_v20 = vld [vmem:[#allocation208_spill] sm:$0xff]  ;;  %v16771_v48 = vld [vmem:[#allocation119_spill] sm:$0xff]  ;;  %v13452_v45 = vmul.f32 %v12668_v59, %v16773_v6 }
 0x3e2   :  { %16764 = vst [vmem:[#allocation219_spill] sm:$0xff] %v13432_v13  ;;  %16766 = vst [vmem:[#allocation220_spill] sm:$0xff] %v13436_v47  ;;  %v13444_v14 = vmul.f32 %v12664_v29, %v16769_v20  ;;  %v13448_v4 = vmul.f32 %v12666_v8, %v16771_v48  ;;  %v16775_v13 = vld [vmem:[#allocation210_spill] sm:$0xff]  ;;  %v16777_v47 = vld [vmem:[#allocation15_spill] sm:$0xff] }
 0x3e3   :  { %16768 = vst [vmem:[#allocation23_spill] sm:$0xff] %v13440_v36  ;;  %16774 = vst [vmem:[#allocation86_spill] sm:$0xff] %v13452_v45  ;;  %v13456_v26 = vmul.f32 %v12656_v12, %v16775_v13  ;;  %v13460_v38 = vmul.f32 %v12658_v60, %v16777_v47  ;;  %v16779_v36 = vld [vmem:[#allocation22_spill] sm:$0xff]  ;;  %v16785_v45 = vld [vmem:[#allocation24_spill] sm:$0xff] }
 0x3e4   :  { %16770 = vst [vmem:[#allocation66_spill] sm:$0xff] %v13444_v14  ;;  %16772 = vst [vmem:[#allocation221_spill] sm:$0xff] %v13448_v4  ;;  %v13464_v20 = vmul.f32 %v12660_v5, %v16779_v36  ;;  %v16781_v14 = vld [vmem:[#allocation19_spill] sm:$0xff]  ;;  %v16783_v4 = vld [vmem:[#allocation20_spill] sm:$0xff]  ;;  %v13476_v13 = vmul.f32 %v12666_v8, %v16785_v45 }
 0x3e5   :  { %16776 = vst [vmem:[#allocation5_spill] sm:$0xff] %v13456_v26  ;;  %16778 = vst [vmem:[#allocation10_spill] sm:$0xff] %v13460_v38  ;;  %v13468_v48 = vmul.f32 %v12662_v24, %v16781_v14  ;;  %v13472_v6 = vmul.f32 %v12664_v29, %v16783_v4  ;;  %v16787_v26 = vld [vmem:[#allocation105_spill] sm:$0xff]  ;;  %v16789_v38 = vld [vmem:[#allocation36_spill] sm:$0xff] }
 0x3e6   :  { %16780 = vst [vmem:[#allocation16_spill] sm:$0xff] %v13464_v20  ;;  %16786 = vst [vmem:[#allocation6_spill] sm:$0xff] %v13476_v13  ;;  %v13480_v47 = vmul.f32 %v12668_v59, %v16787_v26  ;;  %v13484_v36 = vmul.f32 %v12656_v12, %v16789_v38  ;;  %v16791_v20 = vld [vmem:[#allocation110_spill] sm:$0xff]  ;;  %v16797_v13 = vld [vmem:[#allocation113_spill] sm:$0xff] }
 0x3e7   :  { %16782 = vst [vmem:[#allocation222_spill] sm:$0xff] %v13468_v48  ;;  %16784 = vst [vmem:[#allocation27_spill] sm:$0xff] %v13472_v6  ;;  %v13488_v14 = vmul.f32 %v12658_v60, %v16791_v20  ;;  %v16793_v48 = vld [vmem:[#allocation111_spill] sm:$0xff]  ;;  %v16795_v6 = vld [vmem:[#allocation112_spill] sm:$0xff]  ;;  %v13500_v26 = vmul.f32 %v12664_v29, %v16797_v13 }
 0x3e8   :  { %16788 = vst [vmem:[#allocation7_spill] sm:$0xff] %v13480_v47  ;;  %16790 = vst [vmem:[#allocation30_spill] sm:$0xff] %v13484_v36  ;;  %v13492_v4 = vmul.f32 %v12660_v5, %v16793_v48  ;;  %v13496_v45 = vmul.f32 %v12662_v24, %v16795_v6  ;;  %v16799_v47 = vld [vmem:[#allocation114_spill] sm:$0xff]  ;;  %v16801_v36 = vld [vmem:[#allocation212_spill] sm:$0xff] }
 0x3e9   :  { %16792 = vst [vmem:[#allocation69_spill] sm:$0xff] %v13488_v14  ;;  %16798 = vst [vmem:[#allocation116_spill] sm:$0xff] %v13500_v26  ;;  %v13504_v38 = vmul.f32 %v12666_v8, %v16799_v47  ;;  %v13508_v20 = vmul.f32 %v12668_v59, %v16801_v36  ;;  %v16803_v14 = vld [vmem:[#allocation32_spill] sm:$0xff]  ;;  %v16806_v26 = vld [vmem:[#allocation122_spill] sm:$0xff] }
 0x3ea   :  { %16794 = vst [vmem:[#allocation39_spill] sm:$0xff] %v13492_v4  ;;  %16796 = vst [vmem:[#allocation115_spill] sm:$0xff] %v13496_v45  ;;  %v13512_v48 = vmul.f32 %v12656_v12, %v16803_v14  ;;  %v16804_v4 = vld [vmem:[#allocation120_spill] sm:$0xff]  ;;  %v16805_v45 = vld [vmem:[#allocation121_spill] sm:$0xff]  ;;  %v13524_v47 = vmul.f32 %v12662_v24, %v16806_v26  ;;  %v13544_v24 = vsel %vm348_vm0, %v12789_v41, 0.0  ;;  %v13564_v41 = vsel %vm727_vm1, %v12812_v55, 0.0 }
 0x3eb   :  { %16800 = vst [vmem:[#allocation223_spill] sm:$0xff] %v13504_v38  ;;  %16802 = vst [vmem:[#allocation8_spill] sm:$0xff] %v13508_v20  ;;  %v13516_v6 = vmul.f32 %v12658_v60, %v16804_v4  ;;  %v13520_v13 = vmul.f32 %v12660_v5, %v16805_v45  ;;  %v16807_v38 = vld [vmem:[#allocation123_spill] sm:$0xff]  ;;  %v16808_v20 = vld [vmem:[#allocation124_spill] sm:$0xff]  ;;  %v13536_v60 = vmul.f32 %v12668_v59, %v16468_v53  ;;  %v13540_v5 = vsel %vm348_vm0, %v12784_v61, 0.0 }
 0x3ec   :  { %v13528_v36 = vmul.f32 %v12664_v29, %v16807_v38  ;;  %v13532_v12 = vmul.f32 %v12666_v8, %v16808_v20  ;;  %v13548_v29 = vsel %vm348_vm0, %v12793_v51, 0.0  ;;  %v13552_v8 = vsel %vm348_vm0, %v12798_v25, 0.0  ;;  %16813 = vst [vmem:[#allocation18_spill] sm:$0xff] %v13564_v41  ;;  %v16840_v14 = vld [vmem:[#allocation139_spill] sm:$0xff]  ;;  %v16841_v4 = vld [vmem:[#allocation33_spill] sm:$0xff]  ;;  %v16842_v45 = vld [vmem:[#allocation50_spill] sm:$0xff] }
 0x3ed   :  { %16809 = vst [vmem:[#allocation13_spill] sm:$0xff] %v13548_v29  ;;  %16810 = vst [vmem:[#allocation26_spill] sm:$0xff] %v13552_v8  ;;  %v13556_v53 = vsel %vm348_vm0, %v12802_v39, 0.0  ;;  %v13560_v61 = vsel %vm348_vm0, %v12808_v2, 0.0  ;;  %v13568_v51 = vsel %vm348_vm0, %v12816_v17, 0.0  ;;  %v13572_v25 = vsel %vm348_vm0, %v12820_v9, 0.0 }
 0x3ee   :  { %16811 = vst [vmem:[#allocation35_spill] sm:$0xff] %v13556_v53  ;;  %16812 = vst [vmem:[#allocation12_spill] sm:$0xff] %v13560_v61  ;;  %v13576_v39 = vsel %vm348_vm0, %v12824_v62, 0.0  ;;  %v13580_v2 = vsel %vm348_vm0, %v12828_v1, 0.0  ;;  %v13584_v55 = vsel %vm348_vm0, %v12833_v40, 0.0  ;;  %v13588_v17 = vsel %vm348_vm0, %v12837_v19, 0.0 }
 0x3ef   :  { %16814 = vst [vmem:[#allocation34_spill] sm:$0xff] %v13576_v39  ;;  %16815 = vst [vmem:[#allocation43_spill] sm:$0xff] %v13580_v2  ;;  %v13592_v9 = vsel %vm727_vm1, %v12841_v42, 0.0  ;;  %v13596_v62 = vsel %vm348_vm0, %v12847_v15, 0.0  ;;  %v13600_v1 = vsel %vm348_vm0, %v12851_v54, 0.0  ;;  %v13604_v40 = vsel %vm348_vm0, %v12855_v33, 0.0 }
 0x3f0   :  { %16816 = vst [vmem:[#allocation11_spill] sm:$0xff] %v13584_v55  ;;  %16817 = vst [vmem:[#allocation17_spill] sm:$0xff] %v13588_v17  ;;  %v13608_v19 = vsel %vm348_vm0, %v12859_v3, 0.0  ;;  %v13612_v42 = vsel %vm348_vm0, %v12863_v7, 0.0  ;;  %v13616_v15 = vsel %vm348_vm0, %v12867_v28, 0.0  ;;  %v13620_v54 = vsel %vm727_vm1, %v12871_v27, 0.0 }
 0x3f1   :  { %16818 = vst [vmem:[#allocation31_spill] sm:$0xff] %v13592_v9  ;;  %16819 = vst [vmem:[#allocation42_spill] sm:$0xff] %v13604_v40  ;;  %v13624_v33 = vsel %vm348_vm0, %v12876_v18, 0.0  ;;  %v13628_v3 = vsel %vm348_vm0, %v12880_v30, 0.0  ;;  %v13632_v7 = vsel %vm348_vm0, %v12884_v16, 0.0  ;;  %v13636_v28 = vsel %vm348_vm0, %v12888_v43, 0.0 }
 0x3f2   :  { %16820 = vst [vmem:[#allocation70_spill] sm:$0xff] %v13608_v19  ;;  %16821 = vst [vmem:[#allocation74_spill] sm:$0xff] %v13612_v42  ;;  %v13640_v27 = vsel %vm348_vm0, %v12892_v32, 0.0  ;;  %v13644_v18 = vsel %vm348_vm0, %v12896_v10, 0.0  ;;  %v13648_v30 = vsel %vm727_vm1, %v12900_v46, 0.0  ;;  %v13652_v16 = vsel %vm348_vm0, %v12904_v23, 0.0 }
 0x3f3   :  { %16822 = vst [vmem:[#allocation75_spill] sm:$0xff] %v13616_v15  ;;  %16823 = vst [vmem:[#allocation76_spill] sm:$0xff] %v13620_v54  ;;  %v13656_v43 = vsel %vm348_vm0, %v12908_v57, 0.0  ;;  %v13660_v32 = vsel %vm348_vm0, %v12912_v58, 0.0  ;;  %v13664_v10 = vsel %vm348_vm0, %v12916_v22, 0.0  ;;  %v13668_v46 = vsel %vm348_vm0, %v12920_v37, 0.0 }
 0x3f4   :  { %16824 = vst [vmem:[#allocation211_spill] sm:$0xff] %v13632_v7  ;;  %16825 = vst [vmem:[#allocation117_spill] sm:$0xff] %v13636_v28  ;;  %v13672_v23 = vsel %vm348_vm0, %v12924_v0, 0.0  ;;  %v13676_v57 = vsel %vm348_vm0, %v12932_v63, 0.0  ;;  %v13680_v58 = vsel %vm348_vm0, %v12936_v56, 0.0  ;;  %v13684_v22 = vsel %vm348_vm0, %v12940_v21, 0.0 }
 0x3f5   :  { %16826 = vst [vmem:[#allocation107_spill] sm:$0xff] %v13640_v27  ;;  %16827 = vst [vmem:[#allocation38_spill] sm:$0xff] %v13644_v18  ;;  %v13688_v37 = vsel %vm348_vm0, %v12944_v35, 0.0  ;;  %v13692_v0 = vsel %vm348_vm0, %v12948_v31, 0.0  ;;  %v13696_v63 = vsel %vm348_vm0, %v12952_v49, 0.0  ;;  %v13700_v56 = vsel %vm348_vm0, %v12960_v50, 0.0 }
 0x3f6   :  { %16828 = vst [vmem:[#allocation254_spill] sm:$0xff] %v13648_v30  ;;  %16829 = vst [vmem:[#allocation46_spill] sm:$0xff] %v13660_v32  ;;  %v13704_v21 = vsel %vm348_vm0, %v12964_v34, 0.0  ;;  %v13708_v35 = vsel %vm348_vm0, %v12968_v44, 0.0  ;;  %v13712_v31 = vsel %vm348_vm0, %v12972_v52, 0.0  ;;  %v13716_v49 = vsel %vm348_vm0, %v12976_v11, 0.0 }
 0x3f7   :  { %16830 = vst [vmem:[#allocation49_spill] sm:$0xff] %v13664_v10  ;;  %16831 = vst [vmem:[#allocation52_spill] sm:$0xff] %v13668_v46  ;;  %v13720_v50 = vsel %vm348_vm0, %v16840_v14, 0.0  ;;  %v13724_v34 = vsel %vm348_vm0, %v16841_v4, 0.0  ;;  %v13728_v44 = vsel %vm348_vm0, %v16842_v45, 0.0  ;;  %v16844_v26 = vld [vmem:[#allocation140_spill] sm:$0xff] }
 0x3f8   :  { %16832 = vst [vmem:[#allocation101_spill] sm:$0xff] %v13672_v23  ;;  %16833 = vst [vmem:[#allocation106_spill] sm:$0xff] %v13684_v22  ;;  %v13732_v52 = vsel %vm348_vm0, %v16844_v26, 0.0  ;;  %v16846_v38 = vld [vmem:[#allocation143_spill] sm:$0xff]  ;;  %v16847_v20 = vld [vmem:[#allocation144_spill] sm:$0xff] }
 0x3f9   :  { %16834 = vst [vmem:[#allocation109_spill] sm:$0xff] %v13688_v37  ;;  %16835 = vst [vmem:[#allocation224_spill] sm:$0xff] %v13692_v0  ;;  %v13736_v11 = vsel %vm348_vm0, %v16846_v38, 0.0  ;;  %v13740_v14 = vsel %vm348_vm0, %v16847_v20, 0.0  ;;  %v16848_v59 = vld [vmem:[#allocation37_spill] sm:$0xff]  ;;  %v16856_v23 = vld [vmem:[#allocation147_spill] sm:$0xff] }
 0x3fa   :  { %16836 = vst [vmem:[#allocation285_spill] sm:$0xff] %v13696_v63  ;;  %16837 = vst [vmem:[#allocation225_spill] sm:$0xff] %v13708_v35  ;;  %v13744_v4 = vsel %vm348_vm0, %v16848_v59, 0.0  ;;  %v16852_v63 = vld [vmem:[#allocation145_spill] sm:$0xff]  ;;  %v13760_v20 = vsel %vm727_vm1, %v16856_v23, 0.0  ;;  %v16858_v30 = vld [vmem:[#allocation148_spill] sm:$0xff] }
 0x3fb   :  { %16838 = vst [vmem:[#allocation83_spill] sm:$0xff] %v13712_v31  ;;  %16839 = vst [vmem:[#allocation21_spill] sm:$0xff] %v13716_v49  ;;  %v16850_v49 = vld [vmem:[#allocation53_spill] sm:$0xff]  ;;  %v13752_v26 = vsel %vm348_vm0, %v16852_v63, 0.0  ;;  %v13764_v59 = vsel %vm348_vm0, %v16858_v30, 0.0  ;;  %v16862_v41 = vld [vmem:[#allocation58_spill] sm:$0xff] }
 0x3fc   :  { %16843 = vst [vmem:[#allocation102_spill] sm:$0xff] %v13728_v44  ;;  %16845 = vst [vmem:[#allocation108_spill] sm:$0xff] %v13732_v52  ;;  %v13748_v45 = vsel %vm348_vm0, %v16850_v49, 0.0  ;;  %v16854_v52 = vld [vmem:[#allocation146_spill] sm:$0xff]  ;;  %v16859_v54 = vld [vmem:[#allocation149_spill] sm:$0xff] }
 0x3fd   :  { %16849 = vst [vmem:[#allocation28_spill] sm:$0xff] %v13744_v4  ;;  %16851 = vst [vmem:[#allocation84_spill] sm:$0xff] %v13748_v45  ;;  %v13756_v38 = vsel %vm348_vm0, %v16854_v52, 0.0  ;;  %v13768_v49 = vsel %vm348_vm0, %v16859_v54, 0.0  ;;  %v16860_v9 = vld [vmem:[#allocation41_spill] sm:$0xff]  ;;  %v13776_v52 = vsel %vm348_vm0, %v16862_v41, 0.0 }
 0x3fe   :  { %16853 = vst [vmem:[#allocation40_spill] sm:$0xff] %v13752_v26  ;;  %16855 = vst [vmem:[#allocation125_spill] sm:$0xff] %v13756_v38  ;;  %v13772_v63 = vsel %vm348_vm0, %v16860_v9, 0.0  ;;  %v16864_v18 = vld [vmem:[#allocation150_spill] sm:$0xff]  ;;  %v16868_v15 = vld [vmem:[#allocation152_spill] sm:$0xff] }
 0x3ff   :  { %16857 = vst [vmem:[#allocation126_spill] sm:$0xff] %v13760_v20  ;;  %16861 = vst [vmem:[#allocation127_spill] sm:$0xff] %v13772_v63  ;;  %v13780_v23 = vsel %vm348_vm0, %v16864_v18, 0.0  ;;  %v16866_v20 = vld [vmem:[#allocation151_spill] sm:$0xff]  ;;  %v13788_v54 = vsel %vm727_vm1, %v16868_v15, 0.0  ;;  %v16870_v38 = vld [vmem:[#allocation153_spill] sm:$0xff] }
 0x400   :  { %16863 = vst [vmem:[#allocation130_spill] sm:$0xff] %v13776_v52  ;;  %16865 = vst [vmem:[#allocation129_spill] sm:$0xff] %v13780_v23  ;;  %v13784_v30 = vsel %vm348_vm0, %v16866_v20, 0.0  ;;  %v13792_v9 = vsel %vm348_vm0, %v16870_v38, 0.0  ;;  %v16871_v17 = vld [vmem:[#allocation154_spill] sm:$0xff]  ;;  %v16872_v61 = vld [vmem:[#allocation45_spill] sm:$0xff] }
 0x401   :  { %16867 = vst [vmem:[#allocation128_spill] sm:$0xff] %v13784_v30  ;;  %16869 = vst [vmem:[#allocation44_spill] sm:$0xff] %v13788_v54  ;;  %v13796_v41 = vsel %vm348_vm0, %v16871_v17, 0.0  ;;  %v13800_v18 = vsel %vm348_vm0, %v16872_v61, 0.0  ;;  %v16874_v23 = vld [vmem:[#allocation64_spill] sm:$0xff]  ;;  %v16876_v30 = vld [vmem:[#allocation155_spill] sm:$0xff] }
 0x402   :  { %16873 = vst [vmem:[#allocation25_spill] sm:$0xff] %v13800_v18  ;;  %v13804_v20 = vsel %vm348_vm0, %v16874_v23, 0.0  ;;  %v13808_v15 = vsel %vm348_vm0, %v16876_v30, 0.0  ;;  %v16878_v54 = vld [vmem:[#allocation156_spill] sm:$0xff]  ;;  %v16880_v26 = vld [vmem:[#allocation157_spill] sm:$0xff]  ;;  %v16882_v0 = vld [vmem:[#allocation158_spill] sm:$0xff] }
 0x403   :  { %16875 = vst [vmem:[#allocation284_spill] sm:$0xff] %v13804_v20  ;;  %16877 = vst [vmem:[#allocation290_spill] sm:$0xff] %v13808_v15  ;;  %v13812_v38 = vsel %vm348_vm0, %v16878_v54, 0.0  ;;  %v13816_v17 = vsel %vm727_vm1, %v16880_v26, 0.0  ;;  %v13820_v61 = vsel %vm348_vm0, %v16882_v0, 0.0  ;;  %v16883_v46 = vld [vmem:[#allocation159_spill] sm:$0xff] }
 0x404   :  { %16879 = vst [vmem:[#allocation296_spill] sm:$0xff] %v13812_v38  ;;  %16881 = vst [vmem:[#allocation259_spill] sm:$0xff] %v13816_v17  ;;  %v13824_v23 = vsel %vm348_vm0, %v16883_v46, 0.0  ;;  %v16884_v27 = vld [vmem:[#allocation48_spill] sm:$0xff]  ;;  %v16886_v15 = vld [vmem:[#allocation67_spill] sm:$0xff] }
 0x405   :  { %v13828_v30 = vsel %vm348_vm0, %v16884_v27, 0.0  ;;  %v13832_v54 = vsel %vm348_vm0, %v16886_v15, 0.0  ;;  %v16888_v38 = vld [vmem:[#allocation160_spill] sm:$0xff]  ;;  %v16890_v17 = vld [vmem:[#allocation161_spill] sm:$0xff]  ;;  %v16892_v42 = vld [vmem:[#allocation162_spill] sm:$0xff] }
 0x406   :  { %16885 = vst [vmem:[#allocation230_spill] sm:$0xff] %v13828_v30  ;;  %16887 = vst [vmem:[#allocation274_spill] sm:$0xff] %v13832_v54  ;;  %v13836_v26 = vsel %vm348_vm0, %v16888_v38, 0.0  ;;  %v13840_v0 = vsel %vm348_vm0, %v16890_v17, 0.0  ;;  %v13844_v46 = vsel %vm727_vm1, %v16892_v42, 0.0  ;;  %v16894_v55 = vld [vmem:[#allocation163_spill] sm:$0xff] }
 0x407   :  { %16889 = vst [vmem:[#allocation361_spill] sm:$0xff] %v13836_v26  ;;  %16891 = vst [vmem:[#allocation226_spill] sm:$0xff] %v13840_v0  ;;  %v13848_v27 = vsel %vm348_vm0, %v16894_v55, 0.0  ;;  %v16895_v53 = vld [vmem:[#allocation164_spill] sm:$0xff]  ;;  %v16896_v54 = vld [vmem:[#allocation51_spill] sm:$0xff] }
 0x408   :  { %16893 = vst [vmem:[#allocation264_spill] sm:$0xff] %v13844_v46  ;;  %v13852_v15 = vsel %vm348_vm0, %v16895_v53, 0.0  ;;  %v13856_v38 = vsel %vm348_vm0, %v16896_v54, 0.0  ;;  %v16898_v26 = vld [vmem:[#allocation68_spill] sm:$0xff]  ;;  %v16900_v0 = vld [vmem:[#allocation165_spill] sm:$0xff]  ;;  %v16902_v46 = vld [vmem:[#allocation166_spill] sm:$0xff] }
 0x409   :  { %16897 = vst [vmem:[#allocation234_spill] sm:$0xff] %v13856_v38  ;;  %v13860_v17 = vsel %vm348_vm0, %v16898_v26, 0.0  ;;  %v13864_v42 = vsel %vm348_vm0, %v16900_v0, 0.0  ;;  %v13868_v55 = vsel %vm348_vm0, %v16902_v46, 0.0  ;;  %v16904_v20 = vld [vmem:[#allocation167_spill] sm:$0xff]  ;;  %v16906_v52 = vld [vmem:[#allocation168_spill] sm:$0xff] }
 0x40a   :  { %16899 = vst [vmem:[#allocation302_spill] sm:$0xff] %v13860_v17  ;;  %16901 = vst [vmem:[#allocation238_spill] sm:$0xff] %v13864_v42  ;;  %v13872_v53 = vsel %vm727_vm1, %v16904_v20, 0.0  ;;  %v13876_v54 = vsel %vm348_vm0, %v16906_v52, 0.0  ;;  %v16907_v45 = vld [vmem:[#allocation169_spill] sm:$0xff]  ;;  %v16908_v17 = vld [vmem:[#allocation54_spill] sm:$0xff] }
 0x40b   :  { %16903 = vst [vmem:[#allocation332_spill] sm:$0xff] %v13868_v55  ;;  %16905 = vst [vmem:[#allocation255_spill] sm:$0xff] %v13872_v53  ;;  %v13880_v26 = vsel %vm348_vm0, %v16907_v45, 0.0  ;;  %v13884_v0 = vsel %vm348_vm0, %v16908_v17, 0.0  ;;  %v16910_v42 = vld [vmem:[#allocation71_spill] sm:$0xff]  ;;  %v16912_v55 = vld [vmem:[#allocation170_spill] sm:$0xff] }
 0x40c   :  { %16909 = vst [vmem:[#allocation308_spill] sm:$0xff] %v13884_v0  ;;  %v13888_v46 = vsel %vm348_vm0, %v16910_v42, 0.0  ;;  %v13892_v20 = vsel %vm348_vm0, %v16912_v55, 0.0  ;;  %v16914_v53 = vld [vmem:[#allocation171_spill] sm:$0xff]  ;;  %v16916_v31 = vld [vmem:[#allocation173_spill] sm:$0xff]  ;;  %v16917_v37 = vld [vmem:[#allocation174_spill] sm:$0xff] }
 0x40d   :  { %16911 = vst [vmem:[#allocation314_spill] sm:$0xff] %v13888_v46  ;;  %16913 = vst [vmem:[#allocation269_spill] sm:$0xff] %v13892_v20  ;;  %v13896_v52 = vsel %vm348_vm0, %v16914_v53, 0.0  ;;  %v13900_v45 = vsel %vm348_vm0, %v16916_v31, 0.0  ;;  %v13904_v17 = vsel %vm348_vm0, %v16917_v37, 0.0  ;;  %v16918_v10 = vld [vmem:[#allocation55_spill] sm:$0xff] }
 0x40e   :  { %16915 = vst [vmem:[#allocation320_spill] sm:$0xff] %v13896_v52  ;;  %v13908_v42 = vsel %vm348_vm0, %v16918_v10, 0.0  ;;  %v16920_v46 = vld [vmem:[#allocation72_spill] sm:$0xff]  ;;  %v16922_v20 = vld [vmem:[#allocation175_spill] sm:$0xff]  ;;  %v16924_v52 = vld [vmem:[#allocation178_spill] sm:$0xff] }
 0x40f   :  { %16919 = vst [vmem:[#allocation242_spill] sm:$0xff] %v13908_v42  ;;  %v13912_v55 = vsel %vm348_vm0, %v16920_v46, 0.0  ;;  %v13916_v53 = vsel %vm348_vm0, %v16922_v20, 0.0  ;;  %v13920_v31 = vsel %vm348_vm0, %v16924_v52, 0.0  ;;  %v16925_v28 = vld [vmem:[#allocation179_spill] sm:$0xff]  ;;  %v16926_v19 = vld [vmem:[#allocation56_spill] sm:$0xff] }
 0x410   :  { %16921 = vst [vmem:[#allocation279_spill] sm:$0xff] %v13912_v55  ;;  %16923 = vst [vmem:[#allocation291_spill] sm:$0xff] %v13916_v53  ;;  %v13924_v37 = vsel %vm348_vm0, %v16925_v28, 0.0  ;;  %v13928_v10 = vsel %vm348_vm0, %v16926_v19, 0.0  ;;  %v16928_v2 = vld [vmem:[#allocation73_spill] sm:$0xff]  ;;  %v16930_v55 = vld [vmem:[#allocation182_spill] sm:$0xff] }
 0x411   :  { %16927 = vst [vmem:[#allocation326_spill] sm:$0xff] %v13928_v10  ;;  %v13932_v46 = vsel %vm348_vm0, %v16928_v2, 0.0  ;;  %v13936_v20 = vsel %vm348_vm0, %v16930_v55, 0.0  ;;  %v16931_v53 = vld [vmem:[#allocation183_spill] sm:$0xff]  ;;  %v16932_v8 = vld [vmem:[#allocation184_spill] sm:$0xff]  ;;  %v16934_v42 = vld [vmem:[#allocation57_spill] sm:$0xff] }
 0x412   :  { %16929 = vst [vmem:[#allocation246_spill] sm:$0xff] %v13932_v46  ;;  %v13940_v52 = vsel %vm348_vm0, %v16931_v53, 0.0  ;;  %v13944_v28 = vsel %vm348_vm0, %v16932_v8, 0.0  ;;  %v13948_v19 = vsel %vm348_vm0, %v16934_v42, 0.0  ;;  %v16936_v10 = vld [vmem:[#allocation77_spill] sm:$0xff]  ;;  %v16940_v0 = vld [vmem:[#allocation186_spill] sm:$0xff] }
 0x413   :  { %16933 = vst [vmem:[#allocation338_spill] sm:$0xff] %v13944_v28  ;;  %16935 = vst [vmem:[#allocation344_spill] sm:$0xff] %v13948_v19  ;;  %v13952_v2 = vsel %vm348_vm0, %v16936_v10, 0.0  ;;  %v16938_v46 = vld [vmem:[#allocation185_spill] sm:$0xff]  ;;  %v13960_v53 = vsel %vm727_vm1, %v16940_v0, 0.0  ;;  %v16942_v38 = vld [vmem:[#allocation187_spill] sm:$0xff] }
 0x414   :  { %16937 = vst [vmem:[#allocation350_spill] sm:$0xff] %v13952_v2  ;;  %v13956_v55 = vsel %vm348_vm0, %v16938_v46, 0.0  ;;  %16941 = vst [vmem:[#allocation260_spill] sm:$0xff] %v13960_v53  ;;  %v13964_v8 = vsel %vm348_vm0, %v16942_v38, 0.0  ;;  %v16943_v28 = vld [vmem:[#allocation188_spill] sm:$0xff]  ;;  %v16944_v19 = vld [vmem:[#allocation189_spill] sm:$0xff] }
 0x415   :  { %16939 = vst [vmem:[#allocation250_spill] sm:$0xff] %v13956_v55  ;;  %v13968_v42 = vsel %vm348_vm0, %v16943_v28, 0.0  ;;  %v13972_v10 = vsel %vm348_vm0, %v16944_v19, 0.0  ;;  %v16946_v2 = vld [vmem:[#allocation59_spill] sm:$0xff]  ;;  %v16948_v55 = vld [vmem:[#allocation78_spill] sm:$0xff]  ;;  %v16954_v18 = vld [vmem:[#allocation192_spill] sm:$0xff] }
 0x416   :  { %16945 = vst [vmem:[#allocation297_spill] sm:$0xff] %v13972_v10  ;;  %v13976_v46 = vsel %vm348_vm0, %v16946_v2, 0.0  ;;  %v13980_v0 = vsel %vm348_vm0, %v16948_v55, 0.0  ;;  %v16950_v53 = vld [vmem:[#allocation190_spill] sm:$0xff]  ;;  %v16952_v30 = vld [vmem:[#allocation191_spill] sm:$0xff]  ;;  %v13992_v19 = vsel %vm348_vm0, %v16954_v18, 0.0 }
 0x417   :  { %16947 = vst [vmem:[#allocation265_spill] sm:$0xff] %v13976_v46  ;;  %16949 = vst [vmem:[#allocation303_spill] sm:$0xff] %v13980_v0  ;;  %v13984_v38 = vsel %vm348_vm0, %v16950_v53, 0.0  ;;  %v13988_v28 = vsel %vm727_vm1, %v16952_v30, 0.0  ;;  %v16956_v10 = vld [vmem:[#allocation193_spill] sm:$0xff]  ;;  %v16958_v46 = vld [vmem:[#allocation194_spill] sm:$0xff] }
 0x418   :  { %16951 = vst [vmem:[#allocation309_spill] sm:$0xff] %v13984_v38  ;;  %16953 = vst [vmem:[#allocation270_spill] sm:$0xff] %v13988_v28  ;;  %v13996_v2 = vsel %vm348_vm0, %v16956_v10, 0.0  ;;  %v14000_v55 = vsel %vm348_vm0, %v16958_v46, 0.0  ;;  %v16960_v0 = vld [vmem:[#allocation60_spill] sm:$0xff]  ;;  %v16962_v38 = vld [vmem:[#allocation79_spill] sm:$0xff] }
 0x419   :  { %16955 = vst [vmem:[#allocation227_spill] sm:$0xff] %v13992_v19  ;;  %16957 = vst [vmem:[#allocation231_spill] sm:$0xff] %v13996_v2  ;;  %v14004_v53 = vsel %vm348_vm0, %v16960_v0, 0.0  ;;  %v14008_v30 = vsel %vm348_vm0, %v16962_v38, 0.0  ;;  %v16964_v28 = vld [vmem:[#allocation195_spill] sm:$0xff]  ;;  %v16966_v63 = vld [vmem:[#allocation196_spill] sm:$0xff] }
 0x41a   :  { %16959 = vst [vmem:[#allocation235_spill] sm:$0xff] %v14000_v55  ;;  %16961 = vst [vmem:[#allocation275_spill] sm:$0xff] %v14004_v53  ;;  %v14012_v18 = vsel %vm348_vm0, %v16964_v28, 0.0  ;;  %v14016_v10 = vsel %vm727_vm1, %v16966_v63, 0.0  ;;  %v16968_v4 = vld [vmem:[#allocation197_spill] sm:$0xff]  ;;  %v16970_v55 = vld [vmem:[#allocation198_spill] sm:$0xff] }
 0x41b   :  { %16963 = vst [vmem:[#allocation239_spill] sm:$0xff] %v14008_v30  ;;  %16965 = vst [vmem:[#allocation315_spill] sm:$0xff] %v14012_v18  ;;  %v14020_v46 = vsel %vm348_vm0, %v16968_v4, 0.0  ;;  %v14024_v0 = vsel %vm348_vm0, %v16970_v55, 0.0  ;;  %v16972_v53 = vld [vmem:[#allocation199_spill] sm:$0xff]  ;;  %v16974_v30 = vld [vmem:[#allocation61_spill] sm:$0xff] }
 0x41c   :  { %16967 = vst [vmem:[#allocation327_spill] sm:$0xff] %v14016_v10  ;;  %16969 = vst [vmem:[#allocation280_spill] sm:$0xff] %v14020_v46  ;;  %v14028_v38 = vsel %vm348_vm0, %v16972_v53, 0.0  ;;  %v14032_v28 = vsel %vm348_vm0, %v16974_v30, 0.0  ;;  %v16976_v18 = vld [vmem:[#allocation80_spill] sm:$0xff]  ;;  %v16980_v44 = vld [vmem:[#allocation201_spill] sm:$0xff] }
 0x41d   :  { %16971 = vst [vmem:[#allocation243_spill] sm:$0xff] %v14024_v0  ;;  %16973 = vst [vmem:[#allocation321_spill] sm:$0xff] %v14028_v38  ;;  %v14036_v63 = vsel %vm348_vm0, %v16976_v18, 0.0  ;;  %v16978_v10 = vld [vmem:[#allocation200_spill] sm:$0xff]  ;;  %v14044_v55 = vsel %vm727_vm1, %v16980_v44, 0.0  ;;  %v16982_v35 = vld [vmem:[#allocation202_spill] sm:$0xff] }
 0x41e   :  { %16975 = vst [vmem:[#allocation333_spill] sm:$0xff] %v14032_v28  ;;  %16977 = vst [vmem:[#allocation286_spill] sm:$0xff] %v14036_v63  ;;  %v14040_v4 = vsel %vm348_vm0, %v16978_v10, 0.0  ;;  %v14048_v53 = vsel %vm348_vm0, %v16982_v35, 0.0  ;;  %v16984_v38 = vld [vmem:[#allocation203_spill] sm:$0xff]  ;;  %v16986_v28 = vld [vmem:[#allocation204_spill] sm:$0xff] }
 0x41f   :  { %16979 = vst [vmem:[#allocation247_spill] sm:$0xff] %v14040_v4  ;;  %16981 = vst [vmem:[#allocation339_spill] sm:$0xff] %v14044_v55  ;;  %v14052_v30 = vsel %vm348_vm0, %v16984_v38, 0.0  ;;  %v14056_v18 = vsel %vm348_vm0, %v16986_v28, 0.0  ;;  %v16988_v63 = vld [vmem:[#allocation62_spill] sm:$0xff]  ;;  %v16990_v4 = vld [vmem:[#allocation81_spill] sm:$0xff] }
 0x420   :  { %16983 = vst [vmem:[#allocation345_spill] sm:$0xff] %v14048_v53  ;;  %16985 = vst [vmem:[#allocation351_spill] sm:$0xff] %v14052_v30  ;;  %v14060_v10 = vsel %vm348_vm0, %v16988_v63, 0.0  ;;  %v14064_v44 = vsel %vm348_vm0, %v16990_v4, 0.0  ;;  %v16992_v55 = vld [vmem:[#allocation205_spill] sm:$0xff]  ;;  %v17000_v4 = vld [vmem:[#allocation63_spill] sm:$0xff] }
 0x421   :  { %16987 = vst [vmem:[#allocation292_spill] sm:$0xff] %v14056_v18  ;;  %16989 = vst [vmem:[#allocation251_spill] sm:$0xff] %v14060_v10  ;;  %v14068_v35 = vsel %vm348_vm0, %v16992_v55, 0.0  ;;  %v16994_v22 = vld [vmem:[#allocation209_spill] sm:$0xff]  ;;  %v16997_v18 = vld [vmem:[#allocation214_spill] sm:$0xff] }
 0x422   :  { %16991 = vst [vmem:[#allocation356_spill] sm:$0xff] %v14064_v44  ;;  %16993 = vst [vmem:[#allocation298_spill] sm:$0xff] %v14068_v35  ;;  %v14072_v38 = vsel %vm727_vm1, %v16994_v22, 0.0  ;;  %v16996_v32 = vld [vmem:[#allocation213_spill] sm:$0xff]  ;;  %v4641_v7 = vsel %vm348_vm0, %v16997_v18, 0.0  ;;  %v14084_v44 = vsel %vm348_vm0, %v17000_v4, 0.0 }
 0x423   :  { %16995 = vst [vmem:[#allocation256_spill] sm:$0xff] %v14072_v38  ;;  %v4640_v28 = vsel %vm348_vm0, %v16996_v32, 0.0  ;;  %v16998_v63 = vld [vmem:[#allocation9_spill] sm:$0xff]  ;;  %17001 = vst [vmem:[#allocation261_spill] sm:$0xff] %v14084_v44  ;;  %v17002_v55 = vld [vmem:[#allocation82_spill] sm:$0xff] }
 0x424   :  { %v14080_v10 = vsel %vm348_vm0, %v16998_v63, 0.0  ;;  %v14088_v35 = vsel %vm348_vm0, %v17002_v55, 0.0  ;;  %v17004_v22 = vld [vmem:[#allocation359_spill] sm:$0xff]  ;;  %v17008_v18 = vld [vmem:[#allocation216_spill] sm:$0xff]  ;;  %v17012_v55 = vld [vmem:[#allocation14_spill] sm:$0xff] }
 0x425   :  { %16999 = vst [vmem:[#allocation370_spill] sm:$0xff] %v14080_v10  ;;  %17003 = vst [vmem:[#allocation310_spill] sm:$0xff] %v14088_v35  ;;  %v14092_v38 = vsel %vm348_vm0, %v17004_v22, 0.0  ;;  %v17006_v32 = vld [vmem:[#allocation215_spill] sm:$0xff]  ;;  %v4659_v63 = vsel %vm348_vm0, %v17008_v18, 0.0  ;;  %v17009_v10 = vld [vmem:[#allocation2_spill] sm:$0xff] }
 0x426   :  { %17005 = vst [vmem:[#allocation266_spill] sm:$0xff] %v14092_v38  ;;  %v14096_v40 = vsel %vm727_vm1, %v17006_v32, 0.0  ;;  %v4660_v39 = vsel %vm348_vm0, %v17009_v10, 0.0  ;;  %v17010_v4 = vld [vmem:[#allocation3_spill] sm:$0xff]  ;;  %v14108_v35 = vsel %vm348_vm0, %v17012_v55, 0.0  ;;  %v17014_v22 = vld [vmem:[#allocation65_spill] sm:$0xff] }
 0x427   :  { %17007 = vst [vmem:[#allocation316_spill] sm:$0xff] %v14096_v40  ;;  %v14104_v44 = vsel %vm348_vm0, %v17010_v4, 0.0  ;;  %17013 = vst [vmem:[#allocation271_spill] sm:$0xff] %v14108_v35  ;;  %v14112_v38 = vsel %vm348_vm0, %v17014_v22, 0.0  ;;  %v17016_v32 = vld [vmem:[#allocation217_spill] sm:$0xff]  ;;  %v17018_v18 = vld [vmem:[#allocation218_spill] sm:$0xff] }
 0x428   :  { %17011 = vst [vmem:[#allocation322_spill] sm:$0xff] %v14104_v44  ;;  %17015 = vst [vmem:[#allocation328_spill] sm:$0xff] %v14112_v38  ;;  %v14116_v40 = vsel %vm348_vm0, %v17016_v32, 0.0  ;;  %v4678_v29 = vsel %vm348_vm0, %v17018_v18, 0.0  ;;  %v17019_v10 = vld [vmem:[#allocation219_spill] sm:$0xff]  ;;  %v17020_v4 = vld [vmem:[#allocation220_spill] sm:$0xff] }
 0x429   :  { %17017 = vst [vmem:[#allocation334_spill] sm:$0xff] %v14116_v40  ;;  %v4679_v30 = vsel %vm348_vm0, %v17019_v10, 0.0  ;;  %v14124_v44 = vsel %vm348_vm0, %v17020_v4, 0.0  ;;  %v17022_v55 = vld [vmem:[#allocation23_spill] sm:$0xff]  ;;  %v17024_v22 = vld [vmem:[#allocation66_spill] sm:$0xff]  ;;  %v17026_v32 = vld [vmem:[#allocation5_spill] sm:$0xff] }
 0x42a   :  { %17021 = vst [vmem:[#allocation276_spill] sm:$0xff] %v14124_v44  ;;  %v14128_v35 = vsel %vm348_vm0, %v17022_v55, 0.0  ;;  %v14132_v38 = vsel %vm348_vm0, %v17024_v22, 0.0  ;;  %v4697_v40 = vsel %vm348_vm0, %v17026_v32, 0.0  ;;  %v17027_v53 = vld [vmem:[#allocation10_spill] sm:$0xff]  ;;  %v17028_v0 = vld [vmem:[#allocation16_spill] sm:$0xff] }
 0x42b   :  { %17023 = vst [vmem:[#allocation340_spill] sm:$0xff] %v14128_v35  ;;  %17025 = vst [vmem:[#allocation228_spill] sm:$0xff] %v14132_v38  ;;  %v4698_v18 = vsel %vm348_vm0, %v17027_v53, 0.0  ;;  %v14140_v10 = vsel %vm348_vm0, %v17028_v0, 0.0  ;;  %v17030_v4 = vld [vmem:[#allocation222_spill] sm:$0xff]  ;;  %v17032_v55 = vld [vmem:[#allocation27_spill] sm:$0xff] }
 0x42c   :  { %17029 = vst [vmem:[#allocation281_spill] sm:$0xff] %v14140_v10  ;;  %v14144_v44 = vsel %vm348_vm0, %v17030_v4, 0.0  ;;  %v14148_v35 = vsel %vm348_vm0, %v17032_v55, 0.0  ;;  %v17034_v22 = vld [vmem:[#allocation6_spill] sm:$0xff]  ;;  %v17036_v32 = vld [vmem:[#allocation7_spill] sm:$0xff]  ;;  %v17039_v10 = vld [vmem:[#allocation69_spill] sm:$0xff] }
 0x42d   :  { %17031 = vst [vmem:[#allocation232_spill] sm:$0xff] %v14144_v44  ;;  %17033 = vst [vmem:[#allocation236_spill] sm:$0xff] %v14148_v35  ;;  %v14152_v38 = vsel %vm348_vm0, %v17034_v22, 0.0  ;;  %v14156_v46 = vsel %vm727_vm1, %v17036_v32, 0.0  ;;  %v17038_v53 = vld [vmem:[#allocation30_spill] sm:$0xff]  ;;  %v4717_v2 = vsel %vm348_vm0, %v17039_v10, 0.0 }
 0x42e   :  { %17035 = vst [vmem:[#allocation346_spill] sm:$0xff] %v14152_v38  ;;  %17037 = vst [vmem:[#allocation287_spill] sm:$0xff] %v14156_v46  ;;  %v4716_v0 = vsel %vm348_vm0, %v17038_v53, 0.0  ;;  %v17040_v4 = vld [vmem:[#allocation39_spill] sm:$0xff]  ;;  %v17042_v22 = vld [vmem:[#allocation116_spill] sm:$0xff]  ;;  %v4735_v10 = vsel %vm348_vm0, %v13512_v48, 0.0 }
 0x42f   :  { %v14164_v44 = vsel %vm348_vm0, %v17040_v4, 0.0  ;;  %v17041_v55 = vld [vmem:[#allocation115_spill] sm:$0xff]  ;;  %v14172_v38 = vsel %vm348_vm0, %v17042_v22, 0.0  ;;  %v17044_v53 = vld [vmem:[#allocation8_spill] sm:$0xff]  ;;  %v4736_v4 = vsel %vm348_vm0, %v13516_v6, 0.0  ;;  %v14190_v22 = vsel %vm348_vm0, %v13524_v47, 0.0 }
 0x430   :  { %v14168_v35 = vsel %vm348_vm0, %v17041_v55, 0.0  ;;  %v17043_v32 = vld [vmem:[#allocation223_spill] sm:$0xff]  ;;  %v14180_v19 = vsel %vm727_vm1, %v17044_v53, 0.0  ;;  %v4738_v55 = vsel %vm348_vm0, %v13520_v13, 0.0  ;;  %v14198_v53 = vsel %vm348_vm0, %v13532_v12, 0.0 }
 0x431   :  { %v14176_v46 = vsel %vm348_vm0, %v17043_v32, 0.0  ;;  %17045 = vst [vmem:[#allocation240_spill] sm:$0xff] %v14180_v19  ;;  %v14194_v32 = vsel %vm348_vm0, %v13528_v36, 0.0  ;;  %v14202_v48 = vsel %vm727_vm1, %v13536_v60, 0.0  ;;  %v4243_v6 = vadd.f32 %v13544_v24, %v13540_v5 }
 0x432   :  { %v4262_v13 = vadd.f32 %v13572_v25, %v13568_v51  ;;  %v4281_v47 = vadd.f32 %v13600_v1, %v13596_v62  ;;  %v4300_v36 = vadd.f32 %v13628_v3, %v13624_v33  ;;  %v4319_v12 = vadd.f32 %v13656_v43, %v13652_v16 }
 0x433   :  { %v4338_v19 = vadd.f32 %v13680_v58, %v13676_v57  ;;  %v4357_v60 = vadd.f32 %v13704_v21, %v13700_v56  ;;  %v4376_v5 = vadd.f32 %v13724_v34, %v13720_v50  ;;  %v4395_v24 = vadd.f32 %v13740_v14, %v13736_v11  ;;  %v17046_v58 = vld [vmem:[#allocation227_spill] sm:$0xff]  ;;  %v17048_v50 = vld [vmem:[#allocation280_spill] sm:$0xff]  ;;  %v17050_v14 = vld [vmem:[#allocation345_spill] sm:$0xff] }
 0x434   :  { %v4414_v51 = vadd.f32 %v13768_v49, %v13764_v59  ;;  %v4433_v25 = vadd.f32 %v13796_v41, %v13792_v9  ;;  %v4452_v62 = vadd.f32 %v13824_v23, %v13820_v61  ;;  %v4471_v1 = vadd.f32 %v13852_v15, %v13848_v27  ;;  %v17047_v56 = vld [vmem:[#allocation231_spill] sm:$0xff] }
 0x435   :  { %v4490_v33 = vadd.f32 %v13880_v26, %v13876_v54  ;;  %v4509_v3 = vadd.f32 %v13904_v17, %v13900_v45  ;;  %v4528_v16 = vadd.f32 %v13924_v37, %v13920_v31  ;;  %v4547_v43 = vadd.f32 %v13940_v52, %v13936_v20  ;;  %v17049_v34 = vld [vmem:[#allocation243_spill] sm:$0xff]  ;;  %v17052_v54 = vld [vmem:[#allocation13_spill] sm:$0xff]  ;;  %v17053_v45 = vld [vmem:[#allocation34_spill] sm:$0xff] }
 0x436   :  { %v4566_v57 = vadd.f32 %v13968_v42, %v13964_v8  ;;  %v4585_v21 = vadd.f32 %v17047_v56, %v17046_v58  ;;  %v4604_v11 = vadd.f32 %v17049_v34, %v17048_v50  ;;  %v17051_v59 = vld [vmem:[#allocation351_spill] sm:$0xff]  ;;  %v4642_v9 = vadd.f32 %v4641_v7, %v4640_v28  ;;  %v17054_v31 = vld [vmem:[#allocation42_spill] sm:$0xff]  ;;  %v17058_v50 = vld [vmem:[#allocation225_spill] sm:$0xff] }
 0x437   :  { %v4623_v49 = vadd.f32 %v17051_v59, %v17050_v14  ;;  %v4661_v41 = vadd.f32 %v4660_v39, %v4659_v63  ;;  %v4680_v61 = vadd.f32 %v4679_v30, %v4678_v29  ;;  %v4699_v23 = vadd.f32 %v4698_v18, %v4697_v40  ;;  %v17055_v20 = vld [vmem:[#allocation211_spill] sm:$0xff]  ;;  %v17056_v8 = vld [vmem:[#allocation46_spill] sm:$0xff]  ;;  %v17060_v29 = vld [vmem:[#allocation28_spill] sm:$0xff] }
 0x438   :  { %v4718_v27 = vadd.f32 %v4717_v2, %v4716_v0  ;;  %v4737_v15 = vadd.f32 %v4736_v4, %v4735_v10  ;;  %v4245_v26 = vadd.f32 %v17052_v54, %v4243_v6  ;;  %v4264_v17 = vadd.f32 %v17053_v45, %v4262_v13  ;;  %v17057_v58 = vld [vmem:[#allocation106_spill] sm:$0xff]  ;;  %v17061_v2 = vld [vmem:[#allocation127_spill] sm:$0xff]  ;;  %v17062_v28 = vld [vmem:[#allocation25_spill] sm:$0xff] }
 0x439   :  { %v4283_v37 = vadd.f32 %v17054_v31, %v4281_v47  ;;  %v4302_v52 = vadd.f32 %v17055_v20, %v4300_v36  ;;  %v4321_v42 = vadd.f32 %v17056_v8, %v4319_v12  ;;  %v4340_v56 = vadd.f32 %v17057_v58, %v4338_v19  ;;  %v17059_v7 = vld [vmem:[#allocation102_spill] sm:$0xff]  ;;  %v17065_v6 = vld [vmem:[#allocation308_spill] sm:$0xff]  ;;  %v17069_v14 = vld [vmem:[#allocation297_spill] sm:$0xff] }
 0x43a   :  { %v4359_v34 = vadd.f32 %v17058_v50, %v4357_v60  ;;  %v14254_v39 = vadd.f32 %v17059_v7, %v4376_v5  ;;  %v4397_v40 = vadd.f32 %v17060_v29, %v4395_v24  ;;  %v4416_v30 = vadd.f32 %v17061_v2, %v4414_v51  ;;  %v17063_v18 = vld [vmem:[#allocation230_spill] sm:$0xff]  ;;  %v17070_v24 = vld [vmem:[#allocation235_spill] sm:$0xff]  ;;  %v17071_v51 = vld [vmem:[#allocation321_spill] sm:$0xff] }
 0x43b   :  { %v4435_v63 = vadd.f32 %v17062_v28, %v4433_v25  ;;  %v4454_v0 = vadd.f32 %v17063_v18, %v4452_v62  ;;  %v17064_v10 = vld [vmem:[#allocation234_spill] sm:$0xff]  ;;  %v4492_v13 = vadd.f32 %v17065_v6, %v4490_v33  ;;  %v4568_v59 = vadd.f32 %v17069_v14, %v4566_v57  ;;  %v17072_v25 = vld [vmem:[#allocation292_spill] sm:$0xff]  ;;  %v17078_v57 = vld [vmem:[#allocation43_spill] sm:$0xff] }
 0x43c   :  { %v4473_v4 = vadd.f32 %v17064_v10, %v4471_v1  ;;  %v17066_v47 = vld [vmem:[#allocation242_spill] sm:$0xff]  ;;  %v4587_v54 = vadd.f32 %v17070_v24, %v4585_v21  ;;  %v4606_v45 = vadd.f32 %v17071_v51, %v4604_v11  ;;  %v4625_v31 = vadd.f32 %v17072_v25, %v4623_v49  ;;  %v17075_v33 = vld [vmem:[#allocation276_spill] sm:$0xff]  ;;  %v17080_v11 = vld [vmem:[#allocation117_spill] sm:$0xff] }
 0x43d   :  { %v4511_v36 = vadd.f32 %v17066_v47, %v4509_v3  ;;  %v17067_v19 = vld [vmem:[#allocation326_spill] sm:$0xff]  ;;  %v4682_v58 = vadd.f32 %v17075_v33, %v4680_v61  ;;  %v17076_v3 = vld [vmem:[#allocation281_spill] sm:$0xff]  ;;  %v4739_v7 = vadd.f32 %v4738_v55, %v4737_v15  ;;  %v4266_v2 = vadd.f32 %v17078_v57, %v4264_v17  ;;  %v17084_v61 = vld [vmem:[#allocation84_spill] sm:$0xff] }
 0x43e   :  { %v14264_v12 = vadd.f32 %v17067_v19, %v4528_v16  ;;  %v17068_v60 = vld [vmem:[#allocation338_spill] sm:$0xff]  ;;  %v4701_v50 = vadd.f32 %v17076_v3, %v4699_v23  ;;  %v4720_v16 = vadd.f32 %v14164_v44, %v4718_v27  ;;  %v4304_v18 = vadd.f32 %v17080_v11, %v4302_v52  ;;  %v17081_v49 = vld [vmem:[#allocation49_spill] sm:$0xff]  ;;  %v17086_v55 = vld [vmem:[#allocation284_spill] sm:$0xff] }
 0x43f   :  { %v4549_v5 = vadd.f32 %v17068_v60, %v4547_v43  ;;  %v17073_v62 = vld [vmem:[#allocation370_spill] sm:$0xff]  ;;  %v4323_v10 = vadd.f32 %v17081_v49, %v4321_v42  ;;  %v4399_v23 = vadd.f32 %v17084_v61, %v4397_v40  ;;  %v4437_v27 = vadd.f32 %v17086_v55, %v4435_v63  ;;  %v17090_v52 = vld [vmem:[#allocation279_spill] sm:$0xff]  ;;  %v17091_v42 = vld [vmem:[#allocation344_spill] sm:$0xff] }
 0x440   :  { %v4644_v20 = vadd.f32 %v17073_v62, %v4642_v9  ;;  %v17074_v1 = vld [vmem:[#allocation322_spill] sm:$0xff]  ;;  %v17082_v9 = vld [vmem:[#allocation109_spill] sm:$0xff]  ;;  %v14292_v24 = vadd.f32 %v17090_v52, %v4511_v36  ;;  %v17093_v25 = vld [vmem:[#allocation275_spill] sm:$0xff] }
 0x441   :  { %v4663_v8 = vadd.f32 %v17074_v1, %v4661_v41  ;;  %v17077_v43 = vld [vmem:[#allocation26_spill] sm:$0xff]  ;;  %v4342_v6 = vadd.f32 %v17082_v9, %v4340_v56  ;;  %v17083_v41 = vld [vmem:[#allocation83_spill] sm:$0xff]  ;;  %v4551_v56 = vadd.f32 %v17091_v42, %v4549_v5  ;;  %v17092_v51 = vld [vmem:[#allocation265_spill] sm:$0xff]  ;;  %v4589_v62 = vadd.f32 %v17093_v25, %v4587_v54 }
 0x442   :  { %v4247_v29 = vadd.f32 %v17077_v43, %v4245_v26  ;;  %v17079_v21 = vld [vmem:[#allocation70_spill] sm:$0xff]  ;;  %v14283_v47 = vadd.f32 %v17083_v41, %v4359_v34  ;;  %v4570_v34 = vadd.f32 %v17092_v51, %v4568_v59  ;;  %v17094_v40 = vld [vmem:[#allocation333_spill] sm:$0xff]  ;;  %v4741_v5 = vadd.f32 %v14190_v22, %v4739_v7  ;;  %v17100_v59 = vld [vmem:[#allocation35_spill] sm:$0xff] }
 0x443   :  { %v4285_v28 = vadd.f32 %v17079_v21, %v4283_v37  ;;  %v17085_v19 = vld [vmem:[#allocation130_spill] sm:$0xff]  ;;  %v4608_v1 = vadd.f32 %v17094_v40, %v4606_v45  ;;  %v17096_v63 = vld [vmem:[#allocation261_spill] sm:$0xff]  ;;  %v4722_v21 = vadd.f32 %v14168_v35, %v4720_v16  ;;  %v17101_v54 = vld [vmem:[#allocation11_spill] sm:$0xff] }
 0x444   :  { %v4418_v44 = vadd.f32 %v17085_v19, %v4416_v30  ;;  %v17087_v15 = vld [vmem:[#allocation274_spill] sm:$0xff]  ;;  %v17095_v30 = vld [vmem:[#allocation251_spill] sm:$0xff]  ;;  %v4646_v3 = vadd.f32 %v17096_v63, %v4644_v20  ;;  %v4249_v11 = vadd.f32 %v17100_v59, %v4247_v29  ;;  %v4268_v49 = vadd.f32 %v17101_v54, %v4266_v2  ;;  %v17104_v20 = vld [vmem:[#allocation52_spill] sm:$0xff] }
 0x445   :  { %v4456_v26 = vadd.f32 %v17087_v15, %v4454_v0  ;;  %v17088_v17 = vld [vmem:[#allocation302_spill] sm:$0xff]  ;;  %v4627_v33 = vadd.f32 %v17095_v30, %v4625_v31  ;;  %v17097_v0 = vld [vmem:[#allocation271_spill] sm:$0xff]  ;;  %v14312_v61 = vadd.f32 %v17104_v20, %v4323_v10  ;;  %v17106_v19 = vld [vmem:[#allocation40_spill] sm:$0xff] }
 0x446   :  { %v4475_v60 = vadd.f32 %v17088_v17, %v4473_v4  ;;  %v17089_v37 = vld [vmem:[#allocation314_spill] sm:$0xff]  ;;  %v4665_v43 = vadd.f32 %v17097_v0, %v4663_v8  ;;  %v17098_v4 = vld [vmem:[#allocation340_spill] sm:$0xff]  ;;  %v17103_v31 = vld [vmem:[#allocation107_spill] sm:$0xff]  ;;  %v4743_v0 = vadd.f32 %v14194_v32, %v4741_v5 }
 0x447   :  { %v4494_v14 = vadd.f32 %v17089_v37, %v4492_v13  ;;  %v14302_v57 = vadd.f32 %v17098_v4, %v4682_v58  ;;  %v17099_v13 = vld [vmem:[#allocation232_spill] sm:$0xff]  ;;  %v17102_v45 = vld [vmem:[#allocation74_spill] sm:$0xff]  ;;  %v4306_v41 = vadd.f32 %v17103_v31, %v4304_v18  ;;  %v17107_v55 = vld [vmem:[#allocation129_spill] sm:$0xff] }
 0x448   :  { %v4703_v36 = vadd.f32 %v17099_v13, %v4701_v50  ;;  %v4287_v9 = vadd.f32 %v17102_v45, %v4285_v28  ;;  %v17105_v8 = vld [vmem:[#allocation224_spill] sm:$0xff]  ;;  %v4401_v50 = vadd.f32 %v17106_v19, %v4399_v23  ;;  %v4420_v35 = vadd.f32 %v17107_v55, %v4418_v44  ;;  %v17108_v16 = vld [vmem:[#allocation290_spill] sm:$0xff]  ;;  %v17109_v7 = vld [vmem:[#allocation361_spill] sm:$0xff] }
 0x449   :  { %v14315_v58 = vadd.f32 %v17105_v8, %v4342_v6  ;;  %v4439_v22 = vadd.f32 %v17108_v16, %v4437_v27  ;;  %v4458_v29 = vadd.f32 %v17109_v7, %v4456_v26  ;;  %v17110_v15 = vld [vmem:[#allocation238_spill] sm:$0xff]  ;;  %v17111_v17 = vld [vmem:[#allocation269_spill] sm:$0xff]  ;;  %v17113_v10 = vld [vmem:[#allocation303_spill] sm:$0xff] }
 0x44a   :  { %v4477_v2 = vadd.f32 %v17110_v15, %v4475_v60  ;;  %v14323_v28 = vadd.f32 %v17111_v17, %v4494_v14  ;;  %v17112_v18 = vld [vmem:[#allocation350_spill] sm:$0xff]  ;;  %v4572_v52 = vadd.f32 %v17113_v10, %v4570_v34  ;;  %v17114_v42 = vld [vmem:[#allocation239_spill] sm:$0xff]  ;;  %v17116_v23 = vld [vmem:[#allocation356_spill] sm:$0xff]  ;;  %v4724_v14 = vadd.f32 %v14172_v38, %v4722_v21 }
 0x44b   :  { %v4553_v37 = vadd.f32 %v17112_v18, %v4551_v56  ;;  %v4591_v6 = vadd.f32 %v17114_v42, %v4589_v62  ;;  %v17115_v51 = vld [vmem:[#allocation286_spill] sm:$0xff]  ;;  %v4629_v40 = vadd.f32 %v17116_v23, %v4627_v33  ;;  %v17118_v27 = vld [vmem:[#allocation328_spill] sm:$0xff]  ;;  %v17121_v34 = vld [vmem:[#allocation17_spill] sm:$0xff]  ;;  %v4745_v18 = vadd.f32 %v14198_v53, %v4743_v0 }
 0x44c   :  { %v4610_v25 = vadd.f32 %v17115_v51, %v4608_v1  ;;  %v17117_v44 = vld [vmem:[#allocation310_spill] sm:$0xff]  ;;  %v14332_v63 = vadd.f32 %v17118_v27, %v4665_v43  ;;  %v17119_v26 = vld [vmem:[#allocation236_spill] sm:$0xff]  ;;  %v4270_v13 = vadd.f32 %v17121_v34, %v4268_v49  ;;  %v17122_v62 = vld [vmem:[#allocation125_spill] sm:$0xff] }
 0x44d   :  { %v4648_v30 = vadd.f32 %v17117_v44, %v4646_v3  ;;  %v4705_v60 = vadd.f32 %v17119_v26, %v4703_v36  ;;  %v17120_v56 = vld [vmem:[#allocation12_spill] sm:$0xff]  ;;  %v4403_v59 = vadd.f32 %v17122_v62, %v4401_v50  ;;  %v17123_v1 = vld [vmem:[#allocation75_spill] sm:$0xff]  ;;  %v17124_v33 = vld [vmem:[#allocation38_spill] sm:$0xff] }
 0x44e   :  { %v4251_v4 = vadd.f32 %v17120_v56, %v4249_v11  ;;  %v4289_v54 = vadd.f32 %v17123_v1, %v4287_v9  ;;  %v4308_v45 = vadd.f32 %v17124_v33, %v4306_v41  ;;  %v17125_v3 = vld [vmem:[#allocation128_spill] sm:$0xff]  ;;  %v17127_v8 = vld [vmem:[#allocation250_spill] sm:$0xff]  ;;  %v17128_v19 = vld [vmem:[#allocation309_spill] sm:$0xff]  ;;  %v4726_v41 = vadd.f32 %v14176_v46, %v4724_v14 }
 0x44f   :  { %v4422_v31 = vadd.f32 %v17125_v3, %v4420_v35  ;;  %v17126_v43 = vld [vmem:[#allocation296_spill] sm:$0xff]  ;;  %v4555_v36 = vadd.f32 %v17127_v8, %v4553_v37  ;;  %v4574_v38 = vadd.f32 %v17128_v19, %v4572_v52  ;;  %v17129_v21 = vld [vmem:[#allocation315_spill] sm:$0xff]  ;;  %v17131_v55 = vld [vmem:[#allocation226_spill] sm:$0xff] }
 0x450   :  { %v4441_v20 = vadd.f32 %v17126_v43, %v4439_v22  ;;  %v4593_v32 = vadd.f32 %v17129_v21, %v4591_v6  ;;  %v17130_v5 = vld [vmem:[#allocation247_spill] sm:$0xff]  ;;  %v4460_v49 = vadd.f32 %v17131_v55, %v4458_v29  ;;  %v17132_v16 = vld [vmem:[#allocation332_spill] sm:$0xff]  ;;  %v17133_v9 = vld [vmem:[#allocation346_spill] sm:$0xff] }
 0x451   :  { %v4612_v11 = vadd.f32 %v17130_v5, %v4610_v25  ;;  %v14350_v50 = vadd.f32 %v17132_v16, %v4477_v2  ;;  %v4707_v7 = vadd.f32 %v17133_v9, %v4705_v60  ;;  %v17134_v35 = vld [vmem:[#allocation298_spill] sm:$0xff]  ;;  %v17138_v29 = vld [vmem:[#allocation44_spill] sm:$0xff]  ;;  %v17139_v2 = vld [vmem:[#allocation259_spill] sm:$0xff] }
 0x452   :  { %v4631_v15 = vadd.f32 %v17134_v35, %v4629_v40  ;;  %v17135_v22 = vld [vmem:[#allocation266_spill] sm:$0xff]  ;;  %v14364_v6 = vadd.f32 %v17138_v29, %v4422_v31  ;;  %v14367_v51 = vadd.f32 %v17139_v2, %v4441_v20  ;;  %v17140_v25 = vld [vmem:[#allocation260_spill] sm:$0xff]  ;;  %v17141_v23 = vld [vmem:[#allocation31_spill] sm:$0xff] }
 0x453   :  { %v14356_v17 = vadd.f32 %v17135_v22, %v4648_v30  ;;  %v17136_v37 = vld [vmem:[#allocation126_spill] sm:$0xff]  ;;  %v14370_v46 = vadd.f32 %v17140_v25, %v4555_v36  ;;  %v4272_v40 = vadd.f32 %v17141_v23, %v4270_v13  ;;  %v17143_v53 = vld [vmem:[#allocation327_spill] sm:$0xff]  ;;  %v17145_v14 = vld [vmem:[#allocation264_spill] sm:$0xff]  ;;  %v14392_v13 = vadd.f32 %v14202_v48, %v4745_v18 }
 0x454   :  { %v14360_v10 = vadd.f32 %v17136_v37, %v4403_v59  ;;  %v17137_v52 = vld [vmem:[#allocation18_spill] sm:$0xff]  ;;  %v14377_v27 = vadd.f32 %v17143_v53, %v4593_v32  ;;  %v17144_v26 = vld [vmem:[#allocation339_spill] sm:$0xff]  ;;  %v14383_v0 = vadd.f32 %v17145_v14, %v4460_v49  ;;  %v17147_v34 = vld [vmem:[#allocation240_spill] sm:$0xff]  ;;  %v4425_v3 = vrot.slane %v14364_v6, 4 }
 0x455   :  { %v4253_v42 = vadd.f32 %v17137_v52, %v4251_v4  ;;  %v17142_v44 = vld [vmem:[#allocation270_spill] sm:$0xff]  ;;  %v14380_v60 = vadd.f32 %v17144_v26, %v4612_v11  ;;  %v17146_v56 = vld [vmem:[#allocation287_spill] sm:$0xff]  ;;  %v14389_v62 = vadd.f32 %v17147_v34, %v4726_v41  ;;  %v17148_v59 = vld [vmem:[#allocation256_spill] sm:$0xff]  ;;  %v4444_v31 = vrot.slane %v14367_v51, 4 }
 0x456   :  { %v14374_v30 = vadd.f32 %v17142_v44, %v4574_v38  ;;  %v14386_v4 = vadd.f32 %v17146_v56, %v4707_v7  ;;  %v14395_v1 = vadd.f32 %v17148_v59, %v4631_v15  ;;  %v4406_v33 = vrot.slane %v14360_v10, 4  ;;  %v17149_v5 = vld [vmem:[#allocation76_spill] sm:$0xff]  ;;  %v17150_v55 = vld [vmem:[#allocation254_spill] sm:$0xff]  ;;  %v17151_v16 = vld [vmem:[#allocation101_spill] sm:$0xff] }
 0x457   :  { %v4558_v43 = vrot.slane %v14370_v46, 4  ;;  %v4596_v8 = vrot.slane %v14377_v27, 4  ;;  %v4615_v36 = vrot.slane %v14380_v60, 4  ;;  %v4729_v19 = vrot.slane %v14389_v62, 4  ;;  %v17152_v41 = vld [vmem:[#allocation135_spill] sm:$0xff]  ;;  %v17153_v15 = vld [vmem:[#allocation285_spill] sm:$0xff] }
 0x458   :  { %v4577_v20 = vrot.slane %v14374_v30, 4  ;;  %v4710_v48 = vrot.slane %v14386_v4, 4  ;;  %v4748_v38 = vrot.slane %v14392_v13, 4  ;;  %v4254_v21 = vrot.slane %v4253_v42, 4  ;;  %v17154_v18 = vld [vmem:[#allocation136_spill] sm:$0xff] }
 0x459   :  { %v4273_v32 = vrot.slane %v4272_v40, 4  ;;  %v4291_v11 = vadd.f32 %v17149_v5, %v4289_v54  ;;  %v4310_v49 = vadd.f32 %v17150_v55, %v4308_v45  ;;  %v4327_v9 = vadd.f32 %v17151_v16, %v14312_v61  ;;  %v17155_v45 = vld [vmem:[#allocation21_spill] sm:$0xff] }
 0x45a   :  { %v4255_v7 = vadd.f32 %v4254_v21, %v4253_v42  ;;  %v4328_v35 = vsel %vm727_vm1, %v17152_v41, 0.0  ;;  %v4346_v22 = vadd.f32 %v17153_v15, %v14315_v58  ;;  %v4347_v37 = vsel %vm727_vm1, %v17154_v18, 0.0  ;;  %v17156_v61 = vld [vmem:[#allocation137_spill] sm:$0xff]  ;;  %v17157_v21 = vld [vmem:[#allocation138_spill] sm:$0xff] }
 0x45b   :  { %v4274_v52 = vadd.f32 %v4273_v32, %v4272_v40  ;;  %v4292_v29 = vrot.slane %v4291_v11, 4  ;;  %v4311_v2 = vrot.slane %v4310_v49, 4  ;;  %v4329_v25 = vadd.f32 %v4328_v35, %v4327_v9  ;;  %v17158_v35 = vld [vmem:[#allocation108_spill] sm:$0xff] }
 0x45c   :  { %v4256_v54 = vrot.slane %v4255_v7, 2  ;;  %v4348_v23 = vadd.f32 %v4347_v37, %v4346_v22  ;;  %v4363_v44 = vadd.f32 %v17155_v45, %v14283_v47  ;;  %v4364_v42 = vsel %vm348_vm0, %v17156_v61, 0.0  ;;  %v17160_v37 = vld [vmem:[#allocation131_spill] sm:$0xff]  ;;  %v17162_v61 = vld [vmem:[#allocation141_spill] sm:$0xff] }
 0x45d   :  { %v4275_v53 = vrot.slane %v4274_v52, 2  ;;  %v4293_v26 = vadd.f32 %v4292_v29, %v4291_v11  ;;  %v4312_v14 = vadd.f32 %v4311_v2, %v4310_v49  ;;  %v4330_v56 = vrot.slane %v4329_v25, 4  ;;  %v17161_v2 = vld [vmem:[#allocation363_spill] sm:$0xff] }
 0x45e   :  { %v4257_v58 = vadd.f32 %v4256_v54, %v4255_v7  ;;  %v4349_v34 = vrot.slane %v4348_v23, 4  ;;  %v4365_v59 = vadd.f32 %v4364_v42, %v4363_v44  ;;  %v4366_v40 = vsel %vm727_vm1, %v17157_v21, 0.0  ;;  %v17159_v7 = vld [vmem:[#allocation304_spill] sm:$0xff]  ;;  %v17163_v21 = vld [vmem:[#allocation142_spill] sm:$0xff] }
 0x45f   :  { %v4276_v32 = vadd.f32 %v4275_v53, %v4274_v52  ;;  %v4294_v5 = vrot.slane %v4293_v26, 2  ;;  %v4313_v55 = vrot.slane %v4312_v14, 2  ;;  %v4331_v16 = vadd.f32 %v4330_v56, %v4329_v25 }
 0x460   :  { %v4258_v9 = vrot.slane %v4257_v58, 1  ;;  %v4350_v41 = vadd.f32 %v4349_v34, %v4348_v23  ;;  %v4367_v47 = vadd.f32 %v4366_v40, %v4365_v59  ;;  %v4380_v15 = vadd.f32 %v17158_v35, %v14254_v39 }
 0x461   :  { %v4277_v22 = vrot.slane %v4276_v32, 1  ;;  %v4295_v11 = vadd.f32 %v4294_v5, %v4293_v26  ;;  %v4314_v49 = vadd.f32 %v4313_v55, %v4312_v14  ;;  %v4332_v18 = vrot.slane %v4331_v16, 2 }
 0x462   :  { %v4072_v29 = vmul.f32 %v17160_v37, %v17159_v7  ;;  %v14429_v54 = vmul.f32 %v17160_v37, %v17161_v2  ;;  %v4351_v52 = vrot.slane %v4350_v41, 2  ;;  %v4368_v45 = vrot.slane %v4367_v47, 4 }
 0x463   :  { %v4296_v25 = vrot.slane %v4295_v11, 1  ;;  %v4315_v44 = vrot.slane %v4314_v49, 1  ;;  %v4333_v23 = vadd.f32 %v4332_v18, %v4331_v16  ;;  %v4381_v42 = vsel %vm348_vm0, %v17162_v61, 0.0 }
 0x464   :  { %v14433_v39 = vadd.f32 %v4258_v9, %v4257_v58  ;;  %v4352_v53 = vadd.f32 %v4351_v52, %v4350_v41  ;;  %v4369_v26 = vadd.f32 %v4368_v45, %v4367_v47  ;;  %v4382_v14 = vadd.f32 %v4381_v42, %v4380_v15  ;;  %v17166_v42 = vld [vmem:[#allocation172_spill] sm:$0xff] }
 0x465   :  { %v14435_v56 = vadd.f32 %v4277_v22, %v4276_v32  ;;  %v14437_v34 = vadd.f32 %v4296_v25, %v4295_v11  ;;  %v14439_v59 = vadd.f32 %v4315_v44, %v4314_v49  ;;  %v4383_v40 = vsel %vm348_vm0, %v17163_v21, 0.0 }
 0x466   :  { %v4334_v5 = vrot.slane %v4333_v23, 1  ;;  %v4370_v55 = vrot.slane %v4369_v26, 2  ;;  %v4384_v16 = vadd.f32 %v4383_v40, %v4382_v14  ;;  %v4407_v58 = vadd.f32 %v4406_v33, %v14360_v10  ;;  %v17164_v33 = vld [vmem:[#allocation255_spill] sm:$0xff] }
 0x467   :  { %v4385_v9 = vsel %vm727_vm1, %v4072_v29, 0.0  ;;  %v4426_v32 = vadd.f32 %v4425_v3, %v14364_v6  ;;  %v4445_v41 = vadd.f32 %v4444_v31, %v14367_v51  ;;  %v4463_v47 = vrot.slane %v14383_v0, 4  ;;  %v17165_v3 = vld [vmem:[#allocation320_spill] sm:$0xff] }
 0x468   :  { %v4353_v35 = vrot.slane %v4352_v53, 1  ;;  %v4371_v15 = vadd.f32 %v4370_v55, %v4369_v26  ;;  %v4386_v22 = vadd.f32 %v4385_v9, %v4384_v16  ;;  %v4408_v11 = vrot.slane %v4407_v58, 2 }
 0x469   :  { %v4427_v49 = vrot.slane %v4426_v32, 2  ;;  %v4446_v18 = vrot.slane %v4445_v41, 2  ;;  %v4464_v10 = vadd.f32 %v4463_v47, %v14383_v0  ;;  %v4481_v7 = vadd.f32 %v17164_v33, %v14350_v50 }
 0x46a   :  { %v4372_v37 = vrot.slane %v4371_v15, 1  ;;  %v4387_v29 = vrot.slane %v4386_v22, 4  ;;  %v4409_v6 = vadd.f32 %v4408_v11, %v4407_v58  ;;  %v4498_v2 = vadd.f32 %v17165_v3, %v14323_v28  ;;  %v17167_v28 = vld [vmem:[#allocation291_spill] sm:$0xff]  ;;  %v17168_v11 = vld [vmem:[#allocation176_spill] sm:$0xff] }
 0x46b   :  { %v4428_v51 = vadd.f32 %v4427_v49, %v4426_v32  ;;  %v4447_v31 = vadd.f32 %v4446_v18, %v4445_v41  ;;  %v4465_v52 = vrot.slane %v4464_v10, 2  ;;  %v4482_v45 = vrot.slane %v4481_v7, 4 }
 0x46c   :  { %v14459_v25 = vadd.f32 %v4334_v5, %v4333_v23  ;;  %v4388_v44 = vadd.f32 %v4387_v29, %v4386_v22  ;;  %v4410_v61 = vrot.slane %v4409_v6, 1  ;;  %v4499_v0 = vsel %vm727_vm1, %v17166_v42, 0.0 }
 0x46d   :  { %v4429_v26 = vrot.slane %v4428_v51, 1  ;;  %v4448_v14 = vrot.slane %v4447_v31, 1  ;;  %v4466_v50 = vadd.f32 %v4465_v52, %v4464_v10  ;;  %v4483_v21 = vadd.f32 %v4482_v45, %v4481_v7  ;;  %v17172_v52 = vld [vmem:[#allocation181_spill] sm:$0xff] }
 0x46e   :  { %v14463_v40 = vadd.f32 %v4353_v35, %v4352_v53  ;;  %v4389_v55 = vrot.slane %v4388_v44, 2  ;;  %v4500_v16 = vadd.f32 %v4499_v0, %v4498_v2  ;;  %v4515_v58 = vadd.f32 %v17167_v28, %v14292_v24  ;;  %v17169_v35 = vld [vmem:[#allocation246_spill] sm:$0xff]  ;;  %v17170_v24 = vld [vmem:[#allocation177_spill] sm:$0xff] }
 0x46f   :  { %v14467_v9 = vadd.f32 %v4372_v37, %v4371_v15  ;;  %v4411_v23 = vadd.f32 %v4410_v61, %v4409_v6  ;;  %v4467_v5 = vrot.slane %v4466_v50, 1  ;;  %v4484_v32 = vrot.slane %v4483_v21, 2  ;;  %v17171_v37 = vld [vmem:[#allocation180_spill] sm:$0xff] }
 0x470   :  { %v4390_v41 = vadd.f32 %v4389_v55, %v4388_v44  ;;  %v4430_v47 = vadd.f32 %v4429_v26, %v4428_v51  ;;  %v4501_v22 = vrot.slane %v4500_v16, 4  ;;  %v4516_v49 = vsel %vm348_vm0, %v17168_v11, 0.0 }
 0x471   :  { %v4449_v18 = vadd.f32 %v4448_v14, %v4447_v31  ;;  %v4485_v10 = vadd.f32 %v4484_v32, %v4483_v21  ;;  %v4517_v53 = vadd.f32 %v4516_v49, %v4515_v58  ;;  %v4532_v33 = vadd.f32 %v17169_v35, %v14264_v12 }
 0x472   :  { %v4468_v7 = vadd.f32 %v4467_v5, %v4466_v50  ;;  %v4502_v29 = vadd.f32 %v4501_v22, %v4500_v16  ;;  %v4518_v15 = vsel %vm727_vm1, %v17170_v24, 0.0  ;;  %v4533_v6 = vsel %vm348_vm0, %v17171_v37, 0.0 }
 0x473   :  { %v4391_v3 = vrot.slane %v4390_v41, 1  ;;  %v4519_v2 = vadd.f32 %v4518_v15, %v4517_v53  ;;  %v4534_v51 = vadd.f32 %v4533_v6, %v4532_v33  ;;  %v4535_v45 = vsel %vm348_vm0, %v17172_v52, 0.0 }
 0x474   :  { %v4486_v31 = vrot.slane %v4485_v10, 1  ;;  %v4503_v44 = vrot.slane %v4502_v29, 2  ;;  %v4559_v12 = vadd.f32 %v4558_v43, %v14370_v46  ;;  %v4578_v61 = vadd.f32 %v4577_v20, %v14374_v30 }
 0x475   :  { %v4520_v42 = vrot.slane %v4519_v2, 4  ;;  %v4536_v0 = vadd.f32 %v4535_v45, %v4534_v51  ;;  %v4537_v26 = vsel %vm727_vm1, %v14429_v54, 0.0  ;;  %v4597_v14 = vadd.f32 %v4596_v8, %v14377_v27 }
 0x476   :  { %v4504_v50 = vadd.f32 %v4503_v44, %v4502_v29  ;;  %v4560_v21 = vrot.slane %v4559_v12, 2  ;;  %v4579_v55 = vrot.slane %v4578_v61, 2  ;;  %v4711_v46 = vadd.f32 %v4710_v48, %v14386_v4  ;;  %v17173_v44 = vld [vmem:[#allocation316_spill] sm:$0xff] }
 0x477   :  { %v4392_v43 = vadd.f32 %v4391_v3, %v4390_v41  ;;  %v4521_v16 = vadd.f32 %v4520_v42, %v4519_v2  ;;  %v4538_v28 = vadd.f32 %v4537_v26, %v4536_v0  ;;  %v4730_v30 = vadd.f32 %v4729_v19, %v14389_v62 }
 0x478   :  { %v4487_v20 = vadd.f32 %v4486_v31, %v4485_v10  ;;  %v4505_v54 = vrot.slane %v4504_v50, 1  ;;  %v4598_v58 = vrot.slane %v4597_v14, 2  ;;  %v4712_v5 = vrot.slane %v4711_v46, 2 }
 0x479   :  { %v4522_v32 = vrot.slane %v4521_v16, 2  ;;  %v4539_v27 = vrot.slane %v4538_v28, 4  ;;  %v4561_v8 = vadd.f32 %v4560_v21, %v4559_v12  ;;  %v4731_v22 = vrot.slane %v4730_v30, 2 }
 0x47a   :  { %v4580_v11 = vadd.f32 %v4579_v55, %v4578_v61  ;;  %v14499_v4 = vadd.f32 %v4748_v38, %v14392_v13  ;;  %v4506_v48 = vadd.f32 %v4505_v54, %v4504_v50  ;;  %v14501_v62 = vadd.f32 %v4712_v5, %v4711_v46  ;;  %v17174_v61 = vld [vmem:[#allocation334_spill] sm:$0xff] }
 0x47b   :  { %v4523_v41 = vadd.f32 %v4522_v32, %v4521_v16  ;;  %v4540_v49 = vadd.f32 %v4539_v27, %v4538_v28  ;;  %v14503_v19 = vadd.f32 %v4731_v22, %v4730_v30  ;;  %v4938_v10 = vsel %vm4937_vm2, %v14435_v56, %v14433_v39  ;;  %v17178_v32 = vld [vmem:[#allocation86_spill] sm:$0xff] }
 0x47c   :  { %v4940_v13 = vsel %vm4939_vm3, %v14437_v34, %v4938_v10  ;;  %v4951_v33 = vsel %vm4937_vm2, %v4430_v47, %v4411_v23  ;;  %v4562_v29 = vrot.slane %v4561_v8, 1  ;;  %v4750_v15 = vrot.slane %v14499_v4, 2 }
 0x47d   :  { %v4524_v53 = vrot.slane %v4523_v41, 1  ;;  %v4541_v35 = vrot.slane %v4540_v49, 2  ;;  %v4942_v38 = vsel %vm4941_vm4, %v14439_v59, %v4940_v13  ;;  %v4952_v56 = vsel %vm4939_vm3, %v4449_v18, %v4951_v33 }
 0x47e   :  { %v4944_v39 = vsel %vm4943_vm5, %v14459_v25, %v4942_v38  ;;  %v4953_v6 = vsel %vm4941_vm4, %v4468_v7, %v4952_v56  ;;  %v4599_v3 = vadd.f32 %v4598_v58, %v4597_v14  ;;  %v14524_v51 = vadd.f32 %v4562_v29, %v4561_v8  ;;  %v17176_v14 = vld [vmem:[#allocation228_spill] sm:$0xff] }
 0x47f   :  { %v4542_v24 = vadd.f32 %v4541_v35, %v4540_v49  ;;  %v4525_v37 = vadd.f32 %v4524_v53, %v4523_v41  ;;  %v4946_v34 = vsel %vm4945_vm6, %v14463_v40, %v4944_v39  ;;  %v4954_v47 = vsel %vm4943_vm5, %v4487_v20, %v4953_v6  ;;  %v17179_v35 = vld [vmem:[#allocation132_spill] sm:$0xff]  ;;  %v17181_v39 = vld [vmem:[#allocation133_spill] sm:$0xff]  ;;  %v17183_v6 = vld [vmem:[#allocation134_spill] sm:$0xff] }
 0x480   :  { %v4948_v23 = vsel %vm4947_vm7, %v14467_v9, %v4946_v34  ;;  %v4955_v2 = vsel %vm4945_vm6, %v4506_v48, %v4954_v47  ;;  %v4581_v25 = vrot.slane %v4580_v11, 1  ;;  %v4616_v18 = vadd.f32 %v4615_v36, %v14380_v60  ;;  %v17175_v60 = vld [vmem:[#allocation4_spill] sm:$0xff] }
 0x481   :  { %v4543_v59 = vrot.slane %v4542_v24, 1  ;;  %v4950_v52 = vsel %vm4949_vm8, %v4392_v43, %v4948_v23  ;;  %v4956_v7 = vsel %vm4947_vm7, %v4525_v37, %v4955_v2  ;;  %v4634_v45 = vrot.slane %v14395_v1, 4 }
 0x482   :  { %v4600_v9 = vrot.slane %v4599_v3, 1  ;;  %v4617_v31 = vrot.slane %v4616_v18, 2  ;;  %v4652_v12 = vadd.f32 %v17173_v44, %v14356_v17  ;;  %v4669_v42 = vadd.f32 %v17174_v61, %v14332_v63  ;;  %v17177_v17 = vld [vmem:[#allocation221_spill] sm:$0xff] }
 0x483   :  { %v4544_v40 = vadd.f32 %v4543_v59, %v4542_v24  ;;  %v4635_v26 = vadd.f32 %v4634_v45, %v14395_v1  ;;  %v4670_v36 = vsel %vm727_vm1, %v17175_v60, 0.0  ;;  %v4686_v50 = vadd.f32 %v17176_v14, %v14302_v57  ;;  %v17187_v45 = vld [vmem:[#allocation47_spill] sm:$0xff] }
 0x484   :  { %v4618_v55 = vadd.f32 %v4617_v31, %v4616_v18  ;;  %v4653_v46 = vrot.slane %v4652_v12, 4  ;;  %v4671_v43 = vadd.f32 %v4670_v36, %v4669_v42  ;;  %v4582_v16 = vadd.f32 %v4581_v25, %v4580_v11 }
 0x485   :  { %v4957_v0 = vsel %vm4949_vm8, %v4544_v40, %v4956_v7  ;;  %v4636_v28 = vrot.slane %v4635_v26, 2  ;;  %v4687_v30 = vsel %vm348_vm0, %v17177_v17, 0.0  ;;  %v4714_v63 = vrot.slane %v14501_v62, 1  ;;  %v17185_v40 = vld [vmem:[#allocation29_spill] sm:$0xff] }
 0x486   :  { %v5429_v21 = vpack.c.bf16 %v4957_v0, %v4950_v52  ;;  %v4619_v20 = vrot.slane %v4618_v55, 1  ;;  %v4654_v1 = vadd.f32 %v4653_v46, %v4652_v12  ;;  %v4672_v54 = vrot.slane %v4671_v43, 4 }
 0x487   :  { %v4688_v58 = vadd.f32 %v4687_v30, %v4686_v50  ;;  %v4637_v5 = vadd.f32 %v4636_v28, %v4635_v26  ;;  %v4689_v57 = vsel %vm727_vm1, %v17178_v32, 0.0  ;;  %v4733_v27 = vrot.slane %v14503_v19, 1 }
 0x488   :  { %5430 = vmatprep.subr.bf16.mxu0 %v5429_v21  ;;  %v4751_v8 = vadd.f32 %v4750_v15, %v14499_v4  ;;  %v4601_v22 = vadd.f32 %v4600_v9, %v4599_v3  ;;  %v4655_v11 = vrot.slane %v4654_v1, 2  ;;  %v4673_v48 = vadd.f32 %v4672_v54, %v4671_v43 }
 0x489   :  { %5432 = vmatpush3.bf16.msra.mxu0 %v5429_v21  ;;  %v4690_v41 = vadd.f32 %v4689_v57, %v4688_v58  ;;  %v4620_v49 = vadd.f32 %v4619_v20, %v4618_v55  ;;  %v4638_v10 = vrot.slane %v4637_v5, 1  ;;  %v4715_v53 = vadd.f32 %v4714_v63, %v14501_v62 }
 0x48a   :  { %v17180_v13 = vrot.slane %v17179_v35, 4  ;;  %v4656_v33 = vadd.f32 %v4655_v11, %v4654_v1  ;;  %v4674_v29 = vrot.slane %v4673_v48, 2  ;;  %v17182_v56 = vrot.slane %v17181_v39, 4  ;;  %v4849_v1 = vld [vmem:[%s14625_s3] sm:$0xff] }
 0x48b   :  { %v4691_v24 = vrot.slane %v4690_v41, 4  ;;  %v4734_v4 = vadd.f32 %v4733_v27, %v14503_v19  ;;  %v4752_v15 = vrot.slane %v4751_v8, 1  ;;  %v17184_v59 = vrot.slane %v17183_v6, 4  ;;  %5398 = vmatprep.mubr.msk.f32.mxu0 %vm4976_vm9, %v4849_v1 }
 0x48c   :  { %v4768_v38 = vadd.f32 %v17180_v13, %v17179_v35  ;;  %v4787_v37 = vadd.f32 %v17182_v56, %v17181_v39  ;;  %v4657_v62 = vrot.slane %v4656_v33, 1  ;;  %v4675_v47 = vadd.f32 %v4674_v29, %v4673_v48  ;;  %v4850_v29 = vld [vmem:[%s14625_s3 + $0x8] sm:$0xff]  ;;  %v4852_v39 = vld [vmem:[%s14625_s3 + $0x18] sm:$0xff]  ;;  %v4853_v56 = vld [vmem:[%s14625_s3 + $0x20] sm:$0xff] }
 0x48d   :  { %v4806_v23 = vadd.f32 %v17184_v59, %v17183_v6  ;;  %v4692_v3 = vadd.f32 %v4691_v24, %v4690_v41  ;;  %v17186_v52 = vrot.slane %v17185_v40, 4  ;;  %v17188_v9 = vrot.slane %v17187_v45, 4  ;;  %v4851_v24 = vld [vmem:[%s14625_s3 + $0x10] sm:$0xff]  ;;  %v4873_v59 = vpop.permute.xlu0 %4872 }
 0x48e   :  { %v4769_v34 = vrot.slane %v4768_v38, 2  ;;  %v4788_v2 = vrot.slane %v4787_v37, 2  ;;  %v4639_v31 = vadd.f32 %v4638_v10, %v4637_v5  ;;  %v4676_v44 = vrot.slane %v4675_v47, 1 }
 0x48f   :  { %v4807_v18 = vrot.slane %v4806_v23, 2  ;;  %v4825_v7 = vadd.f32 %v17186_v52, %v17185_v40  ;;  %v4844_v19 = vadd.f32 %v17188_v9, %v17187_v45  ;;  %v4693_v12 = vrot.slane %v4692_v3, 2 }
 0x490   :  { %v4770_v25 = vadd.f32 %v4769_v34, %v4768_v38  ;;  %v4789_v61 = vadd.f32 %v4788_v2, %v4787_v37  ;;  %v4753_v14 = vadd.f32 %v4752_v15, %v4751_v8  ;;  %v4958_v21 = vsel %vm4937_vm2, %v4582_v16, %v14524_v51  ;;  %v4854_v37 = vld [vmem:[%s14625_s3 + $0x28] sm:$0xff]  ;;  %v4856_v15 = vld [vmem:[%s14625_s3 + $0x38] sm:$0xff] }
 0x491   :  { %v4808_v0 = vadd.f32 %v4807_v18, %v4806_v23  ;;  %v4826_v26 = vrot.slane %v4825_v7, 2  ;;  %v4845_v60 = vrot.slane %v4844_v19, 2  ;;  %v4694_v36 = vadd.f32 %v4693_v12, %v4692_v3  ;;  %v4868_v23 = vpop.permute.xlu1 %4867 }
 0x492   :  { %v4771_v42 = vrot.slane %v4770_v25, 1  ;;  %v4790_v50 = vrot.slane %v4789_v61, 1  ;;  %v4658_v55 = vadd.f32 %v4657_v62, %v4656_v33  ;;  %v4677_v17 = vadd.f32 %v4676_v44, %v4675_v47  ;;  %v4883_v62 = vpop.permute.xlu0 %4882 }
 0x493   :  { %v4809_v46 = vrot.slane %v4808_v0, 1  ;;  %v4827_v43 = vadd.f32 %v4826_v26, %v4825_v7  ;;  %v4846_v28 = vadd.f32 %v4845_v60, %v4844_v19  ;;  %v4695_v30 = vrot.slane %v4694_v36, 1 }
 0x494   :  { %v4959_v63 = vsel %vm4939_vm3, %v4601_v22, %v4958_v21  ;;  %v4965_v20 = vsel %vm4937_vm2, %v4734_v4, %v4715_v53  ;;  %v4772_v54 = vadd.f32 %v4771_v42, %v4770_v25  ;;  %v4791_v51 = vadd.f32 %v4790_v50, %v4789_v61  ;;  %v4855_v4 = vld [vmem:[%s14625_s3 + $0x30] sm:$0xff] }
 0x495   :  { %v4828_v58 = vrot.slane %v4827_v43, 1  ;;  %v4847_v5 = vrot.slane %v4846_v28, 1  ;;  %v4960_v32 = vsel %vm4941_vm4, %v4620_v49, %v4959_v63  ;;  %v4966_v57 = vsel %vm4939_vm3, %v4753_v14, %v4965_v20  ;;  %v4878_v3 = vpop.permute.xlu1 %4877 }
 0x496   :  { %v4961_v16 = vsel %vm4943_vm5, %v4639_v31, %v4960_v32  ;;  %v4696_v27 = vadd.f32 %v4695_v30, %v4694_v36  ;;  %v4810_v8 = vadd.f32 %v4809_v46, %v4808_v0  ;;  %v4967_v11 = vsel %vm4941_vm4, %v4772_v54, %v4966_v57  ;;  %v4893_v19 = vpop.permute.xlu0 %4892 }
 0x497   :  { %v4962_v22 = vsel %vm4945_vm6, %v4658_v55, %v4961_v16  ;;  %v4829_v48 = vadd.f32 %v4828_v58, %v4827_v43  ;;  %v4968_v10 = vsel %vm4943_vm5, %v4791_v51, %v4967_v11  ;;  %v4848_v49 = vadd.f32 %v4847_v5, %v4846_v28  ;;  %v5114_v58 = vld [vmem:[%s14626_s5] sm:$0xff] }
 0x498   :  { %v4963_v41 = vsel %vm4947_vm7, %v4677_v17, %v4962_v22  ;;  %v4969_v35 = vsel %vm4945_vm6, %v4810_v8, %v4968_v10  ;;  %v5618_v34 = vmov 0.0|0.0   ;;  %v5620_v6 = vmov 0.0  }
 0x499   :  { %v4964_v53 = vsel %vm4949_vm8, %v4696_v27, %v4963_v41  ;;  %v4970_v13 = vsel %vm4947_vm7, %v4829_v48, %v4969_v35  ;;  %5437 = vmatprep.subr.bf16.mxu1 %v5618_v34  ;;  %5426 = vmatprep.mubr.msk.f32.mxu1 %vm5619_vm10, %v5620_v6  ;;  %v4888_v12 = vpop.permute.xlu1 %4887 }
 0x49a   :  { %v4971_v38 = vsel %vm4949_vm8, %v4848_v49, %v4970_v13  ;;  %v4903_v21 = vpop.permute.xlu0 %4902 }
 0x49b   :  { %v5433_v33 = vpack.c.bf16 %v4971_v38, %v4964_v53 }
 0x49d   :  { %5434 = vmatprep.subr.bf16.mxu0 %v5433_v33  ;;  %v4898_v43 = vpop.permute.xlu1 %4897 }
 0x49e   :  { %5436 = vmatpush3.bf16.msra.mxu0 %v5433_v33 }
 0x4a1   :  { %5399 = vmatmul.mubr.msk.f32.vlgmr.msra.gmra.mrb[0].mxu0 %vm4976_vm9, %v4850_v29  ;;  %v5119_v5 = vpop.permute.xlu1 %5118 }
 0x4a2   :  { %5401 = vmatprep.mubr.msk.f32.mxu0 %vm4976_vm9, %v4851_v24 }
 0x4a5   :  { %5402 = vmatmul.mubr.msk.f32.gmra.mrb[2].mxu0 %vm4976_vm9, %v4852_v39 }
 0x4a6   :  { %5404 = vmatprep.mubr.msk.f32.mxu0 %vm4976_vm9, %v4853_v56 }
 0x4a9   :  { %5405 = vmatmul.mubr.msk.f32.gmra.mrb[4].mxu0 %vm4976_vm9, %v4854_v37 }
 0x4aa   :  { %5407 = vmatprep.mubr.msk.f32.mxu0 %vm4976_vm9, %v4855_v4 }
 0x4ad   :  { %5408 = vmatmul.mubr.msk.f32.gmra.mrb[6].mxu0 %vm4976_vm9, %v4856_v15 }
 0x574   :  { %v5400_v47 = vpop.f32.mrb[0].mxu0 }
 0x575   :  { %v5073_v2 = vadd.f32 %v5400_v47, %v4873_v59  ;;  %v5067_v25 = vpop.f32.mrb[1].mxu0 }
 0x576   :  { %v5068_v18 = vadd.f32 %v5067_v25, %v4868_v23 }
 0x577   :  { %v5107_v40 = vmax.f32 %v5073_v2, 0.0 }
 0x578   :  { %v5106_v52 = vmax.f32 %v5068_v18, 0.0  ;;  %v5403_v7 = vpop.f32.mrb[2].mxu0 }
 0x579   :  { %v5083_v45 = vadd.f32 %v5403_v7, %v4883_v62  ;;  %v5077_v9 = vpop.f32.mrb[3].mxu0 }
 0x57a   :  { %v5078_v31 = vadd.f32 %v5077_v9, %v4878_v3  ;;  %v5438_v44 = vpack.c.bf16 %v5107_v40, %v5106_v52 }
 0x57b   :  { %v5109_v61 = vmax.f32 %v5083_v45, 0.0 }
 0x57c   :  { %v5108_v42 = vmax.f32 %v5078_v31, 0.0  ;;  %v5406_v0 = vpop.f32.mrb[4].mxu0  ;;  %5439 = vmatpush3.bf16.msra.mxu1 %v5438_v44 }
 0x57d   :  { %v5093_v26 = vadd.f32 %v5406_v0, %v4893_v19  ;;  %v5087_v60 = vpop.f32.mrb[5].mxu0  ;;  %5440 = vmatprep.subr.bf16.mxu1 %v5618_v34 }
 0x57e   :  { %v5441_v36 = vpack.c.bf16 %v5109_v61, %v5108_v42  ;;  %v5088_v14 = vadd.f32 %v5087_v60, %v4888_v12 }
 0x57f   :  { %v5111_v50 = vmax.f32 %v5093_v26, 0.0 }
 0x580   :  { %v5110_v55 = vmax.f32 %v5088_v14, 0.0  ;;  %v5409_v46 = vpop.f32.mrb[6].mxu0  ;;  %5442 = vmatpush3.bf16.msra.mxu1 %v5441_v36 }
 0x581   :  { %v5103_v28 = vadd.f32 %v5409_v46, %v4903_v21  ;;  %v5097_v17 = vpop.f32.mrb[7].mxu0  ;;  %5443 = vmatprep.subr.bf16.mxu1 %v5618_v34 }
 0x582   :  { %v5444_v30 = vpack.c.bf16 %v5111_v50, %v5110_v55  ;;  %v5098_v63 = vadd.f32 %v5097_v17, %v4898_v43 }
 0x583   :  { %v5113_v20 = vmax.f32 %v5103_v28, 0.0 }
 0x584   :  { %v5112_v1 = vmax.f32 %v5098_v63, 0.0  ;;  %5445 = vmatpush3.bf16.msra.mxu1 %v5444_v30 }
 0x585   :  { %5446 = vmatprep.subr.bf16.mxu1 %v5618_v34 }
 0x586   :  { %v5447_v54 = vpack.c.bf16 %v5113_v20, %v5112_v1 }
 0x588   :  { %5448 = vmatpush3.bf16.msra.mxu1 %v5447_v54 }
 0x58b   :  { %5427 = vmatmul.mubr.msk.f32.vlgmr.msra.gmra.mrb[0].mxu1 %vm5121_vm11, %v5114_v58 }
 0x65e   :  { %v5191_v32 = vpop.f32.mrb[0].mxu1 }
 0x65f   :  { %v5192_v51 = vadd.f32 %v5191_v32, %v5119_v5  ;;  %v5428_v16 = vpop.f32.mrb[1].mxu1 }
 0x661   :  { %5195 = vst.msk [vmem:[%s14627_s7] sm:$0xff] %vm348_vm0, %v5192_v51 }

</bundles_post_ra>
